<compile_context>
chip_gen: v6e
topology: v6e:2x2x1
jax: 0.10.0
libtpu: 0.0.40
codegen_flags: <defaults>
</compile_context>

<pallas_src>
import jax
import jax.numpy as jnp
from jax.experimental import pallas as pl
from jax.experimental.pallas import tpu as pltpu

PI = 3.14159          # torch module uses this literal, not math.pi
HIDDEN = 512
TILE_N = 2048         # output-column tile: multiple of 128 -> plain (unmasked) vst


def cond_phase_kernel(noise_ref, cls_ref, w1n_ref, w1c_ref, b1_ref,
                      w2_ref, b2_ref, o_ref):
    # noise_ref: (Bp, latent) f32    cls_ref: (Bp, classes) f32   (grid-invariant)
    # w1n_ref  : (latent, H)  bf16   w1c_ref: (classes, H)  bf16  (grid-invariant)
    # b1_ref   : (1, H) f32                                       (grid-invariant)
    # w2_ref   : (H, TN) bf16        b2_ref : (1, TN) f32         (streamed over j)
    # o_ref    : (Bp, TN) f32
    noise_bf = noise_ref[...].astype(jnp.bfloat16)
    cls_bf = cls_ref[...].astype(jnp.bfloat16)

    # Layer 1 (recomputed per column tile -- trivial vs. the W2 tile DMA, and
    # keeps the grid axis embarrassingly parallel for v7x's two TensorCores).
    h = (jnp.dot(noise_bf, w1n_ref[...], preferred_element_type=jnp.float32)
         + jnp.dot(cls_bf, w1c_ref[...], preferred_element_type=jnp.float32)
         + b1_ref[...])
    h = jnp.maximum(h, 0.0)                                   # ReLU (f32 VPU)

    # Layer 2, one column tile: bf16 MXU operands, f32 accumulation.
    y = jnp.dot(h.astype(jnp.bfloat16), w2_ref[...],
                preferred_element_type=jnp.float32) + b2_ref[...]

    # clamp(-5,5) -> tanh -> (y+1)*pi fused as a single FMA.  The trailing
    # torch clamp(., 0, 2*pi) is a mathematical no-op (tanh in (-1,1)) and is
    # dropped per the perf review.
    y = jnp.tanh(jnp.clip(y, -5.0, 5.0))
    o_ref[...] = (y * PI + PI).astype(o_ref.dtype)


def _make_call(Bp, latent_dim, num_classes, hidden, nn_total, tile_n,
               single_buffer_consts):
    """Build the pallas_call for one configuration."""

    def const_spec(shape):
        # Grid-invariant blocks: constant index_map; single-buffer when allowed.
        if single_buffer_consts:
            return pl.BlockSpec(shape, lambda j: (0,) * len(shape),
                                pipeline_mode=pl.Buffered(1))
        return pl.BlockSpec(shape, lambda j: (0,) * len(shape))

    cost = pl.CostEstimate(
        flops=2 * Bp * ((latent_dim + num_classes) * hidden + hidden * nn_total),
        transcendentals=Bp * nn_total,
        bytes_accessed=((latent_dim + num_classes) * hidden * 2   # W1 (bf16)
                        + hidden * nn_total * 2                   # W2 (bf16)
                        + (hidden + nn_total) * 4                 # biases (f32)
                        + Bp * (latent_dim + num_classes) * 4     # activations
                        + Bp * nn_total * 4),                     # output
    )

    return pl.pallas_call(
        cond_phase_kernel,
        out_shape=jax.ShapeDtypeStruct((Bp, nn_total), jnp.float32),
        grid=(nn_total // tile_n,),
        in_specs=[
            const_spec((Bp, latent_dim)),
            const_spec((Bp, num_classes)),
            const_spec((latent_dim, hidden)),
            const_spec((num_classes, hidden)),
            const_spec((1, hidden)),
            # W2 / b2 column tiles stream with the default double-buffering.
            pl.BlockSpec((hidden, tile_n), lambda j: (0, j)),
            pl.BlockSpec((1, tile_n), lambda j: (0, j)),
        ],
        out_specs=pl.BlockSpec((Bp, tile_n), lambda j: (0, j)),
        compiler_params=pltpu.CompilerParams(
            dimension_semantics=("parallel",),   # disjoint W2 halves per TC on v7x
            vmem_limit_bytes=32 << 20,           # ~8 MiB working set; v7x-safe
        ),
        cost_estimate=cost,
    )


def conditional_phase_encoder(noise, class_label, params, n, tile_n=TILE_N):
    """noise: (B, latent) f32, class_label: (B, num_classes) f32."""
    w1n, w1c, b1, w2, b2 = params
    B, latent_dim = noise.shape
    num_classes = class_label.shape[1]
    hidden = w1n.shape[1]
    nn_total = n * n

    # Single batch block (no batch grid at small B); pad rows to a multiple of
    # 8 for clean f32 sublane layout, sliced off after the call.
    Bp = max(8, ((B + 7) // 8) * 8)
    if Bp != B:
        pad = Bp - B
        noise = jnp.pad(noise, ((0, pad), (0, 0)))
        class_label = jnp.pad(class_label, ((0, pad), (0, 0)))

    if nn_total % tile_n != 0:
        tile_n = nn_total   # single full-width column tile fallback

    args = (noise, class_label, w1n, w1c, b1, w2, b2)
    try:
        out_flat = _make_call(Bp, latent_dim, num_classes, hidden, nn_total,
                              tile_n, single_buffer_consts=True)(*args)
    except Exception:
        # This JAX/Mosaic build rejects pl.Buffered(1) on the top-level
        # pipeline -> fall back to default double-buffering (still well within
        # the 32 MiB VMEM budget at these shapes).
        out_flat = _make_call(Bp, latent_dim, num_classes, hidden, nn_total,
                              tile_n, single_buffer_consts=False)(*args)

    # torch: .view(-1, 1, n, n) -> NCHW; free reshape outside the kernel so the
    # in-kernel writeback stays lane-dense.
    return out_flat[:B].reshape(B, 1, n, n)


def init_params(key, latent_dim, n, num_classes, hidden=HIDDEN):
    d_in = latent_dim + num_classes
    k1, k2, k3, k4, k5 = jax.random.split(key, 5)
    # Deterministic synthetic init (uniform, torch default Linear scale).
    # Weights stored in bf16 (MXU operands); biases stay f32.
    w1n = (jax.random.uniform(k1, (latent_dim, hidden), jnp.float32, -1.0, 1.0)
           / jnp.sqrt(d_in)).astype(jnp.bfloat16)
    w1c = (jax.random.uniform(k2, (num_classes, hidden), jnp.float32, -1.0, 1.0)
           / jnp.sqrt(d_in)).astype(jnp.bfloat16)
    b1 = jax.random.uniform(k3, (1, hidden), jnp.float32, -1.0, 1.0) / jnp.sqrt(d_in)
    w2 = (jax.random.uniform(k4, (hidden, n * n), jnp.float32, -1.0, 1.0)
          / jnp.sqrt(hidden)).astype(jnp.bfloat16)
    b2 = jax.random.uniform(k5, (1, n * n), jnp.float32, -1.0, 1.0) / jnp.sqrt(hidden)
    return w1n, w1c, b1, w2, b2


if __name__ == "__main__":
    # Shapes from the module spec: latent_dim=100, n=64, num_classes=10, hidden=512.
    batch = 16
    latent_dim = 100
    num_classes = 10
    n = 64
    hidden = HIDDEN

    key = jax.random.PRNGKey(0)
    kp, kn, kc = jax.random.split(key, 3)

    params = init_params(kp, latent_dim, n, num_classes, hidden)

    noise = jax.random.normal(kn, (batch, latent_dim), jnp.float32)
    labels = jax.random.randint(kc, (batch,), 0, num_classes)
    class_label = jax.nn.one_hot(labels, num_classes, dtype=jnp.float32)

    out = conditional_phase_encoder(noise, class_label, params, n)
    out = jax.block_until_ready(out)

    assert out.shape == (batch, 1, n, n), out.shape
    assert bool(jnp.all(out >= 0.0)) and bool(jnp.all(out <= 2.0 * PI))

    # Pure-JAX reference (bf16-rounded operands, f32 accumulate, like the MXU).
    w1n, w1c, b1, w2, b2 = params
    nb = noise.astype(jnp.bfloat16).astype(jnp.float32)
    cb = class_label.astype(jnp.bfloat16).astype(jnp.float32)
    h = jnp.maximum(nb @ w1n.astype(jnp.float32)
                    + cb @ w1c.astype(jnp.float32) + b1, 0.0)
    hb = h.astype(jnp.bfloat16).astype(jnp.float32)
    y = hb @ w2.astype(jnp.float32) + b2
    ref = jnp.clip((jnp.tanh(jnp.clip(y, -5.0, 5.0)) + 1.0) * PI, 0.0, 2.0 * PI)
    ref = ref.reshape(batch, 1, n, n)
    assert jnp.allclose(out, ref, atol=2e-2, rtol=0.0), float(jnp.max(jnp.abs(out - ref)))

    print("KERNEL_OK")
</pallas_src>

<mosaic_0001>
module attributes {stable_mosaic.version = 11 : i64} {
  func.func @cond_phase_kernel(%arg0: i32, %arg1: memref<16x100xf32, #tpu.memory_space<vmem>>, %arg2: memref<16x10xf32, #tpu.memory_space<vmem>>, %arg3: memref<100x512xbf16, #tpu.memory_space<vmem>>, %arg4: memref<10x512xbf16, #tpu.memory_space<vmem>>, %arg5: memref<1x512xf32, #tpu.memory_space<vmem>>, %arg6: memref<512x2048xbf16, #tpu.memory_space<vmem>>, %arg7: memref<1x2048xf32, #tpu.memory_space<vmem>>, %arg8: memref<16x2048xf32, #tpu.memory_space<vmem>>) attributes {dimension_semantics = [#tpu.dimension_semantics<parallel>], iteration_bounds = array<i64: 2>, scalar_prefetch = 0 : i64, scratch_operands = 0 : i64, tpu.core_type = #tpu.core_type<tc>, window_params = [{pipeline_mode = #tpu.pipeline_mode<synchronous>, transform_indices = @transform_0, window_bounds = array<i64: 16, 100>}, {pipeline_mode = #tpu.pipeline_mode<synchronous>, transform_indices = @transform_1, window_bounds = array<i64: 16, 10>}, {pipeline_mode = #tpu.pipeline_mode<synchronous>, transform_indices = @transform_2, window_bounds = array<i64: 100, 512>}, {pipeline_mode = #tpu.pipeline_mode<synchronous>, transform_indices = @transform_3, window_bounds = array<i64: 10, 512>}, {pipeline_mode = #tpu.pipeline_mode<synchronous>, transform_indices = @transform_4, window_bounds = array<i64: 1, 512>}, {transform_indices = @transform_5, window_bounds = array<i64: 512, 2048>}, {transform_indices = @transform_6, window_bounds = array<i64: 1, 2048>}, {transform_indices = @transform_7, window_bounds = array<i64: 16, 2048>}]} {
    %c0 = arith.constant 0 : index
    %c0_0 = arith.constant 0 : index
    %0 = vector.load %arg1[%c0, %c0_0] : memref<16x100xf32, #tpu.memory_space<vmem>>, vector<16x100xf32>
    %1 = arith.truncf %0 : vector<16x100xf32> to vector<16x100xbf16>
    %c0_1 = arith.constant 0 : index
    %c0_2 = arith.constant 0 : index
    %2 = vector.load %arg2[%c0_1, %c0_2] : memref<16x10xf32, #tpu.memory_space<vmem>>, vector<16x10xf32>
    %3 = arith.truncf %2 : vector<16x10xf32> to vector<16x10xbf16>
    %c0_3 = arith.constant 0 : index
    %c0_4 = arith.constant 0 : index
    %4 = vector.load %arg3[%c0_3, %c0_4] : memref<100x512xbf16, #tpu.memory_space<vmem>>, vector<100x512xbf16>
    %cst = arith.constant dense<0.000000e+00> : vector<16x512xf32>
    %5 = tpu.matmul %1, %4, %cst {dimension_numbers = #tpu.dot_dimension_numbers<[1], [0], [0], [1], [0, 0, 1, 1], [], []>} : vector<16x100xbf16>, vector<100x512xbf16>, vector<16x512xf32> -> vector<16x512xf32>
    %c0_5 = arith.constant 0 : index
    %c0_6 = arith.constant 0 : index
    %6 = vector.load %arg4[%c0_5, %c0_6] : memref<10x512xbf16, #tpu.memory_space<vmem>>, vector<10x512xbf16>
    %cst_7 = arith.constant dense<0.000000e+00> : vector<16x512xf32>
    %7 = tpu.matmul %3, %6, %cst_7 {dimension_numbers = #tpu.dot_dimension_numbers<[1], [0], [0], [1], [0, 0, 1, 1], [], []>} : vector<16x10xbf16>, vector<10x512xbf16>, vector<16x512xf32> -> vector<16x512xf32>
    %8 = arith.addf %5, %7 : vector<16x512xf32>
    %c0_8 = arith.constant 0 : index
    %c0_9 = arith.constant 0 : index
    %9 = vector.load %arg5[%c0_8, %c0_9] : memref<1x512xf32, #tpu.memory_space<vmem>>, vector<1x512xf32>
    %10 = vector.broadcast %9 : vector<1x512xf32> to vector<16x512xf32>
    %11 = arith.addf %8, %10 : vector<16x512xf32>
    %cst_10 = arith.constant 0.000000e+00 : f32
    %12 = vector.broadcast %cst_10 : f32 to vector<16x512xf32>
    %13 = arith.maximumf %11, %12 : vector<16x512xf32>
    %14 = arith.truncf %13 : vector<16x512xf32> to vector<16x512xbf16>
    %c0_11 = arith.constant 0 : index
    %c0_12 = arith.constant 0 : index
    %15 = vector.load %arg6[%c0_11, %c0_12] : memref<512x2048xbf16, #tpu.memory_space<vmem>>, vector<512x2048xbf16>
    %cst_13 = arith.constant dense<0.000000e+00> : vector<16x2048xf32>
    %16 = tpu.matmul %14, %15, %cst_13 {dimension_numbers = #tpu.dot_dimension_numbers<[1], [0], [0], [1], [0, 0, 1, 1], [], []>} : vector<16x512xbf16>, vector<512x2048xbf16>, vector<16x2048xf32> -> vector<16x2048xf32>
    %c0_14 = arith.constant 0 : index
    %c0_15 = arith.constant 0 : index
    %17 = vector.load %arg7[%c0_14, %c0_15] : memref<1x2048xf32, #tpu.memory_space<vmem>>, vector<1x2048xf32>
    %18 = vector.broadcast %17 : vector<1x2048xf32> to vector<16x2048xf32>
    %19 = arith.addf %16, %18 : vector<16x2048xf32>
    %cst_16 = arith.constant -5.000000e+00 : f32
    %cst_17 = arith.constant 5.000000e+00 : f32
    %20 = vector.broadcast %cst_16 : f32 to vector<16x2048xf32>
    %21 = arith.maximumf %20, %19 : vector<16x2048xf32>
    %22 = vector.broadcast %cst_17 : f32 to vector<16x2048xf32>
    %23 = arith.minimumf %22, %21 : vector<16x2048xf32>
    %24 = math.tanh %23 : vector<16x2048xf32>
    %cst_18 = arith.constant 3.141590e+00 : f32
    %25 = vector.broadcast %cst_18 : f32 to vector<16x2048xf32>
    %26 = arith.mulf %24, %25 : vector<16x2048xf32>
    %cst_19 = arith.constant 3.141590e+00 : f32
    %27 = vector.broadcast %cst_19 : f32 to vector<16x2048xf32>
    %28 = arith.addf %26, %27 : vector<16x2048xf32>
    %c0_20 = arith.constant 0 : index
    %c0_21 = arith.constant 0 : index
    %29 = vector.load %arg8[%c0_20, %c0_21] : memref<16x2048xf32, #tpu.memory_space<vmem>>, vector<16x2048xf32>
    tpu.vector_store %arg8[%c0_20, %c0_21], %28 {strides = array<i32>} : memref<16x2048xf32, #tpu.memory_space<vmem>>, vector<16x2048xf32>,
    return
  }
  func.func @transform_0(%arg0: i32) -> (i32, i32) {
    %c0_i32 = arith.constant 0 : i32
    %c0_i32_0 = arith.constant 0 : i32
    %c0_i32_1 = arith.constant 0 : i32
    return %c0_i32, %c0_i32_0 : i32, i32
  }
  func.func @transform_1(%arg0: i32) -> (i32, i32) {
    %c0_i32 = arith.constant 0 : i32
    %c0_i32_0 = arith.constant 0 : i32
    %c0_i32_1 = arith.constant 0 : i32
    return %c0_i32, %c0_i32_0 : i32, i32
  }
  func.func @transform_2(%arg0: i32) -> (i32, i32) {
    %c0_i32 = arith.constant 0 : i32
    %c0_i32_0 = arith.constant 0 : i32
    %c0_i32_1 = arith.constant 0 : i32
    return %c0_i32, %c0_i32_0 : i32, i32
  }
  func.func @transform_3(%arg0: i32) -> (i32, i32) {
    %c0_i32 = arith.constant 0 : i32
    %c0_i32_0 = arith.constant 0 : i32
    %c0_i32_1 = arith.constant 0 : i32
    return %c0_i32, %c0_i32_0 : i32, i32
  }
  func.func @transform_4(%arg0: i32) -> (i32, i32) {
    %c0_i32 = arith.constant 0 : i32
    %c0_i32_0 = arith.constant 0 : i32
    %c0_i32_1 = arith.constant 0 : i32
    return %c0_i32, %c0_i32_0 : i32, i32
  }
  func.func @transform_5(%arg0: i32) -> (i32, i32) {
    %c0_i32 = arith.constant 0 : i32
    %c0_i32_0 = arith.constant 0 : i32
    return %c0_i32, %arg0 : i32, i32
  }
  func.func @transform_6(%arg0: i32) -> (i32, i32) {
    %c0_i32 = arith.constant 0 : i32
    %c0_i32_0 = arith.constant 0 : i32
    return %c0_i32, %arg0 : i32, i32
  }
  func.func @transform_7(%arg0: i32) -> (i32, i32) {
    %c0_i32 = arith.constant 0 : i32
    %c0_i32_0 = arith.constant 0 : i32
    return %c0_i32, %arg0 : i32, i32
  }
}

module attributes {stable_mosaic.version = 11 : i64} {
  func.func @cond_phase_kernel(%arg0: i32, %arg1: memref<16x100xf32, #tpu.memory_space<vmem>>, %arg2: memref<16x10xf32, #tpu.memory_space<vmem>>, %arg3: memref<100x512xbf16, #tpu.memory_space<vmem>>, %arg4: memref<10x512xbf16, #tpu.memory_space<vmem>>, %arg5: memref<1x512xf32, #tpu.memory_space<vmem>>, %arg6: memref<512x2048xbf16, #tpu.memory_space<vmem>>, %arg7: memref<1x2048xf32, #tpu.memory_space<vmem>>, %arg8: memref<16x2048xf32, #tpu.memory_space<vmem>>) attributes {dimension_semantics = [#tpu.dimension_semantics<parallel>], iteration_bounds = array<i64: 2>, scalar_prefetch = 0 : i64, scratch_operands = 0 : i64, tpu.core_type = #tpu.core_type<tc>, window_params = [{pipeline_mode = #tpu.pipeline_mode<synchronous>, transform_indices = @transform_0, window_bounds = array<i64: 16, 100>}, {pipeline_mode = #tpu.pipeline_mode<synchronous>, transform_indices = @transform_1, window_bounds = array<i64: 16, 10>}, {pipeline_mode = #tpu.pipeline_mode<synchronous>, transform_indices = @transform_2, window_bounds = array<i64: 100, 512>}, {pipeline_mode = #tpu.pipeline_mode<synchronous>, transform_indices = @transform_3, window_bounds = array<i64: 10, 512>}, {pipeline_mode = #tpu.pipeline_mode<synchronous>, transform_indices = @transform_4, window_bounds = array<i64: 1, 512>}, {transform_indices = @transform_5, window_bounds = array<i64: 512, 2048>}, {transform_indices = @transform_6, window_bounds = array<i64: 1, 2048>}, {transform_indices = @transform_7, window_bounds = array<i64: 16, 2048>}]} {
    %c0 = arith.constant 0 : index
    %c0_0 = arith.constant 0 : index
    %0 = vector.load %arg1[%c0, %c0_0] : memref<16x100xf32, #tpu.memory_space<vmem>>, vector<16x100xf32>
    %1 = arith.truncf %0 : vector<16x100xf32> to vector<16x100xbf16>
    %c0_1 = arith.constant 0 : index
    %c0_2 = arith.constant 0 : index
    %2 = vector.load %arg2[%c0_1, %c0_2] : memref<16x10xf32, #tpu.memory_space<vmem>>, vector<16x10xf32>
    %3 = arith.truncf %2 : vector<16x10xf32> to vector<16x10xbf16>
    %c0_3 = arith.constant 0 : index
    %c0_4 = arith.constant 0 : index
    %4 = vector.load %arg3[%c0_3, %c0_4] : memref<100x512xbf16, #tpu.memory_space<vmem>>, vector<100x512xbf16>
    %cst = arith.constant dense<0.000000e+00> : vector<16x512xf32>
    %5 = tpu.matmul %1, %4, %cst {dimension_numbers = #tpu.dot_dimension_numbers<[1], [0], [0], [1], [0, 0, 1, 1], [], []>} : vector<16x100xbf16>, vector<100x512xbf16>, vector<16x512xf32> -> vector<16x512xf32>
    %c0_5 = arith.constant 0 : index
    %c0_6 = arith.constant 0 : index
    %6 = vector.load %arg4[%c0_5, %c0_6] : memref<10x512xbf16, #tpu.memory_space<vmem>>, vector<10x512xbf16>
    %cst_7 = arith.constant dense<0.000000e+00> : vector<16x512xf32>
    %7 = tpu.matmul %3, %6, %cst_7 {dimension_numbers = #tpu.dot_dimension_numbers<[1], [0], [0], [1], [0, 0, 1, 1], [], []>} : vector<16x10xbf16>, vector<10x512xbf16>, vector<16x512xf32> -> vector<16x512xf32>
    %8 = arith.addf %5, %7 : vector<16x512xf32>
    %c0_8 = arith.constant 0 : index
    %c0_9 = arith.constant 0 : index
    %9 = vector.load %arg5[%c0_8, %c0_9] : memref<1x512xf32, #tpu.memory_space<vmem>>, vector<1x512xf32>
    %10 = vector.broadcast %9 : vector<1x512xf32> to vector<16x512xf32>
    %11 = arith.addf %8, %10 : vector<16x512xf32>
    %cst_10 = arith.constant 0.000000e+00 : f32
    %12 = vector.broadcast %cst_10 : f32 to vector<16x512xf32>
    %13 = arith.maximumf %11, %12 : vector<16x512xf32>
    %14 = arith.truncf %13 : vector<16x512xf32> to vector<16x512xbf16>
    %c0_11 = arith.constant 0 : index
    %c0_12 = arith.constant 0 : index
    %15 = vector.load %arg6[%c0_11, %c0_12] : memref<512x2048xbf16, #tpu.memory_space<vmem>>, vector<512x2048xbf16>
    %cst_13 = arith.constant dense<0.000000e+00> : vector<16x2048xf32>
    %16 = tpu.matmul %14, %15, %cst_13 {dimension_numbers = #tpu.dot_dimension_numbers<[1], [0], [0], [1], [0, 0, 1, 1], [], []>} : vector<16x512xbf16>, vector<512x2048xbf16>, vector<16x2048xf32> -> vector<16x2048xf32>
    %c0_14 = arith.constant 0 : index
    %c0_15 = arith.constant 0 : index
    %17 = vector.load %arg7[%c0_14, %c0_15] : memref<1x2048xf32, #tpu.memory_space<vmem>>, vector<1x2048xf32>
    %18 = vector.broadcast %17 : vector<1x2048xf32> to vector<16x2048xf32>
    %19 = arith.addf %16, %18 : vector<16x2048xf32>
    %cst_16 = arith.constant -5.000000e+00 : f32
    %cst_17 = arith.constant 5.000000e+00 : f32
    %20 = vector.broadcast %cst_16 : f32 to vector<16x2048xf32>
    %21 = arith.maximumf %20, %19 : vector<16x2048xf32>
    %22 = vector.broadcast %cst_17 : f32 to vector<16x2048xf32>
    %23 = arith.minimumf %22, %21 : vector<16x2048xf32>
    %24 = math.tanh %23 : vector<16x2048xf32>
    %cst_18 = arith.constant 3.141590e+00 : f32
    %25 = vector.broadcast %cst_18 : f32 to vector<16x2048xf32>
    %26 = arith.mulf %24, %25 : vector<16x2048xf32>
    %cst_19 = arith.constant 3.141590e+00 : f32
    %27 = vector.broadcast %cst_19 : f32 to vector<16x2048xf32>
    %28 = arith.addf %26, %27 : vector<16x2048xf32>
    %c0_20 = arith.constant 0 : index
    %c0_21 = arith.constant 0 : index
    %29 = vector.load %arg8[%c0_20, %c0_21] : memref<16x2048xf32, #tpu.memory_space<vmem>>, vector<16x2048xf32>
    tpu.vector_store %arg8[%c0_20, %c0_21], %28 {strides = array<i32>} : memref<16x2048xf32, #tpu.memory_space<vmem>>, vector<16x2048xf32>,
    return
  }
  func.func @transform_0(%arg0: i32) -> (i32, i32) {
    %c0_i32 = arith.constant 0 : i32
    %c0_i32_0 = arith.constant 0 : i32
    %c0_i32_1 = arith.constant 0 : i32
    return %c0_i32, %c0_i32_0 : i32, i32
  }
  func.func @transform_1(%arg0: i32) -> (i32, i32) {
    %c0_i32 = arith.constant 0 : i32
    %c0_i32_0 = arith.constant 0 : i32
    %c0_i32_1 = arith.constant 0 : i32
    return %c0_i32, %c0_i32_0 : i32, i32
  }
  func.func @transform_2(%arg0: i32) -> (i32, i32) {
    %c0_i32 = arith.constant 0 : i32
    %c0_i32_0 = arith.constant 0 : i32
    %c0_i32_1 = arith.constant 0 : i32
    return %c0_i32, %c0_i32_0 : i32, i32
  }
  func.func @transform_3(%arg0: i32) -> (i32, i32) {
    %c0_i32 = arith.constant 0 : i32
    %c0_i32_0 = arith.constant 0 : i32
    %c0_i32_1 = arith.constant 0 : i32
    return %c0_i32, %c0_i32_0 : i32, i32
  }
  func.func @transform_4(%arg0: i32) -> (i32, i32) {
    %c0_i32 = arith.constant 0 : i32
    %c0_i32_0 = arith.constant 0 : i32
    %c0_i32_1 = arith.constant 0 : i32
    return %c0_i32, %c0_i32_0 : i32, i32
  }
  func.func @transform_5(%arg0: i32) -> (i32, i32) {
    %c0_i32 = arith.constant 0 : i32
    %c0_i32_0 = arith.constant 0 : i32
    return %c0_i32, %arg0 : i32, i32
  }
  func.func @transform_6(%arg0: i32) -> (i32, i32) {
    %c0_i32 = arith.constant 0 : i32
    %c0_i32_0 = arith.constant 0 : i32
    return %c0_i32, %arg0 : i32, i32
  }
  func.func @transform_7(%arg0: i32) -> (i32, i32) {
    %c0_i32 = arith.constant 0 : i32
    %c0_i32_0 = arith.constant 0 : i32
    return %c0_i32, %arg0 : i32, i32
  }
}

</mosaic_0001>

<bundles_post_ra>
// kernel: tpu_custom_call.1
= control target key start
LH: loop header
LB: loop body
LE: loop exit
PB: predicated region body
PF: predicated region fallthrough
CT: control target
= control target key end

     0   :  { %s7139_s0 = inlined_call_operand.hbm [shape: f32[16,100], index: 0, kind: input, shape index: {}]   ;;  %s7140_s1 = inlined_call_operand.hbm [shape: f32[16,10], index: 1, kind: input, shape index: {}]   ;;  %s7141_s2 = inlined_call_operand.hbm [shape: bf16[100,512], index: 2, kind: input, shape index: {}]   ;;  %s7142_s3 = inlined_call_operand.hbm [shape: bf16[10,512], index: 3, kind: input, shape index: {}]   ;;  %s7143_s4 = inlined_call_operand.hbm [shape: f32[1,512], index: 4, kind: input, shape index: {}]   ;;  %s7144_s5 = inlined_call_operand.hbm [shape: bf16[512,4096], index: 5, kind: input, shape index: {}]   ;;  %s7145_s6 = inlined_call_operand.hbm [shape: f32[1,4096], index: 6, kind: input, shape index: {}]   ;;  %s7146_s7 = inlined_call_operand.hbm [shape: f32[16,4096], index: 7, kind: output, shape index: {}]  }
   0x1   :  { %7158 = sst [smem:[#allocation21_spill]] %s7140_s1 }
   0x2   :  { %7159 = sst [smem:[#allocation22_spill]] %s7142_s3 }
   0x3   :  { %7160 = sst [smem:[#allocation23_spill]] %s7144_s5 }
   0x4   :  { %12 = vsyncpa [#allocation3], 0 }
   0x5   :  { %13 = vsyncpa [#allocation6], 0 }
   0x6   :  { %14 = vsyncpa [#allocation9], 0 }
   0x7   :  { %15 = vsyncpa [#allocation12], 0 }
   0x8   :  { %17 = vsyncpa [#allocation12 + $0x1], 0 }
   0x9   :  { %18 = vsyncpa [#allocation4], 0 }
   0xa   :  { %20 = vsyncpa [#allocation4 + $0x1], 0  ;;  %s6192_s24 = smov 0   ;;  %s6194_s25 = smov 0  }
   0xb   :  { %s6196_s26 = smov 0   ;;  %s6198_s27 = smov 0  }
   0xc LB: > { %s6213_s28 = sadd.s32 4294967295, %s6131_s27   ;;  %s5030_s29 = sadd.s32 4294967294, %s6131_s27   ;;  %s6131_s27 = sphi %s6198_s27, %s7193_s27   ;;  %s6127_s26 = sphi %s6196_s26, %s7192_s26   ;;  %s6123_s25 = sphi %s6194_s25, %s7191_s25   ;;  %s6119_s24 = sphi %s6192_s24, %s7190_s24  }
   0xd   : > { %p151_p0 = scmp.ne.s32.totalorder %s6123_s25, %s6119_s24  ;;  %p7152_p1 = scmp.eq.s32.totalorder %s6213_s28, 0 }
   0xe   : > { %p201_p2 = scmp.eq.s32.totalorder %s6213_s28, 1  ;;  %p207_p3 = scmp.eq.s32.totalorder %s5030_s29, 1 }
   0xf   : > { %p6222_p4 = por %p7152_p1, %p151_p0  ;;  %p5031_p5 = scmp.ge.s32.totalorder %s6131_s27, 1 }
  0x10   : > { %p6227_p6 = por %p207_p3, %p151_p0  ;;  %p214_p7 = scmp.lt.s32.totalorder %s6131_s27, 3 }
  0x11   : > { %s7161_s30 = scalar_select %p6222_p4, 1, 0 }
  0x12   : > { %s7162_s8 = scalar_select %p6227_p6, 1, 0 }
  0x13   : > { %p6232_p8 = pnand %p5031_p5, %p214_p7  ;;  %s6133_s10 = smov [#allocation5]  }
  0x14   : > { %s239_s11 = sshll.u32 %s6133_s10, 4  ;;  %s6134_s13 = smov [#allocation8]   ;;  %s240_s11 = int_to_ptr.vmem [resolvable:$true] %s239_s11 }
  0x15   : > { %s7163_s9 = scalar_select %p6232_p8, 1, 0 }
  0x16   : > { %p5671_p10 = pneg %p6232_p8  ;;  %s265_s14 = sshll.u32 %s6134_s13, 4  ;;  %s266_s14 = int_to_ptr.vmem [resolvable:$true] %s265_s14 }
  0x17   : > { %s5880_s16 = scalar_lea.vmem %s240_s11, 256  ;;  %p5888_p5 = scmp.lt.s32.totalorder %s240_s11, %s240_s11 }
  0x18   : > { %p6241_p11 = pnand %p5671_p10, %p7152_p1  ;;  %p5881_p13 = scmp.ne.s32.totalorder %s240_s11, %s5880_s16 }
  0x19   : > { %p5889_p7 = scmp.lt.s32.totalorder %s5880_s16, %s5880_s16 }
  0x1a   : > { %s7164_s12 = scalar_select %p6241_p11, 1, 0 }
  0x1b   : > { %p6247_p12 = pneg %p6241_p11  ;;  %p5890_p10 = por %p5889_p7, %p5888_p5 }
  0x1d   : > { %p5883_p0 = pnand %p5881_p13, %p6247_p12 }
  0x1f   : > { %p5884_p3 = pneg %p5883_p0 }
  0x21   : > { %p5891_p9 = pnand %p5890_p10, %p5884_p3 }
  0x23   : > { %5894 = shalt.err (!%p5891_p9)
}
  0x24   : > { %s7149_s17 = smov 128   ;;  %s7150_s18 = smov 8  }
  0x25   : > { %s7166_s1 = sld [smem:[#allocation21_spill]]  ;;  %s5906_s21 = scalar_lea.vmem %s266_s14, 512 }
  0x26   : > { %p5907_p13 = scmp.ne.s32.totalorder %s266_s14, %s5906_s21  ;;  %p5914_p3 = scmp.lt.s32.totalorder %s266_s14, %s266_s14 }
  0x27   : > { %p5915_p9 = scmp.lt.s32.totalorder %s5906_s21, %s5906_s21 }
  0x28   : > { %p5909_p0 = pnand %p5907_p13, %p6247_p12 }
  0x29   : > { %p5916_p7 = por %p5915_p9, %p5914_p3 }
  0x2a   : > { %p5910_p5 = pneg %p5909_p0 }
  0x2b   : > { %5677 = dma.hbm_to_vmem [thread:$0]  (!%p6241_p11), %s7166_s1, 256, %s240_s11, [#allocation6], %s7149_s17, %s7149_s17, %s7150_s18  }
  0x2c   : > { %p5917_p10 = pnand %p5916_p7, %p5910_p5 }
  0x2e   : > { %5920 = shalt.err (!%p5917_p10)
}
  0x2f   : > { %s7147_s22 = smov 256   ;;  %s7148_s23 = smov 16  }
  0x30   : > { %s7167_s3 = sld [smem:[#allocation22_spill]]  ;;  %s6272_s11 = sadd.s32 1, %s6131_s27  }
  0x31   : > { %s138_s13 = sadd.s32 1, %s6127_s26  ;;  %s135_s16 = ssub.s32 %s6131_s27, %s6272_s11 }
  0x32   : > { %p145_p13 = scmp.ne.s32.totalorder %s6127_s26, %s6123_s25  ;;  %p136_p0 = scmp.eq.s32.totalorder %s135_s16, 0 }
  0x33   : > { %p146_p5 = scmp.eq.s32.totalorder %s6131_s27, 0  ;;  %p5703_p9 = scmp.lt.s32.totalorder %s6131_s27, 2 }
  0x34   : > { %p6282_p3 = por %p201_p2, %p145_p13  ;;  %s290_s21 = sand.u32 1, %s6131_s27  }
  0x35   : > { %s6288_s20 = scalar_select %p136_p0, %s6127_s26, %s138_s13  }
  0x36   : > { %5683 = dma.hbm_to_vmem [thread:$0]  (!%p6241_p11), %s7167_s3, 512, %s266_s14, [#allocation9], %s7147_s22, %s7147_s22, %s7148_s23  }
  0x37   : > { %s7168_s19 = scalar_select %p6282_p3, 1, 0 }
  0x38   : > { %7169 = sst [smem:[#allocation20_spill]] %s6288_s20  ;;  %p147_p7 = por %p146_p5, %p145_p13 }
  0x39   : > { %s7151_s29 = sand.u32 1, %s6127_s26   ;;  %s5642_s10 = sshll.u32 %s6131_s27, 10 }
  0x3a   : > { %s5038_s14 = sshll.u32 %s7151_s29, 12  ;;  %s7170_s5 = sld [smem:[#allocation23_spill]] }
  0x3b   : > { %s294_s16 = scalar_lea.vmem [#allocation11], %s5038_s14  ;;  %p6300_p2 = pnand %p5703_p9, %p147_p7 }
  0x3c   : > { %s301_s18 = sshll.u32 %s294_s16, 4  ;;  %s6306_s13 = scalar_lea.sflag [#allocation12], %s290_s21  ;;  %s6304_s18 = int_to_ptr.vmem [resolvable:$true] %s301_s18 }
  0x3d   : > { %p5923_p13 = pneg %p6300_p2 }
  0x40   : > { %s6298_s17 = scalar_lea.hbm %s7170_s5, %s5642_s10  ;;  %s5926_s14 = scalar_lea.hbm %s7170_s5, 131072 }
  0x41   : > { %s5921_s29 = scalar_lea.hbm %s6298_s17, 65536  ;;  %p5927_p9 = scmp.lt.s32.totalorder %s6298_s17, %s7170_s5 }
  0x42   : > { %p5922_p10 = scmp.ne.s32.totalorder %s6298_s17, %s5921_s29  ;;  %p5928_p7 = scmp.lt.s32.totalorder %s5926_s14, %s5921_s29 }
  0x44   : > { %p5924_p0 = pnand %p5923_p13, %p5922_p10  ;;  %p5929_p1 = por %p5928_p7, %p5927_p9 }
  0x46   : > { %p5925_p5 = pneg %p5924_p0 }
  0x48   : > { %p5930_p6 = pnand %p5929_p1, %p5925_p5 }
  0x4a   : > { %5933 = shalt.err (!%p5930_p6)
}
  0x4b   : > { %s5934_s21 = scalar_lea.vmem %s6304_s18, 65536  ;;  %s6139_s22 = smov [#allocation11]  }
  0x4c   : > { %p5935_p3 = scmp.ne.s32.totalorder %s6304_s18, %s5934_s21  ;;  %s5939_s23 = sshll.u32 %s6139_s22, 4  ;;  %s5940_s23 = int_to_ptr.vmem [resolvable:$false] %s5939_s23 }
  0x4d   : > { %s5941_s3 = scalar_lea.vmem %s5940_s23, 131072  ;;  %p5942_p4 = scmp.lt.s32.totalorder %s6304_s18, %s5940_s23 }
  0x4e   : > { %p5937_p10 = pnand %p5935_p3, %p5923_p13  ;;  %p5943_p8 = scmp.lt.s32.totalorder %s5941_s3, %s5934_s21 }
  0x50   : > { %p5938_p0 = pneg %p5937_p10  ;;  %p5944_p11 = por %p5943_p8, %p5942_p4 }
  0x52   : > { %p5945_p9 = pnand %p5944_p11, %p5938_p0 }
  0x54   : > { %5948 = shalt.err (!%p5945_p9)
}
  0x55   : > { %s6140_s29 = smov 2048   ;;  %s6141_s14 = smov 1024  }
  0x56   : > { %s6142_s10 = smov 64   ;;  %s6143_s16 = smov [#allocation2]  }
  0x57   : > { %5690 = dma.hbm_to_vmem [thread:$0]  (!%p6300_p2), %s6298_s17, 65536, %s6304_s18, %s6306_s13, %s6140_s29, %s6141_s14, %s6142_s10  }
  0x58   : > { %s226_s5 = sshll.u32 %s6143_s16, 4  ;;  %s6144_s22 = smov [#allocation7]   ;;  %s227_s5 = int_to_ptr.vmem [resolvable:$true] %s226_s5 }
  0x59   : > { %s252_s20 = sshll.u32 %s6144_s22, 4  ;;  %s5960_s23 = scalar_lea.vmem %s227_s5, 256  ;;  %s253_s20 = int_to_ptr.vmem [resolvable:$true] %s252_s20 }
  0x5a   : > { %p5961_p1 = scmp.ne.s32.totalorder %s227_s5, %s5960_s23  ;;  %p5968_p8 = scmp.lt.s32.totalorder %s227_s5, %s227_s5 }
  0x5b   : > { %p5969_p11 = scmp.lt.s32.totalorder %s5960_s23, %s5960_s23 }
  0x5c   : > { %p5963_p4 = pnand %p5961_p1, %p6247_p12 }
  0x5d   : > { %p5970_p3 = por %p5969_p11, %p5968_p8 }
  0x5e   : > { %p5964_p6 = pneg %p5963_p4 }
  0x60   : > { %p5971_p5 = pnand %p5970_p3, %p5964_p6 }
  0x62   : > { %5974 = shalt.err (!%p5971_p5)
}
  0x63   : > { %p7172_p7 = scmp.ne.s32.totalorder %s7164_s12, 0  ;;  %s7173_s3 = smov 8  }
  0x64   : > { %s7174_s21 = smov 128   ;;  %s5986_s29 = scalar_lea.vmem %s253_s20, 3328 }
  0x65   : > { %5674 = dma.hbm_to_vmem [thread:$0]  (!%p7172_p7), %s7139_s0, 256, %s227_s5, [#allocation3], %s7174_s21, %s7174_s21, %s7173_s3  }
  0x66   : > { %p5987_p10 = scmp.ne.s32.totalorder %s253_s20, %s5986_s29  ;;  %p5994_p1 = scmp.lt.s32.totalorder %s253_s20, %s253_s20 }
  0x67   : > { %p5995_p4 = scmp.lt.s32.totalorder %s5986_s29, %s5986_s29 }
  0x68   : > { %p5989_p0 = pnand %p5987_p10, %p6247_p12 }
  0x69   : > { %p5996_p6 = por %p5995_p4, %p5994_p1 }
  0x6a   : > { %p5990_p9 = pneg %p5989_p0 }
  0x6c   : > { %p5997_p8 = pnand %p5996_p6, %p5990_p9 }
  0x6e   : > { %6000 = shalt.err (!%p5997_p8)
}
  0x6f   : > { %s7175_s14 = smov 16   ;;  %s7176_s10 = smov 256  }
  0x70   : > { %5680 = dma.hbm_to_vmem [thread:$0]  (!%p7172_p7), %s7141_s2, 3328, %s253_s20, [#allocation6], %s7176_s10, %s7176_s10, %s7175_s14  }
  0x71   : > { %s6145_s5 = smov [#allocation10]   ;;  %s7177_s3 = sand.u32 1, %s6127_s26  }
  0x72   : > { %s279_s23 = sshll.u32 %s6145_s5, 4  ;;  %s5041_s21 = sshll.u32 %s7177_s3, 4  ;;  %s280_s23 = int_to_ptr.vmem [resolvable:$true] %s279_s23 }
  0x73   : > { %s6012_s17 = scalar_lea.vmem %s280_s23, 64  ;;  %p6020_p10 = scmp.lt.s32.totalorder %s280_s23, %s280_s23 }
  0x74   : > { %p6013_p11 = scmp.ne.s32.totalorder %s280_s23, %s6012_s17  ;;  %p6021_p0 = scmp.lt.s32.totalorder %s6012_s17, %s6012_s17 }
  0x76   : > { %p6015_p3 = pnand %p6013_p11, %p6247_p12  ;;  %p6022_p9 = por %p6021_p0, %p6020_p10 }
  0x78   : > { %p6016_p5 = pneg %p6015_p3 }
  0x7a   : > { %p6023_p1 = pnand %p6022_p9, %p6016_p5 }
  0x7c   : > { %6026 = shalt.err (!%p6023_p1)
}
  0x7d   : > { %5686 = dma.hbm_to_vmem [thread:$0]  (!%p7172_p7), %s7143_s4, 64, %s280_s23, [#allocation9]  }
  0x7e   : > { %s5643_s20 = sshll.u32 %s6131_s27, 8  ;;  %s315_s14 = scalar_lea.vmem [#allocation13], %s5041_s21 }
  0x7f   : > { %s323_s10 = sshll.u32 %s315_s14, 4  ;;  %s321_s22 = scalar_lea.hbm %s7145_s6, %s5643_s20  ;;  %s324_s10 = int_to_ptr.vmem [resolvable:$true] %s323_s10 }
  0x80   : > { %s6027_s5 = scalar_lea.hbm %s321_s22, 256  ;;  %s6032_s17 = scalar_lea.hbm %s7145_s6, 512 }
  0x81   : > { %p6028_p12 = scmp.ne.s32.totalorder %s321_s22, %s6027_s5  ;;  %p6033_p7 = scmp.lt.s32.totalorder %s321_s22, %s7145_s6 }
  0x82   : > { %p6034_p8 = scmp.lt.s32.totalorder %s6032_s17, %s6027_s5 }
  0x83   : > { %p6030_p4 = pnand %p6028_p12, %p5923_p13 }
  0x84   : > { %p6035_p11 = por %p6034_p8, %p6033_p7 }
  0x85   : > { %p6031_p6 = pneg %p6030_p4 }
  0x87   : > { %p6036_p3 = pnand %p6035_p11, %p6031_p6 }
  0x89   : > { %6039 = shalt.err (!%p6036_p3)
}
  0x8a   : > { %s6040_s21 = scalar_lea.vmem %s324_s10, 256  ;;  %s6146_s29 = smov [#allocation13]  }
  0x8b   : > { %p6041_p5 = scmp.ne.s32.totalorder %s324_s10, %s6040_s21  ;;  %s6045_s20 = sshll.u32 %s6146_s29, 4  ;;  %s6046_s20 = int_to_ptr.vmem [resolvable:$false] %s6045_s20 }
  0x8c   : > { %s6047_s14 = scalar_lea.vmem %s6046_s20, 512  ;;  %p6048_p9 = scmp.lt.s32.totalorder %s324_s10, %s6046_s20 }
  0x8d   : > { %p6043_p10 = pnand %p6041_p5, %p5923_p13  ;;  %p6049_p1 = scmp.lt.s32.totalorder %s6047_s14, %s6040_s21 }
  0x8f   : > { %p6044_p0 = pneg %p6043_p10  ;;  %p6050_p12 = por %p6049_p1, %p6048_p9 }
  0x91   : > { %p6051_p4 = pnand %p6050_p12, %p6044_p0 }
  0x93   : > { %6054 = shalt.err (!%p6051_p4)
}
  0x94   : > { %5693 = dma.hbm_to_vmem [thread:$0]  (!%p6300_p2), %s321_s22, 256, %s324_s10, %s6306_s13  }
  0x95   : > { %p7178_p6 = scmp.ne.s32.totalorder %s7163_s9, 0 }
  0x96   : > { %p7179_p7 = scmp.eq.s32.totalorder (!%p7178_p6), %s6213_s28, 0 }
  0x97   : > { %332 = sbr.rel (%p7178_p6) target bundleno = 1097 (0x449), region = 48 }
  0x9c   : > { %6098 = dma.done.wait (%p7179_p7), [#allocation3], 256   ;;  %p7180_p13 = pmov %p7179_p7 }
  0x9d   : > { %p7181_p8 = pmov %p7179_p7 }
  0x9e   : > { %6100 = vsyncadd (%p7180_p13), [#allocation3], 4294967040 }
  0x9f   : > { %6102 = dma.done.wait (%p7181_p8), [#allocation6], 3584   ;;  %p7182_p11 = pmov %p7179_p7 }
  0xa0   : > { %p7183_p3 = pmov %p7179_p7 }
  0xa1   : > { %6104 = vsyncadd (%p7182_p11), [#allocation6], 4294963712 }
  0xa2   : > { %6106 = dma.done.wait (%p7183_p3), [#allocation9], 576   ;;  %p7184_p2 = pmov %p7183_p3 }
  0xa3   : > { %s354_s1 = sand.u32 1, %s6213_s28   ;;  %s6397_s9 = sand.u32 1, %s6123_s25  }
  0xa4   : > { %6108 = vsyncadd (%p7184_p2), [#allocation9], 4294966720  ;;  %s5050_s13 = sshll.u32 %s6397_s9, 12  ;;  %s355_s10 = scalar_lea.sflag [#allocation12], %s354_s1 }
  0xa5   : > { %s6400_s16 = scalar_lea.vmem [#allocation11], %s5050_s13  ;;  %p7185_p5 = scmp.ne.s32.totalorder %s7161_s30, 0 }
  0xa7   : > { %6110 = dma.done.wait (%p7185_p5), %s355_s10, 65792  }
  0xa8   : > { %6112 = vsyncadd (%p7185_p5), %s355_s10, 4294901504  ;;  %v6147_v0 = vmov 0   ;;  %vm463_vm0 = vcmask 1044480   ;;  %v5758_v1 = vld [vmem:[#allocation8 + $0x4] ss:$16 sps:$4 sm:$0x1f]  }
  0xa9   : > { %508 = vmatprep.mubr.bf16.mxu0 %v6147_v0  ;;  %551 = vmatprep.mubr.bf16.mxu1 %v6147_v0  ;;  %v5760_v2 = vld [vmem:[#allocation8 + $0xc] ss:$16 sps:$4 sm:$0x1f]   ;;  %v5762_v3 = vld [vmem:[#allocation8] ss:$16 sps:$4 sm:$0x1f]  }
  0xaa   : > { %5057 = vmatprep.subr.msk.bf16.mxu0 %vm463_vm0, %v5758_v1  ;;  %v5763_v4 = vld [vmem:[#allocation8 + $0x8] ss:$16 sps:$4 sm:$0x1f]   ;;  %5059 = vmatprep.subr.msk.bf16.mxu1 %vm463_vm0, %v5760_v2  ;;  %v410_v5 = vld [vmem:[#allocation5] sm:$0xff]  ;;  %v437_v7 = vld [vmem:[#allocation7 + $0xc0] sm:$0x33] }
  0xab   : > { %v411_v6 = vld [vmem:[#allocation5 + $0x8] sm:$0xff]  ;;  %vm696_vm1 = vcmask 1041408   ;;  %v465_v8 = vsel %vm463_vm0, %v5762_v3, 0  ;;  %v471_v9 = vsel %vm463_vm0, %v5763_v4, 0  ;;  %v5086_v11 = vcombine.high %v437_v7, %v437_v7  ;;  %v438_v12 = vld [vmem:[#allocation7 + $0xc8] sm:$0x33] }
  0xac   : > { %v412_v10 = vpack.c.bf16 %v411_v6, %v410_v5  ;;  %491 = vmatpush1.bf16.msra.mxu0 %v465_v8  ;;  %534 = vmatpush1.bf16.msra.mxu1 %v471_v9  ;;  %vm459_vm2 = vcmask 80896   ;;  %v5088_v13 = vcombine.high %v438_v12, %v438_v12  ;;  %v5085_v14 = vcombine.low %v437_v7, %v437_v7  ;;  %v5770_v16 = vld [vmem:[#allocation7 + $0xa4] ss:$16 sps:$4 sm:$0xff]   ;;  %v5773_v17 = vld [vmem:[#allocation7 + $0xac] ss:$16 sps:$4 sm:$0xff]   ;;  %s5051_s30 = sshll.u32 %s6397_s9, 4 }
  0xad   : > { %v5087_v15 = vcombine.low %v438_v12, %v438_v12  ;;  %5089 = vmatprep.subr.msk.bf16.mxu0 %vm696_vm1, %v5086_v11  ;;  %v5768_v20 = vld [vmem:[#allocation7 + $0xa0] ss:$16 sps:$4 sm:$0xff]   ;;  %v5771_v21 = vld [vmem:[#allocation7 + $0xa8] ss:$16 sps:$4 sm:$0xff]   ;;  %v5776_v22 = vld [vmem:[#allocation7 + $0x84] ss:$16 sps:$4 sm:$0xff]  }
  0xae   : > { %5091 = vmatprep.subr.msk.bf16.mxu1 %vm696_vm1, %v5088_v13  ;;  %v698_v18 = vsel %vm696_vm1, %v5085_v14, 0  ;;  %v5779_v23 = vld [vmem:[#allocation7 + $0x8c] ss:$16 sps:$4 sm:$0xff]   ;;  %v5774_v24 = vld [vmem:[#allocation7 + $0x80] ss:$16 sps:$4 sm:$0xff]   ;;  %v949_v40 = vld [vmem:[%s6400_s16 + $0x380] sm:$0xff] }
  0xaf   : > { %v704_v19 = vsel %vm696_vm1, %v5087_v15, 0  ;;  %5058 = vmatmul.mubr.msk.bf16.vlgmr.msra.gmra.mxu0 %vm459_vm2, %v412_v10  ;;  %5060 = vmatmul.mubr.msk.bf16.vlgmr.msra.gmra.mxu1 %vm459_vm2, %v412_v10  ;;  %v5777_v25 = vld [vmem:[#allocation7 + $0x88] ss:$16 sps:$4 sm:$0xff]   ;;  %v5782_v26 = vld [vmem:[#allocation7 + $0x64] ss:$16 sps:$4 sm:$0xff]   ;;  %vm692_vm3 = vcmask 818176  }
  0xb0   : > { %712 = vmatpush1.bf16.msra.mxu0 %v698_v18  ;;  %755 = vmatpush1.bf16.msra.mxu1 %v704_v19  ;;  %v5785_v27 = vld [vmem:[#allocation7 + $0x6c] ss:$16 sps:$4 sm:$0xff]   ;;  %v5780_v28 = vld [vmem:[#allocation7 + $0x60] ss:$16 sps:$4 sm:$0xff]   ;;  %v5783_v29 = vld [vmem:[#allocation7 + $0x68] ss:$16 sps:$4 sm:$0xff]  }
  0xb1   : > { %713 = vmatprep.subr.bf16.mxu0 %v5770_v16  ;;  %756 = vmatprep.subr.bf16.mxu1 %v5773_v17  ;;  %v5788_v30 = vld [vmem:[#allocation7 + $0x44] ss:$16 sps:$4 sm:$0xff]   ;;  %v5791_v31 = vld [vmem:[#allocation7 + $0x4c] ss:$16 sps:$4 sm:$0xff]   ;;  %v5786_v32 = vld [vmem:[#allocation7 + $0x40] ss:$16 sps:$4 sm:$0xff]  }
  0xb2   : > { %741 = vmatprep.mubr.bf16.mxu0 %v6147_v0  ;;  %784 = vmatprep.mubr.bf16.mxu1 %v6147_v0  ;;  %v5789_v33 = vld [vmem:[#allocation7 + $0x48] ss:$16 sps:$4 sm:$0xff]   ;;  %v5794_v34 = vld [vmem:[#allocation7 + $0x24] ss:$16 sps:$4 sm:$0xff]   ;;  %v5797_v35 = vld [vmem:[#allocation7 + $0x2c] ss:$16 sps:$4 sm:$0xff]  }
  0xb3   : > { %v5792_v36 = vld [vmem:[#allocation7 + $0x20] ss:$16 sps:$4 sm:$0xff]   ;;  %v5795_v37 = vld [vmem:[#allocation7 + $0x28] ss:$16 sps:$4 sm:$0xff]   ;;  %v5800_v38 = vld [vmem:[#allocation7 + $0x4] ss:$16 sps:$4 sm:$0xff]  }
  0xb4   : > { %714 = vmatpush1.bf16.msra.mxu0 %v5768_v20  ;;  %757 = vmatpush1.bf16.msra.mxu1 %v5771_v21  ;;  %v5803_v39 = vld [vmem:[#allocation7 + $0xc] ss:$16 sps:$4 sm:$0xff]   ;;  %v957_v41 = vld [vmem:[%s6400_s16 + $0x3c0] sm:$0xff]  ;;  %v5798_v44 = vld [vmem:[#allocation7] ss:$16 sps:$4 sm:$0xff]   ;;  %s6733_s15 = scalar_lea.vmem [#allocation13], %s5051_s30 }
  0xb5   : > { %715 = vmatprep.subr.bf16.mxu0 %v5776_v22  ;;  %758 = vmatprep.subr.bf16.mxu1 %v5779_v23  ;;  %v1205_v42 = vld [vmem:[%s6400_s16 + $0xb80] sm:$0xff]  ;;  %v407_v46 = vld [vmem:[#allocation2] sm:$0xff]  ;;  %v408_v47 = vld [vmem:[#allocation2 + $0x8] sm:$0xff]  ;;  %v5206_v48 = vcombine.high %v949_v40, %v957_v41  ;;  %v5205_v55 = vcombine.low %v949_v40, %v957_v41  ;;  %s5052_s22 = sshll.u32 %s6397_s9, 8  ;;  %s5644_s12 = sshll.u32 %s6213_s28, 11 }
  0xb6   : > { %v1213_v43 = vld [vmem:[%s6400_s16 + $0xbc0] sm:$0xff]  ;;  %v409_v54 = vpack.c.bf16 %v408_v47, %v407_v46  ;;  %s6779_s5 = scalar_lea.vmem [#allocation14], %s5052_s22  ;;  %s7092_s23 = scalar_lea.hbm %s7146_s7, %s5644_s12 }
  0xb7   : > { %v5801_v45 = vld [vmem:[#allocation7 + $0x8] ss:$16 sps:$4 sm:$0xff]   ;;  %v5462_v49 = vcombine.high %v1205_v42, %v1213_v43  ;;  %v5461_v56 = vcombine.low %v1205_v42, %v1213_v43  ;;  %s4887_s3 = sshll.u32 %s6779_s5, 4  ;;  %s4874_s28 = scalar_lea.sflag [#allocation4], %s6397_s9  ;;  %s7094_s3 = int_to_ptr.vmem [resolvable:$true] %s4887_s3 }
  0xb8   : > { %716 = vmatpush1.bf16.msra.mxu0 %v5774_v24  ;;  %759 = vmatpush1.bf16.msra.mxu1 %v5777_v25  ;;  %v933_v50 = vld [vmem:[%s6400_s16 + $0x300] sm:$0xff]  ;;  %s6055_s21 = scalar_lea.vmem %s7094_s3, 4096  ;;  %p7186_p0 = scmp.ne.s32.totalorder %s7168_s19, 0 }
  0xb9   : > { %717 = vmatprep.subr.bf16.mxu0 %v5782_v26  ;;  %760 = vmatprep.subr.bf16.mxu1 %v5785_v27  ;;  %v941_v51 = vld [vmem:[%s6400_s16 + $0x340] sm:$0xff]  ;;  %p6056_p10 = scmp.ne.s32.totalorder %s7094_s3, %s6055_s21  ;;  %s6148_s29 = smov [#allocation14]  }
  0xba   : > { %v1189_v52 = vld [vmem:[%s6400_s16 + $0xb00] sm:$0xff]  ;;  %v5190_v57 = vcombine.high %v933_v50, %v941_v51  ;;  %v5189_v63 = vcombine.low %v933_v50, %v941_v51  ;;  %s6059_s20 = sshll.u32 %s6148_s29, 4  ;;  %s6060_s20 = int_to_ptr.vmem [resolvable:$false] %s6059_s20 }
  0xbb   : > { %v1197_v53 = vld [vmem:[%s6400_s16 + $0xb40] sm:$0xff]  ;;  %p6057_p9 = pnand %p6056_p10, %p7186_p0  ;;  %s6061_s14 = scalar_lea.vmem %s6060_s20, 8192 }
  0xbc   : > { %718 = vmatpush1.bf16.msra.mxu0 %v5780_v28  ;;  %761 = vmatpush1.bf16.msra.mxu1 %v5783_v29  ;;  %v5446_v58 = vcombine.high %v1189_v52, %v1197_v53  ;;  %v917_v59 = vld [vmem:[%s6400_s16 + $0x280] sm:$0xff]  ;;  %v5445_v0 = vcombine.low %v1189_v52, %v1197_v53  ;;  %p6062_p12 = scmp.lt.s32.totalorder %s7094_s3, %s6060_s20  ;;  %p6063_p4 = scmp.lt.s32.totalorder %s6061_s14, %s6055_s21 }
  0xbd   : > { %719 = vmatprep.subr.bf16.mxu0 %v5788_v30  ;;  %762 = vmatprep.subr.bf16.mxu1 %v5791_v31  ;;  %v925_v60 = vld [vmem:[%s6400_s16 + $0x2c0] sm:$0xff]  ;;  %p6058_p1 = pneg %p6057_p9 }
  0xbe   : > { %v1173_v61 = vld [vmem:[%s6400_s16 + $0xa80] sm:$0xff]  ;;  %v5174_v1 = vcombine.high %v917_v59, %v925_v60  ;;  %v5173_v7 = vcombine.low %v917_v59, %v925_v60  ;;  %p6064_p6 = por %p6063_p4, %p6062_p12 }
  0xbf   : > { %v1181_v62 = vld [vmem:[%s6400_s16 + $0xac0] sm:$0xff] }
  0xc0   : > { %720 = vmatpush1.bf16.msra.mxu0 %v5786_v32  ;;  %763 = vmatpush1.bf16.msra.mxu1 %v5789_v33  ;;  %v5430_v2 = vcombine.high %v1173_v61, %v1181_v62  ;;  %v901_v3 = vld [vmem:[%s6400_s16 + $0x200] sm:$0xff]  ;;  %v5429_v8 = vcombine.low %v1173_v61, %v1181_v62  ;;  %p6065_p7 = pnand %p6064_p6, %p6058_p1 }
  0xc1   : > { %721 = vmatprep.subr.bf16.mxu0 %v5794_v34  ;;  %764 = vmatprep.subr.bf16.mxu1 %v5797_v35  ;;  %v909_v4 = vld [vmem:[%s6400_s16 + $0x240] sm:$0xff] }
  0xc2   : > { %v1157_v5 = vld [vmem:[%s6400_s16 + $0xa00] sm:$0xff]  ;;  %v5158_v9 = vcombine.high %v901_v3, %v909_v4  ;;  %v5157_v15 = vcombine.low %v901_v3, %v909_v4 }
  0xc3   : > { %v1165_v6 = vld [vmem:[%s6400_s16 + $0xa40] sm:$0xff] }
  0xc4   : > { %722 = vmatpush1.bf16.msra.mxu0 %v5792_v36  ;;  %765 = vmatpush1.bf16.msra.mxu1 %v5795_v37  ;;  %v5414_v10 = vcombine.high %v1157_v5, %v1165_v6  ;;  %v885_v11 = vld [vmem:[%s6400_s16 + $0x180] sm:$0xff]  ;;  %v5413_v16 = vcombine.low %v1157_v5, %v1165_v6 }
  0xc5   : > { %723 = vmatprep.subr.bf16.mxu0 %v5800_v38  ;;  %766 = vmatprep.subr.bf16.mxu1 %v5803_v39  ;;  %v893_v12 = vld [vmem:[%s6400_s16 + $0x1c0] sm:$0xff] }
  0xc6   : > { %v1141_v13 = vld [vmem:[%s6400_s16 + $0x980] sm:$0xff]  ;;  %v5142_v17 = vcombine.high %v885_v11, %v893_v12  ;;  %v5141_v23 = vcombine.low %v885_v11, %v893_v12 }
  0xc7   : > { %v1149_v14 = vld [vmem:[%s6400_s16 + $0x9c0] sm:$0xff] }
  0xc8   : > { %724 = vmatpush1.bf16.msra.mxu0 %v5798_v44  ;;  %767 = vmatpush1.bf16.msra.mxu1 %v5801_v45  ;;  %v5398_v18 = vcombine.high %v1141_v13, %v1149_v14  ;;  %v869_v19 = vld [vmem:[%s6400_s16 + $0x100] sm:$0xff]  ;;  %v5397_v24 = vcombine.low %v1141_v13, %v1149_v14 }
  0xc9   : > { %3993 = vmatprep.subr.bf16.mxu0 %v5206_v48  ;;  %4036 = vmatprep.subr.bf16.mxu1 %v5462_v49  ;;  %v877_v20 = vld [vmem:[%s6400_s16 + $0x140] sm:$0xff] }
  0xca   : > { %v1125_v21 = vld [vmem:[%s6400_s16 + $0x900] sm:$0xff]  ;;  %v5126_v25 = vcombine.high %v869_v19, %v877_v20  ;;  %v5125_v27 = vcombine.low %v869_v19, %v877_v20 }
  0xcb   : > { %5090 = vmatmul.mubr.msk.bf16.vlgmr.msra.gmra.mxu0 %vm692_vm3, %v409_v54  ;;  %5092 = vmatmul.mubr.msk.bf16.vlgmr.msra.gmra.mxu1 %vm692_vm3, %v409_v54  ;;  %v1133_v22 = vld [vmem:[%s6400_s16 + $0x940] sm:$0xff] }
  0xcc   : > { %3994 = vmatpush1.bf16.msra.mxu0 %v5205_v55  ;;  %4037 = vmatpush1.bf16.msra.mxu1 %v5461_v56  ;;  %v5382_v26 = vcombine.high %v1125_v21, %v1133_v22  ;;  %v5381_v28 = vcombine.low %v1125_v21, %v1133_v22  ;;  %v853_v29 = vld [vmem:[%s6400_s16 + $0x80] sm:$0xff] }
  0xcd   : > { %3995 = vmatprep.subr.bf16.mxu0 %v5190_v57  ;;  %4038 = vmatprep.subr.bf16.mxu1 %v5446_v58  ;;  %v861_v30 = vld [vmem:[%s6400_s16 + $0xc0] sm:$0xff] }
  0xce   : > { %v1109_v31 = vld [vmem:[%s6400_s16 + $0x880] sm:$0xff]  ;;  %v5110_v32 = vcombine.high %v853_v29, %v861_v30  ;;  %v5109_v34 = vcombine.low %v853_v29, %v861_v30 }
  0xcf   : > { %v1117_v33 = vld [vmem:[%s6400_s16 + $0x8c0] sm:$0xff] }
  0xd0   : > { %3996 = vmatpush1.bf16.msra.mxu0 %v5189_v63  ;;  %4039 = vmatpush1.bf16.msra.mxu1 %v5445_v0  ;;  %v5365_v35 = vcombine.low %v1109_v31, %v1117_v33  ;;  %v5366_v36 = vcombine.high %v1109_v31, %v1117_v33  ;;  %v837_v37 = vld [vmem:[%s6400_s16] sm:$0xff] }
  0xd1   : > { %3997 = vmatprep.subr.bf16.mxu0 %v5174_v1  ;;  %4040 = vmatprep.subr.bf16.mxu1 %v5430_v2  ;;  %v845_v38 = vld [vmem:[%s6400_s16 + $0x40] sm:$0xff] }
  0xd2   : > { %v1093_v39 = vld [vmem:[%s6400_s16 + $0x800] sm:$0xff]  ;;  %v5094_v40 = vcombine.high %v837_v37, %v845_v38  ;;  %v5093_v42 = vcombine.low %v837_v37, %v845_v38 }
  0xd3   : > { %v1101_v41 = vld [vmem:[%s6400_s16 + $0x840] sm:$0xff] }
  0xd4   : > { %3998 = vmatpush1.bf16.msra.mxu0 %v5173_v7  ;;  %4041 = vmatpush1.bf16.msra.mxu1 %v5429_v8  ;;  %v5349_v43 = vcombine.low %v1093_v39, %v1101_v41  ;;  %v5350_v44 = vcombine.high %v1093_v39, %v1101_v41  ;;  %v1077_v45 = vld [vmem:[%s6400_s16 + $0x780] sm:$0xff] }
  0xd5   : > { %3999 = vmatprep.subr.bf16.mxu0 %v5158_v9  ;;  %4042 = vmatprep.subr.bf16.mxu1 %v5414_v10  ;;  %v1085_v46 = vld [vmem:[%s6400_s16 + $0x7c0] sm:$0xff] }
  0xd6   : > { %v1333_v47 = vld [vmem:[%s6400_s16 + $0xf80] sm:$0xff]  ;;  %v5334_v48 = vcombine.high %v1077_v45, %v1085_v46  ;;  %v5333_v52 = vcombine.low %v1077_v45, %v1085_v46  ;;  %v6475_v45 = vld [vmem:[%s6400_s16 + $0x388] sm:$0xff] }
  0xd7   : > { %v1341_v49 = vld [vmem:[%s6400_s16 + $0xfc0] sm:$0xff]  ;;  %v6478_v46 = vld [vmem:[%s6400_s16 + $0x3c8] sm:$0xff] }
  0xd8   : > { %4000 = vmatpush1.bf16.msra.mxu0 %v5157_v15  ;;  %4043 = vmatpush1.bf16.msra.mxu1 %v5413_v16  ;;  %v1061_v50 = vld [vmem:[%s6400_s16 + $0x700] sm:$0xff]  ;;  %v5590_v53 = vcombine.high %v1333_v47, %v1341_v49  ;;  %v5589_v56 = vcombine.low %v1333_v47, %v1341_v49  ;;  %v6481_v47 = vld [vmem:[%s6400_s16 + $0xb88] sm:$0xff] }
  0xd9   : > { %4001 = vmatprep.subr.bf16.mxu0 %v5142_v17  ;;  %4044 = vmatprep.subr.bf16.mxu1 %v5398_v18  ;;  %v1069_v51 = vld [vmem:[%s6400_s16 + $0x740] sm:$0xff]  ;;  %v6486_v49 = vld [vmem:[%s6400_s16 + $0xbc8] sm:$0xff] }
  0xda   : > { %v1317_v54 = vld [vmem:[%s6400_s16 + $0xf00] sm:$0xff]  ;;  %v5318_v57 = vcombine.high %v1061_v50, %v1069_v51  ;;  %v5317_v63 = vcombine.low %v1061_v50, %v1069_v51  ;;  %v5207_v50 = vcombine.low %v6475_v45, %v6478_v46  ;;  %v5463_v51 = vcombine.low %v6481_v47, %v6486_v49 }
  0xdb   : > { %v1325_v55 = vld [vmem:[%s6400_s16 + $0xf40] sm:$0xff] }
  0xdc   : > { %4002 = vmatpush1.bf16.msra.mxu0 %v5141_v23  ;;  %4045 = vmatpush1.bf16.msra.mxu1 %v5397_v24  ;;  %v5574_v58 = vcombine.high %v1317_v54, %v1325_v55  ;;  %v1045_v59 = vld [vmem:[%s6400_s16 + $0x680] sm:$0xff]  ;;  %v5573_v0 = vcombine.low %v1317_v54, %v1325_v55 }
  0xdd   : > { %4003 = vmatprep.subr.bf16.mxu0 %v5126_v25  ;;  %4046 = vmatprep.subr.bf16.mxu1 %v5382_v26  ;;  %v1053_v60 = vld [vmem:[%s6400_s16 + $0x6c0] sm:$0xff] }
  0xde   : > { %v1301_v61 = vld [vmem:[%s6400_s16 + $0xe80] sm:$0xff]  ;;  %v5302_v1 = vcombine.high %v1045_v59, %v1053_v60  ;;  %v5301_v7 = vcombine.low %v1045_v59, %v1053_v60 }
  0xdf   : > { %v1309_v62 = vld [vmem:[%s6400_s16 + $0xec0] sm:$0xff] }
  0xe0   : > { %4004 = vmatpush1.bf16.msra.mxu0 %v5125_v27  ;;  %4047 = vmatpush1.bf16.msra.mxu1 %v5381_v28  ;;  %v5558_v2 = vcombine.high %v1301_v61, %v1309_v62  ;;  %v1029_v3 = vld [vmem:[%s6400_s16 + $0x600] sm:$0xff]  ;;  %v5557_v8 = vcombine.low %v1301_v61, %v1309_v62 }
  0xe1   : > { %4005 = vmatprep.subr.bf16.mxu0 %v5110_v32  ;;  %4048 = vmatprep.subr.bf16.mxu1 %v5366_v36  ;;  %v1037_v4 = vld [vmem:[%s6400_s16 + $0x640] sm:$0xff] }
  0xe2   : > { %v1285_v5 = vld [vmem:[%s6400_s16 + $0xe00] sm:$0xff]  ;;  %v5286_v9 = vcombine.high %v1029_v3, %v1037_v4  ;;  %v5285_v15 = vcombine.low %v1029_v3, %v1037_v4 }
  0xe3   : > { %v1293_v6 = vld [vmem:[%s6400_s16 + $0xe40] sm:$0xff] }
  0xe4   : > { %4006 = vmatpush1.bf16.msra.mxu0 %v5109_v34  ;;  %4049 = vmatpush1.bf16.msra.mxu1 %v5365_v35  ;;  %v5542_v10 = vcombine.high %v1285_v5, %v1293_v6  ;;  %v1013_v11 = vld [vmem:[%s6400_s16 + $0x580] sm:$0xff]  ;;  %v5541_v16 = vcombine.low %v1285_v5, %v1293_v6  ;;  %v795_v5 = vld [vmem:[#allocation10] sm:$0xf] }
  0xe5   : > { %4007 = vmatprep.subr.bf16.mxu0 %v5094_v40  ;;  %4050 = vmatprep.subr.bf16.mxu1 %v5350_v44  ;;  %v1021_v12 = vld [vmem:[%s6400_s16 + $0x5c0] sm:$0xff] }
  0xe6   : > { %v1269_v13 = vld [vmem:[%s6400_s16 + $0xd80] sm:$0xff]  ;;  %v5270_v17 = vcombine.high %v1013_v11, %v1021_v12  ;;  %v5269_v19 = vcombine.low %v1013_v11, %v1021_v12 }
  0xe7   : > { %v1277_v14 = vld [vmem:[%s6400_s16 + $0xdc0] sm:$0xff] }
  0xe8   : > { %4008 = vmatpush1.bf16.msra.mxu0 %v5093_v42  ;;  %4051 = vmatpush1.bf16.msra.mxu1 %v5349_v43  ;;  %v5526_v18 = vcombine.high %v1269_v13, %v1277_v14  ;;  %v5525_v20 = vcombine.low %v1269_v13, %v1277_v14  ;;  %v997_v21 = vld [vmem:[%s6400_s16 + $0x500] sm:$0xff] }
  0xe9   : > { %4009 = vmatprep.subr.bf16.mxu0 %v5334_v48  ;;  %4052 = vmatprep.subr.bf16.mxu1 %v5590_v53  ;;  %v1005_v22 = vld [vmem:[%s6400_s16 + $0x540] sm:$0xff]  ;;  %v5208_v48 = vcombine.high %v6475_v45, %v6478_v46  ;;  %v910_v45 = vld [vmem:[%s6400_s16 + $0x248] sm:$0xff] }
  0xea   : > { %v1253_v23 = vld [vmem:[%s6400_s16 + $0xd00] sm:$0xff]  ;;  %v5253_v25 = vcombine.low %v997_v21, %v1005_v22  ;;  %v5254_v26 = vcombine.high %v997_v21, %v1005_v22  ;;  %v1158_v46 = vld [vmem:[%s6400_s16 + $0xa08] sm:$0xff] }
  0xeb   : > { %v1261_v24 = vld [vmem:[%s6400_s16 + $0xd40] sm:$0xff] }
  0xec   : > { %4010 = vmatpush2.bf16.msra.mxu0 %v5333_v52  ;;  %4053 = vmatpush2.bf16.msra.mxu1 %v5589_v56  ;;  %v5509_v27 = vcombine.low %v1253_v23, %v1261_v24  ;;  %v5510_v28 = vcombine.high %v1253_v23, %v1261_v24  ;;  %v981_v29 = vld [vmem:[%s6400_s16 + $0x480] sm:$0xff]  ;;  %v5464_v52 = vcombine.high %v6481_v47, %v6486_v49 }
  0xed   : > { %4011 = vmatprep.subr.bf16.mxu0 %v5318_v57  ;;  %4054 = vmatprep.subr.bf16.mxu1 %v5574_v58  ;;  %v989_v30 = vld [vmem:[%s6400_s16 + $0x4c0] sm:$0xff]  ;;  %v797_v57 = vlaneseq }
  0xee   : > { %v1237_v31 = vld [vmem:[%s6400_s16 + $0xc80] sm:$0xff]  ;;  %v5238_v32 = vcombine.high %v981_v29, %v989_v30  ;;  %v5237_v34 = vcombine.low %v981_v29, %v989_v30 }
  0xef   : > { %v1245_v33 = vld [vmem:[%s6400_s16 + $0xcc0] sm:$0xff]  ;;  %v6494_v60 = vshrl.u32 %v797_v57, 7  ;;  %v926_v57 = vld [vmem:[%s6400_s16 + $0x2c8] sm:$0xff] }
  0xf0   : > { %4012 = vmatpush2.bf16.msra.mxu0 %v5317_v63  ;;  %4055 = vmatpush2.bf16.msra.mxu1 %v5573_v0  ;;  %v5493_v35 = vcombine.low %v1237_v31, %v1245_v33  ;;  %v5494_v36 = vcombine.high %v1237_v31, %v1245_v33  ;;  %v965_v37 = vld [vmem:[%s6400_s16 + $0x400] sm:$0xff] }
  0xf1   : > { %4013 = vmatprep.subr.bf16.mxu0 %v5302_v1  ;;  %4056 = vmatprep.subr.bf16.mxu1 %v5558_v2  ;;  %v973_v38 = vld [vmem:[%s6400_s16 + $0x440] sm:$0xff]  ;;  %v6497_v63 = vsub.s32 1, %v6494_v60  ;;  %v6500_v0 = vsub.s32 3, %v6494_v60  ;;  %v6503_v2 = vsub.s32 0, %v6494_v60  ;;  %v6506_v4 = vsub.s32 2, %v6494_v60 }
  0xf2   : > { %v1221_v39 = vld [vmem:[%s6400_s16 + $0xc00] sm:$0xff]  ;;  %v5222_v40 = vcombine.high %v965_v37, %v973_v38  ;;  %v5221_v42 = vcombine.low %v965_v37, %v973_v38  ;;  %v934_v38 = vld [vmem:[%s6400_s16 + $0x308] sm:$0xff] }
  0xf3   : > { %v1229_v41 = vld [vmem:[%s6400_s16 + $0xc40] sm:$0xff]  ;;  %v812_v11 = vrot.slane %v795_v5, %v6500_v0  ;;  %v800_v13 = vrot.slane %v795_v5, %v6503_v2 }
  0xf4   : > { %4014 = vmatpush2.bf16.msra.mxu0 %v5301_v7  ;;  %4057 = vmatpush2.bf16.msra.mxu1 %v5557_v8  ;;  %v5477_v43 = vcombine.low %v1221_v39, %v1229_v41  ;;  %v5478_v44 = vcombine.high %v1221_v39, %v1229_v41  ;;  %v942_v41 = vld [vmem:[%s6400_s16 + $0x348] sm:$0xff] }
  0xf5   : > { %4015 = vmatprep.subr.bf16.mxu0 %v5286_v9  ;;  %4058 = vmatprep.subr.bf16.mxu1 %v5542_v10  ;;  %v804_v9 = vrot.slane %v795_v5, %v6497_v63 }
  0xf8   : > { %4016 = vmatpush2.bf16.msra.mxu0 %v5285_v15  ;;  %4059 = vmatpush2.bf16.msra.mxu1 %v5541_v16  ;;  %v808_v15 = vrot.slane %v795_v5, %v6506_v4  ;;  %v902_v5 = vld [vmem:[%s6400_s16 + $0x208] sm:$0xff] }
  0xf9   : > { %4017 = vmatprep.subr.bf16.mxu0 %v5270_v17  ;;  %4060 = vmatprep.subr.bf16.mxu1 %v5526_v18 }
  0xfc   : > { %4018 = vmatpush2.bf16.msra.mxu0 %v5269_v19  ;;  %4061 = vmatpush2.bf16.msra.mxu1 %v5525_v20 }
  0xfd   : > { %4019 = vmatprep.subr.bf16.mxu0 %v5254_v26  ;;  %4062 = vmatprep.subr.bf16.mxu1 %v5510_v28 }
 0x100   : > { %4020 = vmatpush2.bf16.msra.mxu0 %v5253_v25  ;;  %4063 = vmatpush2.bf16.msra.mxu1 %v5509_v27 }
 0x101   : > { %4021 = vmatprep.subr.bf16.mxu0 %v5238_v32  ;;  %4064 = vmatprep.subr.bf16.mxu1 %v5494_v36 }
 0x104   : > { %4022 = vmatpush2.bf16.msra.mxu0 %v5237_v34  ;;  %4065 = vmatpush2.bf16.msra.mxu1 %v5493_v35 }
 0x105   : > { %4023 = vmatprep.subr.bf16.mxu0 %v5222_v40  ;;  %4066 = vmatprep.subr.bf16.mxu1 %v5478_v44 }
 0x108   : > { %4024 = vmatpush2.bf16.msra.mxu0 %v5221_v42  ;;  %4067 = vmatpush2.bf16.msra.mxu1 %v5477_v43  ;;  %v1190_v42 = vld [vmem:[%s6400_s16 + $0xb08] sm:$0xff] }
 0x109   : > { %4079 = vmatprep.subr.bf16.mxu0 %v5208_v48  ;;  %4122 = vmatprep.subr.bf16.mxu1 %v5464_v52  ;;  %v1198_v43 = vld [vmem:[%s6400_s16 + $0xb48] sm:$0xff] }
 0x16f   : > { %v510_v53 = vpop.f32.mrf.mxu0  ;;  %v553_v54 = vpop.f32.mrf.mxu1 }
 0x171   : > { %v512_v55 = vpop.f32.mrf.mxu0  ;;  %v555_v56 = vpop.f32.mrf.mxu1 }
 0x173   : > { %v514_v58 = vpop.f32.mrf.mxu0  ;;  %v557_v59 = vpop.f32.mrf.mxu1 }
 0x175   : > { %v516_v61 = vpop.f32.mrf.mxu0  ;;  %v559_v62 = vpop.f32.mrf.mxu1 }
 0x18b   : > { %v743_v1 = vpop.f32.mrf.mxu0  ;;  %v786_v3 = vpop.f32.mrf.mxu1 }
 0x18c   : > { %v744_v12 = vadd.f32 %v743_v1, %v510_v53  ;;  %v787_v14 = vadd.f32 %v786_v3, %v553_v54  ;;  %v918_v54 = vld [vmem:[%s6400_s16 + $0x288] sm:$0xff] }
 0x18d   : > { %v745_v6 = vpop.f32.mrf.mxu0  ;;  %v788_v7 = vpop.f32.mrf.mxu1  ;;  %v5176_v1 = vcombine.high %v918_v54, %v926_v57  ;;  %v5175_v47 = vcombine.low %v918_v54, %v926_v57  ;;  %v1062_v57 = vld [vmem:[%s6400_s16 + $0x708] sm:$0xff] }
 0x18e   : > { %v746_v8 = vadd.f32 %v745_v6, %v512_v55  ;;  %v789_v10 = vadd.f32 %v788_v7, %v555_v56  ;;  %v817_v26 = vadd.f32 %v800_v13, %v744_v12  ;;  %v819_v27 = vadd.f32 %v808_v15, %v787_v14  ;;  %v886_v7 = vld [vmem:[%s6400_s16 + $0x188] sm:$0xff] }
 0x18f   : > { %v747_v16 = vpop.f32.mrf.mxu0  ;;  %v790_v17 = vpop.f32.mrf.mxu1  ;;  %v5192_v55 = vcombine.high %v934_v38, %v942_v41  ;;  %v5448_v56 = vcombine.high %v1190_v42, %v1198_v43 }
 0x190   : > { %v748_v18 = vadd.f32 %v747_v16, %v514_v58  ;;  %v791_v19 = vadd.f32 %v790_v17, %v557_v59  ;;  %v818_v22 = vadd.f32 %v804_v9, %v746_v8  ;;  %v820_v23 = vadd.f32 %v812_v11, %v789_v10  ;;  %v1174_v58 = vld [vmem:[%s6400_s16 + $0xa88] sm:$0xff] }
 0x191   : > { %v749_v20 = vpop.f32.mrf.mxu0  ;;  %v792_v21 = vpop.f32.mrf.mxu1  ;;  %v825_v39 = vmax.f32 %v817_v26, 0.0  ;;  %v827_v40 = vmax.f32 %v819_v27, 0.0  ;;  %v1182_v59 = vld [vmem:[%s6400_s16 + $0xac8] sm:$0xff] }
 0x192   : > { %v750_v24 = vadd.f32 %v749_v20, %v516_v61  ;;  %v793_v25 = vadd.f32 %v792_v21, %v559_v62  ;;  %v821_v28 = vadd.f32 %v800_v13, %v748_v18  ;;  %v823_v29 = vadd.f32 %v808_v15, %v791_v19  ;;  %v894_v8 = vld [vmem:[%s6400_s16 + $0x1c8] sm:$0xff] }
 0x193   : > { %v826_v34 = vmax.f32 %v818_v22, 0.0  ;;  %v828_v35 = vmax.f32 %v820_v23, 0.0  ;;  %v5191_v61 = vcombine.low %v934_v38, %v942_v41  ;;  %v5447_v62 = vcombine.low %v1190_v42, %v1198_v43  ;;  %v1150_v10 = vld [vmem:[%s6400_s16 + $0x9c8] sm:$0xff] }
 0x194   : > { %v822_v30 = vadd.f32 %v804_v9, %v750_v24  ;;  %v824_v31 = vadd.f32 %v812_v11, %v793_v25  ;;  %v829_v32 = vmax.f32 %v821_v28, 0.0  ;;  %v831_v33 = vmax.f32 %v823_v29, 0.0  ;;  %v1142_v9 = vld [vmem:[%s6400_s16 + $0x988] sm:$0xff] }
 0x195   : > { %v5432_v3 = vcombine.high %v1174_v58, %v1182_v59  ;;  %v5431_v49 = vcombine.low %v1174_v58, %v1182_v59  ;;  %v5159_v11 = vcombine.low %v902_v5, %v910_v45  ;;  %v5144_v13 = vcombine.high %v886_v7, %v894_v8  ;;  %v870_v15 = vld [vmem:[%s6400_s16 + $0x108] sm:$0xff] }
 0x196   : > { %v830_v36 = vmax.f32 %v822_v30, 0.0  ;;  %v832_v37 = vmax.f32 %v824_v31, 0.0  ;;  %v6520_v52 = vpack.c.bf16 %v829_v32, %v825_v39  ;;  %v6522_v53 = vpack.c.bf16 %v831_v33, %v827_v40  ;;  %v878_v16 = vld [vmem:[%s6400_s16 + $0x148] sm:$0xff] }
 0x197   : > { %v5400_v14 = vcombine.high %v1142_v9, %v1150_v10  ;;  %v1126_v17 = vld [vmem:[%s6400_s16 + $0x908] sm:$0xff]  ;;  %v5143_v19 = vcombine.low %v886_v7, %v894_v8  ;;  %v5399_v20 = vcombine.low %v1142_v9, %v1150_v10  ;;  %v5128_v21 = vcombine.high %v870_v15, %v878_v16 }
 0x198   : > { %v6516_v44 = vpack.c.bf16 %v830_v36, %v826_v34  ;;  %v6518_v48 = vpack.c.bf16 %v832_v37, %v828_v35  ;;  %v1134_v18 = vld [vmem:[%s6400_s16 + $0x948] sm:$0xff]  ;;  %v5127_v27 = vcombine.low %v870_v15, %v878_v16 }
 0x199   : > { %v5384_v22 = vcombine.high %v1126_v17, %v1134_v18  ;;  %v854_v23 = vld [vmem:[%s6400_s16 + $0x88] sm:$0xff]  ;;  %v5383_v28 = vcombine.low %v1126_v17, %v1134_v18 }
 0x19a   : > { %4025 = vmatprep.mubr.bf16.mxu0 %v6516_v44  ;;  %4068 = vmatprep.mubr.bf16.mxu1 %v6518_v48  ;;  %v862_v24 = vld [vmem:[%s6400_s16 + $0xc8] sm:$0xff] }
 0x19b   : > { %4026 = vmatmul.mubr.bf16.vlgmr.msra.gmra.mxu0 %v6520_v52  ;;  %4069 = vmatmul.mubr.bf16.vlgmr.msra.gmra.mxu1 %v6522_v53  ;;  %v1110_v25 = vld [vmem:[%s6400_s16 + $0x888] sm:$0xff]  ;;  %v5112_v29 = vcombine.high %v854_v23, %v862_v24  ;;  %v5111_v35 = vcombine.low %v854_v23, %v862_v24 }
 0x19c   : > { %4080 = vmatpush1.bf16.msra.mxu0 %v5207_v50  ;;  %4123 = vmatpush1.bf16.msra.mxu1 %v5463_v51  ;;  %v1166_v50 = vld [vmem:[%s6400_s16 + $0xa48] sm:$0xff]  ;;  %v5160_v51 = vcombine.high %v902_v5, %v910_v45 }
 0x19d   : > { %4111 = vmatprep.mubr.bf16.mxu0 %v6516_v44  ;;  %4154 = vmatprep.mubr.bf16.mxu1 %v6518_v48  ;;  %v5416_v6 = vcombine.high %v1158_v46, %v1166_v50  ;;  %v5415_v12 = vcombine.low %v1158_v46, %v1166_v50  ;;  %v1118_v26 = vld [vmem:[%s6400_s16 + $0x8c8] sm:$0xff] }
 0x19e   : > { %4081 = vmatprep.subr.bf16.mxu0 %v5192_v55  ;;  %4124 = vmatprep.subr.bf16.mxu1 %v5448_v56  ;;  %v5368_v30 = vcombine.high %v1110_v25, %v1118_v26  ;;  %v838_v31 = vld [vmem:[%s6400_s16 + $0x8] sm:$0xff]  ;;  %v5367_v36 = vcombine.low %v1110_v25, %v1118_v26 }
 0x19f   : > { %v846_v32 = vld [vmem:[%s6400_s16 + $0x48] sm:$0xff] }
 0x1a0   : > { %4082 = vmatpush1.bf16.msra.mxu0 %v5191_v61  ;;  %4125 = vmatpush1.bf16.msra.mxu1 %v5447_v62  ;;  %v1094_v33 = vld [vmem:[%s6400_s16 + $0x808] sm:$0xff]  ;;  %v5096_v37 = vcombine.high %v838_v31, %v846_v32  ;;  %v5095_v43 = vcombine.low %v838_v31, %v846_v32 }
 0x1a1   : > { %4083 = vmatprep.subr.bf16.mxu0 %v5176_v1  ;;  %4126 = vmatprep.subr.bf16.mxu1 %v5432_v3  ;;  %v1102_v34 = vld [vmem:[%s6400_s16 + $0x848] sm:$0xff] }
 0x1a2   : > { %v5352_v38 = vcombine.high %v1094_v33, %v1102_v34  ;;  %v1078_v39 = vld [vmem:[%s6400_s16 + $0x788] sm:$0xff]  ;;  %v5351_v54 = vcombine.low %v1094_v33, %v1102_v34 }
 0x1a3   : > { %v1086_v40 = vld [vmem:[%s6400_s16 + $0x7c8] sm:$0xff] }
 0x1a4   : > { %4084 = vmatpush1.bf16.msra.mxu0 %v5175_v47  ;;  %4127 = vmatpush1.bf16.msra.mxu1 %v5431_v49  ;;  %v1334_v41 = vld [vmem:[%s6400_s16 + $0xf88] sm:$0xff]  ;;  %v5336_v55 = vcombine.high %v1078_v39, %v1086_v40  ;;  %v5335_v62 = vcombine.low %v1078_v39, %v1086_v40 }
 0x1a5   : > { %4085 = vmatprep.subr.bf16.mxu0 %v5160_v51  ;;  %4128 = vmatprep.subr.bf16.mxu1 %v5416_v6  ;;  %v1342_v42 = vld [vmem:[%s6400_s16 + $0xfc8] sm:$0xff] }
 0x1a6   : > { %v5592_v56 = vcombine.high %v1334_v41, %v1342_v42  ;;  %v1070_v58 = vld [vmem:[%s6400_s16 + $0x748] sm:$0xff]  ;;  %v5591_v1 = vcombine.low %v1334_v41, %v1342_v42 }
 0x1a7   : > { %v1318_v59 = vld [vmem:[%s6400_s16 + $0xf08] sm:$0xff]  ;;  %v5320_v3 = vcombine.high %v1062_v57, %v1070_v58  ;;  %v5319_v49 = vcombine.low %v1062_v57, %v1070_v58  ;;  %v951_v58 = vld [vmem:[%s6400_s16 + $0x390] sm:$0xff] }
 0x1a8   : > { %4086 = vmatpush1.bf16.msra.mxu0 %v5159_v11  ;;  %4129 = vmatpush1.bf16.msra.mxu1 %v5415_v12  ;;  %v1326_v61 = vld [vmem:[%s6400_s16 + $0xf48] sm:$0xff] }
 0x1a9   : > { %4087 = vmatprep.subr.bf16.mxu0 %v5144_v13  ;;  %4130 = vmatprep.subr.bf16.mxu1 %v5400_v14  ;;  %v5576_v5 = vcombine.high %v1318_v59, %v1326_v61  ;;  %v1046_v45 = vld [vmem:[%s6400_s16 + $0x688] sm:$0xff]  ;;  %v5575_v51 = vcombine.low %v1318_v59, %v1326_v61  ;;  %v959_v59 = vld [vmem:[%s6400_s16 + $0x3d0] sm:$0xff] }
 0x1aa   : > { %v1054_v46 = vld [vmem:[%s6400_s16 + $0x6c8] sm:$0xff]  ;;  %v1207_v61 = vld [vmem:[%s6400_s16 + $0xb90] sm:$0xff] }
 0x1ab   : > { %v1302_v50 = vld [vmem:[%s6400_s16 + $0xe88] sm:$0xff]  ;;  %v5304_v6 = vcombine.high %v1046_v45, %v1054_v46  ;;  %v5303_v12 = vcombine.low %v1046_v45, %v1054_v46  ;;  %v935_v46 = vld [vmem:[%s6400_s16 + $0x310] sm:$0xff] }
 0x1ac   : > { %4088 = vmatpush1.bf16.msra.mxu0 %v5143_v19  ;;  %4131 = vmatpush1.bf16.msra.mxu1 %v5399_v20  ;;  %v1310_v47 = vld [vmem:[%s6400_s16 + $0xec8] sm:$0xff] }
 0x1ad   : > { %4089 = vmatprep.subr.bf16.mxu0 %v5128_v21  ;;  %4132 = vmatprep.subr.bf16.mxu1 %v5384_v22  ;;  %v5560_v7 = vcombine.high %v1302_v50, %v1310_v47  ;;  %v1030_v8 = vld [vmem:[%s6400_s16 + $0x608] sm:$0xff]  ;;  %v5559_v13 = vcombine.low %v1302_v50, %v1310_v47  ;;  %v943_v50 = vld [vmem:[%s6400_s16 + $0x350] sm:$0xff] }
 0x1ae   : > { %v1038_v9 = vld [vmem:[%s6400_s16 + $0x648] sm:$0xff]  ;;  %v1191_v47 = vld [vmem:[%s6400_s16 + $0xb10] sm:$0xff] }
 0x1af   : > { %v1286_v10 = vld [vmem:[%s6400_s16 + $0xe08] sm:$0xff]  ;;  %v5288_v14 = vcombine.high %v1030_v8, %v1038_v9  ;;  %v5287_v20 = vcombine.low %v1030_v8, %v1038_v9  ;;  %v919_v9 = vld [vmem:[%s6400_s16 + $0x290] sm:$0xff] }
 0x1b0   : > { %4090 = vmatpush1.bf16.msra.mxu0 %v5127_v27  ;;  %4133 = vmatpush1.bf16.msra.mxu1 %v5383_v28  ;;  %v1294_v11 = vld [vmem:[%s6400_s16 + $0xe48] sm:$0xff] }
 0x1b1   : > { %4091 = vmatprep.subr.bf16.mxu0 %v5112_v29  ;;  %4134 = vmatprep.subr.bf16.mxu1 %v5368_v30  ;;  %v5544_v15 = vcombine.high %v1286_v10, %v1294_v11  ;;  %v1014_v16 = vld [vmem:[%s6400_s16 + $0x588] sm:$0xff]  ;;  %v5543_v21 = vcombine.low %v1286_v10, %v1294_v11  ;;  %v927_v10 = vld [vmem:[%s6400_s16 + $0x2d0] sm:$0xff] }
 0x1b2   : > { %v1022_v17 = vld [vmem:[%s6400_s16 + $0x5c8] sm:$0xff]  ;;  %v1175_v11 = vld [vmem:[%s6400_s16 + $0xa90] sm:$0xff] }
 0x1b3   : > { %v1270_v18 = vld [vmem:[%s6400_s16 + $0xd88] sm:$0xff]  ;;  %v5272_v22 = vcombine.high %v1014_v16, %v1022_v17  ;;  %v5271_v28 = vcombine.low %v1014_v16, %v1022_v17  ;;  %v903_v17 = vld [vmem:[%s6400_s16 + $0x210] sm:$0xff] }
 0x1b4   : > { %4092 = vmatpush1.bf16.msra.mxu0 %v5111_v35  ;;  %4135 = vmatpush1.bf16.msra.mxu1 %v5367_v36  ;;  %v1278_v19 = vld [vmem:[%s6400_s16 + $0xdc8] sm:$0xff] }
 0x1b5   : > { %4093 = vmatprep.subr.bf16.mxu0 %v5096_v37  ;;  %4136 = vmatprep.subr.bf16.mxu1 %v5352_v38  ;;  %v5528_v23 = vcombine.high %v1270_v18, %v1278_v19  ;;  %v998_v24 = vld [vmem:[%s6400_s16 + $0x508] sm:$0xff]  ;;  %v5527_v29 = vcombine.low %v1270_v18, %v1278_v19  ;;  %v911_v18 = vld [vmem:[%s6400_s16 + $0x250] sm:$0xff] }
 0x1b6   : > { %v1006_v25 = vld [vmem:[%s6400_s16 + $0x548] sm:$0xff]  ;;  %v1159_v19 = vld [vmem:[%s6400_s16 + $0xa10] sm:$0xff] }
 0x1b7   : > { %v1254_v26 = vld [vmem:[%s6400_s16 + $0xd08] sm:$0xff]  ;;  %v5256_v30 = vcombine.high %v998_v24, %v1006_v25  ;;  %v5255_v36 = vcombine.low %v998_v24, %v1006_v25  ;;  %v887_v25 = vld [vmem:[%s6400_s16 + $0x190] sm:$0xff] }
 0x1b8   : > { %4094 = vmatpush1.bf16.msra.mxu0 %v5095_v43  ;;  %4137 = vmatpush1.bf16.msra.mxu1 %v5351_v54  ;;  %v1262_v27 = vld [vmem:[%s6400_s16 + $0xd48] sm:$0xff] }
 0x1b9   : > { %4095 = vmatprep.subr.bf16.mxu0 %v5336_v55  ;;  %4138 = vmatprep.subr.bf16.mxu1 %v5592_v56  ;;  %v5512_v31 = vcombine.high %v1254_v26, %v1262_v27  ;;  %v982_v32 = vld [vmem:[%s6400_s16 + $0x488] sm:$0xff]  ;;  %v5511_v37 = vcombine.low %v1254_v26, %v1262_v27  ;;  %v895_v26 = vld [vmem:[%s6400_s16 + $0x1d0] sm:$0xff] }
 0x1ba   : > { %v990_v33 = vld [vmem:[%s6400_s16 + $0x4c8] sm:$0xff]  ;;  %v1143_v27 = vld [vmem:[%s6400_s16 + $0x990] sm:$0xff] }
 0x1bb   : > { %v1238_v34 = vld [vmem:[%s6400_s16 + $0xc88] sm:$0xff]  ;;  %v5240_v38 = vcombine.high %v982_v32, %v990_v33  ;;  %v5239_v54 = vcombine.low %v982_v32, %v990_v33  ;;  %v871_v33 = vld [vmem:[%s6400_s16 + $0x110] sm:$0xff] }
 0x1bc   : > { %4096 = vmatpush2.bf16.msra.mxu0 %v5335_v62  ;;  %4139 = vmatpush2.bf16.msra.mxu1 %v5591_v1  ;;  %v1246_v35 = vld [vmem:[%s6400_s16 + $0xcc8] sm:$0xff]  ;;  %v1215_v62 = vld [vmem:[%s6400_s16 + $0xbd0] sm:$0xff] }
 0x1bd   : > { %4097 = vmatprep.subr.bf16.mxu0 %v5320_v3  ;;  %4140 = vmatprep.subr.bf16.mxu1 %v5576_v5  ;;  %v5496_v39 = vcombine.high %v1238_v34, %v1246_v35  ;;  %v966_v40 = vld [vmem:[%s6400_s16 + $0x408] sm:$0xff]  ;;  %v5495_v55 = vcombine.low %v1238_v34, %v1246_v35  ;;  %v5210_v5 = vcombine.high %v951_v58, %v959_v59  ;;  %v879_v34 = vld [vmem:[%s6400_s16 + $0x150] sm:$0xff] }
 0x1be   : > { %v974_v41 = vld [vmem:[%s6400_s16 + $0x448] sm:$0xff]  ;;  %v5466_v45 = vcombine.high %v1207_v61, %v1215_v62  ;;  %v1127_v35 = vld [vmem:[%s6400_s16 + $0x910] sm:$0xff] }
 0x1bf   : > { %v1222_v42 = vld [vmem:[%s6400_s16 + $0xc08] sm:$0xff]  ;;  %v5224_v56 = vcombine.high %v966_v40, %v974_v41  ;;  %v5223_v1 = vcombine.low %v966_v40, %v974_v41  ;;  %v855_v41 = vld [vmem:[%s6400_s16 + $0x90] sm:$0xff] }
 0x1c0   : > { %4098 = vmatpush2.bf16.msra.mxu0 %v5319_v49  ;;  %4141 = vmatpush2.bf16.msra.mxu1 %v5575_v51  ;;  %v1230_v43 = vld [vmem:[%s6400_s16 + $0xc48] sm:$0xff]  ;;  %v1199_v49 = vld [vmem:[%s6400_s16 + $0xb50] sm:$0xff]  ;;  %v5209_v51 = vcombine.low %v951_v58, %v959_v59 }
 0x1c1   : > { %4099 = vmatprep.subr.bf16.mxu0 %v5304_v6  ;;  %4142 = vmatprep.subr.bf16.mxu1 %v5560_v7  ;;  %v5480_v57 = vcombine.high %v1222_v42, %v1230_v43  ;;  %v5479_v3 = vcombine.low %v1222_v42, %v1230_v43  ;;  %v5465_v6 = vcombine.low %v1207_v61, %v1215_v62  ;;  %v863_v42 = vld [vmem:[%s6400_s16 + $0xd0] sm:$0xff] }
 0x1c2   : > { %v5194_v7 = vcombine.high %v935_v46, %v943_v50  ;;  %v5450_v8 = vcombine.high %v1191_v47, %v1199_v49  ;;  %v1111_v43 = vld [vmem:[%s6400_s16 + $0x890] sm:$0xff] }
 0x1c3   : > { %v839_v59 = vld [vmem:[%s6400_s16 + $0x10] sm:$0xff] }
 0x1c4   : > { %4100 = vmatpush2.bf16.msra.mxu0 %v5303_v12  ;;  %4143 = vmatpush2.bf16.msra.mxu1 %v5559_v13  ;;  %v1183_v12 = vld [vmem:[%s6400_s16 + $0xad0] sm:$0xff]  ;;  %v5193_v13 = vcombine.low %v935_v46, %v943_v50 }
 0x1c5   : > { %4101 = vmatprep.subr.bf16.mxu0 %v5288_v14  ;;  %4144 = vmatprep.subr.bf16.mxu1 %v5544_v15  ;;  %v5449_v14 = vcombine.low %v1191_v47, %v1199_v49  ;;  %v5178_v15 = vcombine.high %v919_v9, %v927_v10  ;;  %v5434_v16 = vcombine.high %v1175_v11, %v1183_v12  ;;  %v847_v61 = vld [vmem:[%s6400_s16 + $0x50] sm:$0xff] }
 0x1c6   : > { %v1095_v62 = vld [vmem:[%s6400_s16 + $0x810] sm:$0xff] }
 0x1c7   : > { %v1079_v50 = vld [vmem:[%s6400_s16 + $0x790] sm:$0xff] }
 0x1c8   : > { %4102 = vmatpush2.bf16.msra.mxu0 %v5287_v20  ;;  %4145 = vmatpush2.bf16.msra.mxu1 %v5543_v21  ;;  %v1167_v20 = vld [vmem:[%s6400_s16 + $0xa50] sm:$0xff]  ;;  %v5177_v21 = vcombine.low %v919_v9, %v927_v10 }
 0x1c9   : > { %4103 = vmatprep.subr.bf16.mxu0 %v5272_v22  ;;  %4146 = vmatprep.subr.bf16.mxu1 %v5528_v23  ;;  %v5433_v22 = vcombine.low %v1175_v11, %v1183_v12  ;;  %v5162_v23 = vcombine.high %v903_v17, %v911_v18  ;;  %v5418_v24 = vcombine.high %v1159_v19, %v1167_v20  ;;  %v1087_v47 = vld [vmem:[%s6400_s16 + $0x7d0] sm:$0xff] }
 0x1ca   : > { %v1335_v49 = vld [vmem:[%s6400_s16 + $0xf90] sm:$0xff] }
 0x1cb   : > { %v1063_v10 = vld [vmem:[%s6400_s16 + $0x710] sm:$0xff] }
 0x1cc   : > { %4104 = vmatpush2.bf16.msra.mxu0 %v5271_v28  ;;  %4147 = vmatpush2.bf16.msra.mxu1 %v5527_v29  ;;  %v1151_v28 = vld [vmem:[%s6400_s16 + $0x9d0] sm:$0xff]  ;;  %v5161_v29 = vcombine.low %v903_v17, %v911_v18 }
 0x1cd   : > { %4105 = vmatprep.subr.bf16.mxu0 %v5256_v30  ;;  %4148 = vmatprep.subr.bf16.mxu1 %v5512_v31  ;;  %v5417_v30 = vcombine.low %v1159_v19, %v1167_v20  ;;  %v5146_v31 = vcombine.high %v887_v25, %v895_v26  ;;  %v5402_v32 = vcombine.high %v1143_v27, %v1151_v28  ;;  %v1071_v11 = vld [vmem:[%s6400_s16 + $0x750] sm:$0xff] }
 0x1ce   : > { %v1319_v12 = vld [vmem:[%s6400_s16 + $0xf10] sm:$0xff] }
 0x1cf   : > { %v1047_v18 = vld [vmem:[%s6400_s16 + $0x690] sm:$0xff] }
 0x1d0   : > { %4106 = vmatpush2.bf16.msra.mxu0 %v5255_v36  ;;  %4149 = vmatpush2.bf16.msra.mxu1 %v5511_v37  ;;  %v1135_v36 = vld [vmem:[%s6400_s16 + $0x950] sm:$0xff]  ;;  %v5145_v37 = vcombine.low %v887_v25, %v895_v26 }
 0x1d1   : > { %4107 = vmatprep.subr.bf16.mxu0 %v5240_v38  ;;  %4150 = vmatprep.subr.bf16.mxu1 %v5496_v39  ;;  %v5401_v38 = vcombine.low %v1143_v27, %v1151_v28  ;;  %v5130_v39 = vcombine.high %v871_v33, %v879_v34  ;;  %v5386_v40 = vcombine.high %v1127_v35, %v1135_v36  ;;  %v1055_v19 = vld [vmem:[%s6400_s16 + $0x6d0] sm:$0xff] }
 0x1d2   : > { %v1303_v20 = vld [vmem:[%s6400_s16 + $0xe90] sm:$0xff] }
 0x1d3   : > { %v1031_v26 = vld [vmem:[%s6400_s16 + $0x610] sm:$0xff] }
 0x1d4   : > { %4108 = vmatpush2.bf16.msra.mxu0 %v5239_v54  ;;  %4151 = vmatpush2.bf16.msra.mxu1 %v5495_v55  ;;  %v1119_v54 = vld [vmem:[%s6400_s16 + $0x8d0] sm:$0xff]  ;;  %v5129_v55 = vcombine.low %v871_v33, %v879_v34 }
 0x1d5   : > { %4109 = vmatprep.subr.bf16.mxu0 %v5224_v56  ;;  %4152 = vmatprep.subr.bf16.mxu1 %v5480_v57  ;;  %v5385_v56 = vcombine.low %v1127_v35, %v1135_v36  ;;  %v5114_v57 = vcombine.high %v855_v41, %v863_v42  ;;  %v5370_v58 = vcombine.high %v1111_v43, %v1119_v54  ;;  %v1039_v27 = vld [vmem:[%s6400_s16 + $0x650] sm:$0xff] }
 0x1d6   : > { %v1287_v28 = vld [vmem:[%s6400_s16 + $0xe10] sm:$0xff] }
 0x1d7   : > { %v1015_v34 = vld [vmem:[%s6400_s16 + $0x590] sm:$0xff] }
 0x1d8   : > { %4110 = vmatpush2.bf16.msra.mxu0 %v5223_v1  ;;  %4153 = vmatpush2.bf16.msra.mxu1 %v5479_v3  ;;  %v1103_v1 = vld [vmem:[%s6400_s16 + $0x850] sm:$0xff]  ;;  %v5113_v3 = vcombine.low %v855_v41, %v863_v42 }
 0x1d9   : > { %4165 = vmatprep.subr.bf16.mxu0 %v5210_v5  ;;  %4208 = vmatprep.subr.bf16.mxu1 %v5466_v45  ;;  %v5369_v5 = vcombine.low %v1111_v43, %v1119_v54  ;;  %v5098_v45 = vcombine.high %v839_v59, %v847_v61  ;;  %v5354_v46 = vcombine.high %v1095_v62, %v1103_v1  ;;  %v1023_v35 = vld [vmem:[%s6400_s16 + $0x5d0] sm:$0xff] }
 0x1da   : > { %v1271_v36 = vld [vmem:[%s6400_s16 + $0xd90] sm:$0xff] }
 0x1db   : > { %4112 = vmatmul.mubr.bf16.vlgmr.msra.gmra.mxu0 %v6520_v52  ;;  %4155 = vmatmul.mubr.bf16.vlgmr.msra.gmra.mxu1 %v6522_v53  ;;  %v999_v42 = vld [vmem:[%s6400_s16 + $0x510] sm:$0xff] }
 0x1dc   : > { %4166 = vmatpush1.bf16.msra.mxu0 %v5209_v51  ;;  %4197 = vmatprep.mubr.bf16.mxu0 %v6516_v44  ;;  %v1343_v51 = vld [vmem:[%s6400_s16 + $0xfd0] sm:$0xff] }
 0x1dd   : > { %4209 = vmatpush1.bf16.msra.mxu1 %v5465_v6  ;;  %4240 = vmatprep.mubr.bf16.mxu1 %v6518_v48  ;;  %v5097_v6 = vcombine.low %v839_v59, %v847_v61  ;;  %v5594_v9 = vcombine.high %v1335_v49, %v1343_v51  ;;  %v1007_v43 = vld [vmem:[%s6400_s16 + $0x550] sm:$0xff] }
 0x1de   : > { %4167 = vmatprep.subr.bf16.mxu0 %v5194_v7  ;;  %4210 = vmatprep.subr.bf16.mxu1 %v5450_v8  ;;  %v5353_v7 = vcombine.low %v1095_v62, %v1103_v1  ;;  %v5338_v8 = vcombine.high %v1079_v50, %v1087_v47  ;;  %v1255_v54 = vld [vmem:[%s6400_s16 + $0xd10] sm:$0xff] }
 0x1df   : > { %v983_v61 = vld [vmem:[%s6400_s16 + $0x490] sm:$0xff] }
 0x1e0   : > { %4168 = vmatpush1.bf16.msra.mxu0 %v5193_v13  ;;  %v1327_v13 = vld [vmem:[%s6400_s16 + $0xf50] sm:$0xff] }
 0x1e1   : > { %4211 = vmatpush1.bf16.msra.mxu1 %v5449_v14  ;;  %4169 = vmatprep.subr.bf16.mxu0 %v5178_v15  ;;  %v5337_v14 = vcombine.low %v1079_v50, %v1087_v47  ;;  %v5593_v15 = vcombine.low %v1335_v49, %v1343_v51  ;;  %v5578_v17 = vcombine.high %v1319_v12, %v1327_v13  ;;  %v991_v62 = vld [vmem:[%s6400_s16 + $0x4d0] sm:$0xff] }
 0x1e2   : > { %4212 = vmatprep.subr.bf16.mxu1 %v5434_v16  ;;  %v5322_v16 = vcombine.high %v1063_v10, %v1071_v11  ;;  %v1239_v1 = vld [vmem:[%s6400_s16 + $0xc90] sm:$0xff] }
 0x1e3   : > { %v967_v47 = vld [vmem:[%s6400_s16 + $0x410] sm:$0xff] }
 0x1e4   : > { %4170 = vmatpush1.bf16.msra.mxu0 %v5177_v21  ;;  %v1311_v21 = vld [vmem:[%s6400_s16 + $0xed0] sm:$0xff] }
 0x1e5   : > { %4213 = vmatpush1.bf16.msra.mxu1 %v5433_v22  ;;  %4171 = vmatprep.subr.bf16.mxu0 %v5162_v23  ;;  %v5321_v22 = vcombine.low %v1063_v10, %v1071_v11  ;;  %v5577_v23 = vcombine.low %v1319_v12, %v1327_v13  ;;  %v5562_v25 = vcombine.high %v1303_v20, %v1311_v21  ;;  %v975_v49 = vld [vmem:[%s6400_s16 + $0x450] sm:$0xff]  ;;  %v952_v11 = vld [vmem:[%s6400_s16 + $0x398] sm:$0xff] }
 0x1e6   : > { %4214 = vmatprep.subr.bf16.mxu1 %v5418_v24  ;;  %v5306_v24 = vcombine.high %v1047_v18, %v1055_v19  ;;  %v1223_v51 = vld [vmem:[%s6400_s16 + $0xc10] sm:$0xff]  ;;  %v960_v12 = vld [vmem:[%s6400_s16 + $0x3d8] sm:$0xff] }
 0x1e7   : > { %v1208_v13 = vld [vmem:[%s6400_s16 + $0xb98] sm:$0xff] }
 0x1e8   : > { %4172 = vmatpush1.bf16.msra.mxu0 %v5161_v29  ;;  %v1295_v29 = vld [vmem:[%s6400_s16 + $0xe50] sm:$0xff] }
 0x1e9   : > { %4215 = vmatpush1.bf16.msra.mxu1 %v5417_v30  ;;  %4173 = vmatprep.subr.bf16.mxu0 %v5146_v31  ;;  %v5305_v30 = vcombine.low %v1047_v18, %v1055_v19  ;;  %v5561_v31 = vcombine.low %v1303_v20, %v1311_v21  ;;  %v5546_v33 = vcombine.high %v1287_v28, %v1295_v29  ;;  %v936_v19 = vld [vmem:[%s6400_s16 + $0x318] sm:$0xff] }
 0x1ea   : > { %4216 = vmatprep.subr.bf16.mxu1 %v5402_v32  ;;  %v5290_v32 = vcombine.high %v1031_v26, %v1039_v27  ;;  %v944_v20 = vld [vmem:[%s6400_s16 + $0x358] sm:$0xff]  ;;  %v5211_v21 = vcombine.low %v952_v11, %v960_v12 }
 0x1ec   : > { %4174 = vmatpush1.bf16.msra.mxu0 %v5145_v37  ;;  %v1279_v37 = vld [vmem:[%s6400_s16 + $0xdd0] sm:$0xff] }
 0x1ed   : > { %4217 = vmatpush1.bf16.msra.mxu1 %v5401_v38  ;;  %4175 = vmatprep.subr.bf16.mxu0 %v5130_v39  ;;  %v5289_v38 = vcombine.low %v1031_v26, %v1039_v27  ;;  %v5545_v39 = vcombine.low %v1287_v28, %v1295_v29  ;;  %v5530_v41 = vcombine.high %v1271_v36, %v1279_v37  ;;  %v920_v26 = vld [vmem:[%s6400_s16 + $0x298] sm:$0xff] }
 0x1ee   : > { %4218 = vmatprep.subr.bf16.mxu1 %v5386_v40  ;;  %v5274_v40 = vcombine.high %v1015_v34, %v1023_v35  ;;  %v928_v27 = vld [vmem:[%s6400_s16 + $0x2d8] sm:$0xff] }
 0x1ef   : > { %v1176_v29 = vld [vmem:[%s6400_s16 + $0xa98] sm:$0xff] }
 0x1f0   : > { %4176 = vmatpush1.bf16.msra.mxu0 %v5129_v55  ;;  %v1263_v55 = vld [vmem:[%s6400_s16 + $0xd50] sm:$0xff] }
 0x1f1   : > { %4219 = vmatpush1.bf16.msra.mxu1 %v5385_v56  ;;  %4177 = vmatprep.subr.bf16.mxu0 %v5114_v57  ;;  %v5273_v56 = vcombine.low %v1015_v34, %v1023_v35  ;;  %v5529_v57 = vcombine.low %v1271_v36, %v1279_v37  ;;  %v5514_v59 = vcombine.high %v1255_v54, %v1263_v55  ;;  %v904_v35 = vld [vmem:[%s6400_s16 + $0x218] sm:$0xff] }
 0x1f2   : > { %4220 = vmatprep.subr.bf16.mxu1 %v5370_v58  ;;  %v5258_v58 = vcombine.high %v999_v42, %v1007_v43  ;;  %v912_v36 = vld [vmem:[%s6400_s16 + $0x258] sm:$0xff] }
 0x1f3   : > { %v1160_v37 = vld [vmem:[%s6400_s16 + $0xa18] sm:$0xff] }
 0x1f4   : > { %4178 = vmatpush1.bf16.msra.mxu0 %v5113_v3  ;;  %v1247_v3 = vld [vmem:[%s6400_s16 + $0xcd0] sm:$0xff] }
 0x1f5   : > { %4221 = vmatpush1.bf16.msra.mxu1 %v5369_v5  ;;  %4179 = vmatprep.subr.bf16.mxu0 %v5098_v45  ;;  %v5257_v5 = vcombine.low %v999_v42, %v1007_v43  ;;  %v5513_v45 = vcombine.low %v1255_v54, %v1263_v55  ;;  %v5498_v50 = vcombine.high %v1239_v1, %v1247_v3  ;;  %v888_v43 = vld [vmem:[%s6400_s16 + $0x198] sm:$0xff] }
 0x1f6   : > { %4222 = vmatprep.subr.bf16.mxu1 %v5354_v46  ;;  %v5242_v46 = vcombine.high %v983_v61, %v991_v62  ;;  %v896_v54 = vld [vmem:[%s6400_s16 + $0x1d8] sm:$0xff] }
 0x1f7   : > { %v1144_v55 = vld [vmem:[%s6400_s16 + $0x998] sm:$0xff] }
 0x1f8   : > { %4180 = vmatpush1.bf16.msra.mxu0 %v5097_v6  ;;  %v1231_v6 = vld [vmem:[%s6400_s16 + $0xc50] sm:$0xff] }
 0x1f9   : > { %4223 = vmatpush1.bf16.msra.mxu1 %v5353_v7  ;;  %4181 = vmatprep.subr.bf16.mxu0 %v5338_v8  ;;  %v5241_v7 = vcombine.low %v983_v61, %v991_v62  ;;  %v5497_v8 = vcombine.low %v1239_v1, %v1247_v3  ;;  %v5482_v10 = vcombine.high %v1223_v51, %v1231_v6  ;;  %v872_v62 = vld [vmem:[%s6400_s16 + $0x118] sm:$0xff] }
 0x1fa   : > { %4224 = vmatprep.subr.bf16.mxu1 %v5594_v9  ;;  %v5226_v9 = vcombine.high %v967_v47, %v975_v49  ;;  %v880_v1 = vld [vmem:[%s6400_s16 + $0x158] sm:$0xff] }
 0x1fb   : > { %v1128_v3 = vld [vmem:[%s6400_s16 + $0x918] sm:$0xff] }
 0x1fc   : > { %4182 = vmatpush2.bf16.msra.mxu0 %v5337_v14  ;;  %v1216_v14 = vld [vmem:[%s6400_s16 + $0xbd8] sm:$0xff] }
 0x1fd   : > { %4225 = vmatpush2.bf16.msra.mxu1 %v5593_v15  ;;  %4183 = vmatprep.subr.bf16.mxu0 %v5322_v16  ;;  %v5225_v15 = vcombine.low %v967_v47, %v975_v49  ;;  %v5481_v16 = vcombine.low %v1223_v51, %v1231_v6  ;;  %v5468_v18 = vcombine.high %v1208_v13, %v1216_v14  ;;  %v856_v49 = vld [vmem:[%s6400_s16 + $0x98] sm:$0xff] }
 0x1fe   : > { %4226 = vmatprep.subr.bf16.mxu1 %v5578_v17  ;;  %v5212_v17 = vcombine.high %v952_v11, %v960_v12  ;;  %v864_v51 = vld [vmem:[%s6400_s16 + $0xd8] sm:$0xff] }
 0x1ff   : > { %v1112_v6 = vld [vmem:[%s6400_s16 + $0x898] sm:$0xff] }
 0x200   : > { %4184 = vmatpush2.bf16.msra.mxu0 %v5321_v22  ;;  %v1192_v22 = vld [vmem:[%s6400_s16 + $0xb18] sm:$0xff] }
 0x201   : > { %4227 = vmatpush2.bf16.msra.mxu1 %v5577_v23  ;;  %4185 = vmatprep.subr.bf16.mxu0 %v5306_v24  ;;  %v1200_v23 = vld [vmem:[%s6400_s16 + $0xb58] sm:$0xff]  ;;  %v5467_v24 = vcombine.low %v1208_v13, %v1216_v14 }
 0x202   : > { %4228 = vmatprep.subr.bf16.mxu1 %v5562_v25  ;;  %v5196_v25 = vcombine.high %v936_v19, %v944_v20  ;;  %v5452_v28 = vcombine.high %v1192_v22, %v1200_v23  ;;  %v840_v12 = vld [vmem:[%s6400_s16 + $0x18] sm:$0xff] }
 0x203   : > { %v848_v13 = vld [vmem:[%s6400_s16 + $0x58] sm:$0xff] }
 0x204   : > { %4186 = vmatpush2.bf16.msra.mxu0 %v5305_v30  ;;  %v1184_v30 = vld [vmem:[%s6400_s16 + $0xad8] sm:$0xff] }
 0x205   : > { %4229 = vmatpush2.bf16.msra.mxu1 %v5561_v31  ;;  %4187 = vmatprep.subr.bf16.mxu0 %v5290_v32  ;;  %v5195_v31 = vcombine.low %v936_v19, %v944_v20  ;;  %v5451_v32 = vcombine.low %v1192_v22, %v1200_v23  ;;  %v5436_v34 = vcombine.high %v1176_v29, %v1184_v30  ;;  %v1096_v14 = vld [vmem:[%s6400_s16 + $0x818] sm:$0xff] }
 0x206   : > { %4230 = vmatprep.subr.bf16.mxu1 %v5546_v33  ;;  %v5180_v33 = vcombine.high %v920_v26, %v928_v27  ;;  %v1080_v20 = vld [vmem:[%s6400_s16 + $0x798] sm:$0xff] }
 0x207   : > { %v1336_v22 = vld [vmem:[%s6400_s16 + $0xf98] sm:$0xff] }
 0x208   : > { %4188 = vmatpush2.bf16.msra.mxu0 %v5289_v38  ;;  %v1168_v38 = vld [vmem:[%s6400_s16 + $0xa58] sm:$0xff] }
 0x209   : > { %4231 = vmatpush2.bf16.msra.mxu1 %v5545_v39  ;;  %4189 = vmatprep.subr.bf16.mxu0 %v5274_v40  ;;  %v5179_v39 = vcombine.low %v920_v26, %v928_v27  ;;  %v5435_v40 = vcombine.low %v1176_v29, %v1184_v30  ;;  %v5420_v42 = vcombine.high %v1160_v37, %v1168_v38  ;;  %v1344_v23 = vld [vmem:[%s6400_s16 + $0xfd8] sm:$0xff] }
 0x20a   : > { %4232 = vmatprep.subr.bf16.mxu1 %v5530_v41  ;;  %v5164_v41 = vcombine.high %v904_v35, %v912_v36  ;;  %v5596_v27 = vcombine.high %v1336_v22, %v1344_v23  ;;  %v1072_v29 = vld [vmem:[%s6400_s16 + $0x758] sm:$0xff] }
 0x20b   : > { %v1320_v30 = vld [vmem:[%s6400_s16 + $0xf18] sm:$0xff] }
 0x20c   : > { %4190 = vmatpush2.bf16.msra.mxu0 %v5273_v56  ;;  %v1152_v56 = vld [vmem:[%s6400_s16 + $0x9d8] sm:$0xff] }
 0x20d   : > { %4233 = vmatpush2.bf16.msra.mxu1 %v5529_v57  ;;  %4191 = vmatprep.subr.bf16.mxu0 %v5258_v58  ;;  %v5163_v57 = vcombine.low %v904_v35, %v912_v36  ;;  %v5419_v58 = vcombine.low %v1160_v37, %v1168_v38  ;;  %v5404_v61 = vcombine.high %v1144_v55, %v1152_v56  ;;  %v1048_v36 = vld [vmem:[%s6400_s16 + $0x698] sm:$0xff] }
 0x20e   : > { %4234 = vmatprep.subr.bf16.mxu1 %v5514_v59  ;;  %v5148_v59 = vcombine.high %v888_v43, %v896_v54  ;;  %v1056_v37 = vld [vmem:[%s6400_s16 + $0x6d8] sm:$0xff] }
 0x20f   : > { %v1304_v38 = vld [vmem:[%s6400_s16 + $0xe98] sm:$0xff] }
 0x210   : > { %4192 = vmatpush2.bf16.msra.mxu0 %v5257_v5  ;;  %v1136_v5 = vld [vmem:[%s6400_s16 + $0x958] sm:$0xff] }
 0x211   : > { %4235 = vmatpush2.bf16.msra.mxu1 %v5513_v45  ;;  %4193 = vmatprep.subr.bf16.mxu0 %v5242_v46  ;;  %v5147_v45 = vcombine.low %v888_v43, %v896_v54  ;;  %v5403_v46 = vcombine.low %v1144_v55, %v1152_v56  ;;  %v5388_v47 = vcombine.high %v1128_v3, %v1136_v5  ;;  %v1032_v54 = vld [vmem:[%s6400_s16 + $0x618] sm:$0xff] }
 0x212   : > { %4236 = vmatprep.subr.bf16.mxu1 %v5498_v50  ;;  %v5132_v50 = vcombine.high %v872_v62, %v880_v1  ;;  %v1040_v55 = vld [vmem:[%s6400_s16 + $0x658] sm:$0xff] }
 0x213   : > { %v1288_v56 = vld [vmem:[%s6400_s16 + $0xe18] sm:$0xff] }
 0x214   : > { %4194 = vmatpush2.bf16.msra.mxu0 %v5241_v7  ;;  %v1120_v7 = vld [vmem:[%s6400_s16 + $0x8d8] sm:$0xff] }
 0x215   : > { %4237 = vmatpush2.bf16.msra.mxu1 %v5497_v8  ;;  %4195 = vmatprep.subr.bf16.mxu0 %v5226_v9  ;;  %v5131_v8 = vcombine.low %v872_v62, %v880_v1  ;;  %v5387_v9 = vcombine.low %v1128_v3, %v1136_v5  ;;  %v5372_v11 = vcombine.high %v1112_v6, %v1120_v7  ;;  %v1016_v1 = vld [vmem:[%s6400_s16 + $0x598] sm:$0xff] }
 0x216   : > { %4238 = vmatprep.subr.bf16.mxu1 %v5482_v10  ;;  %v5116_v10 = vcombine.high %v856_v49, %v864_v51  ;;  %v1024_v3 = vld [vmem:[%s6400_s16 + $0x5d8] sm:$0xff] }
 0x217   : > { %v1272_v5 = vld [vmem:[%s6400_s16 + $0xd98] sm:$0xff] }
 0x218   : > { %4196 = vmatpush2.bf16.msra.mxu0 %v5225_v15  ;;  %v1104_v15 = vld [vmem:[%s6400_s16 + $0x858] sm:$0xff] }
 0x219   : > { %4239 = vmatpush2.bf16.msra.mxu1 %v5481_v16  ;;  %4251 = vmatprep.subr.bf16.mxu0 %v5212_v17  ;;  %v5115_v16 = vcombine.low %v856_v49, %v864_v51  ;;  %v5371_v17 = vcombine.low %v1112_v6, %v1120_v7  ;;  %v5356_v19 = vcombine.high %v1096_v14, %v1104_v15  ;;  %v1000_v51 = vld [vmem:[%s6400_s16 + $0x518] sm:$0xff] }
 0x21a   : > { %4294 = vmatprep.subr.bf16.mxu1 %v5468_v18  ;;  %v5100_v18 = vcombine.high %v840_v12, %v848_v13  ;;  %v1008_v6 = vld [vmem:[%s6400_s16 + $0x558] sm:$0xff] }
 0x21b   : > { %4198 = vmatmul.mubr.bf16.vlgmr.msra.gmra.mxu0 %v6520_v52  ;;  %v1256_v7 = vld [vmem:[%s6400_s16 + $0xd18] sm:$0xff] }
 0x21c   : > { %4241 = vmatmul.mubr.bf16.vlgmr.msra.gmra.mxu1 %v6522_v53  ;;  %4252 = vmatpush1.bf16.msra.mxu0 %v5211_v21  ;;  %v1088_v21 = vld [vmem:[%s6400_s16 + $0x7d8] sm:$0xff] }
 0x21d   : > { %4283 = vmatprep.mubr.bf16.mxu0 %v6516_v44  ;;  %4295 = vmatpush1.bf16.msra.mxu1 %v5467_v24  ;;  %v5099_v24 = vcombine.low %v840_v12, %v848_v13  ;;  %v5340_v26 = vcombine.high %v1080_v20, %v1088_v21  ;;  %v984_v13 = vld [vmem:[%s6400_s16 + $0x498] sm:$0xff] }
 0x21e   : > { %4326 = vmatprep.mubr.bf16.mxu1 %v6518_v48  ;;  %4253 = vmatprep.subr.bf16.mxu0 %v5196_v25  ;;  %v5355_v25 = vcombine.low %v1096_v14, %v1104_v15  ;;  %v992_v14 = vld [vmem:[%s6400_s16 + $0x4d8] sm:$0xff] }
 0x21f   : > { %4296 = vmatprep.subr.bf16.mxu1 %v5452_v28  ;;  %v1064_v28 = vld [vmem:[%s6400_s16 + $0x718] sm:$0xff] }
 0x220   : > { %4254 = vmatpush1.bf16.msra.mxu0 %v5195_v31  ;;  %v1328_v31 = vld [vmem:[%s6400_s16 + $0xf58] sm:$0xff] }
 0x221   : > { %4297 = vmatpush1.bf16.msra.mxu1 %v5451_v32  ;;  %4255 = vmatprep.subr.bf16.mxu0 %v5180_v33  ;;  %v5339_v32 = vcombine.low %v1080_v20, %v1088_v21  ;;  %v5595_v33 = vcombine.low %v1336_v22, %v1344_v23  ;;  %v5580_v35 = vcombine.high %v1320_v30, %v1328_v31  ;;  %v1240_v15 = vld [vmem:[%s6400_s16 + $0xc98] sm:$0xff] }
 0x222   : > { %4298 = vmatprep.subr.bf16.mxu1 %v5436_v34  ;;  %v5324_v34 = vcombine.high %v1064_v28, %v1072_v29  ;;  %v968_v21 = vld [vmem:[%s6400_s16 + $0x418] sm:$0xff] }
 0x223   : > { %v976_v22 = vld [vmem:[%s6400_s16 + $0x458] sm:$0xff] }
 0x224   : > { %4256 = vmatpush1.bf16.msra.mxu0 %v5179_v39  ;;  %v1312_v39 = vld [vmem:[%s6400_s16 + $0xed8] sm:$0xff] }
 0x225   : > { %4299 = vmatpush1.bf16.msra.mxu1 %v5435_v40  ;;  %4257 = vmatprep.subr.bf16.mxu0 %v5164_v41  ;;  %v5323_v40 = vcombine.low %v1064_v28, %v1072_v29  ;;  %v5579_v41 = vcombine.low %v1320_v30, %v1328_v31  ;;  %v5564_v43 = vcombine.high %v1304_v38, %v1312_v39  ;;  %v1224_v23 = vld [vmem:[%s6400_s16 + $0xc18] sm:$0xff]  ;;  %v953_v29 = vld [vmem:[%s6400_s16 + $0x3a0] sm:$0xff] }
 0x226   : > { %4300 = vmatprep.subr.bf16.mxu1 %v5420_v42  ;;  %v5308_v42 = vcombine.high %v1048_v36, %v1056_v37  ;;  %v961_v30 = vld [vmem:[%s6400_s16 + $0x3e0] sm:$0xff] }
 0x227   : > { %v1209_v31 = vld [vmem:[%s6400_s16 + $0xba0] sm:$0xff] }
 0x228   : > { %4258 = vmatpush1.bf16.msra.mxu0 %v5163_v57  ;;  %v1296_v57 = vld [vmem:[%s6400_s16 + $0xe58] sm:$0xff] }
 0x229   : > { %4301 = vmatpush1.bf16.msra.mxu1 %v5419_v58  ;;  %4259 = vmatprep.subr.bf16.mxu0 %v5148_v59  ;;  %v5307_v58 = vcombine.low %v1048_v36, %v1056_v37  ;;  %v5563_v59 = vcombine.low %v1304_v38, %v1312_v39  ;;  %v5548_v62 = vcombine.high %v1288_v56, %v1296_v57  ;;  %v6736_v36 = vld [vmem:[%s6733_s15] sm:$0xff] }
 0x22a   : > { %4302 = vmatprep.subr.bf16.mxu1 %v5404_v61  ;;  %v5292_v61 = vcombine.high %v1032_v54, %v1040_v55  ;;  %v937_v38 = vld [vmem:[%s6400_s16 + $0x320] sm:$0xff] }
 0x22b   : > { %v945_v39 = vld [vmem:[%s6400_s16 + $0x360] sm:$0xff] }
 0x22c   : > { %4260 = vmatpush1.bf16.msra.mxu0 %v5147_v45  ;;  %v1280_v45 = vld [vmem:[%s6400_s16 + $0xdd8] sm:$0xff] }
 0x22d   : > { %4303 = vmatpush1.bf16.msra.mxu1 %v5403_v46  ;;  %4261 = vmatprep.subr.bf16.mxu0 %v5132_v50  ;;  %v5291_v46 = vcombine.low %v1032_v54, %v1040_v55  ;;  %v5547_v50 = vcombine.low %v1288_v56, %v1296_v57  ;;  %v5532_v49 = vcombine.high %v1272_v5, %v1280_v45  ;;  %v921_v57 = vld [vmem:[%s6400_s16 + $0x2a0] sm:$0xff] }
 0x22e   : > { %4304 = vmatprep.subr.bf16.mxu1 %v5388_v47  ;;  %v5276_v47 = vcombine.high %v1016_v1, %v1024_v3  ;;  %v1360_v55 = vrot.slane %v6736_v36, %v6497_v63  ;;  %v5198_v56 = vcombine.high %v937_v38, %v945_v39 }
 0x230   : > { %4262 = vmatpush1.bf16.msra.mxu0 %v5131_v8  ;;  %v1264_v8 = vld [vmem:[%s6400_s16 + $0xd58] sm:$0xff] }
 0x231   : > { %4305 = vmatpush1.bf16.msra.mxu1 %v5387_v9  ;;  %4263 = vmatprep.subr.bf16.mxu0 %v5116_v10  ;;  %v5275_v9 = vcombine.low %v1016_v1, %v1024_v3  ;;  %v5531_v10 = vcombine.low %v1272_v5, %v1280_v45  ;;  %v5516_v12 = vcombine.high %v1256_v7, %v1264_v8  ;;  %v1177_v1 = vld [vmem:[%s6400_s16 + $0xaa0] sm:$0xff] }
 0x232   : > { %4306 = vmatprep.subr.bf16.mxu1 %v5372_v11  ;;  %v5260_v11 = vcombine.high %v1000_v51, %v1008_v6  ;;  %v1185_v3 = vld [vmem:[%s6400_s16 + $0xae0] sm:$0xff]  ;;  %v5197_v45 = vcombine.low %v937_v38, %v945_v39 }
 0x233   : > { %v873_v38 = vld [vmem:[%s6400_s16 + $0x120] sm:$0xff] }
 0x234   : > { %4264 = vmatpush1.bf16.msra.mxu0 %v5115_v16  ;;  %v1248_v16 = vld [vmem:[%s6400_s16 + $0xcd8] sm:$0xff]  ;;  %v881_v39 = vld [vmem:[%s6400_s16 + $0x160] sm:$0xff] }
 0x235   : > { %4307 = vmatpush1.bf16.msra.mxu1 %v5371_v17  ;;  %4265 = vmatprep.subr.bf16.mxu0 %v5100_v18  ;;  %v5259_v17 = vcombine.low %v1000_v51, %v1008_v6  ;;  %v5515_v18 = vcombine.low %v1256_v7, %v1264_v8  ;;  %v5500_v20 = vcombine.high %v1240_v15, %v1248_v16  ;;  %v905_v51 = vld [vmem:[%s6400_s16 + $0x220] sm:$0xff] }
 0x236   : > { %4308 = vmatprep.subr.bf16.mxu1 %v5356_v19  ;;  %v5244_v19 = vcombine.high %v984_v13, %v992_v14  ;;  %v5438_v8 = vcombine.high %v1177_v1, %v1185_v3 }
 0x238   : > { %4266 = vmatpush1.bf16.msra.mxu0 %v5099_v24  ;;  %v1232_v24 = vld [vmem:[%s6400_s16 + $0xc58] sm:$0xff] }
 0x239   : > { %4309 = vmatpush1.bf16.msra.mxu1 %v5355_v25  ;;  %4267 = vmatprep.subr.bf16.mxu0 %v5340_v26  ;;  %v5243_v25 = vcombine.low %v984_v13, %v992_v14  ;;  %v5499_v26 = vcombine.low %v1240_v15, %v1248_v16  ;;  %v5484_v28 = vcombine.high %v1224_v23, %v1232_v24 }
 0x23a   : > { %4310 = vmatprep.subr.bf16.mxu1 %v5596_v27  ;;  %v5228_v27 = vcombine.high %v968_v21, %v976_v22 }
 0x23c   : > { %4268 = vmatpush2.bf16.msra.mxu0 %v5339_v32  ;;  %v1217_v32 = vld [vmem:[%s6400_s16 + $0xbe0] sm:$0xff] }
 0x23d   : > { %4311 = vmatpush2.bf16.msra.mxu1 %v5595_v33  ;;  %4269 = vmatprep.subr.bf16.mxu0 %v5324_v34  ;;  %v5227_v33 = vcombine.low %v968_v21, %v976_v22  ;;  %v5483_v34 = vcombine.low %v1224_v23, %v1232_v24  ;;  %v5470_v37 = vcombine.high %v1209_v31, %v1217_v32 }
 0x23e   : > { %4312 = vmatprep.subr.bf16.mxu1 %v5580_v35  ;;  %v5214_v35 = vcombine.high %v953_v29, %v961_v30  ;;  %v5469_v54 = vcombine.low %v1209_v31, %v1217_v32 }
 0x240   : > { %4270 = vmatpush2.bf16.msra.mxu0 %v5323_v40  ;;  %v5213_v40 = vcombine.low %v953_v29, %v961_v30  ;;  %v1153_v29 = vld [vmem:[%s6400_s16 + $0x9e0] sm:$0xff] }
 0x241   : > { %4313 = vmatpush2.bf16.msra.mxu1 %v5579_v41  ;;  %4271 = vmatprep.subr.bf16.mxu0 %v5308_v42  ;;  %v1356_v41 = vrot.slane %v6736_v36, %v6503_v2  ;;  %v1193_v42 = vld [vmem:[%s6400_s16 + $0xb20] sm:$0xff] }
 0x242   : > { %4314 = vmatprep.subr.bf16.mxu1 %v5564_v43  ;;  %v1201_v43 = vld [vmem:[%s6400_s16 + $0xb60] sm:$0xff] }
 0x244   : > { %4272 = vmatpush2.bf16.msra.mxu0 %v5307_v58  ;;  %v929_v58 = vld [vmem:[%s6400_s16 + $0x2e0] sm:$0xff] }
 0x245   : > { %4315 = vmatpush2.bf16.msra.mxu1 %v5563_v59  ;;  %4273 = vmatprep.subr.bf16.mxu0 %v5292_v61 }
 0x246   : > { %4316 = vmatprep.subr.bf16.mxu1 %v5548_v62  ;;  %v5454_v62 = vcombine.high %v1193_v42, %v1201_v43 }
 0x248   : > { %4274 = vmatpush2.bf16.msra.mxu0 %v5291_v46 }
 0x249   : > { %4317 = vmatpush2.bf16.msra.mxu1 %v5547_v50  ;;  %4275 = vmatprep.subr.bf16.mxu0 %v5276_v47  ;;  %v5453_v47 = vcombine.low %v1193_v42, %v1201_v43 }
 0x24a   : > { %4318 = vmatprep.subr.bf16.mxu1 %v5532_v49  ;;  %v5182_v49 = vcombine.high %v921_v57, %v929_v58 }
 0x24c   : > { %4276 = vmatpush2.bf16.msra.mxu0 %v5275_v9  ;;  %v913_v9 = vld [vmem:[%s6400_s16 + $0x260] sm:$0xff] }
 0x24d   : > { %4319 = vmatpush2.bf16.msra.mxu1 %v5531_v10  ;;  %4277 = vmatprep.subr.bf16.mxu0 %v5260_v11  ;;  %v1161_v10 = vld [vmem:[%s6400_s16 + $0xa20] sm:$0xff]  ;;  %v5165_v32 = vcombine.low %v905_v51, %v913_v9 }
 0x24e   : > { %4320 = vmatprep.subr.bf16.mxu1 %v5516_v12  ;;  %v1169_v11 = vld [vmem:[%s6400_s16 + $0xa60] sm:$0xff] }
 0x24f   : > { %v5422_v21 = vcombine.high %v1161_v10, %v1169_v11 }
 0x250   : > { %4278 = vmatpush2.bf16.msra.mxu0 %v5259_v17  ;;  %v5181_v17 = vcombine.low %v921_v57, %v929_v58  ;;  %v865_v57 = vld [vmem:[%s6400_s16 + $0xe0] sm:$0xff] }
 0x251   : > { %4321 = vmatpush2.bf16.msra.mxu1 %v5515_v18  ;;  %4279 = vmatprep.subr.bf16.mxu0 %v5244_v19  ;;  %v5437_v19 = vcombine.low %v1177_v1, %v1185_v3  ;;  %v1113_v58 = vld [vmem:[%s6400_s16 + $0x8a0] sm:$0xff] }
 0x252   : > { %4322 = vmatprep.subr.bf16.mxu1 %v5500_v20  ;;  %v5166_v20 = vcombine.high %v905_v51, %v913_v9 }
 0x254   : > { %4280 = vmatpush2.bf16.msra.mxu0 %v5243_v25  ;;  %v889_v25 = vld [vmem:[%s6400_s16 + $0x1a0] sm:$0xff] }
 0x255   : > { %4323 = vmatpush2.bf16.msra.mxu1 %v5499_v26  ;;  %4281 = vmatprep.subr.bf16.mxu0 %v5228_v27  ;;  %v897_v26 = vld [vmem:[%s6400_s16 + $0x1e0] sm:$0xff] }
 0x256   : > { %4324 = vmatprep.subr.bf16.mxu1 %v5484_v28  ;;  %v1145_v28 = vld [vmem:[%s6400_s16 + $0x9a0] sm:$0xff]  ;;  %v5149_v42 = vcombine.low %v889_v25, %v897_v26 }
 0x257   : > { %v5405_v43 = vcombine.low %v1145_v28, %v1153_v29 }
 0x258   : > { %4282 = vmatpush2.bf16.msra.mxu0 %v5227_v33  ;;  %v5421_v33 = vcombine.low %v1161_v10, %v1169_v11 }
 0x259   : > { %4325 = vmatpush2.bf16.msra.mxu1 %v5483_v34  ;;  %4337 = vmatprep.subr.bf16.mxu0 %v5214_v35  ;;  %v5150_v34 = vcombine.high %v889_v25, %v897_v26  ;;  %v1065_v26 = vld [vmem:[%s6400_s16 + $0x720] sm:$0xff] }
 0x25a   : > { %4380 = vmatprep.subr.bf16.mxu1 %v5470_v37  ;;  %v5406_v37 = vcombine.high %v1145_v28, %v1153_v29  ;;  %v1321_v28 = vld [vmem:[%s6400_s16 + $0xf20] sm:$0xff] }
 0x25b   : > { %4284 = vmatmul.mubr.bf16.vlgmr.msra.gmra.mxu0 %v6520_v52  ;;  %v4027_v59 = vpop.f32.mrf.mxu0  ;;  %v4070_v61 = vpop.f32.mrf.mxu1  ;;  %v1329_v29 = vld [vmem:[%s6400_s16 + $0xf60] sm:$0xff] }
 0x25c   : > { %4327 = vmatmul.mubr.bf16.vlgmr.msra.gmra.mxu1 %v6522_v53  ;;  %v4028_v5 = vadd.f32 %v4027_v59, %v1356_v41  ;;  %4338 = vmatpush1.bf16.msra.mxu0 %v5213_v40  ;;  %v1129_v40 = vld [vmem:[%s6400_s16 + $0x920] sm:$0xff] }
 0x25d   : > { %4369 = vmatprep.mubr.bf16.mxu0 %v6516_v44  ;;  %4381 = vmatpush1.bf16.msra.mxu1 %v5469_v54  ;;  %v4029_v46 = vpop.f32.mrf.mxu0  ;;  %v4072_v50 = vpop.f32.mrf.mxu1  ;;  %v5134_v54 = vcombine.high %v873_v38, %v881_v39  ;;  %v1121_v59 = vld [vmem:[%s6400_s16 + $0x8e0] sm:$0xff] }
 0x25e   : > { %v4071_v6 = vadd.f32 %v4070_v61, %v4028_v5  ;;  %4412 = vmatprep.mubr.bf16.mxu1 %v6518_v48  ;;  %v4030_v7 = vadd.f32 %v4029_v46, %v1360_v55  ;;  %4339 = vmatprep.subr.bf16.mxu0 %v5198_v56  ;;  %v857_v56 = vld [vmem:[%s6400_s16 + $0xa0] sm:$0xff]  ;;  %v5133_v61 = vcombine.low %v873_v38, %v881_v39 }
 0x25f   : > { %4382 = vmatprep.subr.bf16.mxu1 %v5454_v62  ;;  %v4031_v12 = vpop.f32.mrf.mxu0  ;;  %v4074_v13 = vpop.f32.mrf.mxu1  ;;  %v5118_v1 = vcombine.high %v857_v56, %v865_v57  ;;  %v5374_v3 = vcombine.high %v1113_v58, %v1121_v59  ;;  %v841_v5 = vld [vmem:[%s6400_s16 + $0x20] sm:$0xff]  ;;  %v5117_v51 = vcombine.low %v857_v56, %v865_v57 }
 0x260   : > { %v5605_v14 = vclamps-f32 %v4071_v6, 5.0  ;;  %v4073_v15 = vadd.f32 %v4072_v50, %v4030_v7  ;;  %v4032_v16 = vadd.f32 %v4031_v12, %v1356_v41  ;;  %4340 = vmatpush1.bf16.msra.mxu0 %v5197_v45  ;;  %v1137_v41 = vld [vmem:[%s6400_s16 + $0x960] sm:$0xff]  ;;  %v5373_v7 = vcombine.low %v1113_v58, %v1121_v59 }
 0x261   : > { %4383 = vmatpush1.bf16.msra.mxu1 %v5453_v47  ;;  %v4033_v18 = vpop.f32.mrf.mxu0  ;;  %4341 = vmatprep.subr.bf16.mxu0 %v5182_v49  ;;  %v4076_v27 = vpop.f32.mrf.mxu1  ;;  %v5389_v62 = vcombine.low %v1129_v40, %v1137_v41  ;;  %v849_v45 = vld [vmem:[%s6400_s16 + $0x60] sm:$0xff] }
 0x262   : > { %5804 = vtanh.f32 %v5605_v14  ;;  %v5606_v22 = vclamps-f32 %v4073_v15, 5.0  ;;  %v4075_v23 = vadd.f32 %v4074_v13, %v4032_v16  ;;  %v4034_v24 = vadd.f32 %v4033_v18, %v1360_v55  ;;  %4384 = vmatprep.subr.bf16.mxu1 %v5438_v8  ;;  %v1097_v50 = vld [vmem:[%s6400_s16 + $0x820] sm:$0xff] }
 0x263   : > { %v5390_v55 = vcombine.high %v1129_v40, %v1137_v41  ;;  %v1105_v47 = vld [vmem:[%s6400_s16 + $0x860] sm:$0xff]  ;;  %v5102_v8 = vcombine.high %v841_v5, %v849_v45  ;;  %v5581_v41 = vcombine.low %v1321_v28, %v1329_v29 }
 0x264   : > { %5806 = vtanh.f32 %v5606_v22  ;;  %v5621_v30 = vclamps-f32 %v4075_v23, 5.0  ;;  %v4077_v31 = vadd.f32 %v4076_v27, %v4034_v24  ;;  %4342 = vmatpush1.bf16.msra.mxu0 %v5181_v17  ;;  %v5358_v11 = vcombine.high %v1097_v50, %v1105_v47  ;;  %v1081_v12 = vld [vmem:[%s6400_s16 + $0x7a0] sm:$0xff] }
 0x265   : > { %4385 = vmatpush1.bf16.msra.mxu1 %v5437_v19  ;;  %4343 = vmatprep.subr.bf16.mxu0 %v5166_v20  ;;  %v1089_v13 = vld [vmem:[%s6400_s16 + $0x7e0] sm:$0xff]  ;;  %v5101_v19 = vcombine.low %v841_v5, %v849_v45 }
 0x266   : > { %5808 = vtanh.f32 %v5621_v30  ;;  %v5622_v35 = vclamps-f32 %v4077_v31, 5.0  ;;  %4386 = vmatprep.subr.bf16.mxu1 %v5422_v21  ;;  %v1337_v15 = vld [vmem:[%s6400_s16 + $0xfa0] sm:$0xff]  ;;  %v5357_v21 = vcombine.low %v1097_v50, %v1105_v47  ;;  %v5342_v22 = vcombine.high %v1081_v12, %v1089_v13 }
 0x267   : > { %v1345_v16 = vld [vmem:[%s6400_s16 + $0xfe0] sm:$0xff]  ;;  %v5341_v31 = vcombine.low %v1081_v12, %v1089_v13 }
 0x268   : > { %5810 = vtanh.f32 %v5622_v35  ;;  %4344 = vmatpush1.bf16.msra.mxu0 %v5165_v32  ;;  %v5598_v25 = vcombine.high %v1337_v15, %v1345_v16  ;;  %v1073_v27 = vld [vmem:[%s6400_s16 + $0x760] sm:$0xff]  ;;  %v5597_v32 = vcombine.low %v1337_v15, %v1345_v16 }
 0x269   : > { %4387 = vmatpush1.bf16.msra.mxu1 %v5421_v33  ;;  %4345 = vmatprep.subr.bf16.mxu0 %v5150_v34  ;;  %v5326_v33 = vcombine.high %v1065_v26, %v1073_v27  ;;  %v5582_v34 = vcombine.high %v1321_v28, %v1329_v29  ;;  %v1049_v35 = vld [vmem:[%s6400_s16 + $0x6a0] sm:$0xff]  ;;  %v5325_v40 = vcombine.low %v1065_v26, %v1073_v27  ;;  %v954_v29 = vld [vmem:[%s6400_s16 + $0x3a8] sm:$0xff] }
 0x26a   : > { %4388 = vmatprep.subr.bf16.mxu1 %v5406_v37  ;;  %v1057_v37 = vld [vmem:[%s6400_s16 + $0x6e0] sm:$0xff] }
 0x26b   : > { %v1305_v38 = vld [vmem:[%s6400_s16 + $0xea0] sm:$0xff]  ;;  %v5309_v58 = vcombine.low %v1049_v35, %v1057_v37 }
 0x26c   : > { %4346 = vmatpush1.bf16.msra.mxu0 %v5149_v42  ;;  %v1313_v39 = vld [vmem:[%s6400_s16 + $0xee0] sm:$0xff]  ;;  %v5310_v42 = vcombine.high %v1049_v35, %v1057_v37 }
 0x26d   : > { %4389 = vmatpush1.bf16.msra.mxu1 %v5405_v43  ;;  %4347 = vmatprep.subr.bf16.mxu0 %v5134_v54  ;;  %v5566_v43 = vcombine.high %v1305_v38, %v1313_v39  ;;  %v1033_v54 = vld [vmem:[%s6400_s16 + $0x620] sm:$0xff]  ;;  %v5565_v59 = vcombine.low %v1305_v38, %v1313_v39  ;;  %v938_v38 = vld [vmem:[%s6400_s16 + $0x328] sm:$0xff] }
 0x26e   : > { %4390 = vmatprep.subr.bf16.mxu1 %v5390_v55  ;;  %v1041_v55 = vld [vmem:[%s6400_s16 + $0x660] sm:$0xff]  ;;  %v946_v39 = vld [vmem:[%s6400_s16 + $0x368] sm:$0xff] }
 0x26f   : > { %v5805_v46 = vpop.eup %5804  ;;  %v1289_v56 = vld [vmem:[%s6400_s16 + $0xe20] sm:$0xff] }
 0x270   : > { %v4777_v49 = vmul.f32 3.14159, %v5805_v46  ;;  %4348 = vmatpush1.bf16.msra.mxu0 %v5133_v61  ;;  %v1297_v57 = vld [vmem:[%s6400_s16 + $0xe60] sm:$0xff]  ;;  %v5294_v61 = vcombine.high %v1033_v54, %v1041_v55  ;;  %v5293_v46 = vcombine.low %v1033_v54, %v1041_v55  ;;  %v1368_v55 = vrot.slane %v6736_v36, %v6500_v0 }
 0x271   : > { %v5807_v6 = vpop.eup %5806  ;;  %4391 = vmatpush1.bf16.msra.mxu1 %v5389_v62  ;;  %4349 = vmatprep.subr.bf16.mxu0 %v5118_v1  ;;  %v5550_v62 = vcombine.high %v1289_v56, %v1297_v57  ;;  %v1017_v1 = vld [vmem:[%s6400_s16 + $0x5a0] sm:$0xff]  ;;  %v5549_v50 = vcombine.low %v1289_v56, %v1297_v57  ;;  %v5200_v56 = vcombine.high %v938_v38, %v946_v39  ;;  %v922_v57 = vld [vmem:[%s6400_s16 + $0x2a8] sm:$0xff] }
 0x272   : > { %v4809_v9 = vadd.f32 3.14159, %v4777_v49  ;;  %v4778_v10 = vmul.f32 3.14159, %v5807_v6  ;;  %4392 = vmatprep.subr.bf16.mxu1 %v5374_v3  ;;  %v1025_v3 = vld [vmem:[%s6400_s16 + $0x5e0] sm:$0xff] }
 0x273   : > { %v5809_v14 = vpop.eup %5808  ;;  %v1273_v5 = vld [vmem:[%s6400_s16 + $0xda0] sm:$0xff]  ;;  %v5278_v47 = vcombine.high %v1017_v1, %v1025_v3 }
 0x274   : > { %4841 = vst [vmem:[%s6779_s5] sm:$0xff] %v4809_v9  ;;  %v4810_v17 = vadd.f32 3.14159, %v4778_v10  ;;  %v4793_v18 = vmul.f32 3.14159, %v5809_v14  ;;  %4350 = vmatpush1.bf16.msra.mxu0 %v5117_v51  ;;  %v1281_v45 = vld [vmem:[%s6400_s16 + $0xde0] sm:$0xff]  ;;  %v5277_v9 = vcombine.low %v1017_v1, %v1025_v3  ;;  %v1178_v1 = vld [vmem:[%s6400_s16 + $0xaa8] sm:$0xff] }
 0x275   : > { %v5811_v20 = vpop.eup %5810  ;;  %4393 = vmatpush1.bf16.msra.mxu1 %v5373_v7  ;;  %4351 = vmatprep.subr.bf16.mxu0 %v5102_v8  ;;  %v5534_v49 = vcombine.high %v1273_v5, %v1281_v45  ;;  %v1001_v51 = vld [vmem:[%s6400_s16 + $0x520] sm:$0xff]  ;;  %v5533_v10 = vcombine.low %v1273_v5, %v1281_v45  ;;  %v1186_v3 = vld [vmem:[%s6400_s16 + $0xae8] sm:$0xff]  ;;  %v5199_v45 = vcombine.low %v938_v38, %v946_v39 }
 0x276   : > { %4842 = vst [vmem:[%s6779_s5 + $0x8] sm:$0xff] %v4810_v17  ;;  %v4825_v23 = vadd.f32 3.14159, %v4793_v18  ;;  %v4794_v24 = vmul.f32 3.14159, %v5811_v20  ;;  %4394 = vmatprep.subr.bf16.mxu1 %v5358_v11  ;;  %v1009_v6 = vld [vmem:[%s6400_s16 + $0x560] sm:$0xff] }
 0x277   : > { %v1257_v7 = vld [vmem:[%s6400_s16 + $0xd20] sm:$0xff]  ;;  %v5262_v11 = vcombine.high %v1001_v51, %v1009_v6  ;;  %v5261_v17 = vcombine.low %v1001_v51, %v1009_v6  ;;  %v906_v51 = vld [vmem:[%s6400_s16 + $0x228] sm:$0xff] }
 0x278   : > { %4857 = vst [vmem:[%s6779_s5 + $0x80] sm:$0xff] %v4825_v23  ;;  %v4826_v30 = vadd.f32 3.14159, %v4794_v24  ;;  %4352 = vmatpush1.bf16.msra.mxu0 %v5101_v19  ;;  %v1265_v8 = vld [vmem:[%s6400_s16 + $0xd60] sm:$0xff]  ;;  %v874_v38 = vld [vmem:[%s6400_s16 + $0x128] sm:$0xff] }
 0x279   : > { %4395 = vmatpush1.bf16.msra.mxu1 %v5357_v21  ;;  %4353 = vmatprep.subr.bf16.mxu0 %v5342_v22  ;;  %v5518_v12 = vcombine.high %v1257_v7, %v1265_v8  ;;  %v985_v13 = vld [vmem:[%s6400_s16 + $0x4a0] sm:$0xff]  ;;  %v5517_v18 = vcombine.low %v1257_v7, %v1265_v8  ;;  %v5440_v8 = vcombine.high %v1178_v1, %v1186_v3  ;;  %v882_v39 = vld [vmem:[%s6400_s16 + $0x168] sm:$0xff] }
 0x27a   : > { %4858 = vst [vmem:[%s6779_s5 + $0x88] sm:$0xff] %v4826_v30  ;;  %4396 = vmatprep.subr.bf16.mxu1 %v5598_v25  ;;  %v993_v14 = vld [vmem:[%s6400_s16 + $0x4e0] sm:$0xff]  ;;  %v962_v30 = vld [vmem:[%s6400_s16 + $0x3e8] sm:$0xff] }
 0x27b   : > { %v1241_v15 = vld [vmem:[%s6400_s16 + $0xca0] sm:$0xff]  ;;  %v5246_v19 = vcombine.high %v985_v13, %v993_v14  ;;  %v5245_v25 = vcombine.low %v985_v13, %v993_v14  ;;  %v5216_v35 = vcombine.high %v954_v29, %v962_v30 }
 0x27c   : > { %4354 = vmatpush2.bf16.msra.mxu0 %v5341_v31  ;;  %v1249_v16 = vld [vmem:[%s6400_s16 + $0xce0] sm:$0xff]  ;;  %v1210_v31 = vld [vmem:[%s6400_s16 + $0xba8] sm:$0xff] }
 0x27d   : > { %4397 = vmatpush2.bf16.msra.mxu1 %v5597_v32  ;;  %4355 = vmatprep.subr.bf16.mxu0 %v5326_v33  ;;  %v5502_v20 = vcombine.high %v1241_v15, %v1249_v16  ;;  %v969_v21 = vld [vmem:[%s6400_s16 + $0x420] sm:$0xff]  ;;  %v5501_v26 = vcombine.low %v1241_v15, %v1249_v16  ;;  %v1218_v32 = vld [vmem:[%s6400_s16 + $0xbe8] sm:$0xff] }
 0x27e   : > { %4398 = vmatprep.subr.bf16.mxu1 %v5582_v34  ;;  %v977_v22 = vld [vmem:[%s6400_s16 + $0x460] sm:$0xff]  ;;  %v5472_v37 = vcombine.high %v1210_v31, %v1218_v32  ;;  %v5471_v54 = vcombine.low %v1210_v31, %v1218_v32 }
 0x27f   : > { %v1225_v23 = vld [vmem:[%s6400_s16 + $0xc20] sm:$0xff]  ;;  %v5230_v27 = vcombine.high %v969_v21, %v977_v22  ;;  %v5229_v33 = vcombine.low %v969_v21, %v977_v22 }
 0x280   : > { %4356 = vmatpush2.bf16.msra.mxu0 %v5325_v40  ;;  %v1233_v24 = vld [vmem:[%s6400_s16 + $0xc60] sm:$0xff]  ;;  %v1364_v40 = vrot.slane %v6736_v36, %v6506_v4 }
 0x281   : > { %4399 = vmatpush2.bf16.msra.mxu1 %v5581_v41  ;;  %4357 = vmatprep.subr.bf16.mxu0 %v5310_v42  ;;  %v5486_v28 = vcombine.high %v1225_v23, %v1233_v24  ;;  %v5485_v34 = vcombine.low %v1225_v23, %v1233_v24  ;;  %v5215_v41 = vcombine.low %v954_v29, %v962_v30  ;;  %v1194_v42 = vld [vmem:[%s6400_s16 + $0xb28] sm:$0xff] }
 0x282   : > { %4400 = vmatprep.subr.bf16.mxu1 %v5566_v43  ;;  %v1202_v43 = vld [vmem:[%s6400_s16 + $0xb68] sm:$0xff] }
 0x283   : > { %v1154_v29 = vld [vmem:[%s6400_s16 + $0x9e8] sm:$0xff] }
 0x284   : > { %4358 = vmatpush2.bf16.msra.mxu0 %v5309_v58  ;;  %v930_v58 = vld [vmem:[%s6400_s16 + $0x2e8] sm:$0xff] }
 0x285   : > { %4401 = vmatpush2.bf16.msra.mxu1 %v5565_v59  ;;  %4359 = vmatprep.subr.bf16.mxu0 %v5294_v61 }
 0x286   : > { %4402 = vmatprep.subr.bf16.mxu1 %v5550_v62  ;;  %v5456_v62 = vcombine.high %v1194_v42, %v1202_v43 }
 0x288   : > { %4360 = vmatpush2.bf16.msra.mxu0 %v5293_v46 }
 0x289   : > { %4403 = vmatpush2.bf16.msra.mxu1 %v5549_v50  ;;  %4361 = vmatprep.subr.bf16.mxu0 %v5278_v47  ;;  %v5455_v47 = vcombine.low %v1194_v42, %v1202_v43 }
 0x28a   : > { %4404 = vmatprep.subr.bf16.mxu1 %v5534_v49  ;;  %v5184_v49 = vcombine.high %v922_v57, %v930_v58 }
 0x28c   : > { %4362 = vmatpush2.bf16.msra.mxu0 %v5277_v9  ;;  %v914_v9 = vld [vmem:[%s6400_s16 + $0x268] sm:$0xff] }
 0x28d   : > { %4405 = vmatpush2.bf16.msra.mxu1 %v5533_v10  ;;  %4363 = vmatprep.subr.bf16.mxu0 %v5262_v11  ;;  %v1162_v10 = vld [vmem:[%s6400_s16 + $0xa28] sm:$0xff]  ;;  %v5167_v32 = vcombine.low %v906_v51, %v914_v9 }
 0x28e   : > { %4406 = vmatprep.subr.bf16.mxu1 %v5518_v12  ;;  %v1170_v11 = vld [vmem:[%s6400_s16 + $0xa68] sm:$0xff] }
 0x28f   : > { %v5424_v21 = vcombine.high %v1162_v10, %v1170_v11 }
 0x290   : > { %4364 = vmatpush2.bf16.msra.mxu0 %v5261_v17  ;;  %v5183_v17 = vcombine.low %v922_v57, %v930_v58  ;;  %v866_v57 = vld [vmem:[%s6400_s16 + $0xe8] sm:$0xff] }
 0x291   : > { %4407 = vmatpush2.bf16.msra.mxu1 %v5517_v18  ;;  %4365 = vmatprep.subr.bf16.mxu0 %v5246_v19  ;;  %v5439_v19 = vcombine.low %v1178_v1, %v1186_v3  ;;  %v1114_v58 = vld [vmem:[%s6400_s16 + $0x8a8] sm:$0xff] }
 0x292   : > { %4408 = vmatprep.subr.bf16.mxu1 %v5502_v20  ;;  %v5168_v20 = vcombine.high %v906_v51, %v914_v9 }
 0x294   : > { %4366 = vmatpush2.bf16.msra.mxu0 %v5245_v25  ;;  %v890_v25 = vld [vmem:[%s6400_s16 + $0x1a8] sm:$0xff] }
 0x295   : > { %4409 = vmatpush2.bf16.msra.mxu1 %v5501_v26  ;;  %4367 = vmatprep.subr.bf16.mxu0 %v5230_v27  ;;  %v898_v26 = vld [vmem:[%s6400_s16 + $0x1e8] sm:$0xff] }
 0x296   : > { %4410 = vmatprep.subr.bf16.mxu1 %v5486_v28  ;;  %v1146_v28 = vld [vmem:[%s6400_s16 + $0x9a8] sm:$0xff]  ;;  %v5151_v42 = vcombine.low %v890_v25, %v898_v26 }
 0x297   : > { %v5407_v43 = vcombine.low %v1146_v28, %v1154_v29 }
 0x298   : > { %4368 = vmatpush2.bf16.msra.mxu0 %v5229_v33  ;;  %v5423_v33 = vcombine.low %v1162_v10, %v1170_v11 }
 0x299   : > { %4411 = vmatpush2.bf16.msra.mxu1 %v5485_v34  ;;  %4423 = vmatprep.subr.bf16.mxu0 %v5216_v35  ;;  %v5152_v34 = vcombine.high %v890_v25, %v898_v26  ;;  %v1066_v26 = vld [vmem:[%s6400_s16 + $0x728] sm:$0xff] }
 0x29a   : > { %4466 = vmatprep.subr.bf16.mxu1 %v5472_v37  ;;  %v5408_v37 = vcombine.high %v1146_v28, %v1154_v29  ;;  %v1322_v28 = vld [vmem:[%s6400_s16 + $0xf28] sm:$0xff] }
 0x29b   : > { %v4113_v59 = vpop.f32.mrf.mxu0  ;;  %v4156_v61 = vpop.f32.mrf.mxu1  ;;  %4370 = vmatmul.mubr.bf16.vlgmr.msra.gmra.mxu0 %v6520_v52  ;;  %v1330_v29 = vld [vmem:[%s6400_s16 + $0xf68] sm:$0xff] }
 0x29c   : > { %v4114_v5 = vadd.f32 %v4113_v59, %v1364_v40  ;;  %4413 = vmatmul.mubr.bf16.vlgmr.msra.gmra.mxu1 %v6522_v53  ;;  %4424 = vmatpush1.bf16.msra.mxu0 %v5215_v41  ;;  %v1138_v41 = vld [vmem:[%s6400_s16 + $0x968] sm:$0xff] }
 0x29d   : > { %4455 = vmatprep.mubr.bf16.mxu0 %v6516_v44  ;;  %4467 = vmatpush1.bf16.msra.mxu1 %v5471_v54  ;;  %v4115_v46 = vpop.f32.mrf.mxu0  ;;  %v4158_v50 = vpop.f32.mrf.mxu1  ;;  %v5136_v54 = vcombine.high %v874_v38, %v882_v39  ;;  %v1122_v59 = vld [vmem:[%s6400_s16 + $0x8e8] sm:$0xff] }
 0x29e   : > { %v4157_v6 = vadd.f32 %v4156_v61, %v4114_v5  ;;  %4498 = vmatprep.mubr.bf16.mxu1 %v6518_v48  ;;  %v4116_v7 = vadd.f32 %v4115_v46, %v1368_v55  ;;  %4425 = vmatprep.subr.bf16.mxu0 %v5200_v56  ;;  %v858_v56 = vld [vmem:[%s6400_s16 + $0xa8] sm:$0xff]  ;;  %v5135_v61 = vcombine.low %v874_v38, %v882_v39 }
 0x29f   : > { %v4117_v12 = vpop.f32.mrf.mxu0  ;;  %v4160_v13 = vpop.f32.mrf.mxu1  ;;  %4468 = vmatprep.subr.bf16.mxu1 %v5456_v62  ;;  %v5120_v1 = vcombine.high %v858_v56, %v866_v57  ;;  %v5376_v3 = vcombine.high %v1114_v58, %v1122_v59  ;;  %v842_v5 = vld [vmem:[%s6400_s16 + $0x28] sm:$0xff]  ;;  %v5119_v51 = vcombine.low %v858_v56, %v866_v57 }
 0x2a0   : > { %v5607_v14 = vclamps-f32 %v4157_v6, 5.0  ;;  %v4159_v15 = vadd.f32 %v4158_v50, %v4116_v7  ;;  %v4118_v16 = vadd.f32 %v4117_v12, %v1364_v40  ;;  %4426 = vmatpush1.bf16.msra.mxu0 %v5199_v45  ;;  %v1130_v40 = vld [vmem:[%s6400_s16 + $0x928] sm:$0xff]  ;;  %v5375_v7 = vcombine.low %v1114_v58, %v1122_v59 }
 0x2a1   : > { %4469 = vmatpush1.bf16.msra.mxu1 %v5455_v47  ;;  %v4119_v18 = vpop.f32.mrf.mxu0  ;;  %4427 = vmatprep.subr.bf16.mxu0 %v5184_v49  ;;  %v4162_v27 = vpop.f32.mrf.mxu1  ;;  %v5391_v62 = vcombine.low %v1130_v40, %v1138_v41  ;;  %v850_v45 = vld [vmem:[%s6400_s16 + $0x68] sm:$0xff] }
 0x2a2   : > { %5812 = vtanh.f32 %v5607_v14  ;;  %v5608_v22 = vclamps-f32 %v4159_v15, 5.0  ;;  %v4161_v23 = vadd.f32 %v4160_v13, %v4118_v16  ;;  %v4120_v24 = vadd.f32 %v4119_v18, %v1368_v55  ;;  %4470 = vmatprep.subr.bf16.mxu1 %v5440_v8  ;;  %v1098_v50 = vld [vmem:[%s6400_s16 + $0x828] sm:$0xff] }
 0x2a3   : > { %v5392_v55 = vcombine.high %v1130_v40, %v1138_v41  ;;  %v1106_v47 = vld [vmem:[%s6400_s16 + $0x868] sm:$0xff]  ;;  %v5104_v8 = vcombine.high %v842_v5, %v850_v45  ;;  %v5583_v41 = vcombine.low %v1322_v28, %v1330_v29 }
 0x2a4   : > { %5814 = vtanh.f32 %v5608_v22  ;;  %v5623_v30 = vclamps-f32 %v4161_v23, 5.0  ;;  %v4163_v31 = vadd.f32 %v4162_v27, %v4120_v24  ;;  %4428 = vmatpush1.bf16.msra.mxu0 %v5183_v17  ;;  %v5360_v11 = vcombine.high %v1098_v50, %v1106_v47  ;;  %v1082_v12 = vld [vmem:[%s6400_s16 + $0x7a8] sm:$0xff] }
 0x2a5   : > { %4471 = vmatpush1.bf16.msra.mxu1 %v5439_v19  ;;  %4429 = vmatprep.subr.bf16.mxu0 %v5168_v20  ;;  %v1090_v13 = vld [vmem:[%s6400_s16 + $0x7e8] sm:$0xff]  ;;  %v5103_v19 = vcombine.low %v842_v5, %v850_v45 }
 0x2a6   : > { %5816 = vtanh.f32 %v5623_v30  ;;  %v5624_v35 = vclamps-f32 %v4163_v31, 5.0  ;;  %4472 = vmatprep.subr.bf16.mxu1 %v5424_v21  ;;  %v1338_v15 = vld [vmem:[%s6400_s16 + $0xfa8] sm:$0xff]  ;;  %v5359_v21 = vcombine.low %v1098_v50, %v1106_v47  ;;  %v5344_v22 = vcombine.high %v1082_v12, %v1090_v13 }
 0x2a7   : > { %v1346_v16 = vld [vmem:[%s6400_s16 + $0xfe8] sm:$0xff]  ;;  %v5343_v31 = vcombine.low %v1082_v12, %v1090_v13 }
 0x2a8   : > { %5818 = vtanh.f32 %v5624_v35  ;;  %4430 = vmatpush1.bf16.msra.mxu0 %v5167_v32  ;;  %v5600_v25 = vcombine.high %v1338_v15, %v1346_v16  ;;  %v1074_v27 = vld [vmem:[%s6400_s16 + $0x768] sm:$0xff]  ;;  %v5599_v32 = vcombine.low %v1338_v15, %v1346_v16 }
 0x2a9   : > { %4473 = vmatpush1.bf16.msra.mxu1 %v5423_v33  ;;  %4431 = vmatprep.subr.bf16.mxu0 %v5152_v34  ;;  %v5328_v33 = vcombine.high %v1066_v26, %v1074_v27  ;;  %v5584_v34 = vcombine.high %v1322_v28, %v1330_v29  ;;  %v1050_v35 = vld [vmem:[%s6400_s16 + $0x6a8] sm:$0xff]  ;;  %v5327_v40 = vcombine.low %v1066_v26, %v1074_v27  ;;  %v955_v29 = vld [vmem:[%s6400_s16 + $0x3b0] sm:$0xff] }
 0x2aa   : > { %4474 = vmatprep.subr.bf16.mxu1 %v5408_v37  ;;  %v1058_v37 = vld [vmem:[%s6400_s16 + $0x6e8] sm:$0xff] }
 0x2ab   : > { %v1306_v38 = vld [vmem:[%s6400_s16 + $0xea8] sm:$0xff]  ;;  %v5311_v58 = vcombine.low %v1050_v35, %v1058_v37 }
 0x2ac   : > { %4432 = vmatpush1.bf16.msra.mxu0 %v5151_v42  ;;  %v1314_v39 = vld [vmem:[%s6400_s16 + $0xee8] sm:$0xff]  ;;  %v5312_v42 = vcombine.high %v1050_v35, %v1058_v37 }
 0x2ad   : > { %4475 = vmatpush1.bf16.msra.mxu1 %v5407_v43  ;;  %4433 = vmatprep.subr.bf16.mxu0 %v5136_v54  ;;  %v5568_v43 = vcombine.high %v1306_v38, %v1314_v39  ;;  %v1034_v54 = vld [vmem:[%s6400_s16 + $0x628] sm:$0xff]  ;;  %v5567_v59 = vcombine.low %v1306_v38, %v1314_v39  ;;  %v1375_v39 = vsub.s32 5, %v6494_v60 }
 0x2ae   : > { %4476 = vmatprep.subr.bf16.mxu1 %v5392_v55  ;;  %v1042_v55 = vld [vmem:[%s6400_s16 + $0x668] sm:$0xff] }
 0x2af   : > { %v5813_v46 = vpop.eup %5812  ;;  %v1290_v56 = vld [vmem:[%s6400_s16 + $0xe28] sm:$0xff] }
 0x2b0   : > { %v4779_v49 = vmul.f32 3.14159, %v5813_v46  ;;  %4434 = vmatpush1.bf16.msra.mxu0 %v5135_v61  ;;  %v1298_v57 = vld [vmem:[%s6400_s16 + $0xe68] sm:$0xff]  ;;  %v5296_v61 = vcombine.high %v1034_v54, %v1042_v55  ;;  %v5295_v46 = vcombine.low %v1034_v54, %v1042_v55  ;;  %v1195_v54 = vld [vmem:[%s6400_s16 + $0xb30] sm:$0xff] }
 0x2b1   : > { %v5815_v6 = vpop.eup %5814  ;;  %4477 = vmatpush1.bf16.msra.mxu1 %v5391_v62  ;;  %4435 = vmatprep.subr.bf16.mxu0 %v5120_v1  ;;  %v5552_v62 = vcombine.high %v1290_v56, %v1298_v57  ;;  %v1018_v1 = vld [vmem:[%s6400_s16 + $0x5a8] sm:$0xff]  ;;  %v5551_v50 = vcombine.low %v1290_v56, %v1298_v57  ;;  %v1203_v55 = vld [vmem:[%s6400_s16 + $0xb70] sm:$0xff]  ;;  %v1376_v57 = vrot.slane %v6736_v36, %v1375_v39 }
 0x2b2   : > { %v4811_v9 = vadd.f32 3.14159, %v4779_v49  ;;  %v4780_v10 = vmul.f32 3.14159, %v5815_v6  ;;  %4478 = vmatprep.subr.bf16.mxu1 %v5376_v3  ;;  %v1026_v3 = vld [vmem:[%s6400_s16 + $0x5e8] sm:$0xff] }
 0x2b3   : > { %v5817_v14 = vpop.eup %5816  ;;  %v1274_v5 = vld [vmem:[%s6400_s16 + $0xda8] sm:$0xff]  ;;  %v5280_v47 = vcombine.high %v1018_v1, %v1026_v3 }
 0x2b4   : > { %4843 = vst [vmem:[%s6779_s5 + $0x10] sm:$0xff] %v4811_v9  ;;  %v4812_v17 = vadd.f32 3.14159, %v4780_v10  ;;  %v4795_v18 = vmul.f32 3.14159, %v5817_v14  ;;  %4436 = vmatpush1.bf16.msra.mxu0 %v5119_v51  ;;  %v1282_v45 = vld [vmem:[%s6400_s16 + $0xde8] sm:$0xff]  ;;  %v5279_v9 = vcombine.low %v1018_v1, %v1026_v3  ;;  %v5458_v1 = vcombine.high %v1195_v54, %v1203_v55 }
 0x2b5   : > { %v5819_v20 = vpop.eup %5818  ;;  %4479 = vmatpush1.bf16.msra.mxu1 %v5375_v7  ;;  %4437 = vmatprep.subr.bf16.mxu0 %v5104_v8  ;;  %v5536_v49 = vcombine.high %v1274_v5, %v1282_v45  ;;  %v1002_v51 = vld [vmem:[%s6400_s16 + $0x528] sm:$0xff]  ;;  %v5535_v10 = vcombine.low %v1274_v5, %v1282_v45  ;;  %v1179_v3 = vld [vmem:[%s6400_s16 + $0xab0] sm:$0xff] }
 0x2b6   : > { %4844 = vst [vmem:[%s6779_s5 + $0x18] sm:$0xff] %v4812_v17  ;;  %v4827_v23 = vadd.f32 3.14159, %v4795_v18  ;;  %v4796_v24 = vmul.f32 3.14159, %v5819_v20  ;;  %4480 = vmatprep.subr.bf16.mxu1 %v5360_v11  ;;  %v1010_v6 = vld [vmem:[%s6400_s16 + $0x568] sm:$0xff] }
 0x2b7   : > { %v1258_v7 = vld [vmem:[%s6400_s16 + $0xd28] sm:$0xff]  ;;  %v5264_v11 = vcombine.high %v1002_v51, %v1010_v6  ;;  %v5263_v17 = vcombine.low %v1002_v51, %v1010_v6  ;;  %v1187_v5 = vld [vmem:[%s6400_s16 + $0xaf0] sm:$0xff] }
 0x2b8   : > { %4859 = vst [vmem:[%s6779_s5 + $0x90] sm:$0xff] %v4827_v23  ;;  %v4828_v30 = vadd.f32 3.14159, %v4796_v24  ;;  %4438 = vmatpush1.bf16.msra.mxu0 %v5103_v19  ;;  %v1266_v8 = vld [vmem:[%s6400_s16 + $0xd68] sm:$0xff]  ;;  %v907_v51 = vld [vmem:[%s6400_s16 + $0x230] sm:$0xff] }
 0x2b9   : > { %4481 = vmatpush1.bf16.msra.mxu1 %v5359_v21  ;;  %4439 = vmatprep.subr.bf16.mxu0 %v5344_v22  ;;  %v5520_v12 = vcombine.high %v1258_v7, %v1266_v8  ;;  %v986_v13 = vld [vmem:[%s6400_s16 + $0x4a8] sm:$0xff]  ;;  %v5519_v18 = vcombine.low %v1258_v7, %v1266_v8 }
 0x2ba   : > { %4860 = vst [vmem:[%s6779_s5 + $0x98] sm:$0xff] %v4828_v30  ;;  %4482 = vmatprep.subr.bf16.mxu1 %v5600_v25  ;;  %v994_v14 = vld [vmem:[%s6400_s16 + $0x4e8] sm:$0xff]  ;;  %v963_v30 = vld [vmem:[%s6400_s16 + $0x3f0] sm:$0xff] }
 0x2bb   : > { %v1242_v15 = vld [vmem:[%s6400_s16 + $0xca8] sm:$0xff]  ;;  %v5248_v19 = vcombine.high %v986_v13, %v994_v14  ;;  %v5247_v25 = vcombine.low %v986_v13, %v994_v14  ;;  %v5218_v37 = vcombine.high %v955_v29, %v963_v30 }
 0x2bc   : > { %4440 = vmatpush2.bf16.msra.mxu0 %v5343_v31  ;;  %v1250_v16 = vld [vmem:[%s6400_s16 + $0xce8] sm:$0xff]  ;;  %v1211_v31 = vld [vmem:[%s6400_s16 + $0xbb0] sm:$0xff] }
 0x2bd   : > { %4483 = vmatpush2.bf16.msra.mxu1 %v5599_v32  ;;  %4441 = vmatprep.subr.bf16.mxu0 %v5328_v33  ;;  %v5504_v20 = vcombine.high %v1242_v15, %v1250_v16  ;;  %v970_v21 = vld [vmem:[%s6400_s16 + $0x428] sm:$0xff]  ;;  %v5503_v26 = vcombine.low %v1242_v15, %v1250_v16  ;;  %v1219_v32 = vld [vmem:[%s6400_s16 + $0xbf0] sm:$0xff] }
 0x2be   : > { %4484 = vmatprep.subr.bf16.mxu1 %v5584_v34  ;;  %v978_v22 = vld [vmem:[%s6400_s16 + $0x468] sm:$0xff]  ;;  %v1371_v34 = vsub.s32 4, %v6494_v60  ;;  %v5474_v38 = vcombine.high %v1211_v31, %v1219_v32  ;;  %v5473_v56 = vcombine.low %v1211_v31, %v1219_v32 }
 0x2bf   : > { %v1226_v23 = vld [vmem:[%s6400_s16 + $0xc28] sm:$0xff]  ;;  %v5232_v27 = vcombine.high %v970_v21, %v978_v22  ;;  %v5231_v33 = vcombine.low %v970_v21, %v978_v22 }
 0x2c0   : > { %4442 = vmatpush2.bf16.msra.mxu0 %v5327_v40  ;;  %v1234_v24 = vld [vmem:[%s6400_s16 + $0xc68] sm:$0xff]  ;;  %v939_v40 = vld [vmem:[%s6400_s16 + $0x330] sm:$0xff] }
 0x2c1   : > { %4485 = vmatpush2.bf16.msra.mxu1 %v5583_v41  ;;  %4443 = vmatprep.subr.bf16.mxu0 %v5312_v42  ;;  %v5488_v28 = vcombine.high %v1226_v23, %v1234_v24  ;;  %v5487_v35 = vcombine.low %v1226_v23, %v1234_v24  ;;  %v947_v41 = vld [vmem:[%s6400_s16 + $0x370] sm:$0xff]  ;;  %v1372_v42 = vrot.slane %v6736_v36, %v1371_v34 }
 0x2c2   : > { %4486 = vmatprep.subr.bf16.mxu1 %v5568_v43  ;;  %v5217_v43 = vcombine.low %v955_v29, %v963_v30  ;;  %v1147_v29 = vld [vmem:[%s6400_s16 + $0x9b0] sm:$0xff] }
 0x2c3   : > { %v1155_v30 = vld [vmem:[%s6400_s16 + $0x9f0] sm:$0xff] }
 0x2c4   : > { %4444 = vmatpush2.bf16.msra.mxu0 %v5311_v58  ;;  %v5202_v58 = vcombine.high %v939_v40, %v947_v41 }
 0x2c5   : > { %4487 = vmatpush2.bf16.msra.mxu1 %v5567_v59  ;;  %4445 = vmatprep.subr.bf16.mxu0 %v5296_v61  ;;  %v923_v59 = vld [vmem:[%s6400_s16 + $0x2b0] sm:$0xff] }
 0x2c6   : > { %4488 = vmatprep.subr.bf16.mxu1 %v5552_v62  ;;  %v931_v61 = vld [vmem:[%s6400_s16 + $0x2f0] sm:$0xff] }
 0x2c8   : > { %4446 = vmatpush2.bf16.msra.mxu0 %v5295_v46 }
 0x2c9   : > { %4489 = vmatpush2.bf16.msra.mxu1 %v5551_v50  ;;  %4447 = vmatprep.subr.bf16.mxu0 %v5280_v47  ;;  %v5201_v50 = vcombine.low %v939_v40, %v947_v41  ;;  %v5457_v47 = vcombine.low %v1195_v54, %v1203_v55  ;;  %v5410_v40 = vcombine.high %v1147_v29, %v1155_v30  ;;  %v875_v41 = vld [vmem:[%s6400_s16 + $0x130] sm:$0xff] }
 0x2ca   : > { %4490 = vmatprep.subr.bf16.mxu1 %v5536_v49  ;;  %v5186_v49 = vcombine.high %v923_v59, %v931_v61  ;;  %v1139_v54 = vld [vmem:[%s6400_s16 + $0x970] sm:$0xff] }
 0x2cc   : > { %4448 = vmatpush2.bf16.msra.mxu0 %v5279_v9  ;;  %v5442_v9 = vcombine.high %v1179_v3, %v1187_v5 }
 0x2cd   : > { %4491 = vmatpush2.bf16.msra.mxu1 %v5535_v10  ;;  %4449 = vmatprep.subr.bf16.mxu0 %v5264_v11  ;;  %v915_v10 = vld [vmem:[%s6400_s16 + $0x270] sm:$0xff] }
 0x2ce   : > { %4492 = vmatprep.subr.bf16.mxu1 %v5520_v12  ;;  %v1163_v11 = vld [vmem:[%s6400_s16 + $0xa30] sm:$0xff]  ;;  %v5170_v21 = vcombine.high %v907_v51, %v915_v10 }
 0x2cf   : > { %v1171_v12 = vld [vmem:[%s6400_s16 + $0xa70] sm:$0xff] }
 0x2d0   : > { %4450 = vmatpush2.bf16.msra.mxu0 %v5263_v17  ;;  %v5426_v22 = vcombine.high %v1163_v11, %v1171_v12 }
 0x2d1   : > { %4493 = vmatpush2.bf16.msra.mxu1 %v5519_v18  ;;  %4451 = vmatprep.subr.bf16.mxu0 %v5248_v19  ;;  %v5185_v18 = vcombine.low %v923_v59, %v931_v61  ;;  %v859_v59 = vld [vmem:[%s6400_s16 + $0xb0] sm:$0xff] }
 0x2d2   : > { %4494 = vmatprep.subr.bf16.mxu1 %v5504_v20  ;;  %v5441_v20 = vcombine.low %v1179_v3, %v1187_v5  ;;  %v867_v61 = vld [vmem:[%s6400_s16 + $0xf0] sm:$0xff] }
 0x2d4   : > { %4452 = vmatpush2.bf16.msra.mxu0 %v5247_v25 }
 0x2d5   : > { %4495 = vmatpush2.bf16.msra.mxu1 %v5503_v26  ;;  %4453 = vmatprep.subr.bf16.mxu0 %v5232_v27  ;;  %v891_v26 = vld [vmem:[%s6400_s16 + $0x1b0] sm:$0xff] }
 0x2d6   : > { %4496 = vmatprep.subr.bf16.mxu1 %v5488_v28  ;;  %v899_v27 = vld [vmem:[%s6400_s16 + $0x1f0] sm:$0xff] }
 0x2d7   : > { %v5153_v55 = vcombine.low %v891_v26, %v899_v27 }
 0x2d8   : > { %4454 = vmatpush2.bf16.msra.mxu0 %v5231_v33  ;;  %v5169_v33 = vcombine.low %v907_v51, %v915_v10  ;;  %v1107_v51 = vld [vmem:[%s6400_s16 + $0x870] sm:$0xff] }
 0x2d9   : > { %4497 = vmatpush2.bf16.msra.mxu1 %v5487_v35  ;;  %4509 = vmatprep.subr.bf16.mxu0 %v5218_v37  ;;  %v5425_v35 = vcombine.low %v1163_v11, %v1171_v12  ;;  %v5154_v37 = vcombine.high %v891_v26, %v899_v27 }
 0x2da   : > { %4552 = vmatprep.subr.bf16.mxu1 %v5474_v38 }
 0x2db   : > { %v4199_v62 = vpop.f32.mrf.mxu0  ;;  %4456 = vmatmul.mubr.bf16.vlgmr.msra.gmra.mxu0 %v6520_v52 }
 0x2dc   : > { %v4200_v45 = vadd.f32 %v4199_v62, %v1372_v42  ;;  %v4242_v46 = vpop.f32.mrf.mxu1  ;;  %4499 = vmatmul.mubr.bf16.vlgmr.msra.gmra.mxu1 %v6522_v53  ;;  %4510 = vmatpush1.bf16.msra.mxu0 %v5217_v43  ;;  %v1131_v43 = vld [vmem:[%s6400_s16 + $0x930] sm:$0xff] }
 0x2dd   : > { %4541 = vmatprep.mubr.bf16.mxu0 %v6516_v44  ;;  %4553 = vmatpush1.bf16.msra.mxu1 %v5473_v56  ;;  %v4201_v36 = vpop.f32.mrf.mxu0  ;;  %v5409_v56 = vcombine.low %v1147_v29, %v1155_v30  ;;  %v1115_v62 = vld [vmem:[%s6400_s16 + $0x8b0] sm:$0xff]  ;;  %v5393_v5 = vcombine.low %v1131_v43, %v1139_v54 }
 0x2de   : > { %v4243_v6 = vadd.f32 %v4242_v46, %v4200_v45  ;;  %4584 = vmatprep.mubr.bf16.mxu1 %v6518_v48  ;;  %v4202_v7 = vadd.f32 %v4201_v36, %v1376_v57  ;;  %v4244_v8 = vpop.f32.mrf.mxu1  ;;  %4511 = vmatprep.subr.bf16.mxu0 %v5202_v58  ;;  %v5394_v58 = vcombine.high %v1131_v43, %v1139_v54  ;;  %v851_v36 = vld [vmem:[%s6400_s16 + $0x70] sm:$0xff] }
 0x2df   : > { %v4203_v13 = vpop.f32.mrf.mxu0  ;;  %4554 = vmatprep.subr.bf16.mxu1 %v5458_v1  ;;  %v1123_v1 = vld [vmem:[%s6400_s16 + $0x8f0] sm:$0xff]  ;;  %v5122_v45 = vcombine.high %v859_v59, %v867_v61 }
 0x2e0   : > { %v5609_v14 = vclamps-f32 %v4243_v6, 5.0  ;;  %v4245_v15 = vadd.f32 %v4244_v8, %v4202_v7  ;;  %v4204_v16 = vadd.f32 %v4203_v13, %v1372_v42  ;;  %v4246_v17 = vpop.f32.mrf.mxu1  ;;  %4512 = vmatpush1.bf16.msra.mxu0 %v5201_v50  ;;  %v883_v42 = vld [vmem:[%s6400_s16 + $0x170] sm:$0xff]  ;;  %v5378_v46 = vcombine.high %v1115_v62, %v1123_v1 }
 0x2e1   : > { %4555 = vmatpush1.bf16.msra.mxu1 %v5457_v47  ;;  %v4205_v19 = vpop.f32.mrf.mxu0  ;;  %4513 = vmatprep.subr.bf16.mxu0 %v5186_v49  ;;  %v5137_v3 = vcombine.low %v875_v41, %v883_v42  ;;  %v843_v50 = vld [vmem:[%s6400_s16 + $0x30] sm:$0xff]  ;;  %v5121_v7 = vcombine.low %v859_v59, %v867_v61 }
 0x2e2   : > { %5820 = vtanh.f32 %v5609_v14  ;;  %v5610_v23 = vclamps-f32 %v4245_v15, 5.0  ;;  %v4247_v24 = vadd.f32 %v4246_v17, %v4204_v16  ;;  %v4206_v25 = vadd.f32 %v4205_v19, %v1376_v57  ;;  %4556 = vmatprep.subr.bf16.mxu1 %v5442_v9  ;;  %v4248_v28 = vpop.f32.mrf.mxu1  ;;  %v1099_v49 = vld [vmem:[%s6400_s16 + $0x830] sm:$0xff] }
 0x2e3   : > { %v5138_v57 = vcombine.high %v875_v41, %v883_v42  ;;  %v5377_v9 = vcombine.low %v1115_v62, %v1123_v1  ;;  %v5106_v10 = vcombine.high %v843_v50, %v851_v36  ;;  %v5362_v13 = vcombine.high %v1099_v49, %v1107_v51  ;;  %v1083_v14 = vld [vmem:[%s6400_s16 + $0x7b0] sm:$0xff] }
 0x2e4   : > { %5822 = vtanh.f32 %v5610_v23  ;;  %v5625_v31 = vclamps-f32 %v4247_v24, 5.0  ;;  %v4249_v32 = vadd.f32 %v4248_v28, %v4206_v25  ;;  %4514 = vmatpush1.bf16.msra.mxu0 %v5185_v18  ;;  %v1091_v15 = vld [vmem:[%s6400_s16 + $0x7f0] sm:$0xff]  ;;  %v5361_v23 = vcombine.low %v1099_v49, %v1107_v51 }
 0x2e5   : > { %4557 = vmatpush1.bf16.msra.mxu1 %v5441_v20  ;;  %4515 = vmatprep.subr.bf16.mxu0 %v5170_v21  ;;  %v1339_v17 = vld [vmem:[%s6400_s16 + $0xfb0] sm:$0xff]  ;;  %v5105_v21 = vcombine.low %v843_v50, %v851_v36  ;;  %v5346_v24 = vcombine.high %v1083_v14, %v1091_v15 }
 0x2e6   : > { %5824 = vtanh.f32 %v5625_v31  ;;  %v5626_v38 = vclamps-f32 %v4249_v32, 5.0  ;;  %4558 = vmatprep.subr.bf16.mxu1 %v5426_v22  ;;  %v1347_v18 = vld [vmem:[%s6400_s16 + $0xff0] sm:$0xff] }
 0x2e7   : > { %v5602_v27 = vcombine.high %v1339_v17, %v1347_v18  ;;  %v1067_v28 = vld [vmem:[%s6400_s16 + $0x730] sm:$0xff] }
 0x2e8   : > { %5826 = vtanh.f32 %v5626_v38  ;;  %4516 = vmatpush1.bf16.msra.mxu0 %v5169_v33  ;;  %v1075_v29 = vld [vmem:[%s6400_s16 + $0x770] sm:$0xff]  ;;  %v5345_v33 = vcombine.low %v1083_v14, %v1091_v15 }
 0x2e9   : > { %4559 = vmatpush1.bf16.msra.mxu1 %v5425_v35  ;;  %4517 = vmatprep.subr.bf16.mxu0 %v5154_v37  ;;  %v1323_v30 = vld [vmem:[%s6400_s16 + $0xf30] sm:$0xff]  ;;  %v5601_v35 = vcombine.low %v1339_v17, %v1347_v18  ;;  %v5330_v37 = vcombine.high %v1067_v28, %v1075_v29  ;;  %v5329_v54 = vcombine.low %v1067_v28, %v1075_v29 }
 0x2ea   : > { %4560 = vmatprep.subr.bf16.mxu1 %v5410_v40  ;;  %v1331_v31 = vld [vmem:[%s6400_s16 + $0xf70] sm:$0xff] }
 0x2eb   : > { %v5586_v38 = vcombine.high %v1323_v30, %v1331_v31  ;;  %v1051_v40 = vld [vmem:[%s6400_s16 + $0x6b0] sm:$0xff] }
 0x2ec   : > { %4518 = vmatpush1.bf16.msra.mxu0 %v5153_v55  ;;  %v1059_v41 = vld [vmem:[%s6400_s16 + $0x6f0] sm:$0xff]  ;;  %v5585_v55 = vcombine.low %v1323_v30, %v1331_v31 }
 0x2ed   : > { %4561 = vmatpush1.bf16.msra.mxu1 %v5409_v56  ;;  %4519 = vmatprep.subr.bf16.mxu0 %v5138_v57  ;;  %v1307_v42 = vld [vmem:[%s6400_s16 + $0xeb0] sm:$0xff]  ;;  %v5314_v56 = vcombine.high %v1051_v40, %v1059_v41  ;;  %v5313_v1 = vcombine.low %v1051_v40, %v1059_v41  ;;  %v1379_v40 = vsub.s32 6, %v6494_v60 }
 0x2ee   : > { %4562 = vmatprep.subr.bf16.mxu1 %v5394_v58  ;;  %v1315_v43 = vld [vmem:[%s6400_s16 + $0xef0] sm:$0xff] }
 0x2ef   : > { %v5821_v47 = vpop.eup %5820  ;;  %v5570_v57 = vcombine.high %v1307_v42, %v1315_v43  ;;  %v1035_v58 = vld [vmem:[%s6400_s16 + $0x630] sm:$0xff] }
 0x2f0   : > { %v4781_v6 = vmul.f32 3.14159, %v5821_v47  ;;  %4520 = vmatpush1.bf16.msra.mxu0 %v5137_v3  ;;  %v1043_v59 = vld [vmem:[%s6400_s16 + $0x670] sm:$0xff]  ;;  %v5569_v3 = vcombine.low %v1307_v42, %v1315_v43 }
 0x2f1   : > { %v5823_v8 = vpop.eup %5822  ;;  %4563 = vmatpush1.bf16.msra.mxu1 %v5393_v5  ;;  %4521 = vmatprep.subr.bf16.mxu0 %v5122_v45  ;;  %v1291_v61 = vld [vmem:[%s6400_s16 + $0xe30] sm:$0xff]  ;;  %v5298_v5 = vcombine.high %v1035_v58, %v1043_v59  ;;  %v5297_v49 = vcombine.low %v1035_v58, %v1043_v59 }
 0x2f2   : > { %v4813_v11 = vadd.f32 3.14159, %v4781_v6  ;;  %v4782_v12 = vmul.f32 3.14159, %v5823_v8  ;;  %4564 = vmatprep.subr.bf16.mxu1 %v5378_v46  ;;  %v1299_v62 = vld [vmem:[%s6400_s16 + $0xe70] sm:$0xff] }
 0x2f3   : > { %v5825_v16 = vpop.eup %5824  ;;  %v5554_v45 = vcombine.high %v1291_v61, %v1299_v62  ;;  %v1019_v46 = vld [vmem:[%s6400_s16 + $0x5b0] sm:$0xff]  ;;  %v5553_v51 = vcombine.low %v1291_v61, %v1299_v62  ;;  %v1196_v61 = vld [vmem:[%s6400_s16 + $0xb38] sm:$0xff] }
 0x2f4   : > { %4845 = vst [vmem:[%s6779_s5 + $0x20] sm:$0xff] %v4813_v11  ;;  %v4814_v19 = vadd.f32 3.14159, %v4782_v12  ;;  %v4797_v20 = vmul.f32 3.14159, %v5825_v16  ;;  %4522 = vmatpush1.bf16.msra.mxu0 %v5121_v7  ;;  %v1027_v50 = vld [vmem:[%s6400_s16 + $0x5f0] sm:$0xff] }
 0x2f5   : > { %v5827_v22 = vpop.eup %5826  ;;  %4565 = vmatpush1.bf16.msra.mxu1 %v5377_v9  ;;  %4523 = vmatprep.subr.bf16.mxu0 %v5106_v10  ;;  %v1275_v36 = vld [vmem:[%s6400_s16 + $0xdb0] sm:$0xff]  ;;  %v5282_v6 = vcombine.high %v1019_v46, %v1027_v50  ;;  %v5281_v12 = vcombine.low %v1019_v46, %v1027_v50  ;;  %v1204_v62 = vld [vmem:[%s6400_s16 + $0xb78] sm:$0xff] }
 0x2f6   : > { %4846 = vst [vmem:[%s6779_s5 + $0x28] sm:$0xff] %v4814_v19  ;;  %v4829_v25 = vadd.f32 3.14159, %v4797_v20  ;;  %v4798_v26 = vmul.f32 3.14159, %v5827_v22  ;;  %4566 = vmatprep.subr.bf16.mxu1 %v5362_v13  ;;  %v1283_v47 = vld [vmem:[%s6400_s16 + $0xdf0] sm:$0xff] }
 0x2f7   : > { %v5538_v7 = vcombine.high %v1275_v36, %v1283_v47  ;;  %v1003_v8 = vld [vmem:[%s6400_s16 + $0x530] sm:$0xff]  ;;  %v5537_v13 = vcombine.low %v1275_v36, %v1283_v47  ;;  %v932_v46 = vld [vmem:[%s6400_s16 + $0x2f8] sm:$0xff]  ;;  %v5460_v36 = vcombine.high %v1196_v61, %v1204_v62 }
 0x2f8   : > { %4861 = vst [vmem:[%s6779_s5 + $0xa0] sm:$0xff] %v4829_v25  ;;  %v4830_v32 = vadd.f32 3.14159, %v4798_v26  ;;  %4524 = vmatpush1.bf16.msra.mxu0 %v5105_v21  ;;  %v1011_v9 = vld [vmem:[%s6400_s16 + $0x570] sm:$0xff]  ;;  %v1180_v47 = vld [vmem:[%s6400_s16 + $0xab8] sm:$0xff] }
 0x2f9   : > { %4567 = vmatpush1.bf16.msra.mxu1 %v5361_v23  ;;  %4525 = vmatprep.subr.bf16.mxu0 %v5346_v24  ;;  %v1259_v10 = vld [vmem:[%s6400_s16 + $0xd30] sm:$0xff]  ;;  %v5266_v14 = vcombine.high %v1003_v8, %v1011_v9  ;;  %v5265_v20 = vcombine.low %v1003_v8, %v1011_v9  ;;  %v5459_v9 = vcombine.low %v1196_v61, %v1204_v62  ;;  %v1140_v61 = vld [vmem:[%s6400_s16 + $0x978] sm:$0xff] }
 0x2fa   : > { %4862 = vst [vmem:[%s6779_s5 + $0xa8] sm:$0xff] %v4830_v32  ;;  %4568 = vmatprep.subr.bf16.mxu1 %v5602_v27  ;;  %v1267_v11 = vld [vmem:[%s6400_s16 + $0xd70] sm:$0xff]  ;;  %v956_v32 = vld [vmem:[%s6400_s16 + $0x3b8] sm:$0xff] }
 0x2fb   : > { %v5522_v15 = vcombine.high %v1259_v10, %v1267_v11  ;;  %v987_v16 = vld [vmem:[%s6400_s16 + $0x4b0] sm:$0xff]  ;;  %v5521_v21 = vcombine.low %v1259_v10, %v1267_v11  ;;  %v908_v11 = vld [vmem:[%s6400_s16 + $0x238] sm:$0xff] }
 0x2fc   : > { %4526 = vmatpush2.bf16.msra.mxu0 %v5345_v33  ;;  %v995_v17 = vld [vmem:[%s6400_s16 + $0x4f0] sm:$0xff]  ;;  %v964_v33 = vld [vmem:[%s6400_s16 + $0x3f8] sm:$0xff] }
 0x2fd   : > { %4569 = vmatpush2.bf16.msra.mxu1 %v5601_v35  ;;  %4527 = vmatprep.subr.bf16.mxu0 %v5330_v37  ;;  %v1243_v18 = vld [vmem:[%s6400_s16 + $0xcb0] sm:$0xff]  ;;  %v5250_v22 = vcombine.high %v987_v16, %v995_v17  ;;  %v5249_v28 = vcombine.low %v987_v16, %v995_v17  ;;  %v1212_v35 = vld [vmem:[%s6400_s16 + $0xbb8] sm:$0xff]  ;;  %v5220_v42 = vcombine.high %v956_v32, %v964_v33 }
 0x2fe   : > { %4570 = vmatprep.subr.bf16.mxu1 %v5586_v38  ;;  %v1251_v19 = vld [vmem:[%s6400_s16 + $0xcf0] sm:$0xff]  ;;  %v1220_v37 = vld [vmem:[%s6400_s16 + $0xbf8] sm:$0xff]  ;;  %v5219_v59 = vcombine.low %v956_v32, %v964_v33 }
 0x2ff   : > { %v5506_v23 = vcombine.high %v1243_v18, %v1251_v19  ;;  %v971_v24 = vld [vmem:[%s6400_s16 + $0x430] sm:$0xff]  ;;  %v5505_v29 = vcombine.low %v1243_v18, %v1251_v19  ;;  %v5476_v43 = vcombine.high %v1212_v35, %v1220_v37  ;;  %v916_v16 = vld [vmem:[%s6400_s16 + $0x278] sm:$0xff] }
 0x300   : > { %4528 = vmatpush2.bf16.msra.mxu0 %v5329_v54  ;;  %v979_v25 = vld [vmem:[%s6400_s16 + $0x470] sm:$0xff]  ;;  %v1383_v54 = vsub.s32 7, %v6494_v60  ;;  %v1164_v17 = vld [vmem:[%s6400_s16 + $0xa38] sm:$0xff] }
 0x301   : > { %4571 = vmatpush2.bf16.msra.mxu1 %v5585_v55  ;;  %4529 = vmatprep.subr.bf16.mxu0 %v5314_v56  ;;  %v1227_v26 = vld [vmem:[%s6400_s16 + $0xc30] sm:$0xff]  ;;  %v5234_v30 = vcombine.high %v971_v24, %v979_v25  ;;  %v5233_v38 = vcombine.low %v971_v24, %v979_v25  ;;  %v940_v55 = vld [vmem:[%s6400_s16 + $0x338] sm:$0xff]  ;;  %v5172_v25 = vcombine.high %v908_v11, %v916_v16 }
 0x302   : > { %4572 = vmatprep.subr.bf16.mxu1 %v5570_v57  ;;  %v1235_v27 = vld [vmem:[%s6400_s16 + $0xc70] sm:$0xff]  ;;  %v948_v56 = vld [vmem:[%s6400_s16 + $0x378] sm:$0xff] }
 0x303   : > { %v5490_v31 = vcombine.high %v1227_v26, %v1235_v27  ;;  %v5489_v41 = vcombine.low %v1227_v26, %v1235_v27  ;;  %v5868_v57 = vld [vmem:[%s6733_s15] sm:$0xff]  ;;  %v1172_v18 = vld [vmem:[%s6400_s16 + $0xa78] sm:$0xff] }
 0x304   : > { %4530 = vmatpush2.bf16.msra.mxu0 %v5313_v1  ;;  %v1380_v58 = vrot.slane %v5868_v57, %v1379_v40  ;;  %v5475_v1 = vcombine.low %v1212_v35, %v1220_v37  ;;  %v5428_v26 = vcombine.high %v1164_v17, %v1172_v18  ;;  %v1148_v33 = vld [vmem:[%s6400_s16 + $0x9b8] sm:$0xff] }
 0x305   : > { %4573 = vmatpush2.bf16.msra.mxu1 %v5569_v3  ;;  %4531 = vmatprep.subr.bf16.mxu0 %v5298_v5  ;;  %v1384_v3 = vrot.slane %v5868_v57, %v1383_v54  ;;  %v5204_v5 = vcombine.high %v940_v55, %v948_v56  ;;  %v1156_v35 = vld [vmem:[%s6400_s16 + $0x9f8] sm:$0xff] }
 0x306   : > { %4574 = vmatprep.subr.bf16.mxu1 %v5554_v45  ;;  %v924_v45 = vld [vmem:[%s6400_s16 + $0x2b8] sm:$0xff] }
 0x307   : > { %v5188_v10 = vcombine.high %v924_v45, %v932_v46  ;;  %v876_v57 = vld [vmem:[%s6400_s16 + $0x138] sm:$0xff] }
 0x308   : > { %4532 = vmatpush2.bf16.msra.mxu0 %v5297_v49  ;;  %v1188_v49 = vld [vmem:[%s6400_s16 + $0xaf8] sm:$0xff] }
 0x309   : > { %4575 = vmatpush2.bf16.msra.mxu1 %v5553_v51  ;;  %4533 = vmatprep.subr.bf16.mxu0 %v5282_v6  ;;  %v5443_v24 = vcombine.low %v1180_v47, %v1188_v49 }
 0x30a   : > { %4576 = vmatprep.subr.bf16.mxu1 %v5538_v7  ;;  %v5203_v7 = vcombine.low %v940_v55, %v948_v56  ;;  %v5412_v56 = vcombine.high %v1148_v33, %v1156_v35 }
 0x30c   : > { %4534 = vmatpush2.bf16.msra.mxu0 %v5281_v12 }
 0x30d   : > { %4577 = vmatpush2.bf16.msra.mxu1 %v5537_v13  ;;  %4535 = vmatprep.subr.bf16.mxu0 %v5266_v14 }
 0x30e   : > { %4578 = vmatprep.subr.bf16.mxu1 %v5522_v15  ;;  %v5444_v15 = vcombine.high %v1180_v47, %v1188_v49 }
 0x310   : > { %4536 = vmatpush2.bf16.msra.mxu0 %v5265_v20 }
 0x311   : > { %4579 = vmatpush2.bf16.msra.mxu1 %v5521_v21  ;;  %4537 = vmatprep.subr.bf16.mxu0 %v5250_v22 }
 0x312   : > { %4580 = vmatprep.subr.bf16.mxu1 %v5506_v23  ;;  %v5187_v23 = vcombine.low %v924_v45, %v932_v46  ;;  %v860_v45 = vld [vmem:[%s6400_s16 + $0xb8] sm:$0xff] }
 0x313   : > { %v868_v46 = vld [vmem:[%s6400_s16 + $0xf8] sm:$0xff] }
 0x314   : > { %4538 = vmatpush2.bf16.msra.mxu0 %v5249_v28 }
 0x315   : > { %4581 = vmatpush2.bf16.msra.mxu1 %v5505_v29  ;;  %4539 = vmatprep.subr.bf16.mxu0 %v5234_v30  ;;  %v892_v30 = vld [vmem:[%s6400_s16 + $0x1b8] sm:$0xff] }
 0x316   : > { %4582 = vmatprep.subr.bf16.mxu1 %v5490_v31  ;;  %v900_v31 = vld [vmem:[%s6400_s16 + $0x1f8] sm:$0xff] }
 0x317   : > { %v5155_v62 = vcombine.low %v892_v30, %v900_v31 }
 0x318   : > { %4540 = vmatpush2.bf16.msra.mxu0 %v5233_v38 }
 0x319   : > { %4583 = vmatpush2.bf16.msra.mxu1 %v5489_v41  ;;  %4595 = vmatprep.subr.bf16.mxu0 %v5220_v42  ;;  %v5171_v41 = vcombine.low %v908_v11, %v916_v16  ;;  %v5427_v42 = vcombine.low %v1164_v17, %v1172_v18  ;;  %v1108_v11 = vld [vmem:[%s6400_s16 + $0x878] sm:$0xff] }
 0x31a   : > { %4638 = vmatprep.subr.bf16.mxu1 %v5476_v43  ;;  %v5156_v43 = vcombine.high %v892_v30, %v900_v31 }
 0x31b   : > { %v4285_v50 = vpop.f32.mrf.mxu0  ;;  %4542 = vmatmul.mubr.bf16.vlgmr.msra.gmra.mxu0 %v6520_v52 }
 0x31c   : > { %v4286_v51 = vadd.f32 %v4285_v50, %v1380_v58  ;;  %v4328_v6 = vpop.f32.mrf.mxu1  ;;  %4585 = vmatmul.mubr.bf16.vlgmr.msra.gmra.mxu1 %v6522_v53  ;;  %4596 = vmatpush1.bf16.msra.mxu0 %v5219_v59  ;;  %v1132_v59 = vld [vmem:[%s6400_s16 + $0x938] sm:$0xff] }
 0x31d   : > { %4627 = vmatprep.mubr.bf16.mxu0 %v6516_v44  ;;  %4639 = vmatpush1.bf16.msra.mxu1 %v5475_v1  ;;  %v4287_v8 = vpop.f32.mrf.mxu0  ;;  %v5411_v1 = vcombine.low %v1148_v33, %v1156_v35  ;;  %v1116_v50 = vld [vmem:[%s6400_s16 + $0x8b8] sm:$0xff]  ;;  %v5395_v49 = vcombine.low %v1132_v59, %v1140_v61 }
 0x31e   : > { %v4329_v12 = vadd.f32 %v4328_v6, %v4286_v51  ;;  %4670 = vmatprep.mubr.bf16.mxu1 %v6518_v48  ;;  %v4288_v13 = vadd.f32 %v4287_v8, %v1384_v3  ;;  %v4330_v14 = vpop.f32.mrf.mxu1  ;;  %4597 = vmatprep.subr.bf16.mxu0 %v5204_v5  ;;  %v5396_v5 = vcombine.high %v1132_v59, %v1140_v61  ;;  %v852_v8 = vld [vmem:[%s6400_s16 + $0x78] sm:$0xff] }
 0x31f   : > { %v4289_v19 = vpop.f32.mrf.mxu0  ;;  %4640 = vmatprep.subr.bf16.mxu1 %v5460_v36  ;;  %v1124_v36 = vld [vmem:[%s6400_s16 + $0x8f8] sm:$0xff]  ;;  %v5124_v51 = vcombine.high %v860_v45, %v868_v46 }
 0x320   : > { %v5611_v20 = vclamps-f32 %v4329_v12, 5.0  ;;  %v4331_v21 = vadd.f32 %v4330_v14, %v4288_v13  ;;  %v4290_v44 = vadd.f32 %v4289_v19, %v1380_v58  ;;  %v4332_v22 = vpop.f32.mrf.mxu1  ;;  %4598 = vmatpush1.bf16.msra.mxu0 %v5203_v7  ;;  %v884_v58 = vld [vmem:[%s6400_s16 + $0x178] sm:$0xff]  ;;  %v5380_v6 = vcombine.high %v1116_v50, %v1124_v36 }
 0x321   : > { %4641 = vmatpush1.bf16.msra.mxu1 %v5459_v9  ;;  %v4291_v48 = vpop.f32.mrf.mxu0  ;;  %4599 = vmatprep.subr.bf16.mxu0 %v5188_v10  ;;  %v5139_v47 = vcombine.low %v876_v57, %v884_v58  ;;  %v844_v7 = vld [vmem:[%s6400_s16 + $0x38] sm:$0xff]  ;;  %v5123_v13 = vcombine.low %v860_v45, %v868_v46 }
 0x322   : > { %5828 = vtanh.f32 %v5611_v20  ;;  %v5612_v27 = vclamps-f32 %v4331_v21, 5.0  ;;  %v4333_v28 = vadd.f32 %v4332_v22, %v4290_v44  ;;  %v4292_v29 = vadd.f32 %v4291_v48, %v1384_v3  ;;  %4642 = vmatprep.subr.bf16.mxu1 %v5444_v15  ;;  %v4334_v32 = vpop.f32.mrf.mxu1  ;;  %v1100_v10 = vld [vmem:[%s6400_s16 + $0x838] sm:$0xff] }
 0x323   : > { %v5140_v3 = vcombine.high %v876_v57, %v884_v58  ;;  %v5379_v15 = vcombine.low %v1116_v50, %v1124_v36  ;;  %v5108_v16 = vcombine.high %v844_v7, %v852_v8  ;;  %v5364_v19 = vcombine.high %v1100_v10, %v1108_v11  ;;  %v1084_v20 = vld [vmem:[%s6400_s16 + $0x7b8] sm:$0xff] }
 0x324   : > { %5830 = vtanh.f32 %v5612_v27  ;;  %v5627_v37 = vclamps-f32 %v4333_v28, 5.0  ;;  %v4335_v38 = vadd.f32 %v4334_v32, %v4292_v29  ;;  %4600 = vmatpush1.bf16.msra.mxu0 %v5187_v23  ;;  %v1092_v21 = vld [vmem:[%s6400_s16 + $0x7f8] sm:$0xff]  ;;  %v5363_v27 = vcombine.low %v1100_v10, %v1108_v11 }
 0x325   : > { %4643 = vmatpush1.bf16.msra.mxu1 %v5443_v24  ;;  %4601 = vmatprep.subr.bf16.mxu0 %v5172_v25  ;;  %v1340_v22 = vld [vmem:[%s6400_s16 + $0xfb8] sm:$0xff]  ;;  %v5107_v25 = vcombine.low %v844_v7, %v852_v8  ;;  %v5348_v28 = vcombine.high %v1084_v20, %v1092_v21 }
 0x326   : > { %5832 = vtanh.f32 %v5627_v37  ;;  %v5628_v55 = vclamps-f32 %v4335_v38, 5.0  ;;  %4644 = vmatprep.subr.bf16.mxu1 %v5428_v26  ;;  %v1348_v23 = vld [vmem:[%s6400_s16 + $0xff8] sm:$0xff] }
 0x327   : > { %v5604_v31 = vcombine.high %v1340_v22, %v1348_v23  ;;  %v1068_v32 = vld [vmem:[%s6400_s16 + $0x738] sm:$0xff] }
 0x328   : > { %5834 = vtanh.f32 %v5628_v55  ;;  %4602 = vmatpush1.bf16.msra.mxu0 %v5171_v41  ;;  %v1076_v33 = vld [vmem:[%s6400_s16 + $0x778] sm:$0xff]  ;;  %v5347_v41 = vcombine.low %v1084_v20, %v1092_v21 }
 0x329   : > { %4645 = vmatpush1.bf16.msra.mxu1 %v5427_v42  ;;  %4603 = vmatprep.subr.bf16.mxu0 %v5156_v43  ;;  %v1324_v35 = vld [vmem:[%s6400_s16 + $0xf38] sm:$0xff]  ;;  %v5603_v42 = vcombine.low %v1340_v22, %v1348_v23  ;;  %v5332_v43 = vcombine.high %v1068_v32, %v1076_v33  ;;  %v5331_v61 = vcombine.low %v1068_v32, %v1076_v33 }
 0x32a   : > { %4646 = vmatprep.subr.bf16.mxu1 %v5412_v56  ;;  %v1332_v37 = vld [vmem:[%s6400_s16 + $0xf78] sm:$0xff] }
 0x32b   : > { %v5588_v55 = vcombine.high %v1324_v35, %v1332_v37  ;;  %v1052_v56 = vld [vmem:[%s6400_s16 + $0x6b8] sm:$0xff] }
 0x32c   : > { %4604 = vmatpush1.bf16.msra.mxu0 %v5155_v62  ;;  %v1060_v57 = vld [vmem:[%s6400_s16 + $0x6f8] sm:$0xff]  ;;  %v5587_v62 = vcombine.low %v1324_v35, %v1332_v37 }
 0x32d   : > { %4647 = vmatpush1.bf16.msra.mxu1 %v5411_v1  ;;  %4605 = vmatprep.subr.bf16.mxu0 %v5140_v3  ;;  %v1308_v58 = vld [vmem:[%s6400_s16 + $0xeb8] sm:$0xff]  ;;  %v5316_v1 = vcombine.high %v1052_v56, %v1060_v57  ;;  %v5315_v36 = vcombine.low %v1052_v56, %v1060_v57 }
 0x32e   : > { %4648 = vmatprep.subr.bf16.mxu1 %v5396_v5  ;;  %v1316_v59 = vld [vmem:[%s6400_s16 + $0xef8] sm:$0xff] }
 0x32f   : > { %v5829_v9 = vpop.eup %5828  ;;  %v5572_v3 = vcombine.high %v1308_v58, %v1316_v59  ;;  %v1036_v5 = vld [vmem:[%s6400_s16 + $0x638] sm:$0xff] }
 0x330   : > { %v4783_v12 = vmul.f32 3.14159, %v5829_v9  ;;  %4606 = vmatpush1.bf16.msra.mxu0 %v5139_v47  ;;  %v1044_v45 = vld [vmem:[%s6400_s16 + $0x678] sm:$0xff]  ;;  %v5571_v47 = vcombine.low %v1308_v58, %v1316_v59 }
 0x331   : > { %v5831_v14 = vpop.eup %5830  ;;  %4649 = vmatpush1.bf16.msra.mxu1 %v5395_v49  ;;  %4607 = vmatprep.subr.bf16.mxu0 %v5124_v51  ;;  %v1292_v46 = vld [vmem:[%s6400_s16 + $0xe38] sm:$0xff]  ;;  %v5300_v49 = vcombine.high %v1036_v5, %v1044_v45  ;;  %v5299_v10 = vcombine.low %v1036_v5, %v1044_v45 }
 0x332   : > { %v4815_v17 = vadd.f32 3.14159, %v4783_v12  ;;  %v4784_v18 = vmul.f32 3.14159, %v5831_v14  ;;  %4650 = vmatprep.subr.bf16.mxu1 %v5380_v6  ;;  %v1300_v50 = vld [vmem:[%s6400_s16 + $0xe78] sm:$0xff] }
 0x333   : > { %v5833_v44 = vpop.eup %5832  ;;  %v5556_v51 = vcombine.high %v1292_v46, %v1300_v50  ;;  %v1020_v6 = vld [vmem:[%s6400_s16 + $0x5b8] sm:$0xff]  ;;  %v5555_v11 = vcombine.low %v1292_v46, %v1300_v50 }
 0x334   : > { %4847 = vst [vmem:[%s6779_s5 + $0x30] sm:$0xff] %v4815_v17  ;;  %v4816_v48 = vadd.f32 3.14159, %v4784_v18  ;;  %v4799_v24 = vmul.f32 3.14159, %v5833_v44  ;;  %4608 = vmatpush1.bf16.msra.mxu0 %v5123_v13  ;;  %v1028_v7 = vld [vmem:[%s6400_s16 + $0x5f8] sm:$0xff] }
 0x335   : > { %v5835_v26 = vpop.eup %5834  ;;  %4651 = vmatpush1.bf16.msra.mxu1 %v5379_v15  ;;  %4609 = vmatprep.subr.bf16.mxu0 %v5108_v16  ;;  %v1276_v8 = vld [vmem:[%s6400_s16 + $0xdb8] sm:$0xff]  ;;  %v5284_v12 = vcombine.high %v1020_v6, %v1028_v7  ;;  %v5283_v18 = vcombine.low %v1020_v6, %v1028_v7 }
 0x336   : > { %4848 = vst [vmem:[%s6779_s5 + $0x38] sm:$0xff] %v4816_v48  ;;  %v4831_v29 = vadd.f32 3.14159, %v4799_v24  ;;  %v4800_v30 = vmul.f32 3.14159, %v5835_v26  ;;  %4652 = vmatprep.subr.bf16.mxu1 %v5364_v19  ;;  %v1284_v9 = vld [vmem:[%s6400_s16 + $0xdf8] sm:$0xff] }
 0x337   : > { %v5540_v13 = vcombine.high %v1276_v8, %v1284_v9  ;;  %v1004_v14 = vld [vmem:[%s6400_s16 + $0x538] sm:$0xff]  ;;  %v5539_v19 = vcombine.low %v1276_v8, %v1284_v9 }
 0x338   : > { %4863 = vst [vmem:[%s6779_s5 + $0xb0] sm:$0xff] %v4831_v29  ;;  %v4832_v38 = vadd.f32 3.14159, %v4800_v30  ;;  %4610 = vmatpush1.bf16.msra.mxu0 %v5107_v25  ;;  %v1012_v15 = vld [vmem:[%s6400_s16 + $0x578] sm:$0xff] }
 0x339   : > { %4653 = vmatpush1.bf16.msra.mxu1 %v5363_v27  ;;  %4611 = vmatprep.subr.bf16.mxu0 %v5348_v28  ;;  %v1260_v16 = vld [vmem:[%s6400_s16 + $0xd38] sm:$0xff]  ;;  %v5268_v20 = vcombine.high %v1004_v14, %v1012_v15  ;;  %v5267_v24 = vcombine.low %v1004_v14, %v1012_v15 }
 0x33a   : > { %4864 = vst [vmem:[%s6779_s5 + $0xb8] sm:$0xff] %v4832_v38  ;;  %4654 = vmatprep.subr.bf16.mxu1 %v5604_v31  ;;  %v1268_v17 = vld [vmem:[%s6400_s16 + $0xd78] sm:$0xff] }
 0x33b   : > { %v5524_v21 = vcombine.high %v1260_v16, %v1268_v17  ;;  %v988_v44 = vld [vmem:[%s6400_s16 + $0x4b8] sm:$0xff]  ;;  %v5523_v25 = vcombine.low %v1260_v16, %v1268_v17 }
 0x33c   : > { %4612 = vmatpush2.bf16.msra.mxu0 %v5347_v41  ;;  %v996_v22 = vld [vmem:[%s6400_s16 + $0x4f8] sm:$0xff] }
 0x33d   : > { %4655 = vmatpush2.bf16.msra.mxu1 %v5603_v42  ;;  %4613 = vmatprep.subr.bf16.mxu0 %v5332_v43  ;;  %v1244_v23 = vld [vmem:[%s6400_s16 + $0xcb8] sm:$0xff]  ;;  %v5252_v26 = vcombine.high %v988_v44, %v996_v22  ;;  %v5251_v32 = vcombine.low %v988_v44, %v996_v22 }
 0x33e   : > { %4656 = vmatprep.subr.bf16.mxu1 %v5588_v55  ;;  %v1252_v48 = vld [vmem:[%s6400_s16 + $0xcf8] sm:$0xff] }
 0x33f   : > { %v5508_v27 = vcombine.high %v1244_v23, %v1252_v48  ;;  %v972_v28 = vld [vmem:[%s6400_s16 + $0x438] sm:$0xff]  ;;  %v5507_v33 = vcombine.low %v1244_v23, %v1252_v48 }
 0x340   : > { %4614 = vmatpush2.bf16.msra.mxu0 %v5331_v61  ;;  %v980_v29 = vld [vmem:[%s6400_s16 + $0x478] sm:$0xff] }
 0x341   : > { %4657 = vmatpush2.bf16.msra.mxu1 %v5587_v62  ;;  %4615 = vmatprep.subr.bf16.mxu0 %v5316_v1  ;;  %v1228_v30 = vld [vmem:[%s6400_s16 + $0xc38] sm:$0xff]  ;;  %v5236_v35 = vcombine.high %v972_v28, %v980_v29  ;;  %v5235_v38 = vcombine.low %v972_v28, %v980_v29 }
 0x342   : > { %4658 = vmatprep.subr.bf16.mxu1 %v5572_v3  ;;  %v1236_v31 = vld [vmem:[%s6400_s16 + $0xc78] sm:$0xff] }
 0x343   : > { %v5492_v37 = vcombine.high %v1228_v30, %v1236_v31  ;;  %v5491_v41 = vcombine.low %v1228_v30, %v1236_v31  ;;  %v7049_v42 = vld [vmem:[%s6733_s15 + $0x8] sm:$0xff] }
 0x344   : > { %4616 = vmatpush2.bf16.msra.mxu0 %v5315_v36  ;;  %v1388_v43 = vrot.slane %v7049_v42, %v6503_v2  ;;  %v1392_v55 = vrot.slane %v7049_v42, %v6497_v63 }
 0x345   : > { %4659 = vmatpush2.bf16.msra.mxu1 %v5571_v47  ;;  %4617 = vmatprep.subr.bf16.mxu0 %v5300_v49 }
 0x346   : > { %4660 = vmatprep.subr.bf16.mxu1 %v5556_v51 }
 0x348   : > { %4618 = vmatpush2.bf16.msra.mxu0 %v5299_v10 }
 0x349   : > { %4661 = vmatpush2.bf16.msra.mxu1 %v5555_v11  ;;  %4619 = vmatprep.subr.bf16.mxu0 %v5284_v12 }
 0x34a   : > { %4662 = vmatprep.subr.bf16.mxu1 %v5540_v13 }
 0x34c   : > { %4620 = vmatpush2.bf16.msra.mxu0 %v5283_v18  ;;  %v1396_v18 = vrot.slane %v7049_v42, %v6506_v4 }
 0x34d   : > { %4663 = vmatpush2.bf16.msra.mxu1 %v5539_v19  ;;  %4621 = vmatprep.subr.bf16.mxu0 %v5268_v20  ;;  %v1400_v19 = vrot.slane %v7049_v42, %v6500_v0 }
 0x34e   : > { %4664 = vmatprep.subr.bf16.mxu1 %v5524_v21 }
 0x350   : > { %4622 = vmatpush2.bf16.msra.mxu0 %v5267_v24 }
 0x351   : > { %4665 = vmatpush2.bf16.msra.mxu1 %v5523_v25  ;;  %4623 = vmatprep.subr.bf16.mxu0 %v5252_v26 }
 0x352   : > { %4666 = vmatprep.subr.bf16.mxu1 %v5508_v27 }
 0x354   : > { %4624 = vmatpush2.bf16.msra.mxu0 %v5251_v32 }
 0x355   : > { %4667 = vmatpush2.bf16.msra.mxu1 %v5507_v33  ;;  %4625 = vmatprep.subr.bf16.mxu0 %v5236_v35 }
 0x356   : > { %4668 = vmatprep.subr.bf16.mxu1 %v5492_v37 }
 0x358   : > { %4626 = vmatpush2.bf16.msra.mxu0 %v5235_v38 }
 0x359   : > { %4669 = vmatpush2.bf16.msra.mxu1 %v5491_v41 }
 0x35b   : > { %v4371_v56 = vpop.f32.mrf.mxu0  ;;  %4628 = vmatmul.mubr.bf16.vlgmr.msra.gmra.mxu0 %v6520_v52 }
 0x35c   : > { %v4372_v57 = vadd.f32 %v4371_v56, %v1388_v43  ;;  %v4414_v58 = vpop.f32.mrf.mxu1  ;;  %4671 = vmatmul.mubr.bf16.vlgmr.msra.gmra.mxu1 %v6522_v53 }
 0x35d   : > { %v4373_v59 = vpop.f32.mrf.mxu0 }
 0x35e   : > { %v4415_v61 = vadd.f32 %v4414_v58, %v4372_v57  ;;  %v4374_v62 = vadd.f32 %v4373_v59, %v1392_v55  ;;  %v4416_v1 = vpop.f32.mrf.mxu1 }
 0x35f   : > { %v4375_v3 = vpop.f32.mrf.mxu0 }
 0x360   : > { %v5613_v5 = vclamps-f32 %v4415_v61, 5.0  ;;  %v4417_v45 = vadd.f32 %v4416_v1, %v4374_v62  ;;  %v4376_v46 = vadd.f32 %v4375_v3, %v1388_v43  ;;  %v4418_v2 = vpop.f32.mrf.mxu1 }
 0x361   : > { %v4377_v50 = vpop.f32.mrf.mxu0 }
 0x362   : > { %5836 = vtanh.f32 %v5613_v5  ;;  %v5614_v36 = vclamps-f32 %v4417_v45, 5.0  ;;  %v4419_v63 = vadd.f32 %v4418_v2, %v4376_v46  ;;  %v4378_v47 = vadd.f32 %v4377_v50, %v1392_v55  ;;  %v4420_v52 = vpop.f32.mrf.mxu1 }
 0x363   : > { %v1404_v5 = vrot.slane %v7049_v42, %v1371_v34  ;;  %v1408_v45 = vrot.slane %v7049_v42, %v1375_v39 }
 0x364   : > { %5838 = vtanh.f32 %v5614_v36  ;;  %v5629_v49 = vclamps-f32 %v4419_v63, 5.0  ;;  %v4421_v53 = vadd.f32 %v4420_v52, %v4378_v47 }
 0x366   : > { %5840 = vtanh.f32 %v5629_v49  ;;  %v5630_v51 = vclamps-f32 %v4421_v53, 5.0 }
 0x368   : > { %5842 = vtanh.f32 %v5630_v51 }
 0x36f   : > { %v5837_v6 = vpop.eup %5836 }
 0x370   : > { %v4785_v7 = vmul.f32 3.14159, %v5837_v6 }
 0x371   : > { %v5839_v8 = vpop.eup %5838 }
 0x372   : > { %v4817_v9 = vadd.f32 3.14159, %v4785_v7  ;;  %v4786_v10 = vmul.f32 3.14159, %v5839_v8 }
 0x373   : > { %v5841_v11 = vpop.eup %5840 }
 0x374   : > { %4849 = vst [vmem:[%s6779_s5 + $0x40] sm:$0xff] %v4817_v9  ;;  %v4818_v12 = vadd.f32 3.14159, %v4786_v10  ;;  %v4801_v13 = vmul.f32 3.14159, %v5841_v11 }
 0x375   : > { %v5843_v14 = vpop.eup %5842 }
 0x376   : > { %4850 = vst [vmem:[%s6779_s5 + $0x48] sm:$0xff] %v4818_v12  ;;  %v4833_v15 = vadd.f32 3.14159, %v4801_v13  ;;  %v4802_v16 = vmul.f32 3.14159, %v5843_v14 }
 0x378   : > { %4865 = vst [vmem:[%s6779_s5 + $0xc0] sm:$0xff] %v4833_v15  ;;  %v4834_v17 = vadd.f32 3.14159, %v4802_v16 }
 0x37a   : > { %4866 = vst [vmem:[%s6779_s5 + $0xc8] sm:$0xff] %v4834_v17 }
 0x39b   : > { %v4457_v20 = vpop.f32.mrf.mxu0 }
 0x39c   : > { %v4458_v21 = vadd.f32 %v4457_v20, %v1396_v18  ;;  %v4500_v44 = vpop.f32.mrf.mxu1 }
 0x39d   : > { %v4459_v22 = vpop.f32.mrf.mxu0 }
 0x39e   : > { %v4501_v23 = vadd.f32 %v4500_v44, %v4458_v21  ;;  %v4460_v48 = vadd.f32 %v4459_v22, %v1400_v19  ;;  %v4502_v24 = vpop.f32.mrf.mxu1 }
 0x39f   : > { %v4461_v25 = vpop.f32.mrf.mxu0 }
 0x3a0   : > { %v5615_v26 = vclamps-f32 %v4501_v23, 5.0  ;;  %v4503_v27 = vadd.f32 %v4502_v24, %v4460_v48  ;;  %v4462_v28 = vadd.f32 %v4461_v25, %v1396_v18  ;;  %v4504_v29 = vpop.f32.mrf.mxu1  ;;  %v1412_v24 = vrot.slane %v7049_v42, %v1379_v40 }
 0x3a1   : > { %v4463_v30 = vpop.f32.mrf.mxu0  ;;  %v1416_v25 = vrot.slane %v7049_v42, %v1383_v54 }
 0x3a2   : > { %5844 = vtanh.f32 %v5615_v26  ;;  %v5616_v31 = vclamps-f32 %v4503_v27, 5.0  ;;  %v4505_v4 = vadd.f32 %v4504_v29, %v4462_v28  ;;  %v4464_v32 = vadd.f32 %v4463_v30, %v1400_v19  ;;  %v4506_v33 = vpop.f32.mrf.mxu1 }
 0x3a4   : > { %5846 = vtanh.f32 %v5616_v31  ;;  %v5631_v0 = vclamps-f32 %v4505_v4, 5.0  ;;  %v4507_v35 = vadd.f32 %v4506_v33, %v4464_v32 }
 0x3a6   : > { %5848 = vtanh.f32 %v5631_v0  ;;  %v5632_v37 = vclamps-f32 %v4507_v35, 5.0 }
 0x3a8   : > { %5850 = vtanh.f32 %v5632_v37 }
 0x3af   : > { %v5845_v38 = vpop.eup %5844 }
 0x3b0   : > { %v4787_v41 = vmul.f32 3.14159, %v5845_v38 }
 0x3b1   : > { %v5847_v43 = vpop.eup %5846 }
 0x3b2   : > { %v4819_v55 = vadd.f32 3.14159, %v4787_v41  ;;  %v4788_v56 = vmul.f32 3.14159, %v5847_v43 }
 0x3b3   : > { %v5849_v57 = vpop.eup %5848 }
 0x3b4   : > { %4851 = vst [vmem:[%s6779_s5 + $0x50] sm:$0xff] %v4819_v55  ;;  %v4820_v58 = vadd.f32 3.14159, %v4788_v56  ;;  %v4803_v59 = vmul.f32 3.14159, %v5849_v57 }
 0x3b5   : > { %v5851_v61 = vpop.eup %5850 }
 0x3b6   : > { %4852 = vst [vmem:[%s6779_s5 + $0x58] sm:$0xff] %v4820_v58  ;;  %v4835_v62 = vadd.f32 3.14159, %v4803_v59  ;;  %v4804_v1 = vmul.f32 3.14159, %v5851_v61 }
 0x3b8   : > { %4867 = vst [vmem:[%s6779_s5 + $0xd0] sm:$0xff] %v4835_v62  ;;  %v4836_v3 = vadd.f32 3.14159, %v4804_v1 }
 0x3ba   : > { %4868 = vst [vmem:[%s6779_s5 + $0xd8] sm:$0xff] %v4836_v3 }
 0x3db   : > { %v4543_v46 = vpop.f32.mrf.mxu0 }
 0x3dc   : > { %v4544_v2 = vadd.f32 %v4543_v46, %v1404_v5  ;;  %v4586_v50 = vpop.f32.mrf.mxu1 }
 0x3dd   : > { %v4545_v36 = vpop.f32.mrf.mxu0 }
 0x3de   : > { %v4587_v63 = vadd.f32 %v4586_v50, %v4544_v2  ;;  %v4546_v47 = vadd.f32 %v4545_v36, %v1408_v45  ;;  %v4588_v52 = vpop.f32.mrf.mxu1 }
 0x3df   : > { %v4547_v49 = vpop.f32.mrf.mxu0 }
 0x3e0   : > { %v5617_v53 = vclamps-f32 %v4587_v63, 5.0  ;;  %v4589_v51 = vadd.f32 %v4588_v52, %v4546_v47  ;;  %v4548_v6 = vadd.f32 %v4547_v49, %v1404_v5  ;;  %v4590_v7 = vpop.f32.mrf.mxu1 }
 0x3e1   : > { %v4549_v8 = vpop.f32.mrf.mxu0 }
 0x3e2   : > { %5852 = vtanh.f32 %v5617_v53  ;;  %v5618_v9 = vclamps-f32 %v4589_v51, 5.0  ;;  %v4591_v34 = vadd.f32 %v4590_v7, %v4548_v6  ;;  %v4550_v10 = vadd.f32 %v4549_v8, %v1408_v45  ;;  %v4592_v11 = vpop.f32.mrf.mxu1 }
 0x3e4   : > { %5854 = vtanh.f32 %v5618_v9  ;;  %v5633_v39 = vclamps-f32 %v4591_v34, 5.0  ;;  %v4593_v12 = vadd.f32 %v4592_v11, %v4550_v10 }
 0x3e6   : > { %5856 = vtanh.f32 %v5633_v39  ;;  %v5634_v13 = vclamps-f32 %v4593_v12, 5.0 }
 0x3e8   : > { %5858 = vtanh.f32 %v5634_v13 }
 0x3ef   : > { %v5853_v14 = vpop.eup %5852 }
 0x3f0   : > { %v4789_v15 = vmul.f32 3.14159, %v5853_v14 }
 0x3f1   : > { %v5855_v16 = vpop.eup %5854 }
 0x3f2   : > { %v4821_v17 = vadd.f32 3.14159, %v4789_v15  ;;  %v4790_v18 = vmul.f32 3.14159, %v5855_v16 }
 0x3f3   : > { %v5857_v19 = vpop.eup %5856 }
 0x3f4   : > { %4853 = vst [vmem:[%s6779_s5 + $0x60] sm:$0xff] %v4821_v17  ;;  %v4822_v20 = vadd.f32 3.14159, %v4790_v18  ;;  %v4805_v21 = vmul.f32 3.14159, %v5857_v19 }
 0x3f5   : > { %v5859_v44 = vpop.eup %5858 }
 0x3f6   : > { %4854 = vst [vmem:[%s6779_s5 + $0x68] sm:$0xff] %v4822_v20  ;;  %v4837_v22 = vadd.f32 3.14159, %v4805_v21  ;;  %v4806_v23 = vmul.f32 3.14159, %v5859_v44 }
 0x3f8   : > { %4869 = vst [vmem:[%s6779_s5 + $0xe0] sm:$0xff] %v4837_v22  ;;  %v4838_v48 = vadd.f32 3.14159, %v4806_v23 }
 0x3fa   : > { %4870 = vst [vmem:[%s6779_s5 + $0xe8] sm:$0xff] %v4838_v48 }
 0x41b   : > { %v4629_v26 = vpop.f32.mrf.mxu0 }
 0x41c   : > { %v4630_v27 = vadd.f32 %v4629_v26, %v1412_v24  ;;  %v4672_v28 = vpop.f32.mrf.mxu1 }
 0x41d   : > { %v4631_v29 = vpop.f32.mrf.mxu0 }
 0x41e   : > { %v4673_v30 = vadd.f32 %v4672_v28, %v4630_v27  ;;  %v4632_v31 = vadd.f32 %v4631_v29, %v1416_v25  ;;  %v4674_v4 = vpop.f32.mrf.mxu1 }
 0x41f   : > { %v4633_v32 = vpop.f32.mrf.mxu0 }
 0x420   : > { %v5619_v33 = vclamps-f32 %v4673_v30, 5.0  ;;  %v4675_v0 = vadd.f32 %v4674_v4, %v4632_v31  ;;  %v4634_v35 = vadd.f32 %v4633_v32, %v1412_v24  ;;  %v4676_v37 = vpop.f32.mrf.mxu1 }
 0x421   : > { %v4635_v38 = vpop.f32.mrf.mxu0 }
 0x422   : > { %5860 = vtanh.f32 %v5619_v33  ;;  %v5620_v41 = vclamps-f32 %v4675_v0, 5.0  ;;  %v4677_v40 = vadd.f32 %v4676_v37, %v4634_v35  ;;  %v4636_v60 = vadd.f32 %v4635_v38, %v1416_v25  ;;  %v4678_v54 = vpop.f32.mrf.mxu1 }
 0x424   : > { %5862 = vtanh.f32 %v5620_v41  ;;  %v5635_v42 = vclamps-f32 %v4677_v40, 5.0  ;;  %v4679_v43 = vadd.f32 %v4678_v54, %v4636_v60 }
 0x426   : > { %5864 = vtanh.f32 %v5635_v42  ;;  %v5636_v55 = vclamps-f32 %v4679_v43, 5.0 }
 0x428   : > { %5866 = vtanh.f32 %v5636_v55 }
 0x42f   : > { %v5861_v56 = vpop.eup %5860 }
 0x430   : > { %v4791_v57 = vmul.f32 3.14159, %v5861_v56 }
 0x431   : > { %v5863_v58 = vpop.eup %5862 }
 0x432   : > { %v4823_v59 = vadd.f32 3.14159, %v4791_v57  ;;  %v4792_v61 = vmul.f32 3.14159, %v5863_v58 }
 0x433   : > { %v5865_v62 = vpop.eup %5864 }
 0x434   : > { %4855 = vst [vmem:[%s6779_s5 + $0x70] sm:$0xff] %v4823_v59  ;;  %v4824_v1 = vadd.f32 3.14159, %v4792_v61  ;;  %v4807_v3 = vmul.f32 3.14159, %v5865_v62 }
 0x435   : > { %v5867_v5 = vpop.eup %5866 }
 0x436   : > { %4856 = vst [vmem:[%s6779_s5 + $0x78] sm:$0xff] %v4824_v1  ;;  %v4839_v45 = vadd.f32 3.14159, %v4807_v3  ;;  %v4808_v46 = vmul.f32 3.14159, %v5867_v5 }
 0x438   : > { %4871 = vst [vmem:[%s6779_s5 + $0xf0] sm:$0xff] %v4839_v45  ;;  %v4840_v2 = vadd.f32 3.14159, %v4808_v46 }
 0x43a   : > { %4872 = vst [vmem:[%s6779_s5 + $0xf8] sm:$0xff] %v4840_v2 }
 0x43b   : > { %6068 = shalt.err (!%p6065_p7)
}
 0x43c   : > { %s6069_s1 = scalar_lea.hbm %s7092_s23, 4096  ;;  %s6073_s16 = scalar_lea.hbm %s7146_s7, 8192 }
 0x43d   : > { %p6070_p13 = scmp.ne.s32.totalorder %s7092_s23, %s6069_s1  ;;  %p6074_p3 = scmp.lt.s32.totalorder %s7092_s23, %s7146_s7 }
 0x43e   : > { %p6075_p2 = scmp.lt.s32.totalorder %s6073_s16, %s6069_s1 }
 0x43f   : > { %p6071_p8 = pnand %p6070_p13, %p7186_p0 }
 0x440   : > { %p6076_p5 = por %p6075_p2, %p6074_p3 }
 0x441   : > { %p6072_p11 = pneg %p6071_p8 }
 0x443   : > { %p6077_p10 = pnand %p6076_p5, %p6072_p11 }
 0x445   : > { %6080 = shalt.err (!%p6077_p10)
}
 0x446   : > { %s6149_s22 = smov 2048   ;;  %s6150_s5 = smov 4096  }
 0x447   : > { %s6151_s12 = smov 128  }
 0x448   : > { %5669 = dma.vmem_to_hbm [thread:$0]  (%p7186_p0), %s7094_s3, 4096, %s7092_s23, %s4874_s28, %s6149_s22, %s6150_s5, %s6151_s12  }
 0x449 PF: > { %s4902_s17 = sand.u32 1, %s6119_s24   ;;  %p7187_p9 = scmp.ne.s32.totalorder %s7162_s8, 0 }
 0x44a   : > { %p7188_p1 = scmp.ge.s32.totalorder %s6131_s27, 2  ;;  %s4903_s18 = scalar_lea.sflag [#allocation4], %s4902_s17 }
 0x44c   : > { %p5695_p12 = pnand %p7188_p1, %p7187_p9 }
 0x44e   : > { %p5696_p4 = pneg %p5695_p12 }
 0x450   : > { %6114 = dma.done.wait (%p5696_p4), %s4903_s18, 4096  }
 0x451   : > { %6116 = vsyncadd (%p5696_p4), %s4903_s18, 4294963200  ;;  %s7189_s21 = sld [smem:[#allocation20_spill]]  ;;  %p23_p6 = scmp.ge.s32.totalorder %s6272_s11, 4  }
 0x452   : > { %s7190_s24 = smov %s6123_s25  ;;  %s7191_s25 = smov %s6127_s26 }
 0x453   : > { %s7193_s27 = smov %s6272_s11  ;;  %25 = sbr.rel (!%p23_p6) target bundleno = 12 (0xc), region = 125 }
 0x457   : > { %s7192_s26 = smov %s7189_s21 }
 0x458   :  { %4908 = vsyncpa [#allocation3], 1 }
 0x459   :  { %4910 = vsyncpa [#allocation3 + $0x1], 1 }
 0x45a   :  { %4911 = vsyncpa [#allocation6], 1 }
 0x45b   :  { %4912 = vsyncpa [#allocation9], 1 }
 0x45c   :  { %4913 = vsyncpa [#allocation12], 1 }
 0x45d   :  { %4915 = vsyncpa [#allocation12 + $0x1], 1 }
 0x45e   :  { %4916 = vsyncpa [#allocation4], 1 }
 0x45f   :  { %4918 = vsyncpa [#allocation4 + $0x1], 1 }

// kernel: tpu_custom_call.1
= control target key start
LH: loop header
LB: loop body
LE: loop exit
PB: predicated region body
PF: predicated region fallthrough
CT: control target
= control target key end

     0   :  { %s7139_s0 = inlined_call_operand.hbm [shape: f32[16,100], index: 0, kind: input, shape index: {}]   ;;  %s7140_s1 = inlined_call_operand.hbm [shape: f32[16,10], index: 1, kind: input, shape index: {}]   ;;  %s7141_s2 = inlined_call_operand.hbm [shape: bf16[100,512], index: 2, kind: input, shape index: {}]   ;;  %s7142_s3 = inlined_call_operand.hbm [shape: bf16[10,512], index: 3, kind: input, shape index: {}]   ;;  %s7143_s4 = inlined_call_operand.hbm [shape: f32[1,512], index: 4, kind: input, shape index: {}]   ;;  %s7144_s5 = inlined_call_operand.hbm [shape: bf16[512,4096], index: 5, kind: input, shape index: {}]   ;;  %s7145_s6 = inlined_call_operand.hbm [shape: f32[1,4096], index: 6, kind: input, shape index: {}]   ;;  %s7146_s7 = inlined_call_operand.hbm [shape: f32[16,4096], index: 7, kind: output, shape index: {}]  }
   0x1   :  { %7158 = sst [smem:[#allocation21_spill]] %s7140_s1 }
   0x2   :  { %7159 = sst [smem:[#allocation22_spill]] %s7142_s3 }
   0x3   :  { %7160 = sst [smem:[#allocation23_spill]] %s7144_s5 }
   0x4   :  { %12 = vsyncpa [#allocation3], 0 }
   0x5   :  { %13 = vsyncpa [#allocation6], 0 }
   0x6   :  { %14 = vsyncpa [#allocation9], 0 }
   0x7   :  { %15 = vsyncpa [#allocation12], 0 }
   0x8   :  { %17 = vsyncpa [#allocation12 + $0x1], 0 }
   0x9   :  { %18 = vsyncpa [#allocation4], 0 }
   0xa   :  { %20 = vsyncpa [#allocation4 + $0x1], 0  ;;  %s6192_s24 = smov 0   ;;  %s6194_s25 = smov 0  }
   0xb   :  { %s6196_s26 = smov 0   ;;  %s6198_s27 = smov 0  }
   0xc LB: > { %s6213_s28 = sadd.s32 4294967295, %s6131_s27   ;;  %s5030_s29 = sadd.s32 4294967294, %s6131_s27   ;;  %s6131_s27 = sphi %s6198_s27, %s7193_s27   ;;  %s6127_s26 = sphi %s6196_s26, %s7192_s26   ;;  %s6123_s25 = sphi %s6194_s25, %s7191_s25   ;;  %s6119_s24 = sphi %s6192_s24, %s7190_s24  }
   0xd   : > { %p151_p0 = scmp.ne.s32.totalorder %s6123_s25, %s6119_s24  ;;  %p7152_p1 = scmp.eq.s32.totalorder %s6213_s28, 0 }
   0xe   : > { %p201_p2 = scmp.eq.s32.totalorder %s6213_s28, 1  ;;  %p207_p3 = scmp.eq.s32.totalorder %s5030_s29, 1 }
   0xf   : > { %p6222_p4 = por %p7152_p1, %p151_p0  ;;  %p5031_p5 = scmp.ge.s32.totalorder %s6131_s27, 1 }
  0x10   : > { %p6227_p6 = por %p207_p3, %p151_p0  ;;  %p214_p7 = scmp.lt.s32.totalorder %s6131_s27, 3 }
  0x11   : > { %s7161_s30 = scalar_select %p6222_p4, 1, 0 }
  0x12   : > { %s7162_s8 = scalar_select %p6227_p6, 1, 0 }
  0x13   : > { %p6232_p8 = pnand %p5031_p5, %p214_p7  ;;  %s6133_s10 = smov [#allocation5]  }
  0x14   : > { %s239_s11 = sshll.u32 %s6133_s10, 4  ;;  %s6134_s13 = smov [#allocation8]   ;;  %s240_s11 = int_to_ptr.vmem [resolvable:$true] %s239_s11 }
  0x15   : > { %s7163_s9 = scalar_select %p6232_p8, 1, 0 }
  0x16   : > { %p5671_p10 = pneg %p6232_p8  ;;  %s265_s14 = sshll.u32 %s6134_s13, 4  ;;  %s266_s14 = int_to_ptr.vmem [resolvable:$true] %s265_s14 }
  0x17   : > { %s5880_s16 = scalar_lea.vmem %s240_s11, 256  ;;  %p5888_p5 = scmp.lt.s32.totalorder %s240_s11, %s240_s11 }
  0x18   : > { %p6241_p11 = pnand %p5671_p10, %p7152_p1  ;;  %p5881_p13 = scmp.ne.s32.totalorder %s240_s11, %s5880_s16 }
  0x19   : > { %p5889_p7 = scmp.lt.s32.totalorder %s5880_s16, %s5880_s16 }
  0x1a   : > { %s7164_s12 = scalar_select %p6241_p11, 1, 0 }
  0x1b   : > { %p6247_p12 = pneg %p6241_p11  ;;  %p5890_p10 = por %p5889_p7, %p5888_p5 }
  0x1d   : > { %p5883_p0 = pnand %p5881_p13, %p6247_p12 }
  0x1f   : > { %p5884_p3 = pneg %p5883_p0 }
  0x21   : > { %p5891_p9 = pnand %p5890_p10, %p5884_p3 }
  0x23   : > { %5894 = shalt.err (!%p5891_p9)
}
  0x24   : > { %s7149_s17 = smov 128   ;;  %s7150_s18 = smov 8  }
  0x25   : > { %s7166_s1 = sld [smem:[#allocation21_spill]]  ;;  %s5906_s21 = scalar_lea.vmem %s266_s14, 512 }
  0x26   : > { %p5907_p13 = scmp.ne.s32.totalorder %s266_s14, %s5906_s21  ;;  %p5914_p3 = scmp.lt.s32.totalorder %s266_s14, %s266_s14 }
  0x27   : > { %p5915_p9 = scmp.lt.s32.totalorder %s5906_s21, %s5906_s21 }
  0x28   : > { %p5909_p0 = pnand %p5907_p13, %p6247_p12 }
  0x29   : > { %p5916_p7 = por %p5915_p9, %p5914_p3 }
  0x2a   : > { %p5910_p5 = pneg %p5909_p0 }
  0x2b   : > { %5677 = dma.hbm_to_vmem [thread:$0]  (!%p6241_p11), %s7166_s1, 256, %s240_s11, [#allocation6], %s7149_s17, %s7149_s17, %s7150_s18  }
  0x2c   : > { %p5917_p10 = pnand %p5916_p7, %p5910_p5 }
  0x2e   : > { %5920 = shalt.err (!%p5917_p10)
}
  0x2f   : > { %s7147_s22 = smov 256   ;;  %s7148_s23 = smov 16  }
  0x30   : > { %s7167_s3 = sld [smem:[#allocation22_spill]]  ;;  %s6272_s11 = sadd.s32 1, %s6131_s27  }
  0x31   : > { %s138_s13 = sadd.s32 1, %s6127_s26  ;;  %s135_s16 = ssub.s32 %s6131_s27, %s6272_s11 }
  0x32   : > { %p145_p13 = scmp.ne.s32.totalorder %s6127_s26, %s6123_s25  ;;  %p136_p0 = scmp.eq.s32.totalorder %s135_s16, 0 }
  0x33   : > { %p146_p5 = scmp.eq.s32.totalorder %s6131_s27, 0  ;;  %p5703_p9 = scmp.lt.s32.totalorder %s6131_s27, 2 }
  0x34   : > { %p6282_p3 = por %p201_p2, %p145_p13  ;;  %s290_s21 = sand.u32 1, %s6131_s27  }
  0x35   : > { %s6288_s20 = scalar_select %p136_p0, %s6127_s26, %s138_s13  }
  0x36   : > { %5683 = dma.hbm_to_vmem [thread:$0]  (!%p6241_p11), %s7167_s3, 512, %s266_s14, [#allocation9], %s7147_s22, %s7147_s22, %s7148_s23  }
  0x37   : > { %s7168_s19 = scalar_select %p6282_p3, 1, 0 }
  0x38   : > { %7169 = sst [smem:[#allocation20_spill]] %s6288_s20  ;;  %p147_p7 = por %p146_p5, %p145_p13 }
  0x39   : > { %s7151_s29 = sand.u32 1, %s6127_s26   ;;  %s5642_s10 = sshll.u32 %s6131_s27, 10 }
  0x3a   : > { %s5038_s14 = sshll.u32 %s7151_s29, 12  ;;  %s7170_s5 = sld [smem:[#allocation23_spill]] }
  0x3b   : > { %s294_s16 = scalar_lea.vmem [#allocation11], %s5038_s14  ;;  %p6300_p2 = pnand %p5703_p9, %p147_p7 }
  0x3c   : > { %s301_s18 = sshll.u32 %s294_s16, 4  ;;  %s6306_s13 = scalar_lea.sflag [#allocation12], %s290_s21  ;;  %s6304_s18 = int_to_ptr.vmem [resolvable:$true] %s301_s18 }
  0x3d   : > { %p5923_p13 = pneg %p6300_p2 }
  0x40   : > { %s6298_s17 = scalar_lea.hbm %s7170_s5, %s5642_s10  ;;  %s5926_s14 = scalar_lea.hbm %s7170_s5, 131072 }
  0x41   : > { %s5921_s29 = scalar_lea.hbm %s6298_s17, 65536  ;;  %p5927_p9 = scmp.lt.s32.totalorder %s6298_s17, %s7170_s5 }
  0x42   : > { %p5922_p10 = scmp.ne.s32.totalorder %s6298_s17, %s5921_s29  ;;  %p5928_p7 = scmp.lt.s32.totalorder %s5926_s14, %s5921_s29 }
  0x44   : > { %p5924_p0 = pnand %p5923_p13, %p5922_p10  ;;  %p5929_p1 = por %p5928_p7, %p5927_p9 }
  0x46   : > { %p5925_p5 = pneg %p5924_p0 }
  0x48   : > { %p5930_p6 = pnand %p5929_p1, %p5925_p5 }
  0x4a   : > { %5933 = shalt.err (!%p5930_p6)
}
  0x4b   : > { %s5934_s21 = scalar_lea.vmem %s6304_s18, 65536  ;;  %s6139_s22 = smov [#allocation11]  }
  0x4c   : > { %p5935_p3 = scmp.ne.s32.totalorder %s6304_s18, %s5934_s21  ;;  %s5939_s23 = sshll.u32 %s6139_s22, 4  ;;  %s5940_s23 = int_to_ptr.vmem [resolvable:$false] %s5939_s23 }
  0x4d   : > { %s5941_s3 = scalar_lea.vmem %s5940_s23, 131072  ;;  %p5942_p4 = scmp.lt.s32.totalorder %s6304_s18, %s5940_s23 }
  0x4e   : > { %p5937_p10 = pnand %p5935_p3, %p5923_p13  ;;  %p5943_p8 = scmp.lt.s32.totalorder %s5941_s3, %s5934_s21 }
  0x50   : > { %p5938_p0 = pneg %p5937_p10  ;;  %p5944_p11 = por %p5943_p8, %p5942_p4 }
  0x52   : > { %p5945_p9 = pnand %p5944_p11, %p5938_p0 }
  0x54   : > { %5948 = shalt.err (!%p5945_p9)
}
  0x55   : > { %s6140_s29 = smov 2048   ;;  %s6141_s14 = smov 1024  }
  0x56   : > { %s6142_s10 = smov 64   ;;  %s6143_s16 = smov [#allocation2]  }
  0x57   : > { %5690 = dma.hbm_to_vmem [thread:$0]  (!%p6300_p2), %s6298_s17, 65536, %s6304_s18, %s6306_s13, %s6140_s29, %s6141_s14, %s6142_s10  }
  0x58   : > { %s226_s5 = sshll.u32 %s6143_s16, 4  ;;  %s6144_s22 = smov [#allocation7]   ;;  %s227_s5 = int_to_ptr.vmem [resolvable:$true] %s226_s5 }
  0x59   : > { %s252_s20 = sshll.u32 %s6144_s22, 4  ;;  %s5960_s23 = scalar_lea.vmem %s227_s5, 256  ;;  %s253_s20 = int_to_ptr.vmem [resolvable:$true] %s252_s20 }
  0x5a   : > { %p5961_p1 = scmp.ne.s32.totalorder %s227_s5, %s5960_s23  ;;  %p5968_p8 = scmp.lt.s32.totalorder %s227_s5, %s227_s5 }
  0x5b   : > { %p5969_p11 = scmp.lt.s32.totalorder %s5960_s23, %s5960_s23 }
  0x5c   : > { %p5963_p4 = pnand %p5961_p1, %p6247_p12 }
  0x5d   : > { %p5970_p3 = por %p5969_p11, %p5968_p8 }
  0x5e   : > { %p5964_p6 = pneg %p5963_p4 }
  0x60   : > { %p5971_p5 = pnand %p5970_p3, %p5964_p6 }
  0x62   : > { %5974 = shalt.err (!%p5971_p5)
}
  0x63   : > { %p7172_p7 = scmp.ne.s32.totalorder %s7164_s12, 0  ;;  %s7173_s3 = smov 8  }
  0x64   : > { %s7174_s21 = smov 128   ;;  %s5986_s29 = scalar_lea.vmem %s253_s20, 3328 }
  0x65   : > { %5674 = dma.hbm_to_vmem [thread:$0]  (!%p7172_p7), %s7139_s0, 256, %s227_s5, [#allocation3], %s7174_s21, %s7174_s21, %s7173_s3  }
  0x66   : > { %p5987_p10 = scmp.ne.s32.totalorder %s253_s20, %s5986_s29  ;;  %p5994_p1 = scmp.lt.s32.totalorder %s253_s20, %s253_s20 }
  0x67   : > { %p5995_p4 = scmp.lt.s32.totalorder %s5986_s29, %s5986_s29 }
  0x68   : > { %p5989_p0 = pnand %p5987_p10, %p6247_p12 }
  0x69   : > { %p5996_p6 = por %p5995_p4, %p5994_p1 }
  0x6a   : > { %p5990_p9 = pneg %p5989_p0 }
  0x6c   : > { %p5997_p8 = pnand %p5996_p6, %p5990_p9 }
  0x6e   : > { %6000 = shalt.err (!%p5997_p8)
}
  0x6f   : > { %s7175_s14 = smov 16   ;;  %s7176_s10 = smov 256  }
  0x70   : > { %5680 = dma.hbm_to_vmem [thread:$0]  (!%p7172_p7), %s7141_s2, 3328, %s253_s20, [#allocation6], %s7176_s10, %s7176_s10, %s7175_s14  }
  0x71   : > { %s6145_s5 = smov [#allocation10]   ;;  %s7177_s3 = sand.u32 1, %s6127_s26  }
  0x72   : > { %s279_s23 = sshll.u32 %s6145_s5, 4  ;;  %s5041_s21 = sshll.u32 %s7177_s3, 4  ;;  %s280_s23 = int_to_ptr.vmem [resolvable:$true] %s279_s23 }
  0x73   : > { %s6012_s17 = scalar_lea.vmem %s280_s23, 64  ;;  %p6020_p10 = scmp.lt.s32.totalorder %s280_s23, %s280_s23 }
  0x74   : > { %p6013_p11 = scmp.ne.s32.totalorder %s280_s23, %s6012_s17  ;;  %p6021_p0 = scmp.lt.s32.totalorder %s6012_s17, %s6012_s17 }
  0x76   : > { %p6015_p3 = pnand %p6013_p11, %p6247_p12  ;;  %p6022_p9 = por %p6021_p0, %p6020_p10 }
  0x78   : > { %p6016_p5 = pneg %p6015_p3 }
  0x7a   : > { %p6023_p1 = pnand %p6022_p9, %p6016_p5 }
  0x7c   : > { %6026 = shalt.err (!%p6023_p1)
}
  0x7d   : > { %5686 = dma.hbm_to_vmem [thread:$0]  (!%p7172_p7), %s7143_s4, 64, %s280_s23, [#allocation9]  }
  0x7e   : > { %s5643_s20 = sshll.u32 %s6131_s27, 8  ;;  %s315_s14 = scalar_lea.vmem [#allocation13], %s5041_s21 }
  0x7f   : > { %s323_s10 = sshll.u32 %s315_s14, 4  ;;  %s321_s22 = scalar_lea.hbm %s7145_s6, %s5643_s20  ;;  %s324_s10 = int_to_ptr.vmem [resolvable:$true] %s323_s10 }
  0x80   : > { %s6027_s5 = scalar_lea.hbm %s321_s22, 256  ;;  %s6032_s17 = scalar_lea.hbm %s7145_s6, 512 }
  0x81   : > { %p6028_p12 = scmp.ne.s32.totalorder %s321_s22, %s6027_s5  ;;  %p6033_p7 = scmp.lt.s32.totalorder %s321_s22, %s7145_s6 }
  0x82   : > { %p6034_p8 = scmp.lt.s32.totalorder %s6032_s17, %s6027_s5 }
  0x83   : > { %p6030_p4 = pnand %p6028_p12, %p5923_p13 }
  0x84   : > { %p6035_p11 = por %p6034_p8, %p6033_p7 }
  0x85   : > { %p6031_p6 = pneg %p6030_p4 }
  0x87   : > { %p6036_p3 = pnand %p6035_p11, %p6031_p6 }
  0x89   : > { %6039 = shalt.err (!%p6036_p3)
}
  0x8a   : > { %s6040_s21 = scalar_lea.vmem %s324_s10, 256  ;;  %s6146_s29 = smov [#allocation13]  }
  0x8b   : > { %p6041_p5 = scmp.ne.s32.totalorder %s324_s10, %s6040_s21  ;;  %s6045_s20 = sshll.u32 %s6146_s29, 4  ;;  %s6046_s20 = int_to_ptr.vmem [resolvable:$false] %s6045_s20 }
  0x8c   : > { %s6047_s14 = scalar_lea.vmem %s6046_s20, 512  ;;  %p6048_p9 = scmp.lt.s32.totalorder %s324_s10, %s6046_s20 }
  0x8d   : > { %p6043_p10 = pnand %p6041_p5, %p5923_p13  ;;  %p6049_p1 = scmp.lt.s32.totalorder %s6047_s14, %s6040_s21 }
  0x8f   : > { %p6044_p0 = pneg %p6043_p10  ;;  %p6050_p12 = por %p6049_p1, %p6048_p9 }
  0x91   : > { %p6051_p4 = pnand %p6050_p12, %p6044_p0 }
  0x93   : > { %6054 = shalt.err (!%p6051_p4)
}
  0x94   : > { %5693 = dma.hbm_to_vmem [thread:$0]  (!%p6300_p2), %s321_s22, 256, %s324_s10, %s6306_s13  }
  0x95   : > { %p7178_p6 = scmp.ne.s32.totalorder %s7163_s9, 0 }
  0x96   : > { %p7179_p7 = scmp.eq.s32.totalorder (!%p7178_p6), %s6213_s28, 0 }
  0x97   : > { %332 = sbr.rel (%p7178_p6) target bundleno = 1097 (0x449), region = 48 }
  0x9c   : > { %6098 = dma.done.wait (%p7179_p7), [#allocation3], 256   ;;  %p7180_p13 = pmov %p7179_p7 }
  0x9d   : > { %p7181_p8 = pmov %p7179_p7 }
  0x9e   : > { %6100 = vsyncadd (%p7180_p13), [#allocation3], 4294967040 }
  0x9f   : > { %6102 = dma.done.wait (%p7181_p8), [#allocation6], 3584   ;;  %p7182_p11 = pmov %p7179_p7 }
  0xa0   : > { %p7183_p3 = pmov %p7179_p7 }
  0xa1   : > { %6104 = vsyncadd (%p7182_p11), [#allocation6], 4294963712 }
  0xa2   : > { %6106 = dma.done.wait (%p7183_p3), [#allocation9], 576   ;;  %p7184_p2 = pmov %p7183_p3 }
  0xa3   : > { %s354_s1 = sand.u32 1, %s6213_s28   ;;  %s6397_s9 = sand.u32 1, %s6123_s25  }
  0xa4   : > { %6108 = vsyncadd (%p7184_p2), [#allocation9], 4294966720  ;;  %s5050_s13 = sshll.u32 %s6397_s9, 12  ;;  %s355_s10 = scalar_lea.sflag [#allocation12], %s354_s1 }
  0xa5   : > { %s6400_s16 = scalar_lea.vmem [#allocation11], %s5050_s13  ;;  %p7185_p5 = scmp.ne.s32.totalorder %s7161_s30, 0 }
  0xa7   : > { %6110 = dma.done.wait (%p7185_p5), %s355_s10, 65792  }
  0xa8   : > { %6112 = vsyncadd (%p7185_p5), %s355_s10, 4294901504  ;;  %v6147_v0 = vmov 0   ;;  %vm463_vm0 = vcmask 1044480   ;;  %v5758_v1 = vld [vmem:[#allocation8 + $0x4] ss:$16 sps:$4 sm:$0x1f]  }
  0xa9   : > { %508 = vmatprep.mubr.bf16.mxu0 %v6147_v0  ;;  %551 = vmatprep.mubr.bf16.mxu1 %v6147_v0  ;;  %v5760_v2 = vld [vmem:[#allocation8 + $0xc] ss:$16 sps:$4 sm:$0x1f]   ;;  %v5762_v3 = vld [vmem:[#allocation8] ss:$16 sps:$4 sm:$0x1f]  }
  0xaa   : > { %5057 = vmatprep.subr.msk.bf16.mxu0 %vm463_vm0, %v5758_v1  ;;  %v5763_v4 = vld [vmem:[#allocation8 + $0x8] ss:$16 sps:$4 sm:$0x1f]   ;;  %5059 = vmatprep.subr.msk.bf16.mxu1 %vm463_vm0, %v5760_v2  ;;  %v410_v5 = vld [vmem:[#allocation5] sm:$0xff]  ;;  %v437_v7 = vld [vmem:[#allocation7 + $0xc0] sm:$0x33] }
  0xab   : > { %v411_v6 = vld [vmem:[#allocation5 + $0x8] sm:$0xff]  ;;  %vm696_vm1 = vcmask 1041408   ;;  %v465_v8 = vsel %vm463_vm0, %v5762_v3, 0  ;;  %v471_v9 = vsel %vm463_vm0, %v5763_v4, 0  ;;  %v5086_v11 = vcombine.high %v437_v7, %v437_v7  ;;  %v438_v12 = vld [vmem:[#allocation7 + $0xc8] sm:$0x33] }
  0xac   : > { %v412_v10 = vpack.c.bf16 %v411_v6, %v410_v5  ;;  %491 = vmatpush1.bf16.msra.mxu0 %v465_v8  ;;  %534 = vmatpush1.bf16.msra.mxu1 %v471_v9  ;;  %vm459_vm2 = vcmask 80896   ;;  %v5088_v13 = vcombine.high %v438_v12, %v438_v12  ;;  %v5085_v14 = vcombine.low %v437_v7, %v437_v7  ;;  %v5770_v16 = vld [vmem:[#allocation7 + $0xa4] ss:$16 sps:$4 sm:$0xff]   ;;  %v5773_v17 = vld [vmem:[#allocation7 + $0xac] ss:$16 sps:$4 sm:$0xff]   ;;  %s5051_s30 = sshll.u32 %s6397_s9, 4 }
  0xad   : > { %v5087_v15 = vcombine.low %v438_v12, %v438_v12  ;;  %5089 = vmatprep.subr.msk.bf16.mxu0 %vm696_vm1, %v5086_v11  ;;  %v5768_v20 = vld [vmem:[#allocation7 + $0xa0] ss:$16 sps:$4 sm:$0xff]   ;;  %v5771_v21 = vld [vmem:[#allocation7 + $0xa8] ss:$16 sps:$4 sm:$0xff]   ;;  %v5776_v22 = vld [vmem:[#allocation7 + $0x84] ss:$16 sps:$4 sm:$0xff]  }
  0xae   : > { %5091 = vmatprep.subr.msk.bf16.mxu1 %vm696_vm1, %v5088_v13  ;;  %v698_v18 = vsel %vm696_vm1, %v5085_v14, 0  ;;  %v5779_v23 = vld [vmem:[#allocation7 + $0x8c] ss:$16 sps:$4 sm:$0xff]   ;;  %v5774_v24 = vld [vmem:[#allocation7 + $0x80] ss:$16 sps:$4 sm:$0xff]   ;;  %v949_v40 = vld [vmem:[%s6400_s16 + $0x380] sm:$0xff] }
  0xaf   : > { %v704_v19 = vsel %vm696_vm1, %v5087_v15, 0  ;;  %5058 = vmatmul.mubr.msk.bf16.vlgmr.msra.gmra.mxu0 %vm459_vm2, %v412_v10  ;;  %5060 = vmatmul.mubr.msk.bf16.vlgmr.msra.gmra.mxu1 %vm459_vm2, %v412_v10  ;;  %v5777_v25 = vld [vmem:[#allocation7 + $0x88] ss:$16 sps:$4 sm:$0xff]   ;;  %v5782_v26 = vld [vmem:[#allocation7 + $0x64] ss:$16 sps:$4 sm:$0xff]   ;;  %vm692_vm3 = vcmask 818176  }
  0xb0   : > { %712 = vmatpush1.bf16.msra.mxu0 %v698_v18  ;;  %755 = vmatpush1.bf16.msra.mxu1 %v704_v19  ;;  %v5785_v27 = vld [vmem:[#allocation7 + $0x6c] ss:$16 sps:$4 sm:$0xff]   ;;  %v5780_v28 = vld [vmem:[#allocation7 + $0x60] ss:$16 sps:$4 sm:$0xff]   ;;  %v5783_v29 = vld [vmem:[#allocation7 + $0x68] ss:$16 sps:$4 sm:$0xff]  }
  0xb1   : > { %713 = vmatprep.subr.bf16.mxu0 %v5770_v16  ;;  %756 = vmatprep.subr.bf16.mxu1 %v5773_v17  ;;  %v5788_v30 = vld [vmem:[#allocation7 + $0x44] ss:$16 sps:$4 sm:$0xff]   ;;  %v5791_v31 = vld [vmem:[#allocation7 + $0x4c] ss:$16 sps:$4 sm:$0xff]   ;;  %v5786_v32 = vld [vmem:[#allocation7 + $0x40] ss:$16 sps:$4 sm:$0xff]  }
  0xb2   : > { %741 = vmatprep.mubr.bf16.mxu0 %v6147_v0  ;;  %784 = vmatprep.mubr.bf16.mxu1 %v6147_v0  ;;  %v5789_v33 = vld [vmem:[#allocation7 + $0x48] ss:$16 sps:$4 sm:$0xff]   ;;  %v5794_v34 = vld [vmem:[#allocation7 + $0x24] ss:$16 sps:$4 sm:$0xff]   ;;  %v5797_v35 = vld [vmem:[#allocation7 + $0x2c] ss:$16 sps:$4 sm:$0xff]  }
  0xb3   : > { %v5792_v36 = vld [vmem:[#allocation7 + $0x20] ss:$16 sps:$4 sm:$0xff]   ;;  %v5795_v37 = vld [vmem:[#allocation7 + $0x28] ss:$16 sps:$4 sm:$0xff]   ;;  %v5800_v38 = vld [vmem:[#allocation7 + $0x4] ss:$16 sps:$4 sm:$0xff]  }
  0xb4   : > { %714 = vmatpush1.bf16.msra.mxu0 %v5768_v20  ;;  %757 = vmatpush1.bf16.msra.mxu1 %v5771_v21  ;;  %v5803_v39 = vld [vmem:[#allocation7 + $0xc] ss:$16 sps:$4 sm:$0xff]   ;;  %v957_v41 = vld [vmem:[%s6400_s16 + $0x3c0] sm:$0xff]  ;;  %v5798_v44 = vld [vmem:[#allocation7] ss:$16 sps:$4 sm:$0xff]   ;;  %s6733_s15 = scalar_lea.vmem [#allocation13], %s5051_s30 }
  0xb5   : > { %715 = vmatprep.subr.bf16.mxu0 %v5776_v22  ;;  %758 = vmatprep.subr.bf16.mxu1 %v5779_v23  ;;  %v1205_v42 = vld [vmem:[%s6400_s16 + $0xb80] sm:$0xff]  ;;  %v407_v46 = vld [vmem:[#allocation2] sm:$0xff]  ;;  %v408_v47 = vld [vmem:[#allocation2 + $0x8] sm:$0xff]  ;;  %v5206_v48 = vcombine.high %v949_v40, %v957_v41  ;;  %v5205_v55 = vcombine.low %v949_v40, %v957_v41  ;;  %s5052_s22 = sshll.u32 %s6397_s9, 8  ;;  %s5644_s12 = sshll.u32 %s6213_s28, 11 }
  0xb6   : > { %v1213_v43 = vld [vmem:[%s6400_s16 + $0xbc0] sm:$0xff]  ;;  %v409_v54 = vpack.c.bf16 %v408_v47, %v407_v46  ;;  %s6779_s5 = scalar_lea.vmem [#allocation14], %s5052_s22  ;;  %s7092_s23 = scalar_lea.hbm %s7146_s7, %s5644_s12 }
  0xb7   : > { %v5801_v45 = vld [vmem:[#allocation7 + $0x8] ss:$16 sps:$4 sm:$0xff]   ;;  %v5462_v49 = vcombine.high %v1205_v42, %v1213_v43  ;;  %v5461_v56 = vcombine.low %v1205_v42, %v1213_v43  ;;  %s4887_s3 = sshll.u32 %s6779_s5, 4  ;;  %s4874_s28 = scalar_lea.sflag [#allocation4], %s6397_s9  ;;  %s7094_s3 = int_to_ptr.vmem [resolvable:$true] %s4887_s3 }
  0xb8   : > { %716 = vmatpush1.bf16.msra.mxu0 %v5774_v24  ;;  %759 = vmatpush1.bf16.msra.mxu1 %v5777_v25  ;;  %v933_v50 = vld [vmem:[%s6400_s16 + $0x300] sm:$0xff]  ;;  %s6055_s21 = scalar_lea.vmem %s7094_s3, 4096  ;;  %p7186_p0 = scmp.ne.s32.totalorder %s7168_s19, 0 }
  0xb9   : > { %717 = vmatprep.subr.bf16.mxu0 %v5782_v26  ;;  %760 = vmatprep.subr.bf16.mxu1 %v5785_v27  ;;  %v941_v51 = vld [vmem:[%s6400_s16 + $0x340] sm:$0xff]  ;;  %p6056_p10 = scmp.ne.s32.totalorder %s7094_s3, %s6055_s21  ;;  %s6148_s29 = smov [#allocation14]  }
  0xba   : > { %v1189_v52 = vld [vmem:[%s6400_s16 + $0xb00] sm:$0xff]  ;;  %v5190_v57 = vcombine.high %v933_v50, %v941_v51  ;;  %v5189_v63 = vcombine.low %v933_v50, %v941_v51  ;;  %s6059_s20 = sshll.u32 %s6148_s29, 4  ;;  %s6060_s20 = int_to_ptr.vmem [resolvable:$false] %s6059_s20 }
  0xbb   : > { %v1197_v53 = vld [vmem:[%s6400_s16 + $0xb40] sm:$0xff]  ;;  %p6057_p9 = pnand %p6056_p10, %p7186_p0  ;;  %s6061_s14 = scalar_lea.vmem %s6060_s20, 8192 }
  0xbc   : > { %718 = vmatpush1.bf16.msra.mxu0 %v5780_v28  ;;  %761 = vmatpush1.bf16.msra.mxu1 %v5783_v29  ;;  %v5446_v58 = vcombine.high %v1189_v52, %v1197_v53  ;;  %v917_v59 = vld [vmem:[%s6400_s16 + $0x280] sm:$0xff]  ;;  %v5445_v0 = vcombine.low %v1189_v52, %v1197_v53  ;;  %p6062_p12 = scmp.lt.s32.totalorder %s7094_s3, %s6060_s20  ;;  %p6063_p4 = scmp.lt.s32.totalorder %s6061_s14, %s6055_s21 }
  0xbd   : > { %719 = vmatprep.subr.bf16.mxu0 %v5788_v30  ;;  %762 = vmatprep.subr.bf16.mxu1 %v5791_v31  ;;  %v925_v60 = vld [vmem:[%s6400_s16 + $0x2c0] sm:$0xff]  ;;  %p6058_p1 = pneg %p6057_p9 }
  0xbe   : > { %v1173_v61 = vld [vmem:[%s6400_s16 + $0xa80] sm:$0xff]  ;;  %v5174_v1 = vcombine.high %v917_v59, %v925_v60  ;;  %v5173_v7 = vcombine.low %v917_v59, %v925_v60  ;;  %p6064_p6 = por %p6063_p4, %p6062_p12 }
  0xbf   : > { %v1181_v62 = vld [vmem:[%s6400_s16 + $0xac0] sm:$0xff] }
  0xc0   : > { %720 = vmatpush1.bf16.msra.mxu0 %v5786_v32  ;;  %763 = vmatpush1.bf16.msra.mxu1 %v5789_v33  ;;  %v5430_v2 = vcombine.high %v1173_v61, %v1181_v62  ;;  %v901_v3 = vld [vmem:[%s6400_s16 + $0x200] sm:$0xff]  ;;  %v5429_v8 = vcombine.low %v1173_v61, %v1181_v62  ;;  %p6065_p7 = pnand %p6064_p6, %p6058_p1 }
  0xc1   : > { %721 = vmatprep.subr.bf16.mxu0 %v5794_v34  ;;  %764 = vmatprep.subr.bf16.mxu1 %v5797_v35  ;;  %v909_v4 = vld [vmem:[%s6400_s16 + $0x240] sm:$0xff] }
  0xc2   : > { %v1157_v5 = vld [vmem:[%s6400_s16 + $0xa00] sm:$0xff]  ;;  %v5158_v9 = vcombine.high %v901_v3, %v909_v4  ;;  %v5157_v15 = vcombine.low %v901_v3, %v909_v4 }
  0xc3   : > { %v1165_v6 = vld [vmem:[%s6400_s16 + $0xa40] sm:$0xff] }
  0xc4   : > { %722 = vmatpush1.bf16.msra.mxu0 %v5792_v36  ;;  %765 = vmatpush1.bf16.msra.mxu1 %v5795_v37  ;;  %v5414_v10 = vcombine.high %v1157_v5, %v1165_v6  ;;  %v885_v11 = vld [vmem:[%s6400_s16 + $0x180] sm:$0xff]  ;;  %v5413_v16 = vcombine.low %v1157_v5, %v1165_v6 }
  0xc5   : > { %723 = vmatprep.subr.bf16.mxu0 %v5800_v38  ;;  %766 = vmatprep.subr.bf16.mxu1 %v5803_v39  ;;  %v893_v12 = vld [vmem:[%s6400_s16 + $0x1c0] sm:$0xff] }
  0xc6   : > { %v1141_v13 = vld [vmem:[%s6400_s16 + $0x980] sm:$0xff]  ;;  %v5142_v17 = vcombine.high %v885_v11, %v893_v12  ;;  %v5141_v23 = vcombine.low %v885_v11, %v893_v12 }
  0xc7   : > { %v1149_v14 = vld [vmem:[%s6400_s16 + $0x9c0] sm:$0xff] }
  0xc8   : > { %724 = vmatpush1.bf16.msra.mxu0 %v5798_v44  ;;  %767 = vmatpush1.bf16.msra.mxu1 %v5801_v45  ;;  %v5398_v18 = vcombine.high %v1141_v13, %v1149_v14  ;;  %v869_v19 = vld [vmem:[%s6400_s16 + $0x100] sm:$0xff]  ;;  %v5397_v24 = vcombine.low %v1141_v13, %v1149_v14 }
  0xc9   : > { %3993 = vmatprep.subr.bf16.mxu0 %v5206_v48  ;;  %4036 = vmatprep.subr.bf16.mxu1 %v5462_v49  ;;  %v877_v20 = vld [vmem:[%s6400_s16 + $0x140] sm:$0xff] }
  0xca   : > { %v1125_v21 = vld [vmem:[%s6400_s16 + $0x900] sm:$0xff]  ;;  %v5126_v25 = vcombine.high %v869_v19, %v877_v20  ;;  %v5125_v27 = vcombine.low %v869_v19, %v877_v20 }
  0xcb   : > { %5090 = vmatmul.mubr.msk.bf16.vlgmr.msra.gmra.mxu0 %vm692_vm3, %v409_v54  ;;  %5092 = vmatmul.mubr.msk.bf16.vlgmr.msra.gmra.mxu1 %vm692_vm3, %v409_v54  ;;  %v1133_v22 = vld [vmem:[%s6400_s16 + $0x940] sm:$0xff] }
  0xcc   : > { %3994 = vmatpush1.bf16.msra.mxu0 %v5205_v55  ;;  %4037 = vmatpush1.bf16.msra.mxu1 %v5461_v56  ;;  %v5382_v26 = vcombine.high %v1125_v21, %v1133_v22  ;;  %v5381_v28 = vcombine.low %v1125_v21, %v1133_v22  ;;  %v853_v29 = vld [vmem:[%s6400_s16 + $0x80] sm:$0xff] }
  0xcd   : > { %3995 = vmatprep.subr.bf16.mxu0 %v5190_v57  ;;  %4038 = vmatprep.subr.bf16.mxu1 %v5446_v58  ;;  %v861_v30 = vld [vmem:[%s6400_s16 + $0xc0] sm:$0xff] }
  0xce   : > { %v1109_v31 = vld [vmem:[%s6400_s16 + $0x880] sm:$0xff]  ;;  %v5110_v32 = vcombine.high %v853_v29, %v861_v30  ;;  %v5109_v34 = vcombine.low %v853_v29, %v861_v30 }
  0xcf   : > { %v1117_v33 = vld [vmem:[%s6400_s16 + $0x8c0] sm:$0xff] }
  0xd0   : > { %3996 = vmatpush1.bf16.msra.mxu0 %v5189_v63  ;;  %4039 = vmatpush1.bf16.msra.mxu1 %v5445_v0  ;;  %v5365_v35 = vcombine.low %v1109_v31, %v1117_v33  ;;  %v5366_v36 = vcombine.high %v1109_v31, %v1117_v33  ;;  %v837_v37 = vld [vmem:[%s6400_s16] sm:$0xff] }
  0xd1   : > { %3997 = vmatprep.subr.bf16.mxu0 %v5174_v1  ;;  %4040 = vmatprep.subr.bf16.mxu1 %v5430_v2  ;;  %v845_v38 = vld [vmem:[%s6400_s16 + $0x40] sm:$0xff] }
  0xd2   : > { %v1093_v39 = vld [vmem:[%s6400_s16 + $0x800] sm:$0xff]  ;;  %v5094_v40 = vcombine.high %v837_v37, %v845_v38  ;;  %v5093_v42 = vcombine.low %v837_v37, %v845_v38 }
  0xd3   : > { %v1101_v41 = vld [vmem:[%s6400_s16 + $0x840] sm:$0xff] }
  0xd4   : > { %3998 = vmatpush1.bf16.msra.mxu0 %v5173_v7  ;;  %4041 = vmatpush1.bf16.msra.mxu1 %v5429_v8  ;;  %v5349_v43 = vcombine.low %v1093_v39, %v1101_v41  ;;  %v5350_v44 = vcombine.high %v1093_v39, %v1101_v41  ;;  %v1077_v45 = vld [vmem:[%s6400_s16 + $0x780] sm:$0xff] }
  0xd5   : > { %3999 = vmatprep.subr.bf16.mxu0 %v5158_v9  ;;  %4042 = vmatprep.subr.bf16.mxu1 %v5414_v10  ;;  %v1085_v46 = vld [vmem:[%s6400_s16 + $0x7c0] sm:$0xff] }
  0xd6   : > { %v1333_v47 = vld [vmem:[%s6400_s16 + $0xf80] sm:$0xff]  ;;  %v5334_v48 = vcombine.high %v1077_v45, %v1085_v46  ;;  %v5333_v52 = vcombine.low %v1077_v45, %v1085_v46  ;;  %v6475_v45 = vld [vmem:[%s6400_s16 + $0x388] sm:$0xff] }
  0xd7   : > { %v1341_v49 = vld [vmem:[%s6400_s16 + $0xfc0] sm:$0xff]  ;;  %v6478_v46 = vld [vmem:[%s6400_s16 + $0x3c8] sm:$0xff] }
  0xd8   : > { %4000 = vmatpush1.bf16.msra.mxu0 %v5157_v15  ;;  %4043 = vmatpush1.bf16.msra.mxu1 %v5413_v16  ;;  %v1061_v50 = vld [vmem:[%s6400_s16 + $0x700] sm:$0xff]  ;;  %v5590_v53 = vcombine.high %v1333_v47, %v1341_v49  ;;  %v5589_v56 = vcombine.low %v1333_v47, %v1341_v49  ;;  %v6481_v47 = vld [vmem:[%s6400_s16 + $0xb88] sm:$0xff] }
  0xd9   : > { %4001 = vmatprep.subr.bf16.mxu0 %v5142_v17  ;;  %4044 = vmatprep.subr.bf16.mxu1 %v5398_v18  ;;  %v1069_v51 = vld [vmem:[%s6400_s16 + $0x740] sm:$0xff]  ;;  %v6486_v49 = vld [vmem:[%s6400_s16 + $0xbc8] sm:$0xff] }
  0xda   : > { %v1317_v54 = vld [vmem:[%s6400_s16 + $0xf00] sm:$0xff]  ;;  %v5318_v57 = vcombine.high %v1061_v50, %v1069_v51  ;;  %v5317_v63 = vcombine.low %v1061_v50, %v1069_v51  ;;  %v5207_v50 = vcombine.low %v6475_v45, %v6478_v46  ;;  %v5463_v51 = vcombine.low %v6481_v47, %v6486_v49 }
  0xdb   : > { %v1325_v55 = vld [vmem:[%s6400_s16 + $0xf40] sm:$0xff] }
  0xdc   : > { %4002 = vmatpush1.bf16.msra.mxu0 %v5141_v23  ;;  %4045 = vmatpush1.bf16.msra.mxu1 %v5397_v24  ;;  %v5574_v58 = vcombine.high %v1317_v54, %v1325_v55  ;;  %v1045_v59 = vld [vmem:[%s6400_s16 + $0x680] sm:$0xff]  ;;  %v5573_v0 = vcombine.low %v1317_v54, %v1325_v55 }
  0xdd   : > { %4003 = vmatprep.subr.bf16.mxu0 %v5126_v25  ;;  %4046 = vmatprep.subr.bf16.mxu1 %v5382_v26  ;;  %v1053_v60 = vld [vmem:[%s6400_s16 + $0x6c0] sm:$0xff] }
  0xde   : > { %v1301_v61 = vld [vmem:[%s6400_s16 + $0xe80] sm:$0xff]  ;;  %v5302_v1 = vcombine.high %v1045_v59, %v1053_v60  ;;  %v5301_v7 = vcombine.low %v1045_v59, %v1053_v60 }
  0xdf   : > { %v1309_v62 = vld [vmem:[%s6400_s16 + $0xec0] sm:$0xff] }
  0xe0   : > { %4004 = vmatpush1.bf16.msra.mxu0 %v5125_v27  ;;  %4047 = vmatpush1.bf16.msra.mxu1 %v5381_v28  ;;  %v5558_v2 = vcombine.high %v1301_v61, %v1309_v62  ;;  %v1029_v3 = vld [vmem:[%s6400_s16 + $0x600] sm:$0xff]  ;;  %v5557_v8 = vcombine.low %v1301_v61, %v1309_v62 }
  0xe1   : > { %4005 = vmatprep.subr.bf16.mxu0 %v5110_v32  ;;  %4048 = vmatprep.subr.bf16.mxu1 %v5366_v36  ;;  %v1037_v4 = vld [vmem:[%s6400_s16 + $0x640] sm:$0xff] }
  0xe2   : > { %v1285_v5 = vld [vmem:[%s6400_s16 + $0xe00] sm:$0xff]  ;;  %v5286_v9 = vcombine.high %v1029_v3, %v1037_v4  ;;  %v5285_v15 = vcombine.low %v1029_v3, %v1037_v4 }
  0xe3   : > { %v1293_v6 = vld [vmem:[%s6400_s16 + $0xe40] sm:$0xff] }
  0xe4   : > { %4006 = vmatpush1.bf16.msra.mxu0 %v5109_v34  ;;  %4049 = vmatpush1.bf16.msra.mxu1 %v5365_v35  ;;  %v5542_v10 = vcombine.high %v1285_v5, %v1293_v6  ;;  %v1013_v11 = vld [vmem:[%s6400_s16 + $0x580] sm:$0xff]  ;;  %v5541_v16 = vcombine.low %v1285_v5, %v1293_v6  ;;  %v795_v5 = vld [vmem:[#allocation10] sm:$0xf] }
  0xe5   : > { %4007 = vmatprep.subr.bf16.mxu0 %v5094_v40  ;;  %4050 = vmatprep.subr.bf16.mxu1 %v5350_v44  ;;  %v1021_v12 = vld [vmem:[%s6400_s16 + $0x5c0] sm:$0xff] }
  0xe6   : > { %v1269_v13 = vld [vmem:[%s6400_s16 + $0xd80] sm:$0xff]  ;;  %v5270_v17 = vcombine.high %v1013_v11, %v1021_v12  ;;  %v5269_v19 = vcombine.low %v1013_v11, %v1021_v12 }
  0xe7   : > { %v1277_v14 = vld [vmem:[%s6400_s16 + $0xdc0] sm:$0xff] }
  0xe8   : > { %4008 = vmatpush1.bf16.msra.mxu0 %v5093_v42  ;;  %4051 = vmatpush1.bf16.msra.mxu1 %v5349_v43  ;;  %v5526_v18 = vcombine.high %v1269_v13, %v1277_v14  ;;  %v5525_v20 = vcombine.low %v1269_v13, %v1277_v14  ;;  %v997_v21 = vld [vmem:[%s6400_s16 + $0x500] sm:$0xff] }
  0xe9   : > { %4009 = vmatprep.subr.bf16.mxu0 %v5334_v48  ;;  %4052 = vmatprep.subr.bf16.mxu1 %v5590_v53  ;;  %v1005_v22 = vld [vmem:[%s6400_s16 + $0x540] sm:$0xff]  ;;  %v5208_v48 = vcombine.high %v6475_v45, %v6478_v46  ;;  %v910_v45 = vld [vmem:[%s6400_s16 + $0x248] sm:$0xff] }
  0xea   : > { %v1253_v23 = vld [vmem:[%s6400_s16 + $0xd00] sm:$0xff]  ;;  %v5253_v25 = vcombine.low %v997_v21, %v1005_v22  ;;  %v5254_v26 = vcombine.high %v997_v21, %v1005_v22  ;;  %v1158_v46 = vld [vmem:[%s6400_s16 + $0xa08] sm:$0xff] }
  0xeb   : > { %v1261_v24 = vld [vmem:[%s6400_s16 + $0xd40] sm:$0xff] }
  0xec   : > { %4010 = vmatpush2.bf16.msra.mxu0 %v5333_v52  ;;  %4053 = vmatpush2.bf16.msra.mxu1 %v5589_v56  ;;  %v5509_v27 = vcombine.low %v1253_v23, %v1261_v24  ;;  %v5510_v28 = vcombine.high %v1253_v23, %v1261_v24  ;;  %v981_v29 = vld [vmem:[%s6400_s16 + $0x480] sm:$0xff]  ;;  %v5464_v52 = vcombine.high %v6481_v47, %v6486_v49 }
  0xed   : > { %4011 = vmatprep.subr.bf16.mxu0 %v5318_v57  ;;  %4054 = vmatprep.subr.bf16.mxu1 %v5574_v58  ;;  %v989_v30 = vld [vmem:[%s6400_s16 + $0x4c0] sm:$0xff]  ;;  %v797_v57 = vlaneseq }
  0xee   : > { %v1237_v31 = vld [vmem:[%s6400_s16 + $0xc80] sm:$0xff]  ;;  %v5238_v32 = vcombine.high %v981_v29, %v989_v30  ;;  %v5237_v34 = vcombine.low %v981_v29, %v989_v30 }
  0xef   : > { %v1245_v33 = vld [vmem:[%s6400_s16 + $0xcc0] sm:$0xff]  ;;  %v6494_v60 = vshrl.u32 %v797_v57, 7  ;;  %v926_v57 = vld [vmem:[%s6400_s16 + $0x2c8] sm:$0xff] }
  0xf0   : > { %4012 = vmatpush2.bf16.msra.mxu0 %v5317_v63  ;;  %4055 = vmatpush2.bf16.msra.mxu1 %v5573_v0  ;;  %v5493_v35 = vcombine.low %v1237_v31, %v1245_v33  ;;  %v5494_v36 = vcombine.high %v1237_v31, %v1245_v33  ;;  %v965_v37 = vld [vmem:[%s6400_s16 + $0x400] sm:$0xff] }
  0xf1   : > { %4013 = vmatprep.subr.bf16.mxu0 %v5302_v1  ;;  %4056 = vmatprep.subr.bf16.mxu1 %v5558_v2  ;;  %v973_v38 = vld [vmem:[%s6400_s16 + $0x440] sm:$0xff]  ;;  %v6497_v63 = vsub.s32 1, %v6494_v60  ;;  %v6500_v0 = vsub.s32 3, %v6494_v60  ;;  %v6503_v2 = vsub.s32 0, %v6494_v60  ;;  %v6506_v4 = vsub.s32 2, %v6494_v60 }
  0xf2   : > { %v1221_v39 = vld [vmem:[%s6400_s16 + $0xc00] sm:$0xff]  ;;  %v5222_v40 = vcombine.high %v965_v37, %v973_v38  ;;  %v5221_v42 = vcombine.low %v965_v37, %v973_v38  ;;  %v934_v38 = vld [vmem:[%s6400_s16 + $0x308] sm:$0xff] }
  0xf3   : > { %v1229_v41 = vld [vmem:[%s6400_s16 + $0xc40] sm:$0xff]  ;;  %v812_v11 = vrot.slane %v795_v5, %v6500_v0  ;;  %v800_v13 = vrot.slane %v795_v5, %v6503_v2 }
  0xf4   : > { %4014 = vmatpush2.bf16.msra.mxu0 %v5301_v7  ;;  %4057 = vmatpush2.bf16.msra.mxu1 %v5557_v8  ;;  %v5477_v43 = vcombine.low %v1221_v39, %v1229_v41  ;;  %v5478_v44 = vcombine.high %v1221_v39, %v1229_v41  ;;  %v942_v41 = vld [vmem:[%s6400_s16 + $0x348] sm:$0xff] }
  0xf5   : > { %4015 = vmatprep.subr.bf16.mxu0 %v5286_v9  ;;  %4058 = vmatprep.subr.bf16.mxu1 %v5542_v10  ;;  %v804_v9 = vrot.slane %v795_v5, %v6497_v63 }
  0xf8   : > { %4016 = vmatpush2.bf16.msra.mxu0 %v5285_v15  ;;  %4059 = vmatpush2.bf16.msra.mxu1 %v5541_v16  ;;  %v808_v15 = vrot.slane %v795_v5, %v6506_v4  ;;  %v902_v5 = vld [vmem:[%s6400_s16 + $0x208] sm:$0xff] }
  0xf9   : > { %4017 = vmatprep.subr.bf16.mxu0 %v5270_v17  ;;  %4060 = vmatprep.subr.bf16.mxu1 %v5526_v18 }
  0xfc   : > { %4018 = vmatpush2.bf16.msra.mxu0 %v5269_v19  ;;  %4061 = vmatpush2.bf16.msra.mxu1 %v5525_v20 }
  0xfd   : > { %4019 = vmatprep.subr.bf16.mxu0 %v5254_v26  ;;  %4062 = vmatprep.subr.bf16.mxu1 %v5510_v28 }
 0x100   : > { %4020 = vmatpush2.bf16.msra.mxu0 %v5253_v25  ;;  %4063 = vmatpush2.bf16.msra.mxu1 %v5509_v27 }
 0x101   : > { %4021 = vmatprep.subr.bf16.mxu0 %v5238_v32  ;;  %4064 = vmatprep.subr.bf16.mxu1 %v5494_v36 }
 0x104   : > { %4022 = vmatpush2.bf16.msra.mxu0 %v5237_v34  ;;  %4065 = vmatpush2.bf16.msra.mxu1 %v5493_v35 }
 0x105   : > { %4023 = vmatprep.subr.bf16.mxu0 %v5222_v40  ;;  %4066 = vmatprep.subr.bf16.mxu1 %v5478_v44 }
 0x108   : > { %4024 = vmatpush2.bf16.msra.mxu0 %v5221_v42  ;;  %4067 = vmatpush2.bf16.msra.mxu1 %v5477_v43  ;;  %v1190_v42 = vld [vmem:[%s6400_s16 + $0xb08] sm:$0xff] }
 0x109   : > { %4079 = vmatprep.subr.bf16.mxu0 %v5208_v48  ;;  %4122 = vmatprep.subr.bf16.mxu1 %v5464_v52  ;;  %v1198_v43 = vld [vmem:[%s6400_s16 + $0xb48] sm:$0xff] }
 0x16f   : > { %v510_v53 = vpop.f32.mrf.mxu0  ;;  %v553_v54 = vpop.f32.mrf.mxu1 }
 0x171   : > { %v512_v55 = vpop.f32.mrf.mxu0  ;;  %v555_v56 = vpop.f32.mrf.mxu1 }
 0x173   : > { %v514_v58 = vpop.f32.mrf.mxu0  ;;  %v557_v59 = vpop.f32.mrf.mxu1 }
 0x175   : > { %v516_v61 = vpop.f32.mrf.mxu0  ;;  %v559_v62 = vpop.f32.mrf.mxu1 }
 0x18b   : > { %v743_v1 = vpop.f32.mrf.mxu0  ;;  %v786_v3 = vpop.f32.mrf.mxu1 }
 0x18c   : > { %v744_v12 = vadd.f32 %v743_v1, %v510_v53  ;;  %v787_v14 = vadd.f32 %v786_v3, %v553_v54  ;;  %v918_v54 = vld [vmem:[%s6400_s16 + $0x288] sm:$0xff] }
 0x18d   : > { %v745_v6 = vpop.f32.mrf.mxu0  ;;  %v788_v7 = vpop.f32.mrf.mxu1  ;;  %v5176_v1 = vcombine.high %v918_v54, %v926_v57  ;;  %v5175_v47 = vcombine.low %v918_v54, %v926_v57  ;;  %v1062_v57 = vld [vmem:[%s6400_s16 + $0x708] sm:$0xff] }
 0x18e   : > { %v746_v8 = vadd.f32 %v745_v6, %v512_v55  ;;  %v789_v10 = vadd.f32 %v788_v7, %v555_v56  ;;  %v817_v26 = vadd.f32 %v800_v13, %v744_v12  ;;  %v819_v27 = vadd.f32 %v808_v15, %v787_v14  ;;  %v886_v7 = vld [vmem:[%s6400_s16 + $0x188] sm:$0xff] }
 0x18f   : > { %v747_v16 = vpop.f32.mrf.mxu0  ;;  %v790_v17 = vpop.f32.mrf.mxu1  ;;  %v5192_v55 = vcombine.high %v934_v38, %v942_v41  ;;  %v5448_v56 = vcombine.high %v1190_v42, %v1198_v43 }
 0x190   : > { %v748_v18 = vadd.f32 %v747_v16, %v514_v58  ;;  %v791_v19 = vadd.f32 %v790_v17, %v557_v59  ;;  %v818_v22 = vadd.f32 %v804_v9, %v746_v8  ;;  %v820_v23 = vadd.f32 %v812_v11, %v789_v10  ;;  %v1174_v58 = vld [vmem:[%s6400_s16 + $0xa88] sm:$0xff] }
 0x191   : > { %v749_v20 = vpop.f32.mrf.mxu0  ;;  %v792_v21 = vpop.f32.mrf.mxu1  ;;  %v825_v39 = vmax.f32 %v817_v26, 0.0  ;;  %v827_v40 = vmax.f32 %v819_v27, 0.0  ;;  %v1182_v59 = vld [vmem:[%s6400_s16 + $0xac8] sm:$0xff] }
 0x192   : > { %v750_v24 = vadd.f32 %v749_v20, %v516_v61  ;;  %v793_v25 = vadd.f32 %v792_v21, %v559_v62  ;;  %v821_v28 = vadd.f32 %v800_v13, %v748_v18  ;;  %v823_v29 = vadd.f32 %v808_v15, %v791_v19  ;;  %v894_v8 = vld [vmem:[%s6400_s16 + $0x1c8] sm:$0xff] }
 0x193   : > { %v826_v34 = vmax.f32 %v818_v22, 0.0  ;;  %v828_v35 = vmax.f32 %v820_v23, 0.0  ;;  %v5191_v61 = vcombine.low %v934_v38, %v942_v41  ;;  %v5447_v62 = vcombine.low %v1190_v42, %v1198_v43  ;;  %v1150_v10 = vld [vmem:[%s6400_s16 + $0x9c8] sm:$0xff] }
 0x194   : > { %v822_v30 = vadd.f32 %v804_v9, %v750_v24  ;;  %v824_v31 = vadd.f32 %v812_v11, %v793_v25  ;;  %v829_v32 = vmax.f32 %v821_v28, 0.0  ;;  %v831_v33 = vmax.f32 %v823_v29, 0.0  ;;  %v1142_v9 = vld [vmem:[%s6400_s16 + $0x988] sm:$0xff] }
 0x195   : > { %v5432_v3 = vcombine.high %v1174_v58, %v1182_v59  ;;  %v5431_v49 = vcombine.low %v1174_v58, %v1182_v59  ;;  %v5159_v11 = vcombine.low %v902_v5, %v910_v45  ;;  %v5144_v13 = vcombine.high %v886_v7, %v894_v8  ;;  %v870_v15 = vld [vmem:[%s6400_s16 + $0x108] sm:$0xff] }
 0x196   : > { %v830_v36 = vmax.f32 %v822_v30, 0.0  ;;  %v832_v37 = vmax.f32 %v824_v31, 0.0  ;;  %v6520_v52 = vpack.c.bf16 %v829_v32, %v825_v39  ;;  %v6522_v53 = vpack.c.bf16 %v831_v33, %v827_v40  ;;  %v878_v16 = vld [vmem:[%s6400_s16 + $0x148] sm:$0xff] }
 0x197   : > { %v5400_v14 = vcombine.high %v1142_v9, %v1150_v10  ;;  %v1126_v17 = vld [vmem:[%s6400_s16 + $0x908] sm:$0xff]  ;;  %v5143_v19 = vcombine.low %v886_v7, %v894_v8  ;;  %v5399_v20 = vcombine.low %v1142_v9, %v1150_v10  ;;  %v5128_v21 = vcombine.high %v870_v15, %v878_v16 }
 0x198   : > { %v6516_v44 = vpack.c.bf16 %v830_v36, %v826_v34  ;;  %v6518_v48 = vpack.c.bf16 %v832_v37, %v828_v35  ;;  %v1134_v18 = vld [vmem:[%s6400_s16 + $0x948] sm:$0xff]  ;;  %v5127_v27 = vcombine.low %v870_v15, %v878_v16 }
 0x199   : > { %v5384_v22 = vcombine.high %v1126_v17, %v1134_v18  ;;  %v854_v23 = vld [vmem:[%s6400_s16 + $0x88] sm:$0xff]  ;;  %v5383_v28 = vcombine.low %v1126_v17, %v1134_v18 }
 0x19a   : > { %4025 = vmatprep.mubr.bf16.mxu0 %v6516_v44  ;;  %4068 = vmatprep.mubr.bf16.mxu1 %v6518_v48  ;;  %v862_v24 = vld [vmem:[%s6400_s16 + $0xc8] sm:$0xff] }
 0x19b   : > { %4026 = vmatmul.mubr.bf16.vlgmr.msra.gmra.mxu0 %v6520_v52  ;;  %4069 = vmatmul.mubr.bf16.vlgmr.msra.gmra.mxu1 %v6522_v53  ;;  %v1110_v25 = vld [vmem:[%s6400_s16 + $0x888] sm:$0xff]  ;;  %v5112_v29 = vcombine.high %v854_v23, %v862_v24  ;;  %v5111_v35 = vcombine.low %v854_v23, %v862_v24 }
 0x19c   : > { %4080 = vmatpush1.bf16.msra.mxu0 %v5207_v50  ;;  %4123 = vmatpush1.bf16.msra.mxu1 %v5463_v51  ;;  %v1166_v50 = vld [vmem:[%s6400_s16 + $0xa48] sm:$0xff]  ;;  %v5160_v51 = vcombine.high %v902_v5, %v910_v45 }
 0x19d   : > { %4111 = vmatprep.mubr.bf16.mxu0 %v6516_v44  ;;  %4154 = vmatprep.mubr.bf16.mxu1 %v6518_v48  ;;  %v5416_v6 = vcombine.high %v1158_v46, %v1166_v50  ;;  %v5415_v12 = vcombine.low %v1158_v46, %v1166_v50  ;;  %v1118_v26 = vld [vmem:[%s6400_s16 + $0x8c8] sm:$0xff] }
 0x19e   : > { %4081 = vmatprep.subr.bf16.mxu0 %v5192_v55  ;;  %4124 = vmatprep.subr.bf16.mxu1 %v5448_v56  ;;  %v5368_v30 = vcombine.high %v1110_v25, %v1118_v26  ;;  %v838_v31 = vld [vmem:[%s6400_s16 + $0x8] sm:$0xff]  ;;  %v5367_v36 = vcombine.low %v1110_v25, %v1118_v26 }
 0x19f   : > { %v846_v32 = vld [vmem:[%s6400_s16 + $0x48] sm:$0xff] }
 0x1a0   : > { %4082 = vmatpush1.bf16.msra.mxu0 %v5191_v61  ;;  %4125 = vmatpush1.bf16.msra.mxu1 %v5447_v62  ;;  %v1094_v33 = vld [vmem:[%s6400_s16 + $0x808] sm:$0xff]  ;;  %v5096_v37 = vcombine.high %v838_v31, %v846_v32  ;;  %v5095_v43 = vcombine.low %v838_v31, %v846_v32 }
 0x1a1   : > { %4083 = vmatprep.subr.bf16.mxu0 %v5176_v1  ;;  %4126 = vmatprep.subr.bf16.mxu1 %v5432_v3  ;;  %v1102_v34 = vld [vmem:[%s6400_s16 + $0x848] sm:$0xff] }
 0x1a2   : > { %v5352_v38 = vcombine.high %v1094_v33, %v1102_v34  ;;  %v1078_v39 = vld [vmem:[%s6400_s16 + $0x788] sm:$0xff]  ;;  %v5351_v54 = vcombine.low %v1094_v33, %v1102_v34 }
 0x1a3   : > { %v1086_v40 = vld [vmem:[%s6400_s16 + $0x7c8] sm:$0xff] }
 0x1a4   : > { %4084 = vmatpush1.bf16.msra.mxu0 %v5175_v47  ;;  %4127 = vmatpush1.bf16.msra.mxu1 %v5431_v49  ;;  %v1334_v41 = vld [vmem:[%s6400_s16 + $0xf88] sm:$0xff]  ;;  %v5336_v55 = vcombine.high %v1078_v39, %v1086_v40  ;;  %v5335_v62 = vcombine.low %v1078_v39, %v1086_v40 }
 0x1a5   : > { %4085 = vmatprep.subr.bf16.mxu0 %v5160_v51  ;;  %4128 = vmatprep.subr.bf16.mxu1 %v5416_v6  ;;  %v1342_v42 = vld [vmem:[%s6400_s16 + $0xfc8] sm:$0xff] }
 0x1a6   : > { %v5592_v56 = vcombine.high %v1334_v41, %v1342_v42  ;;  %v1070_v58 = vld [vmem:[%s6400_s16 + $0x748] sm:$0xff]  ;;  %v5591_v1 = vcombine.low %v1334_v41, %v1342_v42 }
 0x1a7   : > { %v1318_v59 = vld [vmem:[%s6400_s16 + $0xf08] sm:$0xff]  ;;  %v5320_v3 = vcombine.high %v1062_v57, %v1070_v58  ;;  %v5319_v49 = vcombine.low %v1062_v57, %v1070_v58  ;;  %v951_v58 = vld [vmem:[%s6400_s16 + $0x390] sm:$0xff] }
 0x1a8   : > { %4086 = vmatpush1.bf16.msra.mxu0 %v5159_v11  ;;  %4129 = vmatpush1.bf16.msra.mxu1 %v5415_v12  ;;  %v1326_v61 = vld [vmem:[%s6400_s16 + $0xf48] sm:$0xff] }
 0x1a9   : > { %4087 = vmatprep.subr.bf16.mxu0 %v5144_v13  ;;  %4130 = vmatprep.subr.bf16.mxu1 %v5400_v14  ;;  %v5576_v5 = vcombine.high %v1318_v59, %v1326_v61  ;;  %v1046_v45 = vld [vmem:[%s6400_s16 + $0x688] sm:$0xff]  ;;  %v5575_v51 = vcombine.low %v1318_v59, %v1326_v61  ;;  %v959_v59 = vld [vmem:[%s6400_s16 + $0x3d0] sm:$0xff] }
 0x1aa   : > { %v1054_v46 = vld [vmem:[%s6400_s16 + $0x6c8] sm:$0xff]  ;;  %v1207_v61 = vld [vmem:[%s6400_s16 + $0xb90] sm:$0xff] }
 0x1ab   : > { %v1302_v50 = vld [vmem:[%s6400_s16 + $0xe88] sm:$0xff]  ;;  %v5304_v6 = vcombine.high %v1046_v45, %v1054_v46  ;;  %v5303_v12 = vcombine.low %v1046_v45, %v1054_v46  ;;  %v935_v46 = vld [vmem:[%s6400_s16 + $0x310] sm:$0xff] }
 0x1ac   : > { %4088 = vmatpush1.bf16.msra.mxu0 %v5143_v19  ;;  %4131 = vmatpush1.bf16.msra.mxu1 %v5399_v20  ;;  %v1310_v47 = vld [vmem:[%s6400_s16 + $0xec8] sm:$0xff] }
 0x1ad   : > { %4089 = vmatprep.subr.bf16.mxu0 %v5128_v21  ;;  %4132 = vmatprep.subr.bf16.mxu1 %v5384_v22  ;;  %v5560_v7 = vcombine.high %v1302_v50, %v1310_v47  ;;  %v1030_v8 = vld [vmem:[%s6400_s16 + $0x608] sm:$0xff]  ;;  %v5559_v13 = vcombine.low %v1302_v50, %v1310_v47  ;;  %v943_v50 = vld [vmem:[%s6400_s16 + $0x350] sm:$0xff] }
 0x1ae   : > { %v1038_v9 = vld [vmem:[%s6400_s16 + $0x648] sm:$0xff]  ;;  %v1191_v47 = vld [vmem:[%s6400_s16 + $0xb10] sm:$0xff] }
 0x1af   : > { %v1286_v10 = vld [vmem:[%s6400_s16 + $0xe08] sm:$0xff]  ;;  %v5288_v14 = vcombine.high %v1030_v8, %v1038_v9  ;;  %v5287_v20 = vcombine.low %v1030_v8, %v1038_v9  ;;  %v919_v9 = vld [vmem:[%s6400_s16 + $0x290] sm:$0xff] }
 0x1b0   : > { %4090 = vmatpush1.bf16.msra.mxu0 %v5127_v27  ;;  %4133 = vmatpush1.bf16.msra.mxu1 %v5383_v28  ;;  %v1294_v11 = vld [vmem:[%s6400_s16 + $0xe48] sm:$0xff] }
 0x1b1   : > { %4091 = vmatprep.subr.bf16.mxu0 %v5112_v29  ;;  %4134 = vmatprep.subr.bf16.mxu1 %v5368_v30  ;;  %v5544_v15 = vcombine.high %v1286_v10, %v1294_v11  ;;  %v1014_v16 = vld [vmem:[%s6400_s16 + $0x588] sm:$0xff]  ;;  %v5543_v21 = vcombine.low %v1286_v10, %v1294_v11  ;;  %v927_v10 = vld [vmem:[%s6400_s16 + $0x2d0] sm:$0xff] }
 0x1b2   : > { %v1022_v17 = vld [vmem:[%s6400_s16 + $0x5c8] sm:$0xff]  ;;  %v1175_v11 = vld [vmem:[%s6400_s16 + $0xa90] sm:$0xff] }
 0x1b3   : > { %v1270_v18 = vld [vmem:[%s6400_s16 + $0xd88] sm:$0xff]  ;;  %v5272_v22 = vcombine.high %v1014_v16, %v1022_v17  ;;  %v5271_v28 = vcombine.low %v1014_v16, %v1022_v17  ;;  %v903_v17 = vld [vmem:[%s6400_s16 + $0x210] sm:$0xff] }
 0x1b4   : > { %4092 = vmatpush1.bf16.msra.mxu0 %v5111_v35  ;;  %4135 = vmatpush1.bf16.msra.mxu1 %v5367_v36  ;;  %v1278_v19 = vld [vmem:[%s6400_s16 + $0xdc8] sm:$0xff] }
 0x1b5   : > { %4093 = vmatprep.subr.bf16.mxu0 %v5096_v37  ;;  %4136 = vmatprep.subr.bf16.mxu1 %v5352_v38  ;;  %v5528_v23 = vcombine.high %v1270_v18, %v1278_v19  ;;  %v998_v24 = vld [vmem:[%s6400_s16 + $0x508] sm:$0xff]  ;;  %v5527_v29 = vcombine.low %v1270_v18, %v1278_v19  ;;  %v911_v18 = vld [vmem:[%s6400_s16 + $0x250] sm:$0xff] }
 0x1b6   : > { %v1006_v25 = vld [vmem:[%s6400_s16 + $0x548] sm:$0xff]  ;;  %v1159_v19 = vld [vmem:[%s6400_s16 + $0xa10] sm:$0xff] }
 0x1b7   : > { %v1254_v26 = vld [vmem:[%s6400_s16 + $0xd08] sm:$0xff]  ;;  %v5256_v30 = vcombine.high %v998_v24, %v1006_v25  ;;  %v5255_v36 = vcombine.low %v998_v24, %v1006_v25  ;;  %v887_v25 = vld [vmem:[%s6400_s16 + $0x190] sm:$0xff] }
 0x1b8   : > { %4094 = vmatpush1.bf16.msra.mxu0 %v5095_v43  ;;  %4137 = vmatpush1.bf16.msra.mxu1 %v5351_v54  ;;  %v1262_v27 = vld [vmem:[%s6400_s16 + $0xd48] sm:$0xff] }
 0x1b9   : > { %4095 = vmatprep.subr.bf16.mxu0 %v5336_v55  ;;  %4138 = vmatprep.subr.bf16.mxu1 %v5592_v56  ;;  %v5512_v31 = vcombine.high %v1254_v26, %v1262_v27  ;;  %v982_v32 = vld [vmem:[%s6400_s16 + $0x488] sm:$0xff]  ;;  %v5511_v37 = vcombine.low %v1254_v26, %v1262_v27  ;;  %v895_v26 = vld [vmem:[%s6400_s16 + $0x1d0] sm:$0xff] }
 0x1ba   : > { %v990_v33 = vld [vmem:[%s6400_s16 + $0x4c8] sm:$0xff]  ;;  %v1143_v27 = vld [vmem:[%s6400_s16 + $0x990] sm:$0xff] }
 0x1bb   : > { %v1238_v34 = vld [vmem:[%s6400_s16 + $0xc88] sm:$0xff]  ;;  %v5240_v38 = vcombine.high %v982_v32, %v990_v33  ;;  %v5239_v54 = vcombine.low %v982_v32, %v990_v33  ;;  %v871_v33 = vld [vmem:[%s6400_s16 + $0x110] sm:$0xff] }
 0x1bc   : > { %4096 = vmatpush2.bf16.msra.mxu0 %v5335_v62  ;;  %4139 = vmatpush2.bf16.msra.mxu1 %v5591_v1  ;;  %v1246_v35 = vld [vmem:[%s6400_s16 + $0xcc8] sm:$0xff]  ;;  %v1215_v62 = vld [vmem:[%s6400_s16 + $0xbd0] sm:$0xff] }
 0x1bd   : > { %4097 = vmatprep.subr.bf16.mxu0 %v5320_v3  ;;  %4140 = vmatprep.subr.bf16.mxu1 %v5576_v5  ;;  %v5496_v39 = vcombine.high %v1238_v34, %v1246_v35  ;;  %v966_v40 = vld [vmem:[%s6400_s16 + $0x408] sm:$0xff]  ;;  %v5495_v55 = vcombine.low %v1238_v34, %v1246_v35  ;;  %v5210_v5 = vcombine.high %v951_v58, %v959_v59  ;;  %v879_v34 = vld [vmem:[%s6400_s16 + $0x150] sm:$0xff] }
 0x1be   : > { %v974_v41 = vld [vmem:[%s6400_s16 + $0x448] sm:$0xff]  ;;  %v5466_v45 = vcombine.high %v1207_v61, %v1215_v62  ;;  %v1127_v35 = vld [vmem:[%s6400_s16 + $0x910] sm:$0xff] }
 0x1bf   : > { %v1222_v42 = vld [vmem:[%s6400_s16 + $0xc08] sm:$0xff]  ;;  %v5224_v56 = vcombine.high %v966_v40, %v974_v41  ;;  %v5223_v1 = vcombine.low %v966_v40, %v974_v41  ;;  %v855_v41 = vld [vmem:[%s6400_s16 + $0x90] sm:$0xff] }
 0x1c0   : > { %4098 = vmatpush2.bf16.msra.mxu0 %v5319_v49  ;;  %4141 = vmatpush2.bf16.msra.mxu1 %v5575_v51  ;;  %v1230_v43 = vld [vmem:[%s6400_s16 + $0xc48] sm:$0xff]  ;;  %v1199_v49 = vld [vmem:[%s6400_s16 + $0xb50] sm:$0xff]  ;;  %v5209_v51 = vcombine.low %v951_v58, %v959_v59 }
 0x1c1   : > { %4099 = vmatprep.subr.bf16.mxu0 %v5304_v6  ;;  %4142 = vmatprep.subr.bf16.mxu1 %v5560_v7  ;;  %v5480_v57 = vcombine.high %v1222_v42, %v1230_v43  ;;  %v5479_v3 = vcombine.low %v1222_v42, %v1230_v43  ;;  %v5465_v6 = vcombine.low %v1207_v61, %v1215_v62  ;;  %v863_v42 = vld [vmem:[%s6400_s16 + $0xd0] sm:$0xff] }
 0x1c2   : > { %v5194_v7 = vcombine.high %v935_v46, %v943_v50  ;;  %v5450_v8 = vcombine.high %v1191_v47, %v1199_v49  ;;  %v1111_v43 = vld [vmem:[%s6400_s16 + $0x890] sm:$0xff] }
 0x1c3   : > { %v839_v59 = vld [vmem:[%s6400_s16 + $0x10] sm:$0xff] }
 0x1c4   : > { %4100 = vmatpush2.bf16.msra.mxu0 %v5303_v12  ;;  %4143 = vmatpush2.bf16.msra.mxu1 %v5559_v13  ;;  %v1183_v12 = vld [vmem:[%s6400_s16 + $0xad0] sm:$0xff]  ;;  %v5193_v13 = vcombine.low %v935_v46, %v943_v50 }
 0x1c5   : > { %4101 = vmatprep.subr.bf16.mxu0 %v5288_v14  ;;  %4144 = vmatprep.subr.bf16.mxu1 %v5544_v15  ;;  %v5449_v14 = vcombine.low %v1191_v47, %v1199_v49  ;;  %v5178_v15 = vcombine.high %v919_v9, %v927_v10  ;;  %v5434_v16 = vcombine.high %v1175_v11, %v1183_v12  ;;  %v847_v61 = vld [vmem:[%s6400_s16 + $0x50] sm:$0xff] }
 0x1c6   : > { %v1095_v62 = vld [vmem:[%s6400_s16 + $0x810] sm:$0xff] }
 0x1c7   : > { %v1079_v50 = vld [vmem:[%s6400_s16 + $0x790] sm:$0xff] }
 0x1c8   : > { %4102 = vmatpush2.bf16.msra.mxu0 %v5287_v20  ;;  %4145 = vmatpush2.bf16.msra.mxu1 %v5543_v21  ;;  %v1167_v20 = vld [vmem:[%s6400_s16 + $0xa50] sm:$0xff]  ;;  %v5177_v21 = vcombine.low %v919_v9, %v927_v10 }
 0x1c9   : > { %4103 = vmatprep.subr.bf16.mxu0 %v5272_v22  ;;  %4146 = vmatprep.subr.bf16.mxu1 %v5528_v23  ;;  %v5433_v22 = vcombine.low %v1175_v11, %v1183_v12  ;;  %v5162_v23 = vcombine.high %v903_v17, %v911_v18  ;;  %v5418_v24 = vcombine.high %v1159_v19, %v1167_v20  ;;  %v1087_v47 = vld [vmem:[%s6400_s16 + $0x7d0] sm:$0xff] }
 0x1ca   : > { %v1335_v49 = vld [vmem:[%s6400_s16 + $0xf90] sm:$0xff] }
 0x1cb   : > { %v1063_v10 = vld [vmem:[%s6400_s16 + $0x710] sm:$0xff] }
 0x1cc   : > { %4104 = vmatpush2.bf16.msra.mxu0 %v5271_v28  ;;  %4147 = vmatpush2.bf16.msra.mxu1 %v5527_v29  ;;  %v1151_v28 = vld [vmem:[%s6400_s16 + $0x9d0] sm:$0xff]  ;;  %v5161_v29 = vcombine.low %v903_v17, %v911_v18 }
 0x1cd   : > { %4105 = vmatprep.subr.bf16.mxu0 %v5256_v30  ;;  %4148 = vmatprep.subr.bf16.mxu1 %v5512_v31  ;;  %v5417_v30 = vcombine.low %v1159_v19, %v1167_v20  ;;  %v5146_v31 = vcombine.high %v887_v25, %v895_v26  ;;  %v5402_v32 = vcombine.high %v1143_v27, %v1151_v28  ;;  %v1071_v11 = vld [vmem:[%s6400_s16 + $0x750] sm:$0xff] }
 0x1ce   : > { %v1319_v12 = vld [vmem:[%s6400_s16 + $0xf10] sm:$0xff] }
 0x1cf   : > { %v1047_v18 = vld [vmem:[%s6400_s16 + $0x690] sm:$0xff] }
 0x1d0   : > { %4106 = vmatpush2.bf16.msra.mxu0 %v5255_v36  ;;  %4149 = vmatpush2.bf16.msra.mxu1 %v5511_v37  ;;  %v1135_v36 = vld [vmem:[%s6400_s16 + $0x950] sm:$0xff]  ;;  %v5145_v37 = vcombine.low %v887_v25, %v895_v26 }
 0x1d1   : > { %4107 = vmatprep.subr.bf16.mxu0 %v5240_v38  ;;  %4150 = vmatprep.subr.bf16.mxu1 %v5496_v39  ;;  %v5401_v38 = vcombine.low %v1143_v27, %v1151_v28  ;;  %v5130_v39 = vcombine.high %v871_v33, %v879_v34  ;;  %v5386_v40 = vcombine.high %v1127_v35, %v1135_v36  ;;  %v1055_v19 = vld [vmem:[%s6400_s16 + $0x6d0] sm:$0xff] }
 0x1d2   : > { %v1303_v20 = vld [vmem:[%s6400_s16 + $0xe90] sm:$0xff] }
 0x1d3   : > { %v1031_v26 = vld [vmem:[%s6400_s16 + $0x610] sm:$0xff] }
 0x1d4   : > { %4108 = vmatpush2.bf16.msra.mxu0 %v5239_v54  ;;  %4151 = vmatpush2.bf16.msra.mxu1 %v5495_v55  ;;  %v1119_v54 = vld [vmem:[%s6400_s16 + $0x8d0] sm:$0xff]  ;;  %v5129_v55 = vcombine.low %v871_v33, %v879_v34 }
 0x1d5   : > { %4109 = vmatprep.subr.bf16.mxu0 %v5224_v56  ;;  %4152 = vmatprep.subr.bf16.mxu1 %v5480_v57  ;;  %v5385_v56 = vcombine.low %v1127_v35, %v1135_v36  ;;  %v5114_v57 = vcombine.high %v855_v41, %v863_v42  ;;  %v5370_v58 = vcombine.high %v1111_v43, %v1119_v54  ;;  %v1039_v27 = vld [vmem:[%s6400_s16 + $0x650] sm:$0xff] }
 0x1d6   : > { %v1287_v28 = vld [vmem:[%s6400_s16 + $0xe10] sm:$0xff] }
 0x1d7   : > { %v1015_v34 = vld [vmem:[%s6400_s16 + $0x590] sm:$0xff] }
 0x1d8   : > { %4110 = vmatpush2.bf16.msra.mxu0 %v5223_v1  ;;  %4153 = vmatpush2.bf16.msra.mxu1 %v5479_v3  ;;  %v1103_v1 = vld [vmem:[%s6400_s16 + $0x850] sm:$0xff]  ;;  %v5113_v3 = vcombine.low %v855_v41, %v863_v42 }
 0x1d9   : > { %4165 = vmatprep.subr.bf16.mxu0 %v5210_v5  ;;  %4208 = vmatprep.subr.bf16.mxu1 %v5466_v45  ;;  %v5369_v5 = vcombine.low %v1111_v43, %v1119_v54  ;;  %v5098_v45 = vcombine.high %v839_v59, %v847_v61  ;;  %v5354_v46 = vcombine.high %v1095_v62, %v1103_v1  ;;  %v1023_v35 = vld [vmem:[%s6400_s16 + $0x5d0] sm:$0xff] }
 0x1da   : > { %v1271_v36 = vld [vmem:[%s6400_s16 + $0xd90] sm:$0xff] }
 0x1db   : > { %4112 = vmatmul.mubr.bf16.vlgmr.msra.gmra.mxu0 %v6520_v52  ;;  %4155 = vmatmul.mubr.bf16.vlgmr.msra.gmra.mxu1 %v6522_v53  ;;  %v999_v42 = vld [vmem:[%s6400_s16 + $0x510] sm:$0xff] }
 0x1dc   : > { %4166 = vmatpush1.bf16.msra.mxu0 %v5209_v51  ;;  %4197 = vmatprep.mubr.bf16.mxu0 %v6516_v44  ;;  %v1343_v51 = vld [vmem:[%s6400_s16 + $0xfd0] sm:$0xff] }
 0x1dd   : > { %4209 = vmatpush1.bf16.msra.mxu1 %v5465_v6  ;;  %4240 = vmatprep.mubr.bf16.mxu1 %v6518_v48  ;;  %v5097_v6 = vcombine.low %v839_v59, %v847_v61  ;;  %v5594_v9 = vcombine.high %v1335_v49, %v1343_v51  ;;  %v1007_v43 = vld [vmem:[%s6400_s16 + $0x550] sm:$0xff] }
 0x1de   : > { %4167 = vmatprep.subr.bf16.mxu0 %v5194_v7  ;;  %4210 = vmatprep.subr.bf16.mxu1 %v5450_v8  ;;  %v5353_v7 = vcombine.low %v1095_v62, %v1103_v1  ;;  %v5338_v8 = vcombine.high %v1079_v50, %v1087_v47  ;;  %v1255_v54 = vld [vmem:[%s6400_s16 + $0xd10] sm:$0xff] }
 0x1df   : > { %v983_v61 = vld [vmem:[%s6400_s16 + $0x490] sm:$0xff] }
 0x1e0   : > { %4168 = vmatpush1.bf16.msra.mxu0 %v5193_v13  ;;  %v1327_v13 = vld [vmem:[%s6400_s16 + $0xf50] sm:$0xff] }
 0x1e1   : > { %4211 = vmatpush1.bf16.msra.mxu1 %v5449_v14  ;;  %4169 = vmatprep.subr.bf16.mxu0 %v5178_v15  ;;  %v5337_v14 = vcombine.low %v1079_v50, %v1087_v47  ;;  %v5593_v15 = vcombine.low %v1335_v49, %v1343_v51  ;;  %v5578_v17 = vcombine.high %v1319_v12, %v1327_v13  ;;  %v991_v62 = vld [vmem:[%s6400_s16 + $0x4d0] sm:$0xff] }
 0x1e2   : > { %4212 = vmatprep.subr.bf16.mxu1 %v5434_v16  ;;  %v5322_v16 = vcombine.high %v1063_v10, %v1071_v11  ;;  %v1239_v1 = vld [vmem:[%s6400_s16 + $0xc90] sm:$0xff] }
 0x1e3   : > { %v967_v47 = vld [vmem:[%s6400_s16 + $0x410] sm:$0xff] }
 0x1e4   : > { %4170 = vmatpush1.bf16.msra.mxu0 %v5177_v21  ;;  %v1311_v21 = vld [vmem:[%s6400_s16 + $0xed0] sm:$0xff] }
 0x1e5   : > { %4213 = vmatpush1.bf16.msra.mxu1 %v5433_v22  ;;  %4171 = vmatprep.subr.bf16.mxu0 %v5162_v23  ;;  %v5321_v22 = vcombine.low %v1063_v10, %v1071_v11  ;;  %v5577_v23 = vcombine.low %v1319_v12, %v1327_v13  ;;  %v5562_v25 = vcombine.high %v1303_v20, %v1311_v21  ;;  %v975_v49 = vld [vmem:[%s6400_s16 + $0x450] sm:$0xff]  ;;  %v952_v11 = vld [vmem:[%s6400_s16 + $0x398] sm:$0xff] }
 0x1e6   : > { %4214 = vmatprep.subr.bf16.mxu1 %v5418_v24  ;;  %v5306_v24 = vcombine.high %v1047_v18, %v1055_v19  ;;  %v1223_v51 = vld [vmem:[%s6400_s16 + $0xc10] sm:$0xff]  ;;  %v960_v12 = vld [vmem:[%s6400_s16 + $0x3d8] sm:$0xff] }
 0x1e7   : > { %v1208_v13 = vld [vmem:[%s6400_s16 + $0xb98] sm:$0xff] }
 0x1e8   : > { %4172 = vmatpush1.bf16.msra.mxu0 %v5161_v29  ;;  %v1295_v29 = vld [vmem:[%s6400_s16 + $0xe50] sm:$0xff] }
 0x1e9   : > { %4215 = vmatpush1.bf16.msra.mxu1 %v5417_v30  ;;  %4173 = vmatprep.subr.bf16.mxu0 %v5146_v31  ;;  %v5305_v30 = vcombine.low %v1047_v18, %v1055_v19  ;;  %v5561_v31 = vcombine.low %v1303_v20, %v1311_v21  ;;  %v5546_v33 = vcombine.high %v1287_v28, %v1295_v29  ;;  %v936_v19 = vld [vmem:[%s6400_s16 + $0x318] sm:$0xff] }
 0x1ea   : > { %4216 = vmatprep.subr.bf16.mxu1 %v5402_v32  ;;  %v5290_v32 = vcombine.high %v1031_v26, %v1039_v27  ;;  %v944_v20 = vld [vmem:[%s6400_s16 + $0x358] sm:$0xff]  ;;  %v5211_v21 = vcombine.low %v952_v11, %v960_v12 }
 0x1ec   : > { %4174 = vmatpush1.bf16.msra.mxu0 %v5145_v37  ;;  %v1279_v37 = vld [vmem:[%s6400_s16 + $0xdd0] sm:$0xff] }
 0x1ed   : > { %4217 = vmatpush1.bf16.msra.mxu1 %v5401_v38  ;;  %4175 = vmatprep.subr.bf16.mxu0 %v5130_v39  ;;  %v5289_v38 = vcombine.low %v1031_v26, %v1039_v27  ;;  %v5545_v39 = vcombine.low %v1287_v28, %v1295_v29  ;;  %v5530_v41 = vcombine.high %v1271_v36, %v1279_v37  ;;  %v920_v26 = vld [vmem:[%s6400_s16 + $0x298] sm:$0xff] }
 0x1ee   : > { %4218 = vmatprep.subr.bf16.mxu1 %v5386_v40  ;;  %v5274_v40 = vcombine.high %v1015_v34, %v1023_v35  ;;  %v928_v27 = vld [vmem:[%s6400_s16 + $0x2d8] sm:$0xff] }
 0x1ef   : > { %v1176_v29 = vld [vmem:[%s6400_s16 + $0xa98] sm:$0xff] }
 0x1f0   : > { %4176 = vmatpush1.bf16.msra.mxu0 %v5129_v55  ;;  %v1263_v55 = vld [vmem:[%s6400_s16 + $0xd50] sm:$0xff] }
 0x1f1   : > { %4219 = vmatpush1.bf16.msra.mxu1 %v5385_v56  ;;  %4177 = vmatprep.subr.bf16.mxu0 %v5114_v57  ;;  %v5273_v56 = vcombine.low %v1015_v34, %v1023_v35  ;;  %v5529_v57 = vcombine.low %v1271_v36, %v1279_v37  ;;  %v5514_v59 = vcombine.high %v1255_v54, %v1263_v55  ;;  %v904_v35 = vld [vmem:[%s6400_s16 + $0x218] sm:$0xff] }
 0x1f2   : > { %4220 = vmatprep.subr.bf16.mxu1 %v5370_v58  ;;  %v5258_v58 = vcombine.high %v999_v42, %v1007_v43  ;;  %v912_v36 = vld [vmem:[%s6400_s16 + $0x258] sm:$0xff] }
 0x1f3   : > { %v1160_v37 = vld [vmem:[%s6400_s16 + $0xa18] sm:$0xff] }
 0x1f4   : > { %4178 = vmatpush1.bf16.msra.mxu0 %v5113_v3  ;;  %v1247_v3 = vld [vmem:[%s6400_s16 + $0xcd0] sm:$0xff] }
 0x1f5   : > { %4221 = vmatpush1.bf16.msra.mxu1 %v5369_v5  ;;  %4179 = vmatprep.subr.bf16.mxu0 %v5098_v45  ;;  %v5257_v5 = vcombine.low %v999_v42, %v1007_v43  ;;  %v5513_v45 = vcombine.low %v1255_v54, %v1263_v55  ;;  %v5498_v50 = vcombine.high %v1239_v1, %v1247_v3  ;;  %v888_v43 = vld [vmem:[%s6400_s16 + $0x198] sm:$0xff] }
 0x1f6   : > { %4222 = vmatprep.subr.bf16.mxu1 %v5354_v46  ;;  %v5242_v46 = vcombine.high %v983_v61, %v991_v62  ;;  %v896_v54 = vld [vmem:[%s6400_s16 + $0x1d8] sm:$0xff] }
 0x1f7   : > { %v1144_v55 = vld [vmem:[%s6400_s16 + $0x998] sm:$0xff] }
 0x1f8   : > { %4180 = vmatpush1.bf16.msra.mxu0 %v5097_v6  ;;  %v1231_v6 = vld [vmem:[%s6400_s16 + $0xc50] sm:$0xff] }
 0x1f9   : > { %4223 = vmatpush1.bf16.msra.mxu1 %v5353_v7  ;;  %4181 = vmatprep.subr.bf16.mxu0 %v5338_v8  ;;  %v5241_v7 = vcombine.low %v983_v61, %v991_v62  ;;  %v5497_v8 = vcombine.low %v1239_v1, %v1247_v3  ;;  %v5482_v10 = vcombine.high %v1223_v51, %v1231_v6  ;;  %v872_v62 = vld [vmem:[%s6400_s16 + $0x118] sm:$0xff] }
 0x1fa   : > { %4224 = vmatprep.subr.bf16.mxu1 %v5594_v9  ;;  %v5226_v9 = vcombine.high %v967_v47, %v975_v49  ;;  %v880_v1 = vld [vmem:[%s6400_s16 + $0x158] sm:$0xff] }
 0x1fb   : > { %v1128_v3 = vld [vmem:[%s6400_s16 + $0x918] sm:$0xff] }
 0x1fc   : > { %4182 = vmatpush2.bf16.msra.mxu0 %v5337_v14  ;;  %v1216_v14 = vld [vmem:[%s6400_s16 + $0xbd8] sm:$0xff] }
 0x1fd   : > { %4225 = vmatpush2.bf16.msra.mxu1 %v5593_v15  ;;  %4183 = vmatprep.subr.bf16.mxu0 %v5322_v16  ;;  %v5225_v15 = vcombine.low %v967_v47, %v975_v49  ;;  %v5481_v16 = vcombine.low %v1223_v51, %v1231_v6  ;;  %v5468_v18 = vcombine.high %v1208_v13, %v1216_v14  ;;  %v856_v49 = vld [vmem:[%s6400_s16 + $0x98] sm:$0xff] }
 0x1fe   : > { %4226 = vmatprep.subr.bf16.mxu1 %v5578_v17  ;;  %v5212_v17 = vcombine.high %v952_v11, %v960_v12  ;;  %v864_v51 = vld [vmem:[%s6400_s16 + $0xd8] sm:$0xff] }
 0x1ff   : > { %v1112_v6 = vld [vmem:[%s6400_s16 + $0x898] sm:$0xff] }
 0x200   : > { %4184 = vmatpush2.bf16.msra.mxu0 %v5321_v22  ;;  %v1192_v22 = vld [vmem:[%s6400_s16 + $0xb18] sm:$0xff] }
 0x201   : > { %4227 = vmatpush2.bf16.msra.mxu1 %v5577_v23  ;;  %4185 = vmatprep.subr.bf16.mxu0 %v5306_v24  ;;  %v1200_v23 = vld [vmem:[%s6400_s16 + $0xb58] sm:$0xff]  ;;  %v5467_v24 = vcombine.low %v1208_v13, %v1216_v14 }
 0x202   : > { %4228 = vmatprep.subr.bf16.mxu1 %v5562_v25  ;;  %v5196_v25 = vcombine.high %v936_v19, %v944_v20  ;;  %v5452_v28 = vcombine.high %v1192_v22, %v1200_v23  ;;  %v840_v12 = vld [vmem:[%s6400_s16 + $0x18] sm:$0xff] }
 0x203   : > { %v848_v13 = vld [vmem:[%s6400_s16 + $0x58] sm:$0xff] }
 0x204   : > { %4186 = vmatpush2.bf16.msra.mxu0 %v5305_v30  ;;  %v1184_v30 = vld [vmem:[%s6400_s16 + $0xad8] sm:$0xff] }
 0x205   : > { %4229 = vmatpush2.bf16.msra.mxu1 %v5561_v31  ;;  %4187 = vmatprep.subr.bf16.mxu0 %v5290_v32  ;;  %v5195_v31 = vcombine.low %v936_v19, %v944_v20  ;;  %v5451_v32 = vcombine.low %v1192_v22, %v1200_v23  ;;  %v5436_v34 = vcombine.high %v1176_v29, %v1184_v30  ;;  %v1096_v14 = vld [vmem:[%s6400_s16 + $0x818] sm:$0xff] }
 0x206   : > { %4230 = vmatprep.subr.bf16.mxu1 %v5546_v33  ;;  %v5180_v33 = vcombine.high %v920_v26, %v928_v27  ;;  %v1080_v20 = vld [vmem:[%s6400_s16 + $0x798] sm:$0xff] }
 0x207   : > { %v1336_v22 = vld [vmem:[%s6400_s16 + $0xf98] sm:$0xff] }
 0x208   : > { %4188 = vmatpush2.bf16.msra.mxu0 %v5289_v38  ;;  %v1168_v38 = vld [vmem:[%s6400_s16 + $0xa58] sm:$0xff] }
 0x209   : > { %4231 = vmatpush2.bf16.msra.mxu1 %v5545_v39  ;;  %4189 = vmatprep.subr.bf16.mxu0 %v5274_v40  ;;  %v5179_v39 = vcombine.low %v920_v26, %v928_v27  ;;  %v5435_v40 = vcombine.low %v1176_v29, %v1184_v30  ;;  %v5420_v42 = vcombine.high %v1160_v37, %v1168_v38  ;;  %v1344_v23 = vld [vmem:[%s6400_s16 + $0xfd8] sm:$0xff] }
 0x20a   : > { %4232 = vmatprep.subr.bf16.mxu1 %v5530_v41  ;;  %v5164_v41 = vcombine.high %v904_v35, %v912_v36  ;;  %v5596_v27 = vcombine.high %v1336_v22, %v1344_v23  ;;  %v1072_v29 = vld [vmem:[%s6400_s16 + $0x758] sm:$0xff] }
 0x20b   : > { %v1320_v30 = vld [vmem:[%s6400_s16 + $0xf18] sm:$0xff] }
 0x20c   : > { %4190 = vmatpush2.bf16.msra.mxu0 %v5273_v56  ;;  %v1152_v56 = vld [vmem:[%s6400_s16 + $0x9d8] sm:$0xff] }
 0x20d   : > { %4233 = vmatpush2.bf16.msra.mxu1 %v5529_v57  ;;  %4191 = vmatprep.subr.bf16.mxu0 %v5258_v58  ;;  %v5163_v57 = vcombine.low %v904_v35, %v912_v36  ;;  %v5419_v58 = vcombine.low %v1160_v37, %v1168_v38  ;;  %v5404_v61 = vcombine.high %v1144_v55, %v1152_v56  ;;  %v1048_v36 = vld [vmem:[%s6400_s16 + $0x698] sm:$0xff] }
 0x20e   : > { %4234 = vmatprep.subr.bf16.mxu1 %v5514_v59  ;;  %v5148_v59 = vcombine.high %v888_v43, %v896_v54  ;;  %v1056_v37 = vld [vmem:[%s6400_s16 + $0x6d8] sm:$0xff] }
 0x20f   : > { %v1304_v38 = vld [vmem:[%s6400_s16 + $0xe98] sm:$0xff] }
 0x210   : > { %4192 = vmatpush2.bf16.msra.mxu0 %v5257_v5  ;;  %v1136_v5 = vld [vmem:[%s6400_s16 + $0x958] sm:$0xff] }
 0x211   : > { %4235 = vmatpush2.bf16.msra.mxu1 %v5513_v45  ;;  %4193 = vmatprep.subr.bf16.mxu0 %v5242_v46  ;;  %v5147_v45 = vcombine.low %v888_v43, %v896_v54  ;;  %v5403_v46 = vcombine.low %v1144_v55, %v1152_v56  ;;  %v5388_v47 = vcombine.high %v1128_v3, %v1136_v5  ;;  %v1032_v54 = vld [vmem:[%s6400_s16 + $0x618] sm:$0xff] }
 0x212   : > { %4236 = vmatprep.subr.bf16.mxu1 %v5498_v50  ;;  %v5132_v50 = vcombine.high %v872_v62, %v880_v1  ;;  %v1040_v55 = vld [vmem:[%s6400_s16 + $0x658] sm:$0xff] }
 0x213   : > { %v1288_v56 = vld [vmem:[%s6400_s16 + $0xe18] sm:$0xff] }
 0x214   : > { %4194 = vmatpush2.bf16.msra.mxu0 %v5241_v7  ;;  %v1120_v7 = vld [vmem:[%s6400_s16 + $0x8d8] sm:$0xff] }
 0x215   : > { %4237 = vmatpush2.bf16.msra.mxu1 %v5497_v8  ;;  %4195 = vmatprep.subr.bf16.mxu0 %v5226_v9  ;;  %v5131_v8 = vcombine.low %v872_v62, %v880_v1  ;;  %v5387_v9 = vcombine.low %v1128_v3, %v1136_v5  ;;  %v5372_v11 = vcombine.high %v1112_v6, %v1120_v7  ;;  %v1016_v1 = vld [vmem:[%s6400_s16 + $0x598] sm:$0xff] }
 0x216   : > { %4238 = vmatprep.subr.bf16.mxu1 %v5482_v10  ;;  %v5116_v10 = vcombine.high %v856_v49, %v864_v51  ;;  %v1024_v3 = vld [vmem:[%s6400_s16 + $0x5d8] sm:$0xff] }
 0x217   : > { %v1272_v5 = vld [vmem:[%s6400_s16 + $0xd98] sm:$0xff] }
 0x218   : > { %4196 = vmatpush2.bf16.msra.mxu0 %v5225_v15  ;;  %v1104_v15 = vld [vmem:[%s6400_s16 + $0x858] sm:$0xff] }
 0x219   : > { %4239 = vmatpush2.bf16.msra.mxu1 %v5481_v16  ;;  %4251 = vmatprep.subr.bf16.mxu0 %v5212_v17  ;;  %v5115_v16 = vcombine.low %v856_v49, %v864_v51  ;;  %v5371_v17 = vcombine.low %v1112_v6, %v1120_v7  ;;  %v5356_v19 = vcombine.high %v1096_v14, %v1104_v15  ;;  %v1000_v51 = vld [vmem:[%s6400_s16 + $0x518] sm:$0xff] }
 0x21a   : > { %4294 = vmatprep.subr.bf16.mxu1 %v5468_v18  ;;  %v5100_v18 = vcombine.high %v840_v12, %v848_v13  ;;  %v1008_v6 = vld [vmem:[%s6400_s16 + $0x558] sm:$0xff] }
 0x21b   : > { %4198 = vmatmul.mubr.bf16.vlgmr.msra.gmra.mxu0 %v6520_v52  ;;  %v1256_v7 = vld [vmem:[%s6400_s16 + $0xd18] sm:$0xff] }
 0x21c   : > { %4241 = vmatmul.mubr.bf16.vlgmr.msra.gmra.mxu1 %v6522_v53  ;;  %4252 = vmatpush1.bf16.msra.mxu0 %v5211_v21  ;;  %v1088_v21 = vld [vmem:[%s6400_s16 + $0x7d8] sm:$0xff] }
 0x21d   : > { %4283 = vmatprep.mubr.bf16.mxu0 %v6516_v44  ;;  %4295 = vmatpush1.bf16.msra.mxu1 %v5467_v24  ;;  %v5099_v24 = vcombine.low %v840_v12, %v848_v13  ;;  %v5340_v26 = vcombine.high %v1080_v20, %v1088_v21  ;;  %v984_v13 = vld [vmem:[%s6400_s16 + $0x498] sm:$0xff] }
 0x21e   : > { %4326 = vmatprep.mubr.bf16.mxu1 %v6518_v48  ;;  %4253 = vmatprep.subr.bf16.mxu0 %v5196_v25  ;;  %v5355_v25 = vcombine.low %v1096_v14, %v1104_v15  ;;  %v992_v14 = vld [vmem:[%s6400_s16 + $0x4d8] sm:$0xff] }
 0x21f   : > { %4296 = vmatprep.subr.bf16.mxu1 %v5452_v28  ;;  %v1064_v28 = vld [vmem:[%s6400_s16 + $0x718] sm:$0xff] }
 0x220   : > { %4254 = vmatpush1.bf16.msra.mxu0 %v5195_v31  ;;  %v1328_v31 = vld [vmem:[%s6400_s16 + $0xf58] sm:$0xff] }
 0x221   : > { %4297 = vmatpush1.bf16.msra.mxu1 %v5451_v32  ;;  %4255 = vmatprep.subr.bf16.mxu0 %v5180_v33  ;;  %v5339_v32 = vcombine.low %v1080_v20, %v1088_v21  ;;  %v5595_v33 = vcombine.low %v1336_v22, %v1344_v23  ;;  %v5580_v35 = vcombine.high %v1320_v30, %v1328_v31  ;;  %v1240_v15 = vld [vmem:[%s6400_s16 + $0xc98] sm:$0xff] }
 0x222   : > { %4298 = vmatprep.subr.bf16.mxu1 %v5436_v34  ;;  %v5324_v34 = vcombine.high %v1064_v28, %v1072_v29  ;;  %v968_v21 = vld [vmem:[%s6400_s16 + $0x418] sm:$0xff] }
 0x223   : > { %v976_v22 = vld [vmem:[%s6400_s16 + $0x458] sm:$0xff] }
 0x224   : > { %4256 = vmatpush1.bf16.msra.mxu0 %v5179_v39  ;;  %v1312_v39 = vld [vmem:[%s6400_s16 + $0xed8] sm:$0xff] }
 0x225   : > { %4299 = vmatpush1.bf16.msra.mxu1 %v5435_v40  ;;  %4257 = vmatprep.subr.bf16.mxu0 %v5164_v41  ;;  %v5323_v40 = vcombine.low %v1064_v28, %v1072_v29  ;;  %v5579_v41 = vcombine.low %v1320_v30, %v1328_v31  ;;  %v5564_v43 = vcombine.high %v1304_v38, %v1312_v39  ;;  %v1224_v23 = vld [vmem:[%s6400_s16 + $0xc18] sm:$0xff]  ;;  %v953_v29 = vld [vmem:[%s6400_s16 + $0x3a0] sm:$0xff] }
 0x226   : > { %4300 = vmatprep.subr.bf16.mxu1 %v5420_v42  ;;  %v5308_v42 = vcombine.high %v1048_v36, %v1056_v37  ;;  %v961_v30 = vld [vmem:[%s6400_s16 + $0x3e0] sm:$0xff] }
 0x227   : > { %v1209_v31 = vld [vmem:[%s6400_s16 + $0xba0] sm:$0xff] }
 0x228   : > { %4258 = vmatpush1.bf16.msra.mxu0 %v5163_v57  ;;  %v1296_v57 = vld [vmem:[%s6400_s16 + $0xe58] sm:$0xff] }
 0x229   : > { %4301 = vmatpush1.bf16.msra.mxu1 %v5419_v58  ;;  %4259 = vmatprep.subr.bf16.mxu0 %v5148_v59  ;;  %v5307_v58 = vcombine.low %v1048_v36, %v1056_v37  ;;  %v5563_v59 = vcombine.low %v1304_v38, %v1312_v39  ;;  %v5548_v62 = vcombine.high %v1288_v56, %v1296_v57  ;;  %v6736_v36 = vld [vmem:[%s6733_s15] sm:$0xff] }
 0x22a   : > { %4302 = vmatprep.subr.bf16.mxu1 %v5404_v61  ;;  %v5292_v61 = vcombine.high %v1032_v54, %v1040_v55  ;;  %v937_v38 = vld [vmem:[%s6400_s16 + $0x320] sm:$0xff] }
 0x22b   : > { %v945_v39 = vld [vmem:[%s6400_s16 + $0x360] sm:$0xff] }
 0x22c   : > { %4260 = vmatpush1.bf16.msra.mxu0 %v5147_v45  ;;  %v1280_v45 = vld [vmem:[%s6400_s16 + $0xdd8] sm:$0xff] }
 0x22d   : > { %4303 = vmatpush1.bf16.msra.mxu1 %v5403_v46  ;;  %4261 = vmatprep.subr.bf16.mxu0 %v5132_v50  ;;  %v5291_v46 = vcombine.low %v1032_v54, %v1040_v55  ;;  %v5547_v50 = vcombine.low %v1288_v56, %v1296_v57  ;;  %v5532_v49 = vcombine.high %v1272_v5, %v1280_v45  ;;  %v921_v57 = vld [vmem:[%s6400_s16 + $0x2a0] sm:$0xff] }
 0x22e   : > { %4304 = vmatprep.subr.bf16.mxu1 %v5388_v47  ;;  %v5276_v47 = vcombine.high %v1016_v1, %v1024_v3  ;;  %v1360_v55 = vrot.slane %v6736_v36, %v6497_v63  ;;  %v5198_v56 = vcombine.high %v937_v38, %v945_v39 }
 0x230   : > { %4262 = vmatpush1.bf16.msra.mxu0 %v5131_v8  ;;  %v1264_v8 = vld [vmem:[%s6400_s16 + $0xd58] sm:$0xff] }
 0x231   : > { %4305 = vmatpush1.bf16.msra.mxu1 %v5387_v9  ;;  %4263 = vmatprep.subr.bf16.mxu0 %v5116_v10  ;;  %v5275_v9 = vcombine.low %v1016_v1, %v1024_v3  ;;  %v5531_v10 = vcombine.low %v1272_v5, %v1280_v45  ;;  %v5516_v12 = vcombine.high %v1256_v7, %v1264_v8  ;;  %v1177_v1 = vld [vmem:[%s6400_s16 + $0xaa0] sm:$0xff] }
 0x232   : > { %4306 = vmatprep.subr.bf16.mxu1 %v5372_v11  ;;  %v5260_v11 = vcombine.high %v1000_v51, %v1008_v6  ;;  %v1185_v3 = vld [vmem:[%s6400_s16 + $0xae0] sm:$0xff]  ;;  %v5197_v45 = vcombine.low %v937_v38, %v945_v39 }
 0x233   : > { %v873_v38 = vld [vmem:[%s6400_s16 + $0x120] sm:$0xff] }
 0x234   : > { %4264 = vmatpush1.bf16.msra.mxu0 %v5115_v16  ;;  %v1248_v16 = vld [vmem:[%s6400_s16 + $0xcd8] sm:$0xff]  ;;  %v881_v39 = vld [vmem:[%s6400_s16 + $0x160] sm:$0xff] }
 0x235   : > { %4307 = vmatpush1.bf16.msra.mxu1 %v5371_v17  ;;  %4265 = vmatprep.subr.bf16.mxu0 %v5100_v18  ;;  %v5259_v17 = vcombine.low %v1000_v51, %v1008_v6  ;;  %v5515_v18 = vcombine.low %v1256_v7, %v1264_v8  ;;  %v5500_v20 = vcombine.high %v1240_v15, %v1248_v16  ;;  %v905_v51 = vld [vmem:[%s6400_s16 + $0x220] sm:$0xff] }
 0x236   : > { %4308 = vmatprep.subr.bf16.mxu1 %v5356_v19  ;;  %v5244_v19 = vcombine.high %v984_v13, %v992_v14  ;;  %v5438_v8 = vcombine.high %v1177_v1, %v1185_v3 }
 0x238   : > { %4266 = vmatpush1.bf16.msra.mxu0 %v5099_v24  ;;  %v1232_v24 = vld [vmem:[%s6400_s16 + $0xc58] sm:$0xff] }
 0x239   : > { %4309 = vmatpush1.bf16.msra.mxu1 %v5355_v25  ;;  %4267 = vmatprep.subr.bf16.mxu0 %v5340_v26  ;;  %v5243_v25 = vcombine.low %v984_v13, %v992_v14  ;;  %v5499_v26 = vcombine.low %v1240_v15, %v1248_v16  ;;  %v5484_v28 = vcombine.high %v1224_v23, %v1232_v24 }
 0x23a   : > { %4310 = vmatprep.subr.bf16.mxu1 %v5596_v27  ;;  %v5228_v27 = vcombine.high %v968_v21, %v976_v22 }
 0x23c   : > { %4268 = vmatpush2.bf16.msra.mxu0 %v5339_v32  ;;  %v1217_v32 = vld [vmem:[%s6400_s16 + $0xbe0] sm:$0xff] }
 0x23d   : > { %4311 = vmatpush2.bf16.msra.mxu1 %v5595_v33  ;;  %4269 = vmatprep.subr.bf16.mxu0 %v5324_v34  ;;  %v5227_v33 = vcombine.low %v968_v21, %v976_v22  ;;  %v5483_v34 = vcombine.low %v1224_v23, %v1232_v24  ;;  %v5470_v37 = vcombine.high %v1209_v31, %v1217_v32 }
 0x23e   : > { %4312 = vmatprep.subr.bf16.mxu1 %v5580_v35  ;;  %v5214_v35 = vcombine.high %v953_v29, %v961_v30  ;;  %v5469_v54 = vcombine.low %v1209_v31, %v1217_v32 }
 0x240   : > { %4270 = vmatpush2.bf16.msra.mxu0 %v5323_v40  ;;  %v5213_v40 = vcombine.low %v953_v29, %v961_v30  ;;  %v1153_v29 = vld [vmem:[%s6400_s16 + $0x9e0] sm:$0xff] }
 0x241   : > { %4313 = vmatpush2.bf16.msra.mxu1 %v5579_v41  ;;  %4271 = vmatprep.subr.bf16.mxu0 %v5308_v42  ;;  %v1356_v41 = vrot.slane %v6736_v36, %v6503_v2  ;;  %v1193_v42 = vld [vmem:[%s6400_s16 + $0xb20] sm:$0xff] }
 0x242   : > { %4314 = vmatprep.subr.bf16.mxu1 %v5564_v43  ;;  %v1201_v43 = vld [vmem:[%s6400_s16 + $0xb60] sm:$0xff] }
 0x244   : > { %4272 = vmatpush2.bf16.msra.mxu0 %v5307_v58  ;;  %v929_v58 = vld [vmem:[%s6400_s16 + $0x2e0] sm:$0xff] }
 0x245   : > { %4315 = vmatpush2.bf16.msra.mxu1 %v5563_v59  ;;  %4273 = vmatprep.subr.bf16.mxu0 %v5292_v61 }
 0x246   : > { %4316 = vmatprep.subr.bf16.mxu1 %v5548_v62  ;;  %v5454_v62 = vcombine.high %v1193_v42, %v1201_v43 }
 0x248   : > { %4274 = vmatpush2.bf16.msra.mxu0 %v5291_v46 }
 0x249   : > { %4317 = vmatpush2.bf16.msra.mxu1 %v5547_v50  ;;  %4275 = vmatprep.subr.bf16.mxu0 %v5276_v47  ;;  %v5453_v47 = vcombine.low %v1193_v42, %v1201_v43 }
 0x24a   : > { %4318 = vmatprep.subr.bf16.mxu1 %v5532_v49  ;;  %v5182_v49 = vcombine.high %v921_v57, %v929_v58 }
 0x24c   : > { %4276 = vmatpush2.bf16.msra.mxu0 %v5275_v9  ;;  %v913_v9 = vld [vmem:[%s6400_s16 + $0x260] sm:$0xff] }
 0x24d   : > { %4319 = vmatpush2.bf16.msra.mxu1 %v5531_v10  ;;  %4277 = vmatprep.subr.bf16.mxu0 %v5260_v11  ;;  %v1161_v10 = vld [vmem:[%s6400_s16 + $0xa20] sm:$0xff]  ;;  %v5165_v32 = vcombine.low %v905_v51, %v913_v9 }
 0x24e   : > { %4320 = vmatprep.subr.bf16.mxu1 %v5516_v12  ;;  %v1169_v11 = vld [vmem:[%s6400_s16 + $0xa60] sm:$0xff] }
 0x24f   : > { %v5422_v21 = vcombine.high %v1161_v10, %v1169_v11 }
 0x250   : > { %4278 = vmatpush2.bf16.msra.mxu0 %v5259_v17  ;;  %v5181_v17 = vcombine.low %v921_v57, %v929_v58  ;;  %v865_v57 = vld [vmem:[%s6400_s16 + $0xe0] sm:$0xff] }
 0x251   : > { %4321 = vmatpush2.bf16.msra.mxu1 %v5515_v18  ;;  %4279 = vmatprep.subr.bf16.mxu0 %v5244_v19  ;;  %v5437_v19 = vcombine.low %v1177_v1, %v1185_v3  ;;  %v1113_v58 = vld [vmem:[%s6400_s16 + $0x8a0] sm:$0xff] }
 0x252   : > { %4322 = vmatprep.subr.bf16.mxu1 %v5500_v20  ;;  %v5166_v20 = vcombine.high %v905_v51, %v913_v9 }
 0x254   : > { %4280 = vmatpush2.bf16.msra.mxu0 %v5243_v25  ;;  %v889_v25 = vld [vmem:[%s6400_s16 + $0x1a0] sm:$0xff] }
 0x255   : > { %4323 = vmatpush2.bf16.msra.mxu1 %v5499_v26  ;;  %4281 = vmatprep.subr.bf16.mxu0 %v5228_v27  ;;  %v897_v26 = vld [vmem:[%s6400_s16 + $0x1e0] sm:$0xff] }
 0x256   : > { %4324 = vmatprep.subr.bf16.mxu1 %v5484_v28  ;;  %v1145_v28 = vld [vmem:[%s6400_s16 + $0x9a0] sm:$0xff]  ;;  %v5149_v42 = vcombine.low %v889_v25, %v897_v26 }
 0x257   : > { %v5405_v43 = vcombine.low %v1145_v28, %v1153_v29 }
 0x258   : > { %4282 = vmatpush2.bf16.msra.mxu0 %v5227_v33  ;;  %v5421_v33 = vcombine.low %v1161_v10, %v1169_v11 }
 0x259   : > { %4325 = vmatpush2.bf16.msra.mxu1 %v5483_v34  ;;  %4337 = vmatprep.subr.bf16.mxu0 %v5214_v35  ;;  %v5150_v34 = vcombine.high %v889_v25, %v897_v26  ;;  %v1065_v26 = vld [vmem:[%s6400_s16 + $0x720] sm:$0xff] }
 0x25a   : > { %4380 = vmatprep.subr.bf16.mxu1 %v5470_v37  ;;  %v5406_v37 = vcombine.high %v1145_v28, %v1153_v29  ;;  %v1321_v28 = vld [vmem:[%s6400_s16 + $0xf20] sm:$0xff] }
 0x25b   : > { %4284 = vmatmul.mubr.bf16.vlgmr.msra.gmra.mxu0 %v6520_v52  ;;  %v4027_v59 = vpop.f32.mrf.mxu0  ;;  %v4070_v61 = vpop.f32.mrf.mxu1  ;;  %v1329_v29 = vld [vmem:[%s6400_s16 + $0xf60] sm:$0xff] }
 0x25c   : > { %4327 = vmatmul.mubr.bf16.vlgmr.msra.gmra.mxu1 %v6522_v53  ;;  %v4028_v5 = vadd.f32 %v4027_v59, %v1356_v41  ;;  %4338 = vmatpush1.bf16.msra.mxu0 %v5213_v40  ;;  %v1129_v40 = vld [vmem:[%s6400_s16 + $0x920] sm:$0xff] }
 0x25d   : > { %4369 = vmatprep.mubr.bf16.mxu0 %v6516_v44  ;;  %4381 = vmatpush1.bf16.msra.mxu1 %v5469_v54  ;;  %v4029_v46 = vpop.f32.mrf.mxu0  ;;  %v4072_v50 = vpop.f32.mrf.mxu1  ;;  %v5134_v54 = vcombine.high %v873_v38, %v881_v39  ;;  %v1121_v59 = vld [vmem:[%s6400_s16 + $0x8e0] sm:$0xff] }
 0x25e   : > { %v4071_v6 = vadd.f32 %v4070_v61, %v4028_v5  ;;  %4412 = vmatprep.mubr.bf16.mxu1 %v6518_v48  ;;  %v4030_v7 = vadd.f32 %v4029_v46, %v1360_v55  ;;  %4339 = vmatprep.subr.bf16.mxu0 %v5198_v56  ;;  %v857_v56 = vld [vmem:[%s6400_s16 + $0xa0] sm:$0xff]  ;;  %v5133_v61 = vcombine.low %v873_v38, %v881_v39 }
 0x25f   : > { %4382 = vmatprep.subr.bf16.mxu1 %v5454_v62  ;;  %v4031_v12 = vpop.f32.mrf.mxu0  ;;  %v4074_v13 = vpop.f32.mrf.mxu1  ;;  %v5118_v1 = vcombine.high %v857_v56, %v865_v57  ;;  %v5374_v3 = vcombine.high %v1113_v58, %v1121_v59  ;;  %v841_v5 = vld [vmem:[%s6400_s16 + $0x20] sm:$0xff]  ;;  %v5117_v51 = vcombine.low %v857_v56, %v865_v57 }
 0x260   : > { %v5605_v14 = vclamps-f32 %v4071_v6, 5.0  ;;  %v4073_v15 = vadd.f32 %v4072_v50, %v4030_v7  ;;  %v4032_v16 = vadd.f32 %v4031_v12, %v1356_v41  ;;  %4340 = vmatpush1.bf16.msra.mxu0 %v5197_v45  ;;  %v1137_v41 = vld [vmem:[%s6400_s16 + $0x960] sm:$0xff]  ;;  %v5373_v7 = vcombine.low %v1113_v58, %v1121_v59 }
 0x261   : > { %4383 = vmatpush1.bf16.msra.mxu1 %v5453_v47  ;;  %v4033_v18 = vpop.f32.mrf.mxu0  ;;  %4341 = vmatprep.subr.bf16.mxu0 %v5182_v49  ;;  %v4076_v27 = vpop.f32.mrf.mxu1  ;;  %v5389_v62 = vcombine.low %v1129_v40, %v1137_v41  ;;  %v849_v45 = vld [vmem:[%s6400_s16 + $0x60] sm:$0xff] }
 0x262   : > { %5804 = vtanh.f32 %v5605_v14  ;;  %v5606_v22 = vclamps-f32 %v4073_v15, 5.0  ;;  %v4075_v23 = vadd.f32 %v4074_v13, %v4032_v16  ;;  %v4034_v24 = vadd.f32 %v4033_v18, %v1360_v55  ;;  %4384 = vmatprep.subr.bf16.mxu1 %v5438_v8  ;;  %v1097_v50 = vld [vmem:[%s6400_s16 + $0x820] sm:$0xff] }
 0x263   : > { %v5390_v55 = vcombine.high %v1129_v40, %v1137_v41  ;;  %v1105_v47 = vld [vmem:[%s6400_s16 + $0x860] sm:$0xff]  ;;  %v5102_v8 = vcombine.high %v841_v5, %v849_v45  ;;  %v5581_v41 = vcombine.low %v1321_v28, %v1329_v29 }
 0x264   : > { %5806 = vtanh.f32 %v5606_v22  ;;  %v5621_v30 = vclamps-f32 %v4075_v23, 5.0  ;;  %v4077_v31 = vadd.f32 %v4076_v27, %v4034_v24  ;;  %4342 = vmatpush1.bf16.msra.mxu0 %v5181_v17  ;;  %v5358_v11 = vcombine.high %v1097_v50, %v1105_v47  ;;  %v1081_v12 = vld [vmem:[%s6400_s16 + $0x7a0] sm:$0xff] }
 0x265   : > { %4385 = vmatpush1.bf16.msra.mxu1 %v5437_v19  ;;  %4343 = vmatprep.subr.bf16.mxu0 %v5166_v20  ;;  %v1089_v13 = vld [vmem:[%s6400_s16 + $0x7e0] sm:$0xff]  ;;  %v5101_v19 = vcombine.low %v841_v5, %v849_v45 }
 0x266   : > { %5808 = vtanh.f32 %v5621_v30  ;;  %v5622_v35 = vclamps-f32 %v4077_v31, 5.0  ;;  %4386 = vmatprep.subr.bf16.mxu1 %v5422_v21  ;;  %v1337_v15 = vld [vmem:[%s6400_s16 + $0xfa0] sm:$0xff]  ;;  %v5357_v21 = vcombine.low %v1097_v50, %v1105_v47  ;;  %v5342_v22 = vcombine.high %v1081_v12, %v1089_v13 }
 0x267   : > { %v1345_v16 = vld [vmem:[%s6400_s16 + $0xfe0] sm:$0xff]  ;;  %v5341_v31 = vcombine.low %v1081_v12, %v1089_v13 }
 0x268   : > { %5810 = vtanh.f32 %v5622_v35  ;;  %4344 = vmatpush1.bf16.msra.mxu0 %v5165_v32  ;;  %v5598_v25 = vcombine.high %v1337_v15, %v1345_v16  ;;  %v1073_v27 = vld [vmem:[%s6400_s16 + $0x760] sm:$0xff]  ;;  %v5597_v32 = vcombine.low %v1337_v15, %v1345_v16 }
 0x269   : > { %4387 = vmatpush1.bf16.msra.mxu1 %v5421_v33  ;;  %4345 = vmatprep.subr.bf16.mxu0 %v5150_v34  ;;  %v5326_v33 = vcombine.high %v1065_v26, %v1073_v27  ;;  %v5582_v34 = vcombine.high %v1321_v28, %v1329_v29  ;;  %v1049_v35 = vld [vmem:[%s6400_s16 + $0x6a0] sm:$0xff]  ;;  %v5325_v40 = vcombine.low %v1065_v26, %v1073_v27  ;;  %v954_v29 = vld [vmem:[%s6400_s16 + $0x3a8] sm:$0xff] }
 0x26a   : > { %4388 = vmatprep.subr.bf16.mxu1 %v5406_v37  ;;  %v1057_v37 = vld [vmem:[%s6400_s16 + $0x6e0] sm:$0xff] }
 0x26b   : > { %v1305_v38 = vld [vmem:[%s6400_s16 + $0xea0] sm:$0xff]  ;;  %v5309_v58 = vcombine.low %v1049_v35, %v1057_v37 }
 0x26c   : > { %4346 = vmatpush1.bf16.msra.mxu0 %v5149_v42  ;;  %v1313_v39 = vld [vmem:[%s6400_s16 + $0xee0] sm:$0xff]  ;;  %v5310_v42 = vcombine.high %v1049_v35, %v1057_v37 }
 0x26d   : > { %4389 = vmatpush1.bf16.msra.mxu1 %v5405_v43  ;;  %4347 = vmatprep.subr.bf16.mxu0 %v5134_v54  ;;  %v5566_v43 = vcombine.high %v1305_v38, %v1313_v39  ;;  %v1033_v54 = vld [vmem:[%s6400_s16 + $0x620] sm:$0xff]  ;;  %v5565_v59 = vcombine.low %v1305_v38, %v1313_v39  ;;  %v938_v38 = vld [vmem:[%s6400_s16 + $0x328] sm:$0xff] }
 0x26e   : > { %4390 = vmatprep.subr.bf16.mxu1 %v5390_v55  ;;  %v1041_v55 = vld [vmem:[%s6400_s16 + $0x660] sm:$0xff]  ;;  %v946_v39 = vld [vmem:[%s6400_s16 + $0x368] sm:$0xff] }
 0x26f   : > { %v5805_v46 = vpop.eup %5804  ;;  %v1289_v56 = vld [vmem:[%s6400_s16 + $0xe20] sm:$0xff] }
 0x270   : > { %v4777_v49 = vmul.f32 3.14159, %v5805_v46  ;;  %4348 = vmatpush1.bf16.msra.mxu0 %v5133_v61  ;;  %v1297_v57 = vld [vmem:[%s6400_s16 + $0xe60] sm:$0xff]  ;;  %v5294_v61 = vcombine.high %v1033_v54, %v1041_v55  ;;  %v5293_v46 = vcombine.low %v1033_v54, %v1041_v55  ;;  %v1368_v55 = vrot.slane %v6736_v36, %v6500_v0 }
 0x271   : > { %v5807_v6 = vpop.eup %5806  ;;  %4391 = vmatpush1.bf16.msra.mxu1 %v5389_v62  ;;  %4349 = vmatprep.subr.bf16.mxu0 %v5118_v1  ;;  %v5550_v62 = vcombine.high %v1289_v56, %v1297_v57  ;;  %v1017_v1 = vld [vmem:[%s6400_s16 + $0x5a0] sm:$0xff]  ;;  %v5549_v50 = vcombine.low %v1289_v56, %v1297_v57  ;;  %v5200_v56 = vcombine.high %v938_v38, %v946_v39  ;;  %v922_v57 = vld [vmem:[%s6400_s16 + $0x2a8] sm:$0xff] }
 0x272   : > { %v4809_v9 = vadd.f32 3.14159, %v4777_v49  ;;  %v4778_v10 = vmul.f32 3.14159, %v5807_v6  ;;  %4392 = vmatprep.subr.bf16.mxu1 %v5374_v3  ;;  %v1025_v3 = vld [vmem:[%s6400_s16 + $0x5e0] sm:$0xff] }
 0x273   : > { %v5809_v14 = vpop.eup %5808  ;;  %v1273_v5 = vld [vmem:[%s6400_s16 + $0xda0] sm:$0xff]  ;;  %v5278_v47 = vcombine.high %v1017_v1, %v1025_v3 }
 0x274   : > { %4841 = vst [vmem:[%s6779_s5] sm:$0xff] %v4809_v9  ;;  %v4810_v17 = vadd.f32 3.14159, %v4778_v10  ;;  %v4793_v18 = vmul.f32 3.14159, %v5809_v14  ;;  %4350 = vmatpush1.bf16.msra.mxu0 %v5117_v51  ;;  %v1281_v45 = vld [vmem:[%s6400_s16 + $0xde0] sm:$0xff]  ;;  %v5277_v9 = vcombine.low %v1017_v1, %v1025_v3  ;;  %v1178_v1 = vld [vmem:[%s6400_s16 + $0xaa8] sm:$0xff] }
 0x275   : > { %v5811_v20 = vpop.eup %5810  ;;  %4393 = vmatpush1.bf16.msra.mxu1 %v5373_v7  ;;  %4351 = vmatprep.subr.bf16.mxu0 %v5102_v8  ;;  %v5534_v49 = vcombine.high %v1273_v5, %v1281_v45  ;;  %v1001_v51 = vld [vmem:[%s6400_s16 + $0x520] sm:$0xff]  ;;  %v5533_v10 = vcombine.low %v1273_v5, %v1281_v45  ;;  %v1186_v3 = vld [vmem:[%s6400_s16 + $0xae8] sm:$0xff]  ;;  %v5199_v45 = vcombine.low %v938_v38, %v946_v39 }
 0x276   : > { %4842 = vst [vmem:[%s6779_s5 + $0x8] sm:$0xff] %v4810_v17  ;;  %v4825_v23 = vadd.f32 3.14159, %v4793_v18  ;;  %v4794_v24 = vmul.f32 3.14159, %v5811_v20  ;;  %4394 = vmatprep.subr.bf16.mxu1 %v5358_v11  ;;  %v1009_v6 = vld [vmem:[%s6400_s16 + $0x560] sm:$0xff] }
 0x277   : > { %v1257_v7 = vld [vmem:[%s6400_s16 + $0xd20] sm:$0xff]  ;;  %v5262_v11 = vcombine.high %v1001_v51, %v1009_v6  ;;  %v5261_v17 = vcombine.low %v1001_v51, %v1009_v6  ;;  %v906_v51 = vld [vmem:[%s6400_s16 + $0x228] sm:$0xff] }
 0x278   : > { %4857 = vst [vmem:[%s6779_s5 + $0x80] sm:$0xff] %v4825_v23  ;;  %v4826_v30 = vadd.f32 3.14159, %v4794_v24  ;;  %4352 = vmatpush1.bf16.msra.mxu0 %v5101_v19  ;;  %v1265_v8 = vld [vmem:[%s6400_s16 + $0xd60] sm:$0xff]  ;;  %v874_v38 = vld [vmem:[%s6400_s16 + $0x128] sm:$0xff] }
 0x279   : > { %4395 = vmatpush1.bf16.msra.mxu1 %v5357_v21  ;;  %4353 = vmatprep.subr.bf16.mxu0 %v5342_v22  ;;  %v5518_v12 = vcombine.high %v1257_v7, %v1265_v8  ;;  %v985_v13 = vld [vmem:[%s6400_s16 + $0x4a0] sm:$0xff]  ;;  %v5517_v18 = vcombine.low %v1257_v7, %v1265_v8  ;;  %v5440_v8 = vcombine.high %v1178_v1, %v1186_v3  ;;  %v882_v39 = vld [vmem:[%s6400_s16 + $0x168] sm:$0xff] }
 0x27a   : > { %4858 = vst [vmem:[%s6779_s5 + $0x88] sm:$0xff] %v4826_v30  ;;  %4396 = vmatprep.subr.bf16.mxu1 %v5598_v25  ;;  %v993_v14 = vld [vmem:[%s6400_s16 + $0x4e0] sm:$0xff]  ;;  %v962_v30 = vld [vmem:[%s6400_s16 + $0x3e8] sm:$0xff] }
 0x27b   : > { %v1241_v15 = vld [vmem:[%s6400_s16 + $0xca0] sm:$0xff]  ;;  %v5246_v19 = vcombine.high %v985_v13, %v993_v14  ;;  %v5245_v25 = vcombine.low %v985_v13, %v993_v14  ;;  %v5216_v35 = vcombine.high %v954_v29, %v962_v30 }
 0x27c   : > { %4354 = vmatpush2.bf16.msra.mxu0 %v5341_v31  ;;  %v1249_v16 = vld [vmem:[%s6400_s16 + $0xce0] sm:$0xff]  ;;  %v1210_v31 = vld [vmem:[%s6400_s16 + $0xba8] sm:$0xff] }
 0x27d   : > { %4397 = vmatpush2.bf16.msra.mxu1 %v5597_v32  ;;  %4355 = vmatprep.subr.bf16.mxu0 %v5326_v33  ;;  %v5502_v20 = vcombine.high %v1241_v15, %v1249_v16  ;;  %v969_v21 = vld [vmem:[%s6400_s16 + $0x420] sm:$0xff]  ;;  %v5501_v26 = vcombine.low %v1241_v15, %v1249_v16  ;;  %v1218_v32 = vld [vmem:[%s6400_s16 + $0xbe8] sm:$0xff] }
 0x27e   : > { %4398 = vmatprep.subr.bf16.mxu1 %v5582_v34  ;;  %v977_v22 = vld [vmem:[%s6400_s16 + $0x460] sm:$0xff]  ;;  %v5472_v37 = vcombine.high %v1210_v31, %v1218_v32  ;;  %v5471_v54 = vcombine.low %v1210_v31, %v1218_v32 }
 0x27f   : > { %v1225_v23 = vld [vmem:[%s6400_s16 + $0xc20] sm:$0xff]  ;;  %v5230_v27 = vcombine.high %v969_v21, %v977_v22  ;;  %v5229_v33 = vcombine.low %v969_v21, %v977_v22 }
 0x280   : > { %4356 = vmatpush2.bf16.msra.mxu0 %v5325_v40  ;;  %v1233_v24 = vld [vmem:[%s6400_s16 + $0xc60] sm:$0xff]  ;;  %v1364_v40 = vrot.slane %v6736_v36, %v6506_v4 }
 0x281   : > { %4399 = vmatpush2.bf16.msra.mxu1 %v5581_v41  ;;  %4357 = vmatprep.subr.bf16.mxu0 %v5310_v42  ;;  %v5486_v28 = vcombine.high %v1225_v23, %v1233_v24  ;;  %v5485_v34 = vcombine.low %v1225_v23, %v1233_v24  ;;  %v5215_v41 = vcombine.low %v954_v29, %v962_v30  ;;  %v1194_v42 = vld [vmem:[%s6400_s16 + $0xb28] sm:$0xff] }
 0x282   : > { %4400 = vmatprep.subr.bf16.mxu1 %v5566_v43  ;;  %v1202_v43 = vld [vmem:[%s6400_s16 + $0xb68] sm:$0xff] }
 0x283   : > { %v1154_v29 = vld [vmem:[%s6400_s16 + $0x9e8] sm:$0xff] }
 0x284   : > { %4358 = vmatpush2.bf16.msra.mxu0 %v5309_v58  ;;  %v930_v58 = vld [vmem:[%s6400_s16 + $0x2e8] sm:$0xff] }
 0x285   : > { %4401 = vmatpush2.bf16.msra.mxu1 %v5565_v59  ;;  %4359 = vmatprep.subr.bf16.mxu0 %v5294_v61 }
 0x286   : > { %4402 = vmatprep.subr.bf16.mxu1 %v5550_v62  ;;  %v5456_v62 = vcombine.high %v1194_v42, %v1202_v43 }
 0x288   : > { %4360 = vmatpush2.bf16.msra.mxu0 %v5293_v46 }
 0x289   : > { %4403 = vmatpush2.bf16.msra.mxu1 %v5549_v50  ;;  %4361 = vmatprep.subr.bf16.mxu0 %v5278_v47  ;;  %v5455_v47 = vcombine.low %v1194_v42, %v1202_v43 }
 0x28a   : > { %4404 = vmatprep.subr.bf16.mxu1 %v5534_v49  ;;  %v5184_v49 = vcombine.high %v922_v57, %v930_v58 }
 0x28c   : > { %4362 = vmatpush2.bf16.msra.mxu0 %v5277_v9  ;;  %v914_v9 = vld [vmem:[%s6400_s16 + $0x268] sm:$0xff] }
 0x28d   : > { %4405 = vmatpush2.bf16.msra.mxu1 %v5533_v10  ;;  %4363 = vmatprep.subr.bf16.mxu0 %v5262_v11  ;;  %v1162_v10 = vld [vmem:[%s6400_s16 + $0xa28] sm:$0xff]  ;;  %v5167_v32 = vcombine.low %v906_v51, %v914_v9 }
 0x28e   : > { %4406 = vmatprep.subr.bf16.mxu1 %v5518_v12  ;;  %v1170_v11 = vld [vmem:[%s6400_s16 + $0xa68] sm:$0xff] }
 0x28f   : > { %v5424_v21 = vcombine.high %v1162_v10, %v1170_v11 }
 0x290   : > { %4364 = vmatpush2.bf16.msra.mxu0 %v5261_v17  ;;  %v5183_v17 = vcombine.low %v922_v57, %v930_v58  ;;  %v866_v57 = vld [vmem:[%s6400_s16 + $0xe8] sm:$0xff] }
 0x291   : > { %4407 = vmatpush2.bf16.msra.mxu1 %v5517_v18  ;;  %4365 = vmatprep.subr.bf16.mxu0 %v5246_v19  ;;  %v5439_v19 = vcombine.low %v1178_v1, %v1186_v3  ;;  %v1114_v58 = vld [vmem:[%s6400_s16 + $0x8a8] sm:$0xff] }
 0x292   : > { %4408 = vmatprep.subr.bf16.mxu1 %v5502_v20  ;;  %v5168_v20 = vcombine.high %v906_v51, %v914_v9 }
 0x294   : > { %4366 = vmatpush2.bf16.msra.mxu0 %v5245_v25  ;;  %v890_v25 = vld [vmem:[%s6400_s16 + $0x1a8] sm:$0xff] }
 0x295   : > { %4409 = vmatpush2.bf16.msra.mxu1 %v5501_v26  ;;  %4367 = vmatprep.subr.bf16.mxu0 %v5230_v27  ;;  %v898_v26 = vld [vmem:[%s6400_s16 + $0x1e8] sm:$0xff] }
 0x296   : > { %4410 = vmatprep.subr.bf16.mxu1 %v5486_v28  ;;  %v1146_v28 = vld [vmem:[%s6400_s16 + $0x9a8] sm:$0xff]  ;;  %v5151_v42 = vcombine.low %v890_v25, %v898_v26 }
 0x297   : > { %v5407_v43 = vcombine.low %v1146_v28, %v1154_v29 }
 0x298   : > { %4368 = vmatpush2.bf16.msra.mxu0 %v5229_v33  ;;  %v5423_v33 = vcombine.low %v1162_v10, %v1170_v11 }
 0x299   : > { %4411 = vmatpush2.bf16.msra.mxu1 %v5485_v34  ;;  %4423 = vmatprep.subr.bf16.mxu0 %v5216_v35  ;;  %v5152_v34 = vcombine.high %v890_v25, %v898_v26  ;;  %v1066_v26 = vld [vmem:[%s6400_s16 + $0x728] sm:$0xff] }
 0x29a   : > { %4466 = vmatprep.subr.bf16.mxu1 %v5472_v37  ;;  %v5408_v37 = vcombine.high %v1146_v28, %v1154_v29  ;;  %v1322_v28 = vld [vmem:[%s6400_s16 + $0xf28] sm:$0xff] }
 0x29b   : > { %v4113_v59 = vpop.f32.mrf.mxu0  ;;  %v4156_v61 = vpop.f32.mrf.mxu1  ;;  %4370 = vmatmul.mubr.bf16.vlgmr.msra.gmra.mxu0 %v6520_v52  ;;  %v1330_v29 = vld [vmem:[%s6400_s16 + $0xf68] sm:$0xff] }
 0x29c   : > { %v4114_v5 = vadd.f32 %v4113_v59, %v1364_v40  ;;  %4413 = vmatmul.mubr.bf16.vlgmr.msra.gmra.mxu1 %v6522_v53  ;;  %4424 = vmatpush1.bf16.msra.mxu0 %v5215_v41  ;;  %v1138_v41 = vld [vmem:[%s6400_s16 + $0x968] sm:$0xff] }
 0x29d   : > { %4455 = vmatprep.mubr.bf16.mxu0 %v6516_v44  ;;  %4467 = vmatpush1.bf16.msra.mxu1 %v5471_v54  ;;  %v4115_v46 = vpop.f32.mrf.mxu0  ;;  %v4158_v50 = vpop.f32.mrf.mxu1  ;;  %v5136_v54 = vcombine.high %v874_v38, %v882_v39  ;;  %v1122_v59 = vld [vmem:[%s6400_s16 + $0x8e8] sm:$0xff] }
 0x29e   : > { %v4157_v6 = vadd.f32 %v4156_v61, %v4114_v5  ;;  %4498 = vmatprep.mubr.bf16.mxu1 %v6518_v48  ;;  %v4116_v7 = vadd.f32 %v4115_v46, %v1368_v55  ;;  %4425 = vmatprep.subr.bf16.mxu0 %v5200_v56  ;;  %v858_v56 = vld [vmem:[%s6400_s16 + $0xa8] sm:$0xff]  ;;  %v5135_v61 = vcombine.low %v874_v38, %v882_v39 }
 0x29f   : > { %v4117_v12 = vpop.f32.mrf.mxu0  ;;  %v4160_v13 = vpop.f32.mrf.mxu1  ;;  %4468 = vmatprep.subr.bf16.mxu1 %v5456_v62  ;;  %v5120_v1 = vcombine.high %v858_v56, %v866_v57  ;;  %v5376_v3 = vcombine.high %v1114_v58, %v1122_v59  ;;  %v842_v5 = vld [vmem:[%s6400_s16 + $0x28] sm:$0xff]  ;;  %v5119_v51 = vcombine.low %v858_v56, %v866_v57 }
 0x2a0   : > { %v5607_v14 = vclamps-f32 %v4157_v6, 5.0  ;;  %v4159_v15 = vadd.f32 %v4158_v50, %v4116_v7  ;;  %v4118_v16 = vadd.f32 %v4117_v12, %v1364_v40  ;;  %4426 = vmatpush1.bf16.msra.mxu0 %v5199_v45  ;;  %v1130_v40 = vld [vmem:[%s6400_s16 + $0x928] sm:$0xff]  ;;  %v5375_v7 = vcombine.low %v1114_v58, %v1122_v59 }
 0x2a1   : > { %4469 = vmatpush1.bf16.msra.mxu1 %v5455_v47  ;;  %v4119_v18 = vpop.f32.mrf.mxu0  ;;  %4427 = vmatprep.subr.bf16.mxu0 %v5184_v49  ;;  %v4162_v27 = vpop.f32.mrf.mxu1  ;;  %v5391_v62 = vcombine.low %v1130_v40, %v1138_v41  ;;  %v850_v45 = vld [vmem:[%s6400_s16 + $0x68] sm:$0xff] }
 0x2a2   : > { %5812 = vtanh.f32 %v5607_v14  ;;  %v5608_v22 = vclamps-f32 %v4159_v15, 5.0  ;;  %v4161_v23 = vadd.f32 %v4160_v13, %v4118_v16  ;;  %v4120_v24 = vadd.f32 %v4119_v18, %v1368_v55  ;;  %4470 = vmatprep.subr.bf16.mxu1 %v5440_v8  ;;  %v1098_v50 = vld [vmem:[%s6400_s16 + $0x828] sm:$0xff] }
 0x2a3   : > { %v5392_v55 = vcombine.high %v1130_v40, %v1138_v41  ;;  %v1106_v47 = vld [vmem:[%s6400_s16 + $0x868] sm:$0xff]  ;;  %v5104_v8 = vcombine.high %v842_v5, %v850_v45  ;;  %v5583_v41 = vcombine.low %v1322_v28, %v1330_v29 }
 0x2a4   : > { %5814 = vtanh.f32 %v5608_v22  ;;  %v5623_v30 = vclamps-f32 %v4161_v23, 5.0  ;;  %v4163_v31 = vadd.f32 %v4162_v27, %v4120_v24  ;;  %4428 = vmatpush1.bf16.msra.mxu0 %v5183_v17  ;;  %v5360_v11 = vcombine.high %v1098_v50, %v1106_v47  ;;  %v1082_v12 = vld [vmem:[%s6400_s16 + $0x7a8] sm:$0xff] }
 0x2a5   : > { %4471 = vmatpush1.bf16.msra.mxu1 %v5439_v19  ;;  %4429 = vmatprep.subr.bf16.mxu0 %v5168_v20  ;;  %v1090_v13 = vld [vmem:[%s6400_s16 + $0x7e8] sm:$0xff]  ;;  %v5103_v19 = vcombine.low %v842_v5, %v850_v45 }
 0x2a6   : > { %5816 = vtanh.f32 %v5623_v30  ;;  %v5624_v35 = vclamps-f32 %v4163_v31, 5.0  ;;  %4472 = vmatprep.subr.bf16.mxu1 %v5424_v21  ;;  %v1338_v15 = vld [vmem:[%s6400_s16 + $0xfa8] sm:$0xff]  ;;  %v5359_v21 = vcombine.low %v1098_v50, %v1106_v47  ;;  %v5344_v22 = vcombine.high %v1082_v12, %v1090_v13 }
 0x2a7   : > { %v1346_v16 = vld [vmem:[%s6400_s16 + $0xfe8] sm:$0xff]  ;;  %v5343_v31 = vcombine.low %v1082_v12, %v1090_v13 }
 0x2a8   : > { %5818 = vtanh.f32 %v5624_v35  ;;  %4430 = vmatpush1.bf16.msra.mxu0 %v5167_v32  ;;  %v5600_v25 = vcombine.high %v1338_v15, %v1346_v16  ;;  %v1074_v27 = vld [vmem:[%s6400_s16 + $0x768] sm:$0xff]  ;;  %v5599_v32 = vcombine.low %v1338_v15, %v1346_v16 }
 0x2a9   : > { %4473 = vmatpush1.bf16.msra.mxu1 %v5423_v33  ;;  %4431 = vmatprep.subr.bf16.mxu0 %v5152_v34  ;;  %v5328_v33 = vcombine.high %v1066_v26, %v1074_v27  ;;  %v5584_v34 = vcombine.high %v1322_v28, %v1330_v29  ;;  %v1050_v35 = vld [vmem:[%s6400_s16 + $0x6a8] sm:$0xff]  ;;  %v5327_v40 = vcombine.low %v1066_v26, %v1074_v27  ;;  %v955_v29 = vld [vmem:[%s6400_s16 + $0x3b0] sm:$0xff] }
 0x2aa   : > { %4474 = vmatprep.subr.bf16.mxu1 %v5408_v37  ;;  %v1058_v37 = vld [vmem:[%s6400_s16 + $0x6e8] sm:$0xff] }
 0x2ab   : > { %v1306_v38 = vld [vmem:[%s6400_s16 + $0xea8] sm:$0xff]  ;;  %v5311_v58 = vcombine.low %v1050_v35, %v1058_v37 }
 0x2ac   : > { %4432 = vmatpush1.bf16.msra.mxu0 %v5151_v42  ;;  %v1314_v39 = vld [vmem:[%s6400_s16 + $0xee8] sm:$0xff]  ;;  %v5312_v42 = vcombine.high %v1050_v35, %v1058_v37 }
 0x2ad   : > { %4475 = vmatpush1.bf16.msra.mxu1 %v5407_v43  ;;  %4433 = vmatprep.subr.bf16.mxu0 %v5136_v54  ;;  %v5568_v43 = vcombine.high %v1306_v38, %v1314_v39  ;;  %v1034_v54 = vld [vmem:[%s6400_s16 + $0x628] sm:$0xff]  ;;  %v5567_v59 = vcombine.low %v1306_v38, %v1314_v39  ;;  %v1375_v39 = vsub.s32 5, %v6494_v60 }
 0x2ae   : > { %4476 = vmatprep.subr.bf16.mxu1 %v5392_v55  ;;  %v1042_v55 = vld [vmem:[%s6400_s16 + $0x668] sm:$0xff] }
 0x2af   : > { %v5813_v46 = vpop.eup %5812  ;;  %v1290_v56 = vld [vmem:[%s6400_s16 + $0xe28] sm:$0xff] }
 0x2b0   : > { %v4779_v49 = vmul.f32 3.14159, %v5813_v46  ;;  %4434 = vmatpush1.bf16.msra.mxu0 %v5135_v61  ;;  %v1298_v57 = vld [vmem:[%s6400_s16 + $0xe68] sm:$0xff]  ;;  %v5296_v61 = vcombine.high %v1034_v54, %v1042_v55  ;;  %v5295_v46 = vcombine.low %v1034_v54, %v1042_v55  ;;  %v1195_v54 = vld [vmem:[%s6400_s16 + $0xb30] sm:$0xff] }
 0x2b1   : > { %v5815_v6 = vpop.eup %5814  ;;  %4477 = vmatpush1.bf16.msra.mxu1 %v5391_v62  ;;  %4435 = vmatprep.subr.bf16.mxu0 %v5120_v1  ;;  %v5552_v62 = vcombine.high %v1290_v56, %v1298_v57  ;;  %v1018_v1 = vld [vmem:[%s6400_s16 + $0x5a8] sm:$0xff]  ;;  %v5551_v50 = vcombine.low %v1290_v56, %v1298_v57  ;;  %v1203_v55 = vld [vmem:[%s6400_s16 + $0xb70] sm:$0xff]  ;;  %v1376_v57 = vrot.slane %v6736_v36, %v1375_v39 }
 0x2b2   : > { %v4811_v9 = vadd.f32 3.14159, %v4779_v49  ;;  %v4780_v10 = vmul.f32 3.14159, %v5815_v6  ;;  %4478 = vmatprep.subr.bf16.mxu1 %v5376_v3  ;;  %v1026_v3 = vld [vmem:[%s6400_s16 + $0x5e8] sm:$0xff] }
 0x2b3   : > { %v5817_v14 = vpop.eup %5816  ;;  %v1274_v5 = vld [vmem:[%s6400_s16 + $0xda8] sm:$0xff]  ;;  %v5280_v47 = vcombine.high %v1018_v1, %v1026_v3 }
 0x2b4   : > { %4843 = vst [vmem:[%s6779_s5 + $0x10] sm:$0xff] %v4811_v9  ;;  %v4812_v17 = vadd.f32 3.14159, %v4780_v10  ;;  %v4795_v18 = vmul.f32 3.14159, %v5817_v14  ;;  %4436 = vmatpush1.bf16.msra.mxu0 %v5119_v51  ;;  %v1282_v45 = vld [vmem:[%s6400_s16 + $0xde8] sm:$0xff]  ;;  %v5279_v9 = vcombine.low %v1018_v1, %v1026_v3  ;;  %v5458_v1 = vcombine.high %v1195_v54, %v1203_v55 }
 0x2b5   : > { %v5819_v20 = vpop.eup %5818  ;;  %4479 = vmatpush1.bf16.msra.mxu1 %v5375_v7  ;;  %4437 = vmatprep.subr.bf16.mxu0 %v5104_v8  ;;  %v5536_v49 = vcombine.high %v1274_v5, %v1282_v45  ;;  %v1002_v51 = vld [vmem:[%s6400_s16 + $0x528] sm:$0xff]  ;;  %v5535_v10 = vcombine.low %v1274_v5, %v1282_v45  ;;  %v1179_v3 = vld [vmem:[%s6400_s16 + $0xab0] sm:$0xff] }
 0x2b6   : > { %4844 = vst [vmem:[%s6779_s5 + $0x18] sm:$0xff] %v4812_v17  ;;  %v4827_v23 = vadd.f32 3.14159, %v4795_v18  ;;  %v4796_v24 = vmul.f32 3.14159, %v5819_v20  ;;  %4480 = vmatprep.subr.bf16.mxu1 %v5360_v11  ;;  %v1010_v6 = vld [vmem:[%s6400_s16 + $0x568] sm:$0xff] }
 0x2b7   : > { %v1258_v7 = vld [vmem:[%s6400_s16 + $0xd28] sm:$0xff]  ;;  %v5264_v11 = vcombine.high %v1002_v51, %v1010_v6  ;;  %v5263_v17 = vcombine.low %v1002_v51, %v1010_v6  ;;  %v1187_v5 = vld [vmem:[%s6400_s16 + $0xaf0] sm:$0xff] }
 0x2b8   : > { %4859 = vst [vmem:[%s6779_s5 + $0x90] sm:$0xff] %v4827_v23  ;;  %v4828_v30 = vadd.f32 3.14159, %v4796_v24  ;;  %4438 = vmatpush1.bf16.msra.mxu0 %v5103_v19  ;;  %v1266_v8 = vld [vmem:[%s6400_s16 + $0xd68] sm:$0xff]  ;;  %v907_v51 = vld [vmem:[%s6400_s16 + $0x230] sm:$0xff] }
 0x2b9   : > { %4481 = vmatpush1.bf16.msra.mxu1 %v5359_v21  ;;  %4439 = vmatprep.subr.bf16.mxu0 %v5344_v22  ;;  %v5520_v12 = vcombine.high %v1258_v7, %v1266_v8  ;;  %v986_v13 = vld [vmem:[%s6400_s16 + $0x4a8] sm:$0xff]  ;;  %v5519_v18 = vcombine.low %v1258_v7, %v1266_v8 }
 0x2ba   : > { %4860 = vst [vmem:[%s6779_s5 + $0x98] sm:$0xff] %v4828_v30  ;;  %4482 = vmatprep.subr.bf16.mxu1 %v5600_v25  ;;  %v994_v14 = vld [vmem:[%s6400_s16 + $0x4e8] sm:$0xff]  ;;  %v963_v30 = vld [vmem:[%s6400_s16 + $0x3f0] sm:$0xff] }
 0x2bb   : > { %v1242_v15 = vld [vmem:[%s6400_s16 + $0xca8] sm:$0xff]  ;;  %v5248_v19 = vcombine.high %v986_v13, %v994_v14  ;;  %v5247_v25 = vcombine.low %v986_v13, %v994_v14  ;;  %v5218_v37 = vcombine.high %v955_v29, %v963_v30 }
 0x2bc   : > { %4440 = vmatpush2.bf16.msra.mxu0 %v5343_v31  ;;  %v1250_v16 = vld [vmem:[%s6400_s16 + $0xce8] sm:$0xff]  ;;  %v1211_v31 = vld [vmem:[%s6400_s16 + $0xbb0] sm:$0xff] }
 0x2bd   : > { %4483 = vmatpush2.bf16.msra.mxu1 %v5599_v32  ;;  %4441 = vmatprep.subr.bf16.mxu0 %v5328_v33  ;;  %v5504_v20 = vcombine.high %v1242_v15, %v1250_v16  ;;  %v970_v21 = vld [vmem:[%s6400_s16 + $0x428] sm:$0xff]  ;;  %v5503_v26 = vcombine.low %v1242_v15, %v1250_v16  ;;  %v1219_v32 = vld [vmem:[%s6400_s16 + $0xbf0] sm:$0xff] }
 0x2be   : > { %4484 = vmatprep.subr.bf16.mxu1 %v5584_v34  ;;  %v978_v22 = vld [vmem:[%s6400_s16 + $0x468] sm:$0xff]  ;;  %v1371_v34 = vsub.s32 4, %v6494_v60  ;;  %v5474_v38 = vcombine.high %v1211_v31, %v1219_v32  ;;  %v5473_v56 = vcombine.low %v1211_v31, %v1219_v32 }
 0x2bf   : > { %v1226_v23 = vld [vmem:[%s6400_s16 + $0xc28] sm:$0xff]  ;;  %v5232_v27 = vcombine.high %v970_v21, %v978_v22  ;;  %v5231_v33 = vcombine.low %v970_v21, %v978_v22 }
 0x2c0   : > { %4442 = vmatpush2.bf16.msra.mxu0 %v5327_v40  ;;  %v1234_v24 = vld [vmem:[%s6400_s16 + $0xc68] sm:$0xff]  ;;  %v939_v40 = vld [vmem:[%s6400_s16 + $0x330] sm:$0xff] }
 0x2c1   : > { %4485 = vmatpush2.bf16.msra.mxu1 %v5583_v41  ;;  %4443 = vmatprep.subr.bf16.mxu0 %v5312_v42  ;;  %v5488_v28 = vcombine.high %v1226_v23, %v1234_v24  ;;  %v5487_v35 = vcombine.low %v1226_v23, %v1234_v24  ;;  %v947_v41 = vld [vmem:[%s6400_s16 + $0x370] sm:$0xff]  ;;  %v1372_v42 = vrot.slane %v6736_v36, %v1371_v34 }
 0x2c2   : > { %4486 = vmatprep.subr.bf16.mxu1 %v5568_v43  ;;  %v5217_v43 = vcombine.low %v955_v29, %v963_v30  ;;  %v1147_v29 = vld [vmem:[%s6400_s16 + $0x9b0] sm:$0xff] }
 0x2c3   : > { %v1155_v30 = vld [vmem:[%s6400_s16 + $0x9f0] sm:$0xff] }
 0x2c4   : > { %4444 = vmatpush2.bf16.msra.mxu0 %v5311_v58  ;;  %v5202_v58 = vcombine.high %v939_v40, %v947_v41 }
 0x2c5   : > { %4487 = vmatpush2.bf16.msra.mxu1 %v5567_v59  ;;  %4445 = vmatprep.subr.bf16.mxu0 %v5296_v61  ;;  %v923_v59 = vld [vmem:[%s6400_s16 + $0x2b0] sm:$0xff] }
 0x2c6   : > { %4488 = vmatprep.subr.bf16.mxu1 %v5552_v62  ;;  %v931_v61 = vld [vmem:[%s6400_s16 + $0x2f0] sm:$0xff] }
 0x2c8   : > { %4446 = vmatpush2.bf16.msra.mxu0 %v5295_v46 }
 0x2c9   : > { %4489 = vmatpush2.bf16.msra.mxu1 %v5551_v50  ;;  %4447 = vmatprep.subr.bf16.mxu0 %v5280_v47  ;;  %v5201_v50 = vcombine.low %v939_v40, %v947_v41  ;;  %v5457_v47 = vcombine.low %v1195_v54, %v1203_v55  ;;  %v5410_v40 = vcombine.high %v1147_v29, %v1155_v30  ;;  %v875_v41 = vld [vmem:[%s6400_s16 + $0x130] sm:$0xff] }
 0x2ca   : > { %4490 = vmatprep.subr.bf16.mxu1 %v5536_v49  ;;  %v5186_v49 = vcombine.high %v923_v59, %v931_v61  ;;  %v1139_v54 = vld [vmem:[%s6400_s16 + $0x970] sm:$0xff] }
 0x2cc   : > { %4448 = vmatpush2.bf16.msra.mxu0 %v5279_v9  ;;  %v5442_v9 = vcombine.high %v1179_v3, %v1187_v5 }
 0x2cd   : > { %4491 = vmatpush2.bf16.msra.mxu1 %v5535_v10  ;;  %4449 = vmatprep.subr.bf16.mxu0 %v5264_v11  ;;  %v915_v10 = vld [vmem:[%s6400_s16 + $0x270] sm:$0xff] }
 0x2ce   : > { %4492 = vmatprep.subr.bf16.mxu1 %v5520_v12  ;;  %v1163_v11 = vld [vmem:[%s6400_s16 + $0xa30] sm:$0xff]  ;;  %v5170_v21 = vcombine.high %v907_v51, %v915_v10 }
 0x2cf   : > { %v1171_v12 = vld [vmem:[%s6400_s16 + $0xa70] sm:$0xff] }
 0x2d0   : > { %4450 = vmatpush2.bf16.msra.mxu0 %v5263_v17  ;;  %v5426_v22 = vcombine.high %v1163_v11, %v1171_v12 }
 0x2d1   : > { %4493 = vmatpush2.bf16.msra.mxu1 %v5519_v18  ;;  %4451 = vmatprep.subr.bf16.mxu0 %v5248_v19  ;;  %v5185_v18 = vcombine.low %v923_v59, %v931_v61  ;;  %v859_v59 = vld [vmem:[%s6400_s16 + $0xb0] sm:$0xff] }
 0x2d2   : > { %4494 = vmatprep.subr.bf16.mxu1 %v5504_v20  ;;  %v5441_v20 = vcombine.low %v1179_v3, %v1187_v5  ;;  %v867_v61 = vld [vmem:[%s6400_s16 + $0xf0] sm:$0xff] }
 0x2d4   : > { %4452 = vmatpush2.bf16.msra.mxu0 %v5247_v25 }
 0x2d5   : > { %4495 = vmatpush2.bf16.msra.mxu1 %v5503_v26  ;;  %4453 = vmatprep.subr.bf16.mxu0 %v5232_v27  ;;  %v891_v26 = vld [vmem:[%s6400_s16 + $0x1b0] sm:$0xff] }
 0x2d6   : > { %4496 = vmatprep.subr.bf16.mxu1 %v5488_v28  ;;  %v899_v27 = vld [vmem:[%s6400_s16 + $0x1f0] sm:$0xff] }
 0x2d7   : > { %v5153_v55 = vcombine.low %v891_v26, %v899_v27 }
 0x2d8   : > { %4454 = vmatpush2.bf16.msra.mxu0 %v5231_v33  ;;  %v5169_v33 = vcombine.low %v907_v51, %v915_v10  ;;  %v1107_v51 = vld [vmem:[%s6400_s16 + $0x870] sm:$0xff] }
 0x2d9   : > { %4497 = vmatpush2.bf16.msra.mxu1 %v5487_v35  ;;  %4509 = vmatprep.subr.bf16.mxu0 %v5218_v37  ;;  %v5425_v35 = vcombine.low %v1163_v11, %v1171_v12  ;;  %v5154_v37 = vcombine.high %v891_v26, %v899_v27 }
 0x2da   : > { %4552 = vmatprep.subr.bf16.mxu1 %v5474_v38 }
 0x2db   : > { %v4199_v62 = vpop.f32.mrf.mxu0  ;;  %4456 = vmatmul.mubr.bf16.vlgmr.msra.gmra.mxu0 %v6520_v52 }
 0x2dc   : > { %v4200_v45 = vadd.f32 %v4199_v62, %v1372_v42  ;;  %v4242_v46 = vpop.f32.mrf.mxu1  ;;  %4499 = vmatmul.mubr.bf16.vlgmr.msra.gmra.mxu1 %v6522_v53  ;;  %4510 = vmatpush1.bf16.msra.mxu0 %v5217_v43  ;;  %v1131_v43 = vld [vmem:[%s6400_s16 + $0x930] sm:$0xff] }
 0x2dd   : > { %4541 = vmatprep.mubr.bf16.mxu0 %v6516_v44  ;;  %4553 = vmatpush1.bf16.msra.mxu1 %v5473_v56  ;;  %v4201_v36 = vpop.f32.mrf.mxu0  ;;  %v5409_v56 = vcombine.low %v1147_v29, %v1155_v30  ;;  %v1115_v62 = vld [vmem:[%s6400_s16 + $0x8b0] sm:$0xff]  ;;  %v5393_v5 = vcombine.low %v1131_v43, %v1139_v54 }
 0x2de   : > { %v4243_v6 = vadd.f32 %v4242_v46, %v4200_v45  ;;  %4584 = vmatprep.mubr.bf16.mxu1 %v6518_v48  ;;  %v4202_v7 = vadd.f32 %v4201_v36, %v1376_v57  ;;  %v4244_v8 = vpop.f32.mrf.mxu1  ;;  %4511 = vmatprep.subr.bf16.mxu0 %v5202_v58  ;;  %v5394_v58 = vcombine.high %v1131_v43, %v1139_v54  ;;  %v851_v36 = vld [vmem:[%s6400_s16 + $0x70] sm:$0xff] }
 0x2df   : > { %v4203_v13 = vpop.f32.mrf.mxu0  ;;  %4554 = vmatprep.subr.bf16.mxu1 %v5458_v1  ;;  %v1123_v1 = vld [vmem:[%s6400_s16 + $0x8f0] sm:$0xff]  ;;  %v5122_v45 = vcombine.high %v859_v59, %v867_v61 }
 0x2e0   : > { %v5609_v14 = vclamps-f32 %v4243_v6, 5.0  ;;  %v4245_v15 = vadd.f32 %v4244_v8, %v4202_v7  ;;  %v4204_v16 = vadd.f32 %v4203_v13, %v1372_v42  ;;  %v4246_v17 = vpop.f32.mrf.mxu1  ;;  %4512 = vmatpush1.bf16.msra.mxu0 %v5201_v50  ;;  %v883_v42 = vld [vmem:[%s6400_s16 + $0x170] sm:$0xff]  ;;  %v5378_v46 = vcombine.high %v1115_v62, %v1123_v1 }
 0x2e1   : > { %4555 = vmatpush1.bf16.msra.mxu1 %v5457_v47  ;;  %v4205_v19 = vpop.f32.mrf.mxu0  ;;  %4513 = vmatprep.subr.bf16.mxu0 %v5186_v49  ;;  %v5137_v3 = vcombine.low %v875_v41, %v883_v42  ;;  %v843_v50 = vld [vmem:[%s6400_s16 + $0x30] sm:$0xff]  ;;  %v5121_v7 = vcombine.low %v859_v59, %v867_v61 }
 0x2e2   : > { %5820 = vtanh.f32 %v5609_v14  ;;  %v5610_v23 = vclamps-f32 %v4245_v15, 5.0  ;;  %v4247_v24 = vadd.f32 %v4246_v17, %v4204_v16  ;;  %v4206_v25 = vadd.f32 %v4205_v19, %v1376_v57  ;;  %4556 = vmatprep.subr.bf16.mxu1 %v5442_v9  ;;  %v4248_v28 = vpop.f32.mrf.mxu1  ;;  %v1099_v49 = vld [vmem:[%s6400_s16 + $0x830] sm:$0xff] }
 0x2e3   : > { %v5138_v57 = vcombine.high %v875_v41, %v883_v42  ;;  %v5377_v9 = vcombine.low %v1115_v62, %v1123_v1  ;;  %v5106_v10 = vcombine.high %v843_v50, %v851_v36  ;;  %v5362_v13 = vcombine.high %v1099_v49, %v1107_v51  ;;  %v1083_v14 = vld [vmem:[%s6400_s16 + $0x7b0] sm:$0xff] }
 0x2e4   : > { %5822 = vtanh.f32 %v5610_v23  ;;  %v5625_v31 = vclamps-f32 %v4247_v24, 5.0  ;;  %v4249_v32 = vadd.f32 %v4248_v28, %v4206_v25  ;;  %4514 = vmatpush1.bf16.msra.mxu0 %v5185_v18  ;;  %v1091_v15 = vld [vmem:[%s6400_s16 + $0x7f0] sm:$0xff]  ;;  %v5361_v23 = vcombine.low %v1099_v49, %v1107_v51 }
 0x2e5   : > { %4557 = vmatpush1.bf16.msra.mxu1 %v5441_v20  ;;  %4515 = vmatprep.subr.bf16.mxu0 %v5170_v21  ;;  %v1339_v17 = vld [vmem:[%s6400_s16 + $0xfb0] sm:$0xff]  ;;  %v5105_v21 = vcombine.low %v843_v50, %v851_v36  ;;  %v5346_v24 = vcombine.high %v1083_v14, %v1091_v15 }
 0x2e6   : > { %5824 = vtanh.f32 %v5625_v31  ;;  %v5626_v38 = vclamps-f32 %v4249_v32, 5.0  ;;  %4558 = vmatprep.subr.bf16.mxu1 %v5426_v22  ;;  %v1347_v18 = vld [vmem:[%s6400_s16 + $0xff0] sm:$0xff] }
 0x2e7   : > { %v5602_v27 = vcombine.high %v1339_v17, %v1347_v18  ;;  %v1067_v28 = vld [vmem:[%s6400_s16 + $0x730] sm:$0xff] }
 0x2e8   : > { %5826 = vtanh.f32 %v5626_v38  ;;  %4516 = vmatpush1.bf16.msra.mxu0 %v5169_v33  ;;  %v1075_v29 = vld [vmem:[%s6400_s16 + $0x770] sm:$0xff]  ;;  %v5345_v33 = vcombine.low %v1083_v14, %v1091_v15 }
 0x2e9   : > { %4559 = vmatpush1.bf16.msra.mxu1 %v5425_v35  ;;  %4517 = vmatprep.subr.bf16.mxu0 %v5154_v37  ;;  %v1323_v30 = vld [vmem:[%s6400_s16 + $0xf30] sm:$0xff]  ;;  %v5601_v35 = vcombine.low %v1339_v17, %v1347_v18  ;;  %v5330_v37 = vcombine.high %v1067_v28, %v1075_v29  ;;  %v5329_v54 = vcombine.low %v1067_v28, %v1075_v29 }
 0x2ea   : > { %4560 = vmatprep.subr.bf16.mxu1 %v5410_v40  ;;  %v1331_v31 = vld [vmem:[%s6400_s16 + $0xf70] sm:$0xff] }
 0x2eb   : > { %v5586_v38 = vcombine.high %v1323_v30, %v1331_v31  ;;  %v1051_v40 = vld [vmem:[%s6400_s16 + $0x6b0] sm:$0xff] }
 0x2ec   : > { %4518 = vmatpush1.bf16.msra.mxu0 %v5153_v55  ;;  %v1059_v41 = vld [vmem:[%s6400_s16 + $0x6f0] sm:$0xff]  ;;  %v5585_v55 = vcombine.low %v1323_v30, %v1331_v31 }
 0x2ed   : > { %4561 = vmatpush1.bf16.msra.mxu1 %v5409_v56  ;;  %4519 = vmatprep.subr.bf16.mxu0 %v5138_v57  ;;  %v1307_v42 = vld [vmem:[%s6400_s16 + $0xeb0] sm:$0xff]  ;;  %v5314_v56 = vcombine.high %v1051_v40, %v1059_v41  ;;  %v5313_v1 = vcombine.low %v1051_v40, %v1059_v41  ;;  %v1379_v40 = vsub.s32 6, %v6494_v60 }
 0x2ee   : > { %4562 = vmatprep.subr.bf16.mxu1 %v5394_v58  ;;  %v1315_v43 = vld [vmem:[%s6400_s16 + $0xef0] sm:$0xff] }
 0x2ef   : > { %v5821_v47 = vpop.eup %5820  ;;  %v5570_v57 = vcombine.high %v1307_v42, %v1315_v43  ;;  %v1035_v58 = vld [vmem:[%s6400_s16 + $0x630] sm:$0xff] }
 0x2f0   : > { %v4781_v6 = vmul.f32 3.14159, %v5821_v47  ;;  %4520 = vmatpush1.bf16.msra.mxu0 %v5137_v3  ;;  %v1043_v59 = vld [vmem:[%s6400_s16 + $0x670] sm:$0xff]  ;;  %v5569_v3 = vcombine.low %v1307_v42, %v1315_v43 }
 0x2f1   : > { %v5823_v8 = vpop.eup %5822  ;;  %4563 = vmatpush1.bf16.msra.mxu1 %v5393_v5  ;;  %4521 = vmatprep.subr.bf16.mxu0 %v5122_v45  ;;  %v1291_v61 = vld [vmem:[%s6400_s16 + $0xe30] sm:$0xff]  ;;  %v5298_v5 = vcombine.high %v1035_v58, %v1043_v59  ;;  %v5297_v49 = vcombine.low %v1035_v58, %v1043_v59 }
 0x2f2   : > { %v4813_v11 = vadd.f32 3.14159, %v4781_v6  ;;  %v4782_v12 = vmul.f32 3.14159, %v5823_v8  ;;  %4564 = vmatprep.subr.bf16.mxu1 %v5378_v46  ;;  %v1299_v62 = vld [vmem:[%s6400_s16 + $0xe70] sm:$0xff] }
 0x2f3   : > { %v5825_v16 = vpop.eup %5824  ;;  %v5554_v45 = vcombine.high %v1291_v61, %v1299_v62  ;;  %v1019_v46 = vld [vmem:[%s6400_s16 + $0x5b0] sm:$0xff]  ;;  %v5553_v51 = vcombine.low %v1291_v61, %v1299_v62  ;;  %v1196_v61 = vld [vmem:[%s6400_s16 + $0xb38] sm:$0xff] }
 0x2f4   : > { %4845 = vst [vmem:[%s6779_s5 + $0x20] sm:$0xff] %v4813_v11  ;;  %v4814_v19 = vadd.f32 3.14159, %v4782_v12  ;;  %v4797_v20 = vmul.f32 3.14159, %v5825_v16  ;;  %4522 = vmatpush1.bf16.msra.mxu0 %v5121_v7  ;;  %v1027_v50 = vld [vmem:[%s6400_s16 + $0x5f0] sm:$0xff] }
 0x2f5   : > { %v5827_v22 = vpop.eup %5826  ;;  %4565 = vmatpush1.bf16.msra.mxu1 %v5377_v9  ;;  %4523 = vmatprep.subr.bf16.mxu0 %v5106_v10  ;;  %v1275_v36 = vld [vmem:[%s6400_s16 + $0xdb0] sm:$0xff]  ;;  %v5282_v6 = vcombine.high %v1019_v46, %v1027_v50  ;;  %v5281_v12 = vcombine.low %v1019_v46, %v1027_v50  ;;  %v1204_v62 = vld [vmem:[%s6400_s16 + $0xb78] sm:$0xff] }
 0x2f6   : > { %4846 = vst [vmem:[%s6779_s5 + $0x28] sm:$0xff] %v4814_v19  ;;  %v4829_v25 = vadd.f32 3.14159, %v4797_v20  ;;  %v4798_v26 = vmul.f32 3.14159, %v5827_v22  ;;  %4566 = vmatprep.subr.bf16.mxu1 %v5362_v13  ;;  %v1283_v47 = vld [vmem:[%s6400_s16 + $0xdf0] sm:$0xff] }
 0x2f7   : > { %v5538_v7 = vcombine.high %v1275_v36, %v1283_v47  ;;  %v1003_v8 = vld [vmem:[%s6400_s16 + $0x530] sm:$0xff]  ;;  %v5537_v13 = vcombine.low %v1275_v36, %v1283_v47  ;;  %v932_v46 = vld [vmem:[%s6400_s16 + $0x2f8] sm:$0xff]  ;;  %v5460_v36 = vcombine.high %v1196_v61, %v1204_v62 }
 0x2f8   : > { %4861 = vst [vmem:[%s6779_s5 + $0xa0] sm:$0xff] %v4829_v25  ;;  %v4830_v32 = vadd.f32 3.14159, %v4798_v26  ;;  %4524 = vmatpush1.bf16.msra.mxu0 %v5105_v21  ;;  %v1011_v9 = vld [vmem:[%s6400_s16 + $0x570] sm:$0xff]  ;;  %v1180_v47 = vld [vmem:[%s6400_s16 + $0xab8] sm:$0xff] }
 0x2f9   : > { %4567 = vmatpush1.bf16.msra.mxu1 %v5361_v23  ;;  %4525 = vmatprep.subr.bf16.mxu0 %v5346_v24  ;;  %v1259_v10 = vld [vmem:[%s6400_s16 + $0xd30] sm:$0xff]  ;;  %v5266_v14 = vcombine.high %v1003_v8, %v1011_v9  ;;  %v5265_v20 = vcombine.low %v1003_v8, %v1011_v9  ;;  %v5459_v9 = vcombine.low %v1196_v61, %v1204_v62  ;;  %v1140_v61 = vld [vmem:[%s6400_s16 + $0x978] sm:$0xff] }
 0x2fa   : > { %4862 = vst [vmem:[%s6779_s5 + $0xa8] sm:$0xff] %v4830_v32  ;;  %4568 = vmatprep.subr.bf16.mxu1 %v5602_v27  ;;  %v1267_v11 = vld [vmem:[%s6400_s16 + $0xd70] sm:$0xff]  ;;  %v956_v32 = vld [vmem:[%s6400_s16 + $0x3b8] sm:$0xff] }
 0x2fb   : > { %v5522_v15 = vcombine.high %v1259_v10, %v1267_v11  ;;  %v987_v16 = vld [vmem:[%s6400_s16 + $0x4b0] sm:$0xff]  ;;  %v5521_v21 = vcombine.low %v1259_v10, %v1267_v11  ;;  %v908_v11 = vld [vmem:[%s6400_s16 + $0x238] sm:$0xff] }
 0x2fc   : > { %4526 = vmatpush2.bf16.msra.mxu0 %v5345_v33  ;;  %v995_v17 = vld [vmem:[%s6400_s16 + $0x4f0] sm:$0xff]  ;;  %v964_v33 = vld [vmem:[%s6400_s16 + $0x3f8] sm:$0xff] }
 0x2fd   : > { %4569 = vmatpush2.bf16.msra.mxu1 %v5601_v35  ;;  %4527 = vmatprep.subr.bf16.mxu0 %v5330_v37  ;;  %v1243_v18 = vld [vmem:[%s6400_s16 + $0xcb0] sm:$0xff]  ;;  %v5250_v22 = vcombine.high %v987_v16, %v995_v17  ;;  %v5249_v28 = vcombine.low %v987_v16, %v995_v17  ;;  %v1212_v35 = vld [vmem:[%s6400_s16 + $0xbb8] sm:$0xff]  ;;  %v5220_v42 = vcombine.high %v956_v32, %v964_v33 }
 0x2fe   : > { %4570 = vmatprep.subr.bf16.mxu1 %v5586_v38  ;;  %v1251_v19 = vld [vmem:[%s6400_s16 + $0xcf0] sm:$0xff]  ;;  %v1220_v37 = vld [vmem:[%s6400_s16 + $0xbf8] sm:$0xff]  ;;  %v5219_v59 = vcombine.low %v956_v32, %v964_v33 }
 0x2ff   : > { %v5506_v23 = vcombine.high %v1243_v18, %v1251_v19  ;;  %v971_v24 = vld [vmem:[%s6400_s16 + $0x430] sm:$0xff]  ;;  %v5505_v29 = vcombine.low %v1243_v18, %v1251_v19  ;;  %v5476_v43 = vcombine.high %v1212_v35, %v1220_v37  ;;  %v916_v16 = vld [vmem:[%s6400_s16 + $0x278] sm:$0xff] }
 0x300   : > { %4528 = vmatpush2.bf16.msra.mxu0 %v5329_v54  ;;  %v979_v25 = vld [vmem:[%s6400_s16 + $0x470] sm:$0xff]  ;;  %v1383_v54 = vsub.s32 7, %v6494_v60  ;;  %v1164_v17 = vld [vmem:[%s6400_s16 + $0xa38] sm:$0xff] }
 0x301   : > { %4571 = vmatpush2.bf16.msra.mxu1 %v5585_v55  ;;  %4529 = vmatprep.subr.bf16.mxu0 %v5314_v56  ;;  %v1227_v26 = vld [vmem:[%s6400_s16 + $0xc30] sm:$0xff]  ;;  %v5234_v30 = vcombine.high %v971_v24, %v979_v25  ;;  %v5233_v38 = vcombine.low %v971_v24, %v979_v25  ;;  %v940_v55 = vld [vmem:[%s6400_s16 + $0x338] sm:$0xff]  ;;  %v5172_v25 = vcombine.high %v908_v11, %v916_v16 }
 0x302   : > { %4572 = vmatprep.subr.bf16.mxu1 %v5570_v57  ;;  %v1235_v27 = vld [vmem:[%s6400_s16 + $0xc70] sm:$0xff]  ;;  %v948_v56 = vld [vmem:[%s6400_s16 + $0x378] sm:$0xff] }
 0x303   : > { %v5490_v31 = vcombine.high %v1227_v26, %v1235_v27  ;;  %v5489_v41 = vcombine.low %v1227_v26, %v1235_v27  ;;  %v5868_v57 = vld [vmem:[%s6733_s15] sm:$0xff]  ;;  %v1172_v18 = vld [vmem:[%s6400_s16 + $0xa78] sm:$0xff] }
 0x304   : > { %4530 = vmatpush2.bf16.msra.mxu0 %v5313_v1  ;;  %v1380_v58 = vrot.slane %v5868_v57, %v1379_v40  ;;  %v5475_v1 = vcombine.low %v1212_v35, %v1220_v37  ;;  %v5428_v26 = vcombine.high %v1164_v17, %v1172_v18  ;;  %v1148_v33 = vld [vmem:[%s6400_s16 + $0x9b8] sm:$0xff] }
 0x305   : > { %4573 = vmatpush2.bf16.msra.mxu1 %v5569_v3  ;;  %4531 = vmatprep.subr.bf16.mxu0 %v5298_v5  ;;  %v1384_v3 = vrot.slane %v5868_v57, %v1383_v54  ;;  %v5204_v5 = vcombine.high %v940_v55, %v948_v56  ;;  %v1156_v35 = vld [vmem:[%s6400_s16 + $0x9f8] sm:$0xff] }
 0x306   : > { %4574 = vmatprep.subr.bf16.mxu1 %v5554_v45  ;;  %v924_v45 = vld [vmem:[%s6400_s16 + $0x2b8] sm:$0xff] }
 0x307   : > { %v5188_v10 = vcombine.high %v924_v45, %v932_v46  ;;  %v876_v57 = vld [vmem:[%s6400_s16 + $0x138] sm:$0xff] }
 0x308   : > { %4532 = vmatpush2.bf16.msra.mxu0 %v5297_v49  ;;  %v1188_v49 = vld [vmem:[%s6400_s16 + $0xaf8] sm:$0xff] }
 0x309   : > { %4575 = vmatpush2.bf16.msra.mxu1 %v5553_v51  ;;  %4533 = vmatprep.subr.bf16.mxu0 %v5282_v6  ;;  %v5443_v24 = vcombine.low %v1180_v47, %v1188_v49 }
 0x30a   : > { %4576 = vmatprep.subr.bf16.mxu1 %v5538_v7  ;;  %v5203_v7 = vcombine.low %v940_v55, %v948_v56  ;;  %v5412_v56 = vcombine.high %v1148_v33, %v1156_v35 }
 0x30c   : > { %4534 = vmatpush2.bf16.msra.mxu0 %v5281_v12 }
 0x30d   : > { %4577 = vmatpush2.bf16.msra.mxu1 %v5537_v13  ;;  %4535 = vmatprep.subr.bf16.mxu0 %v5266_v14 }
 0x30e   : > { %4578 = vmatprep.subr.bf16.mxu1 %v5522_v15  ;;  %v5444_v15 = vcombine.high %v1180_v47, %v1188_v49 }
 0x310   : > { %4536 = vmatpush2.bf16.msra.mxu0 %v5265_v20 }
 0x311   : > { %4579 = vmatpush2.bf16.msra.mxu1 %v5521_v21  ;;  %4537 = vmatprep.subr.bf16.mxu0 %v5250_v22 }
 0x312   : > { %4580 = vmatprep.subr.bf16.mxu1 %v5506_v23  ;;  %v5187_v23 = vcombine.low %v924_v45, %v932_v46  ;;  %v860_v45 = vld [vmem:[%s6400_s16 + $0xb8] sm:$0xff] }
 0x313   : > { %v868_v46 = vld [vmem:[%s6400_s16 + $0xf8] sm:$0xff] }
 0x314   : > { %4538 = vmatpush2.bf16.msra.mxu0 %v5249_v28 }
 0x315   : > { %4581 = vmatpush2.bf16.msra.mxu1 %v5505_v29  ;;  %4539 = vmatprep.subr.bf16.mxu0 %v5234_v30  ;;  %v892_v30 = vld [vmem:[%s6400_s16 + $0x1b8] sm:$0xff] }
 0x316   : > { %4582 = vmatprep.subr.bf16.mxu1 %v5490_v31  ;;  %v900_v31 = vld [vmem:[%s6400_s16 + $0x1f8] sm:$0xff] }
 0x317   : > { %v5155_v62 = vcombine.low %v892_v30, %v900_v31 }
 0x318   : > { %4540 = vmatpush2.bf16.msra.mxu0 %v5233_v38 }
 0x319   : > { %4583 = vmatpush2.bf16.msra.mxu1 %v5489_v41  ;;  %4595 = vmatprep.subr.bf16.mxu0 %v5220_v42  ;;  %v5171_v41 = vcombine.low %v908_v11, %v916_v16  ;;  %v5427_v42 = vcombine.low %v1164_v17, %v1172_v18  ;;  %v1108_v11 = vld [vmem:[%s6400_s16 + $0x878] sm:$0xff] }
 0x31a   : > { %4638 = vmatprep.subr.bf16.mxu1 %v5476_v43  ;;  %v5156_v43 = vcombine.high %v892_v30, %v900_v31 }
 0x31b   : > { %v4285_v50 = vpop.f32.mrf.mxu0  ;;  %4542 = vmatmul.mubr.bf16.vlgmr.msra.gmra.mxu0 %v6520_v52 }
 0x31c   : > { %v4286_v51 = vadd.f32 %v4285_v50, %v1380_v58  ;;  %v4328_v6 = vpop.f32.mrf.mxu1  ;;  %4585 = vmatmul.mubr.bf16.vlgmr.msra.gmra.mxu1 %v6522_v53  ;;  %4596 = vmatpush1.bf16.msra.mxu0 %v5219_v59  ;;  %v1132_v59 = vld [vmem:[%s6400_s16 + $0x938] sm:$0xff] }
 0x31d   : > { %4627 = vmatprep.mubr.bf16.mxu0 %v6516_v44  ;;  %4639 = vmatpush1.bf16.msra.mxu1 %v5475_v1  ;;  %v4287_v8 = vpop.f32.mrf.mxu0  ;;  %v5411_v1 = vcombine.low %v1148_v33, %v1156_v35  ;;  %v1116_v50 = vld [vmem:[%s6400_s16 + $0x8b8] sm:$0xff]  ;;  %v5395_v49 = vcombine.low %v1132_v59, %v1140_v61 }
 0x31e   : > { %v4329_v12 = vadd.f32 %v4328_v6, %v4286_v51  ;;  %4670 = vmatprep.mubr.bf16.mxu1 %v6518_v48  ;;  %v4288_v13 = vadd.f32 %v4287_v8, %v1384_v3  ;;  %v4330_v14 = vpop.f32.mrf.mxu1  ;;  %4597 = vmatprep.subr.bf16.mxu0 %v5204_v5  ;;  %v5396_v5 = vcombine.high %v1132_v59, %v1140_v61  ;;  %v852_v8 = vld [vmem:[%s6400_s16 + $0x78] sm:$0xff] }
 0x31f   : > { %v4289_v19 = vpop.f32.mrf.mxu0  ;;  %4640 = vmatprep.subr.bf16.mxu1 %v5460_v36  ;;  %v1124_v36 = vld [vmem:[%s6400_s16 + $0x8f8] sm:$0xff]  ;;  %v5124_v51 = vcombine.high %v860_v45, %v868_v46 }
 0x320   : > { %v5611_v20 = vclamps-f32 %v4329_v12, 5.0  ;;  %v4331_v21 = vadd.f32 %v4330_v14, %v4288_v13  ;;  %v4290_v44 = vadd.f32 %v4289_v19, %v1380_v58  ;;  %v4332_v22 = vpop.f32.mrf.mxu1  ;;  %4598 = vmatpush1.bf16.msra.mxu0 %v5203_v7  ;;  %v884_v58 = vld [vmem:[%s6400_s16 + $0x178] sm:$0xff]  ;;  %v5380_v6 = vcombine.high %v1116_v50, %v1124_v36 }
 0x321   : > { %4641 = vmatpush1.bf16.msra.mxu1 %v5459_v9  ;;  %v4291_v48 = vpop.f32.mrf.mxu0  ;;  %4599 = vmatprep.subr.bf16.mxu0 %v5188_v10  ;;  %v5139_v47 = vcombine.low %v876_v57, %v884_v58  ;;  %v844_v7 = vld [vmem:[%s6400_s16 + $0x38] sm:$0xff]  ;;  %v5123_v13 = vcombine.low %v860_v45, %v868_v46 }
 0x322   : > { %5828 = vtanh.f32 %v5611_v20  ;;  %v5612_v27 = vclamps-f32 %v4331_v21, 5.0  ;;  %v4333_v28 = vadd.f32 %v4332_v22, %v4290_v44  ;;  %v4292_v29 = vadd.f32 %v4291_v48, %v1384_v3  ;;  %4642 = vmatprep.subr.bf16.mxu1 %v5444_v15  ;;  %v4334_v32 = vpop.f32.mrf.mxu1  ;;  %v1100_v10 = vld [vmem:[%s6400_s16 + $0x838] sm:$0xff] }
 0x323   : > { %v5140_v3 = vcombine.high %v876_v57, %v884_v58  ;;  %v5379_v15 = vcombine.low %v1116_v50, %v1124_v36  ;;  %v5108_v16 = vcombine.high %v844_v7, %v852_v8  ;;  %v5364_v19 = vcombine.high %v1100_v10, %v1108_v11  ;;  %v1084_v20 = vld [vmem:[%s6400_s16 + $0x7b8] sm:$0xff] }
 0x324   : > { %5830 = vtanh.f32 %v5612_v27  ;;  %v5627_v37 = vclamps-f32 %v4333_v28, 5.0  ;;  %v4335_v38 = vadd.f32 %v4334_v32, %v4292_v29  ;;  %4600 = vmatpush1.bf16.msra.mxu0 %v5187_v23  ;;  %v1092_v21 = vld [vmem:[%s6400_s16 + $0x7f8] sm:$0xff]  ;;  %v5363_v27 = vcombine.low %v1100_v10, %v1108_v11 }
 0x325   : > { %4643 = vmatpush1.bf16.msra.mxu1 %v5443_v24  ;;  %4601 = vmatprep.subr.bf16.mxu0 %v5172_v25  ;;  %v1340_v22 = vld [vmem:[%s6400_s16 + $0xfb8] sm:$0xff]  ;;  %v5107_v25 = vcombine.low %v844_v7, %v852_v8  ;;  %v5348_v28 = vcombine.high %v1084_v20, %v1092_v21 }
 0x326   : > { %5832 = vtanh.f32 %v5627_v37  ;;  %v5628_v55 = vclamps-f32 %v4335_v38, 5.0  ;;  %4644 = vmatprep.subr.bf16.mxu1 %v5428_v26  ;;  %v1348_v23 = vld [vmem:[%s6400_s16 + $0xff8] sm:$0xff] }
 0x327   : > { %v5604_v31 = vcombine.high %v1340_v22, %v1348_v23  ;;  %v1068_v32 = vld [vmem:[%s6400_s16 + $0x738] sm:$0xff] }
 0x328   : > { %5834 = vtanh.f32 %v5628_v55  ;;  %4602 = vmatpush1.bf16.msra.mxu0 %v5171_v41  ;;  %v1076_v33 = vld [vmem:[%s6400_s16 + $0x778] sm:$0xff]  ;;  %v5347_v41 = vcombine.low %v1084_v20, %v1092_v21 }
 0x329   : > { %4645 = vmatpush1.bf16.msra.mxu1 %v5427_v42  ;;  %4603 = vmatprep.subr.bf16.mxu0 %v5156_v43  ;;  %v1324_v35 = vld [vmem:[%s6400_s16 + $0xf38] sm:$0xff]  ;;  %v5603_v42 = vcombine.low %v1340_v22, %v1348_v23  ;;  %v5332_v43 = vcombine.high %v1068_v32, %v1076_v33  ;;  %v5331_v61 = vcombine.low %v1068_v32, %v1076_v33 }
 0x32a   : > { %4646 = vmatprep.subr.bf16.mxu1 %v5412_v56  ;;  %v1332_v37 = vld [vmem:[%s6400_s16 + $0xf78] sm:$0xff] }
 0x32b   : > { %v5588_v55 = vcombine.high %v1324_v35, %v1332_v37  ;;  %v1052_v56 = vld [vmem:[%s6400_s16 + $0x6b8] sm:$0xff] }
 0x32c   : > { %4604 = vmatpush1.bf16.msra.mxu0 %v5155_v62  ;;  %v1060_v57 = vld [vmem:[%s6400_s16 + $0x6f8] sm:$0xff]  ;;  %v5587_v62 = vcombine.low %v1324_v35, %v1332_v37 }
 0x32d   : > { %4647 = vmatpush1.bf16.msra.mxu1 %v5411_v1  ;;  %4605 = vmatprep.subr.bf16.mxu0 %v5140_v3  ;;  %v1308_v58 = vld [vmem:[%s6400_s16 + $0xeb8] sm:$0xff]  ;;  %v5316_v1 = vcombine.high %v1052_v56, %v1060_v57  ;;  %v5315_v36 = vcombine.low %v1052_v56, %v1060_v57 }
 0x32e   : > { %4648 = vmatprep.subr.bf16.mxu1 %v5396_v5  ;;  %v1316_v59 = vld [vmem:[%s6400_s16 + $0xef8] sm:$0xff] }
 0x32f   : > { %v5829_v9 = vpop.eup %5828  ;;  %v5572_v3 = vcombine.high %v1308_v58, %v1316_v59  ;;  %v1036_v5 = vld [vmem:[%s6400_s16 + $0x638] sm:$0xff] }
 0x330   : > { %v4783_v12 = vmul.f32 3.14159, %v5829_v9  ;;  %4606 = vmatpush1.bf16.msra.mxu0 %v5139_v47  ;;  %v1044_v45 = vld [vmem:[%s6400_s16 + $0x678] sm:$0xff]  ;;  %v5571_v47 = vcombine.low %v1308_v58, %v1316_v59 }
 0x331   : > { %v5831_v14 = vpop.eup %5830  ;;  %4649 = vmatpush1.bf16.msra.mxu1 %v5395_v49  ;;  %4607 = vmatprep.subr.bf16.mxu0 %v5124_v51  ;;  %v1292_v46 = vld [vmem:[%s6400_s16 + $0xe38] sm:$0xff]  ;;  %v5300_v49 = vcombine.high %v1036_v5, %v1044_v45  ;;  %v5299_v10 = vcombine.low %v1036_v5, %v1044_v45 }
 0x332   : > { %v4815_v17 = vadd.f32 3.14159, %v4783_v12  ;;  %v4784_v18 = vmul.f32 3.14159, %v5831_v14  ;;  %4650 = vmatprep.subr.bf16.mxu1 %v5380_v6  ;;  %v1300_v50 = vld [vmem:[%s6400_s16 + $0xe78] sm:$0xff] }
 0x333   : > { %v5833_v44 = vpop.eup %5832  ;;  %v5556_v51 = vcombine.high %v1292_v46, %v1300_v50  ;;  %v1020_v6 = vld [vmem:[%s6400_s16 + $0x5b8] sm:$0xff]  ;;  %v5555_v11 = vcombine.low %v1292_v46, %v1300_v50 }
 0x334   : > { %4847 = vst [vmem:[%s6779_s5 + $0x30] sm:$0xff] %v4815_v17  ;;  %v4816_v48 = vadd.f32 3.14159, %v4784_v18  ;;  %v4799_v24 = vmul.f32 3.14159, %v5833_v44  ;;  %4608 = vmatpush1.bf16.msra.mxu0 %v5123_v13  ;;  %v1028_v7 = vld [vmem:[%s6400_s16 + $0x5f8] sm:$0xff] }
 0x335   : > { %v5835_v26 = vpop.eup %5834  ;;  %4651 = vmatpush1.bf16.msra.mxu1 %v5379_v15  ;;  %4609 = vmatprep.subr.bf16.mxu0 %v5108_v16  ;;  %v1276_v8 = vld [vmem:[%s6400_s16 + $0xdb8] sm:$0xff]  ;;  %v5284_v12 = vcombine.high %v1020_v6, %v1028_v7  ;;  %v5283_v18 = vcombine.low %v1020_v6, %v1028_v7 }
 0x336   : > { %4848 = vst [vmem:[%s6779_s5 + $0x38] sm:$0xff] %v4816_v48  ;;  %v4831_v29 = vadd.f32 3.14159, %v4799_v24  ;;  %v4800_v30 = vmul.f32 3.14159, %v5835_v26  ;;  %4652 = vmatprep.subr.bf16.mxu1 %v5364_v19  ;;  %v1284_v9 = vld [vmem:[%s6400_s16 + $0xdf8] sm:$0xff] }
 0x337   : > { %v5540_v13 = vcombine.high %v1276_v8, %v1284_v9  ;;  %v1004_v14 = vld [vmem:[%s6400_s16 + $0x538] sm:$0xff]  ;;  %v5539_v19 = vcombine.low %v1276_v8, %v1284_v9 }
 0x338   : > { %4863 = vst [vmem:[%s6779_s5 + $0xb0] sm:$0xff] %v4831_v29  ;;  %v4832_v38 = vadd.f32 3.14159, %v4800_v30  ;;  %4610 = vmatpush1.bf16.msra.mxu0 %v5107_v25  ;;  %v1012_v15 = vld [vmem:[%s6400_s16 + $0x578] sm:$0xff] }
 0x339   : > { %4653 = vmatpush1.bf16.msra.mxu1 %v5363_v27  ;;  %4611 = vmatprep.subr.bf16.mxu0 %v5348_v28  ;;  %v1260_v16 = vld [vmem:[%s6400_s16 + $0xd38] sm:$0xff]  ;;  %v5268_v20 = vcombine.high %v1004_v14, %v1012_v15  ;;  %v5267_v24 = vcombine.low %v1004_v14, %v1012_v15 }
 0x33a   : > { %4864 = vst [vmem:[%s6779_s5 + $0xb8] sm:$0xff] %v4832_v38  ;;  %4654 = vmatprep.subr.bf16.mxu1 %v5604_v31  ;;  %v1268_v17 = vld [vmem:[%s6400_s16 + $0xd78] sm:$0xff] }
 0x33b   : > { %v5524_v21 = vcombine.high %v1260_v16, %v1268_v17  ;;  %v988_v44 = vld [vmem:[%s6400_s16 + $0x4b8] sm:$0xff]  ;;  %v5523_v25 = vcombine.low %v1260_v16, %v1268_v17 }
 0x33c   : > { %4612 = vmatpush2.bf16.msra.mxu0 %v5347_v41  ;;  %v996_v22 = vld [vmem:[%s6400_s16 + $0x4f8] sm:$0xff] }
 0x33d   : > { %4655 = vmatpush2.bf16.msra.mxu1 %v5603_v42  ;;  %4613 = vmatprep.subr.bf16.mxu0 %v5332_v43  ;;  %v1244_v23 = vld [vmem:[%s6400_s16 + $0xcb8] sm:$0xff]  ;;  %v5252_v26 = vcombine.high %v988_v44, %v996_v22  ;;  %v5251_v32 = vcombine.low %v988_v44, %v996_v22 }
 0x33e   : > { %4656 = vmatprep.subr.bf16.mxu1 %v5588_v55  ;;  %v1252_v48 = vld [vmem:[%s6400_s16 + $0xcf8] sm:$0xff] }
 0x33f   : > { %v5508_v27 = vcombine.high %v1244_v23, %v1252_v48  ;;  %v972_v28 = vld [vmem:[%s6400_s16 + $0x438] sm:$0xff]  ;;  %v5507_v33 = vcombine.low %v1244_v23, %v1252_v48 }
 0x340   : > { %4614 = vmatpush2.bf16.msra.mxu0 %v5331_v61  ;;  %v980_v29 = vld [vmem:[%s6400_s16 + $0x478] sm:$0xff] }
 0x341   : > { %4657 = vmatpush2.bf16.msra.mxu1 %v5587_v62  ;;  %4615 = vmatprep.subr.bf16.mxu0 %v5316_v1  ;;  %v1228_v30 = vld [vmem:[%s6400_s16 + $0xc38] sm:$0xff]  ;;  %v5236_v35 = vcombine.high %v972_v28, %v980_v29  ;;  %v5235_v38 = vcombine.low %v972_v28, %v980_v29 }
 0x342   : > { %4658 = vmatprep.subr.bf16.mxu1 %v5572_v3  ;;  %v1236_v31 = vld [vmem:[%s6400_s16 + $0xc78] sm:$0xff] }
 0x343   : > { %v5492_v37 = vcombine.high %v1228_v30, %v1236_v31  ;;  %v5491_v41 = vcombine.low %v1228_v30, %v1236_v31  ;;  %v7049_v42 = vld [vmem:[%s6733_s15 + $0x8] sm:$0xff] }
 0x344   : > { %4616 = vmatpush2.bf16.msra.mxu0 %v5315_v36  ;;  %v1388_v43 = vrot.slane %v7049_v42, %v6503_v2  ;;  %v1392_v55 = vrot.slane %v7049_v42, %v6497_v63 }
 0x345   : > { %4659 = vmatpush2.bf16.msra.mxu1 %v5571_v47  ;;  %4617 = vmatprep.subr.bf16.mxu0 %v5300_v49 }
 0x346   : > { %4660 = vmatprep.subr.bf16.mxu1 %v5556_v51 }
 0x348   : > { %4618 = vmatpush2.bf16.msra.mxu0 %v5299_v10 }
 0x349   : > { %4661 = vmatpush2.bf16.msra.mxu1 %v5555_v11  ;;  %4619 = vmatprep.subr.bf16.mxu0 %v5284_v12 }
 0x34a   : > { %4662 = vmatprep.subr.bf16.mxu1 %v5540_v13 }
 0x34c   : > { %4620 = vmatpush2.bf16.msra.mxu0 %v5283_v18  ;;  %v1396_v18 = vrot.slane %v7049_v42, %v6506_v4 }
 0x34d   : > { %4663 = vmatpush2.bf16.msra.mxu1 %v5539_v19  ;;  %4621 = vmatprep.subr.bf16.mxu0 %v5268_v20  ;;  %v1400_v19 = vrot.slane %v7049_v42, %v6500_v0 }
 0x34e   : > { %4664 = vmatprep.subr.bf16.mxu1 %v5524_v21 }
 0x350   : > { %4622 = vmatpush2.bf16.msra.mxu0 %v5267_v24 }
 0x351   : > { %4665 = vmatpush2.bf16.msra.mxu1 %v5523_v25  ;;  %4623 = vmatprep.subr.bf16.mxu0 %v5252_v26 }
 0x352   : > { %4666 = vmatprep.subr.bf16.mxu1 %v5508_v27 }
 0x354   : > { %4624 = vmatpush2.bf16.msra.mxu0 %v5251_v32 }
 0x355   : > { %4667 = vmatpush2.bf16.msra.mxu1 %v5507_v33  ;;  %4625 = vmatprep.subr.bf16.mxu0 %v5236_v35 }
 0x356   : > { %4668 = vmatprep.subr.bf16.mxu1 %v5492_v37 }
 0x358   : > { %4626 = vmatpush2.bf16.msra.mxu0 %v5235_v38 }
 0x359   : > { %4669 = vmatpush2.bf16.msra.mxu1 %v5491_v41 }
 0x35b   : > { %v4371_v56 = vpop.f32.mrf.mxu0  ;;  %4628 = vmatmul.mubr.bf16.vlgmr.msra.gmra.mxu0 %v6520_v52 }
 0x35c   : > { %v4372_v57 = vadd.f32 %v4371_v56, %v1388_v43  ;;  %v4414_v58 = vpop.f32.mrf.mxu1  ;;  %4671 = vmatmul.mubr.bf16.vlgmr.msra.gmra.mxu1 %v6522_v53 }
 0x35d   : > { %v4373_v59 = vpop.f32.mrf.mxu0 }
 0x35e   : > { %v4415_v61 = vadd.f32 %v4414_v58, %v4372_v57  ;;  %v4374_v62 = vadd.f32 %v4373_v59, %v1392_v55  ;;  %v4416_v1 = vpop.f32.mrf.mxu1 }
 0x35f   : > { %v4375_v3 = vpop.f32.mrf.mxu0 }
 0x360   : > { %v5613_v5 = vclamps-f32 %v4415_v61, 5.0  ;;  %v4417_v45 = vadd.f32 %v4416_v1, %v4374_v62  ;;  %v4376_v46 = vadd.f32 %v4375_v3, %v1388_v43  ;;  %v4418_v2 = vpop.f32.mrf.mxu1 }
 0x361   : > { %v4377_v50 = vpop.f32.mrf.mxu0 }
 0x362   : > { %5836 = vtanh.f32 %v5613_v5  ;;  %v5614_v36 = vclamps-f32 %v4417_v45, 5.0  ;;  %v4419_v63 = vadd.f32 %v4418_v2, %v4376_v46  ;;  %v4378_v47 = vadd.f32 %v4377_v50, %v1392_v55  ;;  %v4420_v52 = vpop.f32.mrf.mxu1 }
 0x363   : > { %v1404_v5 = vrot.slane %v7049_v42, %v1371_v34  ;;  %v1408_v45 = vrot.slane %v7049_v42, %v1375_v39 }
 0x364   : > { %5838 = vtanh.f32 %v5614_v36  ;;  %v5629_v49 = vclamps-f32 %v4419_v63, 5.0  ;;  %v4421_v53 = vadd.f32 %v4420_v52, %v4378_v47 }
 0x366   : > { %5840 = vtanh.f32 %v5629_v49  ;;  %v5630_v51 = vclamps-f32 %v4421_v53, 5.0 }
 0x368   : > { %5842 = vtanh.f32 %v5630_v51 }
 0x36f   : > { %v5837_v6 = vpop.eup %5836 }
 0x370   : > { %v4785_v7 = vmul.f32 3.14159, %v5837_v6 }
 0x371   : > { %v5839_v8 = vpop.eup %5838 }
 0x372   : > { %v4817_v9 = vadd.f32 3.14159, %v4785_v7  ;;  %v4786_v10 = vmul.f32 3.14159, %v5839_v8 }
 0x373   : > { %v5841_v11 = vpop.eup %5840 }
 0x374   : > { %4849 = vst [vmem:[%s6779_s5 + $0x40] sm:$0xff] %v4817_v9  ;;  %v4818_v12 = vadd.f32 3.14159, %v4786_v10  ;;  %v4801_v13 = vmul.f32 3.14159, %v5841_v11 }
 0x375   : > { %v5843_v14 = vpop.eup %5842 }
 0x376   : > { %4850 = vst [vmem:[%s6779_s5 + $0x48] sm:$0xff] %v4818_v12  ;;  %v4833_v15 = vadd.f32 3.14159, %v4801_v13  ;;  %v4802_v16 = vmul.f32 3.14159, %v5843_v14 }
 0x378   : > { %4865 = vst [vmem:[%s6779_s5 + $0xc0] sm:$0xff] %v4833_v15  ;;  %v4834_v17 = vadd.f32 3.14159, %v4802_v16 }
 0x37a   : > { %4866 = vst [vmem:[%s6779_s5 + $0xc8] sm:$0xff] %v4834_v17 }
 0x39b   : > { %v4457_v20 = vpop.f32.mrf.mxu0 }
 0x39c   : > { %v4458_v21 = vadd.f32 %v4457_v20, %v1396_v18  ;;  %v4500_v44 = vpop.f32.mrf.mxu1 }
 0x39d   : > { %v4459_v22 = vpop.f32.mrf.mxu0 }
 0x39e   : > { %v4501_v23 = vadd.f32 %v4500_v44, %v4458_v21  ;;  %v4460_v48 = vadd.f32 %v4459_v22, %v1400_v19  ;;  %v4502_v24 = vpop.f32.mrf.mxu1 }
 0x39f   : > { %v4461_v25 = vpop.f32.mrf.mxu0 }
 0x3a0   : > { %v5615_v26 = vclamps-f32 %v4501_v23, 5.0  ;;  %v4503_v27 = vadd.f32 %v4502_v24, %v4460_v48  ;;  %v4462_v28 = vadd.f32 %v4461_v25, %v1396_v18  ;;  %v4504_v29 = vpop.f32.mrf.mxu1  ;;  %v1412_v24 = vrot.slane %v7049_v42, %v1379_v40 }
 0x3a1   : > { %v4463_v30 = vpop.f32.mrf.mxu0  ;;  %v1416_v25 = vrot.slane %v7049_v42, %v1383_v54 }
 0x3a2   : > { %5844 = vtanh.f32 %v5615_v26  ;;  %v5616_v31 = vclamps-f32 %v4503_v27, 5.0  ;;  %v4505_v4 = vadd.f32 %v4504_v29, %v4462_v28  ;;  %v4464_v32 = vadd.f32 %v4463_v30, %v1400_v19  ;;  %v4506_v33 = vpop.f32.mrf.mxu1 }
 0x3a4   : > { %5846 = vtanh.f32 %v5616_v31  ;;  %v5631_v0 = vclamps-f32 %v4505_v4, 5.0  ;;  %v4507_v35 = vadd.f32 %v4506_v33, %v4464_v32 }
 0x3a6   : > { %5848 = vtanh.f32 %v5631_v0  ;;  %v5632_v37 = vclamps-f32 %v4507_v35, 5.0 }
 0x3a8   : > { %5850 = vtanh.f32 %v5632_v37 }
 0x3af   : > { %v5845_v38 = vpop.eup %5844 }
 0x3b0   : > { %v4787_v41 = vmul.f32 3.14159, %v5845_v38 }
 0x3b1   : > { %v5847_v43 = vpop.eup %5846 }
 0x3b2   : > { %v4819_v55 = vadd.f32 3.14159, %v4787_v41  ;;  %v4788_v56 = vmul.f32 3.14159, %v5847_v43 }
 0x3b3   : > { %v5849_v57 = vpop.eup %5848 }
 0x3b4   : > { %4851 = vst [vmem:[%s6779_s5 + $0x50] sm:$0xff] %v4819_v55  ;;  %v4820_v58 = vadd.f32 3.14159, %v4788_v56  ;;  %v4803_v59 = vmul.f32 3.14159, %v5849_v57 }
 0x3b5   : > { %v5851_v61 = vpop.eup %5850 }
 0x3b6   : > { %4852 = vst [vmem:[%s6779_s5 + $0x58] sm:$0xff] %v4820_v58  ;;  %v4835_v62 = vadd.f32 3.14159, %v4803_v59  ;;  %v4804_v1 = vmul.f32 3.14159, %v5851_v61 }
 0x3b8   : > { %4867 = vst [vmem:[%s6779_s5 + $0xd0] sm:$0xff] %v4835_v62  ;;  %v4836_v3 = vadd.f32 3.14159, %v4804_v1 }
 0x3ba   : > { %4868 = vst [vmem:[%s6779_s5 + $0xd8] sm:$0xff] %v4836_v3 }
 0x3db   : > { %v4543_v46 = vpop.f32.mrf.mxu0 }
 0x3dc   : > { %v4544_v2 = vadd.f32 %v4543_v46, %v1404_v5  ;;  %v4586_v50 = vpop.f32.mrf.mxu1 }
 0x3dd   : > { %v4545_v36 = vpop.f32.mrf.mxu0 }
 0x3de   : > { %v4587_v63 = vadd.f32 %v4586_v50, %v4544_v2  ;;  %v4546_v47 = vadd.f32 %v4545_v36, %v1408_v45  ;;  %v4588_v52 = vpop.f32.mrf.mxu1 }
 0x3df   : > { %v4547_v49 = vpop.f32.mrf.mxu0 }
 0x3e0   : > { %v5617_v53 = vclamps-f32 %v4587_v63, 5.0  ;;  %v4589_v51 = vadd.f32 %v4588_v52, %v4546_v47  ;;  %v4548_v6 = vadd.f32 %v4547_v49, %v1404_v5  ;;  %v4590_v7 = vpop.f32.mrf.mxu1 }
 0x3e1   : > { %v4549_v8 = vpop.f32.mrf.mxu0 }
 0x3e2   : > { %5852 = vtanh.f32 %v5617_v53  ;;  %v5618_v9 = vclamps-f32 %v4589_v51, 5.0  ;;  %v4591_v34 = vadd.f32 %v4590_v7, %v4548_v6  ;;  %v4550_v10 = vadd.f32 %v4549_v8, %v1408_v45  ;;  %v4592_v11 = vpop.f32.mrf.mxu1 }
 0x3e4   : > { %5854 = vtanh.f32 %v5618_v9  ;;  %v5633_v39 = vclamps-f32 %v4591_v34, 5.0  ;;  %v4593_v12 = vadd.f32 %v4592_v11, %v4550_v10 }
 0x3e6   : > { %5856 = vtanh.f32 %v5633_v39  ;;  %v5634_v13 = vclamps-f32 %v4593_v12, 5.0 }
 0x3e8   : > { %5858 = vtanh.f32 %v5634_v13 }
 0x3ef   : > { %v5853_v14 = vpop.eup %5852 }
 0x3f0   : > { %v4789_v15 = vmul.f32 3.14159, %v5853_v14 }
 0x3f1   : > { %v5855_v16 = vpop.eup %5854 }
 0x3f2   : > { %v4821_v17 = vadd.f32 3.14159, %v4789_v15  ;;  %v4790_v18 = vmul.f32 3.14159, %v5855_v16 }
 0x3f3   : > { %v5857_v19 = vpop.eup %5856 }
 0x3f4   : > { %4853 = vst [vmem:[%s6779_s5 + $0x60] sm:$0xff] %v4821_v17  ;;  %v4822_v20 = vadd.f32 3.14159, %v4790_v18  ;;  %v4805_v21 = vmul.f32 3.14159, %v5857_v19 }
 0x3f5   : > { %v5859_v44 = vpop.eup %5858 }
 0x3f6   : > { %4854 = vst [vmem:[%s6779_s5 + $0x68] sm:$0xff] %v4822_v20  ;;  %v4837_v22 = vadd.f32 3.14159, %v4805_v21  ;;  %v4806_v23 = vmul.f32 3.14159, %v5859_v44 }
 0x3f8   : > { %4869 = vst [vmem:[%s6779_s5 + $0xe0] sm:$0xff] %v4837_v22  ;;  %v4838_v48 = vadd.f32 3.14159, %v4806_v23 }
 0x3fa   : > { %4870 = vst [vmem:[%s6779_s5 + $0xe8] sm:$0xff] %v4838_v48 }
 0x41b   : > { %v4629_v26 = vpop.f32.mrf.mxu0 }
 0x41c   : > { %v4630_v27 = vadd.f32 %v4629_v26, %v1412_v24  ;;  %v4672_v28 = vpop.f32.mrf.mxu1 }
 0x41d   : > { %v4631_v29 = vpop.f32.mrf.mxu0 }
 0x41e   : > { %v4673_v30 = vadd.f32 %v4672_v28, %v4630_v27  ;;  %v4632_v31 = vadd.f32 %v4631_v29, %v1416_v25  ;;  %v4674_v4 = vpop.f32.mrf.mxu1 }
 0x41f   : > { %v4633_v32 = vpop.f32.mrf.mxu0 }
 0x420   : > { %v5619_v33 = vclamps-f32 %v4673_v30, 5.0  ;;  %v4675_v0 = vadd.f32 %v4674_v4, %v4632_v31  ;;  %v4634_v35 = vadd.f32 %v4633_v32, %v1412_v24  ;;  %v4676_v37 = vpop.f32.mrf.mxu1 }
 0x421   : > { %v4635_v38 = vpop.f32.mrf.mxu0 }
 0x422   : > { %5860 = vtanh.f32 %v5619_v33  ;;  %v5620_v41 = vclamps-f32 %v4675_v0, 5.0  ;;  %v4677_v40 = vadd.f32 %v4676_v37, %v4634_v35  ;;  %v4636_v60 = vadd.f32 %v4635_v38, %v1416_v25  ;;  %v4678_v54 = vpop.f32.mrf.mxu1 }
 0x424   : > { %5862 = vtanh.f32 %v5620_v41  ;;  %v5635_v42 = vclamps-f32 %v4677_v40, 5.0  ;;  %v4679_v43 = vadd.f32 %v4678_v54, %v4636_v60 }
 0x426   : > { %5864 = vtanh.f32 %v5635_v42  ;;  %v5636_v55 = vclamps-f32 %v4679_v43, 5.0 }
 0x428   : > { %5866 = vtanh.f32 %v5636_v55 }
 0x42f   : > { %v5861_v56 = vpop.eup %5860 }
 0x430   : > { %v4791_v57 = vmul.f32 3.14159, %v5861_v56 }
 0x431   : > { %v5863_v58 = vpop.eup %5862 }
 0x432   : > { %v4823_v59 = vadd.f32 3.14159, %v4791_v57  ;;  %v4792_v61 = vmul.f32 3.14159, %v5863_v58 }
 0x433   : > { %v5865_v62 = vpop.eup %5864 }
 0x434   : > { %4855 = vst [vmem:[%s6779_s5 + $0x70] sm:$0xff] %v4823_v59  ;;  %v4824_v1 = vadd.f32 3.14159, %v4792_v61  ;;  %v4807_v3 = vmul.f32 3.14159, %v5865_v62 }
 0x435   : > { %v5867_v5 = vpop.eup %5866 }
 0x436   : > { %4856 = vst [vmem:[%s6779_s5 + $0x78] sm:$0xff] %v4824_v1  ;;  %v4839_v45 = vadd.f32 3.14159, %v4807_v3  ;;  %v4808_v46 = vmul.f32 3.14159, %v5867_v5 }
 0x438   : > { %4871 = vst [vmem:[%s6779_s5 + $0xf0] sm:$0xff] %v4839_v45  ;;  %v4840_v2 = vadd.f32 3.14159, %v4808_v46 }
 0x43a   : > { %4872 = vst [vmem:[%s6779_s5 + $0xf8] sm:$0xff] %v4840_v2 }
 0x43b   : > { %6068 = shalt.err (!%p6065_p7)
}
 0x43c   : > { %s6069_s1 = scalar_lea.hbm %s7092_s23, 4096  ;;  %s6073_s16 = scalar_lea.hbm %s7146_s7, 8192 }
 0x43d   : > { %p6070_p13 = scmp.ne.s32.totalorder %s7092_s23, %s6069_s1  ;;  %p6074_p3 = scmp.lt.s32.totalorder %s7092_s23, %s7146_s7 }
 0x43e   : > { %p6075_p2 = scmp.lt.s32.totalorder %s6073_s16, %s6069_s1 }
 0x43f   : > { %p6071_p8 = pnand %p6070_p13, %p7186_p0 }
 0x440   : > { %p6076_p5 = por %p6075_p2, %p6074_p3 }
 0x441   : > { %p6072_p11 = pneg %p6071_p8 }
 0x443   : > { %p6077_p10 = pnand %p6076_p5, %p6072_p11 }
 0x445   : > { %6080 = shalt.err (!%p6077_p10)
}
 0x446   : > { %s6149_s22 = smov 2048   ;;  %s6150_s5 = smov 4096  }
 0x447   : > { %s6151_s12 = smov 128  }
 0x448   : > { %5669 = dma.vmem_to_hbm [thread:$0]  (%p7186_p0), %s7094_s3, 4096, %s7092_s23, %s4874_s28, %s6149_s22, %s6150_s5, %s6151_s12  }
 0x449 PF: > { %s4902_s17 = sand.u32 1, %s6119_s24   ;;  %p7187_p9 = scmp.ne.s32.totalorder %s7162_s8, 0 }
 0x44a   : > { %p7188_p1 = scmp.ge.s32.totalorder %s6131_s27, 2  ;;  %s4903_s18 = scalar_lea.sflag [#allocation4], %s4902_s17 }
 0x44c   : > { %p5695_p12 = pnand %p7188_p1, %p7187_p9 }
 0x44e   : > { %p5696_p4 = pneg %p5695_p12 }
 0x450   : > { %6114 = dma.done.wait (%p5696_p4), %s4903_s18, 4096  }
 0x451   : > { %6116 = vsyncadd (%p5696_p4), %s4903_s18, 4294963200  ;;  %s7189_s21 = sld [smem:[#allocation20_spill]]  ;;  %p23_p6 = scmp.ge.s32.totalorder %s6272_s11, 4  }
 0x452   : > { %s7190_s24 = smov %s6123_s25  ;;  %s7191_s25 = smov %s6127_s26 }
 0x453   : > { %s7193_s27 = smov %s6272_s11  ;;  %25 = sbr.rel (!%p23_p6) target bundleno = 12 (0xc), region = 125 }
 0x457   : > { %s7192_s26 = smov %s7189_s21 }
 0x458   :  { %4908 = vsyncpa [#allocation3], 1 }
 0x459   :  { %4910 = vsyncpa [#allocation3 + $0x1], 1 }
 0x45a   :  { %4911 = vsyncpa [#allocation6], 1 }
 0x45b   :  { %4912 = vsyncpa [#allocation9], 1 }
 0x45c   :  { %4913 = vsyncpa [#allocation12], 1 }
 0x45d   :  { %4915 = vsyncpa [#allocation12 + $0x1], 1 }
 0x45e   :  { %4916 = vsyncpa [#allocation4], 1 }
 0x45f   :  { %4918 = vsyncpa [#allocation4 + $0x1], 1 }

</bundles_post_ra>
